<compile_context>
chip_gen: v7x
topology: tpu7x:2x2x1
jax: 0.10.0
libtpu: 0.0.40
codegen_flags: <defaults>
</compile_context>

<pallas_src>
import functools

import jax
import jax.numpy as jnp
from jax.experimental import pallas as pl
from jax.experimental.pallas import tpu as pltpu


# dtype fed to the MXU / used for the 512-wide activation scratch in the heavy
# style matmuls (native on v6e/v7x).  Set to jnp.float32 for bit-faithful f32
# semantics (gamma/beta then match the PyTorch reference to ~1e-6 instead of
# ~1e-2 relative).
STYLE_MXU_DTYPE = jnp.bfloat16

_VMEM_LIMIT = 48 * 1024 * 1024


def _round_up(x, m):
    return (x + m - 1) // m * m


# ----------------------------------------------------------------------------
# Kernel A: fused style path  (mlp_shared  ->  mlp_gamma || mlp_beta)
# ----------------------------------------------------------------------------
def _style_gb_kernel(p_ref, w10_ref, wgb_ref, bgb_ref, o_ref, actv_ref, *,
                     wa, m_t, m_in, cs=512):
    # p_ref:    (1, 1, m_in, 10) f32  3x3 style patches + validity channel for
    #                                 this halo'd row tile, flattened on the
    #                                 zero-padded Wa-wide activation grid.
    # w10_ref:  (10, 512)        f32  shared-conv taps (rows 0..8) + bias (row 9)
    # wgb_ref:  (9, 512, 2C)     bf16 gamma||beta conv weights per tap
    # bgb_ref:  (1, 2C)          f32  gamma||beta bias
    # o_ref:    (1, 2C, m_t)     f32  lane-dense output (pixels on lanes)
    # actv_ref: (m_in, 512)      bf16 VMEM scratch: ReLU'd shared activation

    # ---- 1) shared 1->512 conv + ReLU, computed in row chunks straight into the
    #         bf16 VMEM scratch (no big f32 intermediate).  The validity channel
    #         carries the shared-conv bias and zeroes the pad ring after ReLU.
    s = 0
    while s < m_in:
        e = min(s + cs, m_in)
        pc = p_ref[0, 0, s:e, :]
        ac = jnp.dot(pc, w10_ref[...], preferred_element_type=jnp.float32)
        actv_ref[s:e, :] = jnp.maximum(ac, 0.0).astype(actv_ref.dtype)
        s = e

    # ---- 2) 3x3 512->2C conv.  dy windows are sublane-ALIGNED slices
    #         (wa % 8 == 0); the +-dx shift is applied to the narrow (ext, 2C)
    #         f32 partials instead of the wide 512-channel windows.
    ext = m_t + 8
    parts = [None, None, None]
    for dy in range(3):
        seg = actv_ref[dy * wa: dy * wa + ext, :]              # aligned (ext, 512)
        for dx in range(3):
            r = jnp.dot(seg, wgb_ref[dy * 3 + dx],
                        preferred_element_type=jnp.float32)    # (ext, 2C)
            parts[dx] = r if parts[dx] is None else parts[dx] + r

    out = parts[0][0:m_t] + parts[1][1:1 + m_t] + parts[2][2:2 + m_t]
    out = out + bgb_ref[...]                                   # (m_t, 2C)
    # lane-dense store: 2C on sublanes, flattened pixels on lanes.
    o_ref[0] = jnp.transpose(out)


# ----------------------------------------------------------------------------
# Kernel B: conv3x3(x) + InstanceNorm + noise + style denorm + LeakyReLU
# ----------------------------------------------------------------------------
def _conv_norm_mod_kernel(ns_ref, p_ref, w_ref, b_ref, noise_ref, gb_ref,
                          o_ref, *, c_out, eps, activate):
    # ns_ref:    (1,)          SMEM  noise_strength
    # p_ref:     (1, K, HW)    f32   im2col patches of x
    # w_ref:     (C, K)        f32   conv weight ; b_ref: (C, 1)
    # noise_ref: (1, C, HW)    f32
    # gb_ref:    (1, 2C, HW)   f32   lane-dense gamma||beta from kernel A
    y = jnp.dot(w_ref[...], p_ref[0], preferred_element_type=jnp.float32)  # (C, HW)
    y = y + b_ref[...]
    # InstanceNorm2d(affine=False): two-pass (centered) variance for stability.
    mean = jnp.mean(y, axis=1, keepdims=True)
    yc = y - mean
    var = jnp.mean(yc * yc, axis=1, keepdims=True)
    xn = yc * jax.lax.rsqrt(var + eps)
    # TODO(synk): generate the noise in-kernel (pltpu.prng_seed +
    # pltpu.stateful_normal) to drop one HBM input stream; kept external so the
    # random stream stays in the wrapper like torch.randn_like.
    xn = xn + noise_ref[0] * ns_ref[0]
    gamma = gb_ref[0, 0:c_out, :]
    beta = gb_ref[0, c_out:2 * c_out, :]
    out = xn * gamma + beta
    if activate:
        out = jnp.where(out >= 0, out, 0.2 * out)               # LeakyReLU(0.2)
    o_ref[0] = out.astype(o_ref.dtype)


# ----------------------------------------------------------------------------
# Wrappers
# ----------------------------------------------------------------------------
def _nearest_resize(style_nchw, H, W):
    """F.interpolate(mode='nearest'): src index = floor(dst*in/out). -> (N,H,W)."""
    N, _, hs, ws = style_nchw.shape
    ih = (jnp.arange(H) * hs) // H
    iw = (jnp.arange(W) * ws) // W
    return style_nchw[:, 0][:, ih][:, :, iw]


def _pick_row_tile(H, Wa, nh, max_scratch_bytes=12 * 1024 * 1024):
    """Largest TR | H whose halo'd bf16 activation tile fits the scratch budget
    and whose output tile is lane-tileable (TR*Wa % 128 == 0, or TR == H)."""
    max_rows = max_scratch_bytes // (nh * 2)
    for tr in sorted([d for d in range(1, H + 1) if H % d == 0], reverse=True):
        if (tr + 3) * Wa > max_rows:
            continue
        if tr == H or (tr * Wa) % 128 == 0:
            return tr
    # TODO(synk): no divisor of H satisfies the constraints within budget; fall
    # back to a single whole-image tile (relies on vmem_limit_bytes headroom).
    return H


def _style_gamma_beta(style_hw, w_shared, b_shared, w_gamma, b_gamma,
                      w_beta, b_beta):
    """Fused mlp_shared -> (mlp_gamma || mlp_beta).  Returns (N, 2C, H*W) f32,
    lane-dense, gamma rows first."""
    N, H, W = style_hw.shape
    nh = w_shared.shape[0]                     # 512
    Cout = w_gamma.shape[0]
    Wa = _round_up(W + 2, 8)                   # padded row width, sublane aligned
    TR = _pick_row_tile(H, Wa, nh)
    nt = H // TR
    m_t = TR * Wa                              # output rows (flat) per tile
    m_in = (TR + 3) * Wa                       # halo'd activation rows per tile
    R = (H + 3) * Wa

    # 3x3 style patches + validity channel on the zero-padded (H+3, Wa)
    # activation grid, flattened (1-channel source -> this glue is tiny).
    sp = jnp.pad(style_hw.astype(jnp.float32), ((0, 0), (1, 1), (1, 1)))
    taps = [sp[:, dy:dy + H, dx:dx + W] for dy in range(3) for dx in range(3)]
    taps.append(jnp.ones((N, H, W), jnp.float32))
    p = jnp.stack(taps, axis=-1)                                 # (N, H, W, 10)
    p = jnp.pad(p, ((0, 0), (1, 2), (1, Wa - W - 1), (0, 0)))    # (N, H+3, Wa, 10)
    p_flat = p.reshape(N, R, 10)
    if nt == 1:
        p_tiles = p_flat[:, None]                                # (N, 1, m_in, 10)
    else:
        p_tiles = jnp.stack(
            [p_flat[:, t * m_t: t * m_t + m_in] for t in range(nt)], axis=1)

    # Shared-conv weights as a (10, 512) matrix: 9 taps + bias row.
    w10 = jnp.concatenate(
        [w_shared.reshape(nh, 9).T, b_shared.reshape(1, nh)],
        axis=0).astype(jnp.float32)                              # (10, nh)
    # gamma||beta weights, tap-major, bf16 for the MXU.
    w_gb = jnp.concatenate([w_gamma, w_beta], axis=0)            # (2C, nh, 3, 3)
    wgb = jnp.transpose(w_gb, (2, 3, 1, 0)).reshape(9, nh, 2 * Cout)
    wgb = wgb.astype(STYLE_MXU_DTYPE)
    bgb = jnp.concatenate([b_gamma, b_beta]).reshape(1, 2 * Cout)
    bgb = bgb.astype(jnp.float32)

    kern = functools.partial(_style_gb_kernel, wa=Wa, m_t=m_t, m_in=m_in)
    out = pl.pallas_call(
        kern,
        out_shape=jax.ShapeDtypeStruct((N, 2 * Cout, H * Wa), jnp.float32),
        grid_spec=pltpu.PrefetchScalarGridSpec(
            num_scalar_prefetch=0,
            grid=(N, nt),
            in_specs=[
                pl.BlockSpec((1, 1, m_in, 10), lambda n, t: (n, t, 0, 0)),
                pl.BlockSpec((10, nh), lambda n, t: (0, 0)),
                pl.BlockSpec((9, nh, 2 * Cout), lambda n, t: (0, 0, 0)),
                pl.BlockSpec((1, 2 * Cout), lambda n, t: (0, 0)),
            ],
            out_specs=pl.BlockSpec((1, 2 * Cout, m_t), lambda n, t: (n, 0, t)),
            scratch_shapes=[pltpu.VMEM((m_in, nh), STYLE_MXU_DTYPE)],
        ),
        compiler_params=pltpu.CompilerParams(
            dimension_semantics=("parallel", "parallel"),
            vmem_limit_bytes=_VMEM_LIMIT),
    )(p_tiles, w10, wgb, bgb)

    # Crop the Wa-W junk columns; stays lane-dense (N, 2C, H*W).
    gb = out.reshape(N, 2 * Cout, H, Wa)[:, :, :, :W]
    return gb.reshape(N, 2 * Cout, H * W)


def _conv_norm_modulate(x_nchw, w_conv, b_conv, noise_nchw, gb,
                        noise_strength, *, eps=1e-5, activate=True):
    """Fused: conv3x3(x) + InstanceNorm + noise + style denorm + LeakyReLU."""
    N, Cin, H, W = x_nchw.shape
    Cout = w_conv.shape[0]
    HW = H * W
    K = 9 * Cin
    xp = jnp.pad(x_nchw, ((0, 0), (0, 0), (1, 1), (1, 1)))
    taps = [xp[:, :, dy:dy + H, dx:dx + W] for dy in range(3) for dx in range(3)]
    patches = jnp.stack(taps, axis=1).reshape(N, K, HW)           # (N, K, HW)
    w_mat = jnp.transpose(w_conv, (0, 2, 3, 1)).reshape(Cout, K)  # (C, K)
    b_mat = b_conv.reshape(Cout, 1)
    noise = noise_nchw.reshape(N, Cout, HW)

    kern = functools.partial(_conv_norm_mod_kernel, c_out=Cout, eps=eps,
                             activate=activate)
    # TODO(synk): for very large H*W, tile HW with partial-sum InstanceNorm
    # statistics (reduction axis 'arbitrary' + finalize pass) instead of a
    # whole-image block per batch element.
    out = pl.pallas_call(
        kern,
        out_shape=jax.ShapeDtypeStruct((N, Cout, HW), jnp.float32),
        grid_spec=pltpu.PrefetchScalarGridSpec(
            num_scalar_prefetch=0,
            grid=(N,),
            in_specs=[
                pl.BlockSpec(memory_space=pltpu.MemorySpace.SMEM),  # noise_strength
                pl.BlockSpec((1, K, HW), lambda n: (n, 0, 0)),
                pl.BlockSpec((Cout, K), lambda n: (0, 0)),
                pl.BlockSpec((Cout, 1), lambda n: (0, 0)),
                pl.BlockSpec((1, Cout, HW), lambda n: (n, 0, 0)),
                pl.BlockSpec((1, 2 * Cout, HW), lambda n: (n, 0, 0)),
            ],
            out_specs=pl.BlockSpec((1, Cout, HW), lambda n: (n, 0, 0)),
        ),
        compiler_params=pltpu.CompilerParams(
            dimension_semantics=("parallel",),
            vmem_limit_bytes=_VMEM_LIMIT),
    )(noise_strength, patches, w_mat, b_mat, noise, gb)
    return out.reshape(N, Cout, H, W)


def style_conv_forward(x_nchw, style_nchw, params, noise_nchw):
    """StyleConv(input_nc, feat_ch, 3, activate=True, style_denorm=True, ch=1)."""
    # TODO(synk): upsample/downsample branches and the ch=2 branch are not used
    # by this configuration and are not implemented.
    N, Cin, H, W = x_nchw.shape

    # ---- style path: one fused kernel (shared conv + ReLU + gamma||beta conv).
    style_hw = _nearest_resize(style_nchw, H, W)
    gb = _style_gamma_beta(style_hw, params["w_shared"], params["b_shared"],
                           params["w_gamma"], params["b_gamma"],
                           params["w_beta"], params["b_beta"])

    # ---- main path: fused conv + IN + noise + modulation + LeakyReLU.
    out = _conv_norm_modulate(x_nchw, params["w_conv"], params["b_conv"],
                              noise_nchw, gb, params["noise_strength"],
                              eps=1e-5, activate=True)  # nn.InstanceNorm2d eps
    return out                                          # NCHW


# ----------------------------------------------------------------------------
# Example / smoke test
# ----------------------------------------------------------------------------
if __name__ == "__main__":
    key = jax.random.PRNGKey(0)
    N, input_nc, feat_ch = 2, 4, 8
    H = W = 16
    hs = ws = 8          # style map is smaller -> exercises nearest interpolate
    nhidden = 512        # hardcoded in the module

    ks = jax.random.split(key, 11)
    params = {
        "w_conv":   0.10 * jax.random.normal(ks[0], (feat_ch, input_nc, 3, 3), jnp.float32),
        "b_conv":   0.10 * jax.random.normal(ks[1], (feat_ch,), jnp.float32),
        "w_shared": 0.10 * jax.random.normal(ks[2], (nhidden, 1, 3, 3), jnp.float32),
        "b_shared": 0.10 * jax.random.normal(ks[3], (nhidden,), jnp.float32),
        "w_gamma":  0.05 * jax.random.normal(ks[4], (feat_ch, nhidden, 3, 3), jnp.float32),
        "b_gamma":  0.05 * jax.random.normal(ks[5], (feat_ch,), jnp.float32),
        "w_beta":   0.05 * jax.random.normal(ks[6], (feat_ch, nhidden, 3, 3), jnp.float32),
        "b_beta":   0.05 * jax.random.normal(ks[7], (feat_ch,), jnp.float32),
        # nn.Parameter(torch.zeros(1))
        "noise_strength": jnp.zeros((1,), jnp.float32),
    }

    x = jax.random.normal(ks[8], (N, input_nc, H, W), jnp.float32)
    style = jax.random.normal(ks[9], (N, 1, hs, ws), jnp.float32)
    # randomize_noise=True: torch.randn_like(x) generated in the wrapper (glue),
    # scaled by noise_strength inside the fused kernel.
    noise = jax.random.normal(ks[10], (N, feat_ch, H, W), jnp.float32)

    fwd = jax.jit(style_conv_forward)
    out = fwd(x, style, params, noise)
    out = jax.block_until_ready(out)
    assert out.shape == (N, feat_ch, H, W), out.shape
    assert bool(jnp.all(jnp.isfinite(out)))
    print("KERNEL_OK")
</pallas_src>

<mosaic_0001>
module attributes {stable_mosaic.version = 11 : i64} {
  func.func @_style_gb_kernel(%arg0: i32, %arg1: i32, %arg2: memref<1x1x456x10xf32, #tpu.memory_space<vmem>>, %arg3: memref<10x512xf32, #tpu.memory_space<vmem>>, %arg4: memref<9x512x16xbf16, #tpu.memory_space<vmem>>, %arg5: memref<1x16xf32, #tpu.memory_space<vmem>>, %arg6: memref<1x16x384xf32, #tpu.memory_space<vmem>>, %arg7: memref<456x512xbf16, #tpu.memory_space<vmem>>) attributes {dimension_semantics = [#tpu.dimension_semantics<parallel>, #tpu.dimension_semantics<parallel>], iteration_bounds = array<i64: 2, 1>, scalar_prefetch = 0 : i64, scratch_operands = 1 : i64, tpu.core_type = #tpu.core_type<tc>, window_params = [{transform_indices = @transform_0, window_bounds = array<i64: 1, 1, 456, 10>}, {pipeline_mode = #tpu.pipeline_mode<synchronous>, transform_indices = @transform_1, window_bounds = array<i64: 10, 512>}, {pipeline_mode = #tpu.pipeline_mode<synchronous>, transform_indices = @transform_2, window_bounds = array<i64: 9, 512, 16>}, {pipeline_mode = #tpu.pipeline_mode<synchronous>, transform_indices = @transform_3, window_bounds = array<i64: 1, 16>}, {transform_indices = @transform_4, window_bounds = array<i64: 1, 16, 384>}]} {
    %c0 = arith.constant 0 : index
    %c0_0 = arith.constant 0 : index
    %c0_1 = arith.constant 0 : index
    %c0_2 = arith.constant 0 : index
    %0 = vector.load %arg2[%c0, %c0_0, %c0_1, %c0_2] : memref<1x1x456x10xf32, #tpu.memory_space<vmem>>, vector<1x1x456x10xf32>
    %1 = vector.shape_cast %0 : vector<1x1x456x10xf32> to vector<456x10xf32>
    %c0_3 = arith.constant 0 : index
    %c0_4 = arith.constant 0 : index
    %2 = vector.load %arg3[%c0_3, %c0_4] : memref<10x512xf32, #tpu.memory_space<vmem>>, vector<10x512xf32>
    %cst = arith.constant dense<0.000000e+00> : vector<456x512xf32>
    %3 = tpu.matmul %1, %2, %cst {dimension_numbers = #tpu.dot_dimension_numbers<[1], [0], [0], [1], [0, 0, 1, 1], [], []>} : vector<456x10xf32>, vector<10x512xf32>, vector<456x512xf32> -> vector<456x512xf32>
    %cst_5 = arith.constant 0.000000e+00 : f32
    %4 = vector.broadcast %cst_5 : f32 to vector<456x512xf32>
    %5 = arith.maximumf %3, %4 : vector<456x512xf32>
    %6 = arith.truncf %5 : vector<456x512xf32> to vector<456x512xbf16>
    %c0_6 = arith.constant 0 : index
    %c0_7 = arith.constant 0 : index
    %7 = vector.load %arg7[%c0_6, %c0_7] : memref<456x512xbf16, #tpu.memory_space<vmem>>, vector<456x512xbf16>
    tpu.vector_store %arg7[%c0_6, %c0_7], %6 {strides = array<i32>} : memref<456x512xbf16, #tpu.memory_space<vmem>>, vector<456x512xbf16>,
    %c0_8 = arith.constant 0 : index
    %c0_9 = arith.constant 0 : index
    %8 = vector.load %arg7[%c0_8, %c0_9] : memref<456x512xbf16, #tpu.memory_space<vmem>>, vector<392x512xbf16>
    %c0_10 = arith.constant 0 : index
    %c0_11 = arith.constant 0 : index
    %c0_12 = arith.constant 0 : index
    %9 = vector.load %arg4[%c0_10, %c0_11, %c0_12] : memref<9x512x16xbf16, #tpu.memory_space<vmem>>, vector<1x512x16xbf16>
    %10 = vector.shape_cast %9 : vector<1x512x16xbf16> to vector<512x16xbf16>
    %cst_13 = arith.constant dense<0.000000e+00> : vector<392x16xf32>
    %11 = tpu.matmul %8, %10, %cst_13 {dimension_numbers = #tpu.dot_dimension_numbers<[1], [0], [0], [1], [0, 0, 1, 1], [], []>} : vector<392x512xbf16>, vector<512x16xbf16>, vector<392x16xf32> -> vector<392x16xf32>
    %c1 = arith.constant 1 : index
    %c0_14 = arith.constant 0 : index
    %c0_15 = arith.constant 0 : index
    %12 = vector.load %arg4[%c1, %c0_14, %c0_15] : memref<9x512x16xbf16, #tpu.memory_space<vmem>>, vector<1x512x16xbf16>
    %13 = vector.shape_cast %12 : vector<1x512x16xbf16> to vector<512x16xbf16>
    %cst_16 = arith.constant dense<0.000000e+00> : vector<392x16xf32>
    %14 = tpu.matmul %8, %13, %cst_16 {dimension_numbers = #tpu.dot_dimension_numbers<[1], [0], [0], [1], [0, 0, 1, 1], [], []>} : vector<392x512xbf16>, vector<512x16xbf16>, vector<392x16xf32> -> vector<392x16xf32>
    %c2 = arith.constant 2 : index
    %c0_17 = arith.constant 0 : index
    %c0_18 = arith.constant 0 : index
    %15 = vector.load %arg4[%c2, %c0_17, %c0_18] : memref<9x512x16xbf16, #tpu.memory_space<vmem>>, vector<1x512x16xbf16>
    %16 = vector.shape_cast %15 : vector<1x512x16xbf16> to vector<512x16xbf16>
    %cst_19 = arith.constant dense<0.000000e+00> : vector<392x16xf32>
    %17 = tpu.matmul %8, %16, %cst_19 {dimension_numbers = #tpu.dot_dimension_numbers<[1], [0], [0], [1], [0, 0, 1, 1], [], []>} : vector<392x512xbf16>, vector<512x16xbf16>, vector<392x16xf32> -> vector<392x16xf32>
    %c24 = arith.constant 24 : index
    %c0_20 = arith.constant 0 : index
    %18 = vector.load %arg7[%c24, %c0_20] : memref<456x512xbf16, #tpu.memory_space<vmem>>, vector<392x512xbf16>
    %c3 = arith.constant 3 : index
    %c0_21 = arith.constant 0 : index
    %c0_22 = arith.constant 0 : index
    %19 = vector.load %arg4[%c3, %c0_21, %c0_22] : memref<9x512x16xbf16, #tpu.memory_space<vmem>>, vector<1x512x16xbf16>
    %20 = vector.shape_cast %19 : vector<1x512x16xbf16> to vector<512x16xbf16>
    %cst_23 = arith.constant dense<0.000000e+00> : vector<392x16xf32>
    %21 = tpu.matmul %18, %20, %cst_23 {dimension_numbers = #tpu.dot_dimension_numbers<[1], [0], [0], [1], [0, 0, 1, 1], [], []>} : vector<392x512xbf16>, vector<512x16xbf16>, vector<392x16xf32> -> vector<392x16xf32>
    %22 = arith.addf %11, %21 : vector<392x16xf32>
    %c4 = arith.constant 4 : index
    %c0_24 = arith.constant 0 : index
    %c0_25 = arith.constant 0 : index
    %23 = vector.load %arg4[%c4, %c0_24, %c0_25] : memref<9x512x16xbf16, #tpu.memory_space<vmem>>, vector<1x512x16xbf16>
    %24 = vector.shape_cast %23 : vector<1x512x16xbf16> to vector<512x16xbf16>
    %cst_26 = arith.constant dense<0.000000e+00> : vector<392x16xf32>
    %25 = tpu.matmul %18, %24, %cst_26 {dimension_numbers = #tpu.dot_dimension_numbers<[1], [0], [0], [1], [0, 0, 1, 1], [], []>} : vector<392x512xbf16>, vector<512x16xbf16>, vector<392x16xf32> -> vector<392x16xf32>
    %26 = arith.addf %14, %25 : vector<392x16xf32>
    %c5 = arith.constant 5 : index
    %c0_27 = arith.constant 0 : index
    %c0_28 = arith.constant 0 : index
    %27 = vector.load %arg4[%c5, %c0_27, %c0_28] : memref<9x512x16xbf16, #tpu.memory_space<vmem>>, vector<1x512x16xbf16>
    %28 = vector.shape_cast %27 : vector<1x512x16xbf16> to vector<512x16xbf16>
    %cst_29 = arith.constant dense<0.000000e+00> : vector<392x16xf32>
    %29 = tpu.matmul %18, %28, %cst_29 {dimension_numbers = #tpu.dot_dimension_numbers<[1], [0], [0], [1], [0, 0, 1, 1], [], []>} : vector<392x512xbf16>, vector<512x16xbf16>, vector<392x16xf32> -> vector<392x16xf32>
    %30 = arith.addf %17, %29 : vector<392x16xf32>
    %c48 = arith.constant 48 : index
    %c0_30 = arith.constant 0 : index
    %31 = vector.load %arg7[%c48, %c0_30] : memref<456x512xbf16, #tpu.memory_space<vmem>>, vector<392x512xbf16>
    %c6 = arith.constant 6 : index
    %c0_31 = arith.constant 0 : index
    %c0_32 = arith.constant 0 : index
    %32 = vector.load %arg4[%c6, %c0_31, %c0_32] : memref<9x512x16xbf16, #tpu.memory_space<vmem>>, vector<1x512x16xbf16>
    %33 = vector.shape_cast %32 : vector<1x512x16xbf16> to vector<512x16xbf16>
    %cst_33 = arith.constant dense<0.000000e+00> : vector<392x16xf32>
    %34 = tpu.matmul %31, %33, %cst_33 {dimension_numbers = #tpu.dot_dimension_numbers<[1], [0], [0], [1], [0, 0, 1, 1], [], []>} : vector<392x512xbf16>, vector<512x16xbf16>, vector<392x16xf32> -> vector<392x16xf32>
    %35 = arith.addf %22, %34 : vector<392x16xf32>
    %c7 = arith.constant 7 : index
    %c0_34 = arith.constant 0 : index
    %c0_35 = arith.constant 0 : index
    %36 = vector.load %arg4[%c7, %c0_34, %c0_35] : memref<9x512x16xbf16, #tpu.memory_space<vmem>>, vector<1x512x16xbf16>
    %37 = vector.shape_cast %36 : vector<1x512x16xbf16> to vector<512x16xbf16>
    %cst_36 = arith.constant dense<0.000000e+00> : vector<392x16xf32>
    %38 = tpu.matmul %31, %37, %cst_36 {dimension_numbers = #tpu.dot_dimension_numbers<[1], [0], [0], [1], [0, 0, 1, 1], [], []>} : vector<392x512xbf16>, vector<512x16xbf16>, vector<392x16xf32> -> vector<392x16xf32>
    %39 = arith.addf %26, %38 : vector<392x16xf32>
    %c8 = arith.constant 8 : index
    %c0_37 = arith.constant 0 : index
    %c0_38 = arith.constant 0 : index
    %40 = vector.load %arg4[%c8, %c0_37, %c0_38] : memref<9x512x16xbf16, #tpu.memory_space<vmem>>, vector<1x512x16xbf16>
    %41 = vector.shape_cast %40 : vector<1x512x16xbf16> to vector<512x16xbf16>
    %cst_39 = arith.constant dense<0.000000e+00> : vector<392x16xf32>
    %42 = tpu.matmul %31, %41, %cst_39 {dimension_numbers = #tpu.dot_dimension_numbers<[1], [0], [0], [1], [0, 0, 1, 1], [], []>} : vector<392x512xbf16>, vector<512x16xbf16>, vector<392x16xf32> -> vector<392x16xf32>
    %43 = arith.addf %30, %42 : vector<392x16xf32>
    %44 = vector.extract_strided_slice %35 {offsets = [0, 0], sizes = [384, 16], strides = [1, 1]} : vector<392x16xf32> to vector<384x16xf32>
    %45 = vector.extract_strided_slice %39 {offsets = [1, 0], sizes = [384, 16], strides = [1, 1]} : vector<392x16xf32> to vector<384x16xf32>
    %46 = arith.addf %44, %45 : vector<384x16xf32>
    %47 = vector.extract_strided_slice %43 {offsets = [2, 0], sizes = [384, 16], strides = [1, 1]} : vector<392x16xf32> to vector<384x16xf32>
    %48 = arith.addf %46, %47 : vector<384x16xf32>
    %c0_40 = arith.constant 0 : index
    %c0_41 = arith.constant 0 : index
    %49 = vector.load %arg5[%c0_40, %c0_41] : memref<1x16xf32, #tpu.memory_space<vmem>>, vector<1x16xf32>
    %50 = vector.broadcast %49 : vector<1x16xf32> to vector<384x16xf32>
    %51 = arith.addf %48, %50 : vector<384x16xf32>
    %52 = tpu.transpose %51, [1, 0] : vector<384x16xf32> -> vector<16x384xf32>
    %c0_42 = arith.constant 0 : index
    %c0_43 = arith.constant 0 : index
    %c0_44 = arith.constant 0 : index
    %53 = vector.load %arg6[%c0_42, %c0_43, %c0_44] : memref<1x16x384xf32, #tpu.memory_space<vmem>>, vector<1x16x384xf32>
    %54 = vector.shape_cast %53 : vector<1x16x384xf32> to vector<16x384xf32>
    %55 = vector.shape_cast %52 : vector<16x384xf32> to vector<1x16x384xf32>
    tpu.vector_store %arg6[%c0_42, %c0_43, %c0_44], %55 {strides = array<i32>} : memref<1x16x384xf32, #tpu.memory_space<vmem>>, vector<1x16x384xf32>,
    return
  }
  func.func @transform_0(%arg0: i32, %arg1: i32) -> (i32, i32, i32, i32) {
    %c0_i32 = arith.constant 0 : i32
    %c0_i32_0 = arith.constant 0 : i32
    %c0_i32_1 = arith.constant 0 : i32
    return %arg0, %arg1, %c0_i32, %c0_i32_0 : i32, i32, i32, i32
  }
  func.func @transform_1(%arg0: i32, %arg1: i32) -> (i32, i32) {
    %c0_i32 = arith.constant 0 : i32
    %c0_i32_0 = arith.constant 0 : i32
    %c0_i32_1 = arith.constant 0 : i32
    return %c0_i32, %c0_i32_0 : i32, i32
  }
  func.func @transform_2(%arg0: i32, %arg1: i32) -> (i32, i32, i32) {
    %c0_i32 = arith.constant 0 : i32
    %c0_i32_0 = arith.constant 0 : i32
    %c0_i32_1 = arith.constant 0 : i32
    %c0_i32_2 = arith.constant 0 : i32
    return %c0_i32, %c0_i32_0, %c0_i32_1 : i32, i32, i32
  }
  func.func @transform_3(%arg0: i32, %arg1: i32) -> (i32, i32) {
    %c0_i32 = arith.constant 0 : i32
    %c0_i32_0 = arith.constant 0 : i32
    %c0_i32_1 = arith.constant 0 : i32
    return %c0_i32, %c0_i32_0 : i32, i32
  }
  func.func @transform_4(%arg0: i32, %arg1: i32) -> (i32, i32, i32) {
    %c0_i32 = arith.constant 0 : i32
    %c0_i32_0 = arith.constant 0 : i32
    return %arg0, %c0_i32, %arg1 : i32, i32, i32
  }
}

module attributes {stable_mosaic.version = 11 : i64} {
  func.func @_conv_norm_mod_kernel(%arg0: i32, %arg1: memref<1xf32, #tpu.memory_space<smem>>, %arg2: memref<1x36x256xf32, #tpu.memory_space<vmem>>, %arg3: memref<8x36xf32, #tpu.memory_space<vmem>>, %arg4: memref<8x1xf32, #tpu.memory_space<vmem>>, %arg5: memref<1x8x256xf32, #tpu.memory_space<vmem>>, %arg6: memref<1x16x256xf32, #tpu.memory_space<vmem>>, %arg7: memref<1x8x256xf32, #tpu.memory_space<vmem>>) attributes {dimension_semantics = [#tpu.dimension_semantics<parallel>], iteration_bounds = array<i64: 2>, scalar_prefetch = 0 : i64, scratch_operands = 0 : i64, tpu.core_type = #tpu.core_type<tc>, window_params = [{transform_indices = @transform_0, window_bounds = array<i64: 1>}, {transform_indices = @transform_1, window_bounds = array<i64: 1, 36, 256>}, {pipeline_mode = #tpu.pipeline_mode<synchronous>, transform_indices = @transform_2, window_bounds = array<i64: 8, 36>}, {pipeline_mode = #tpu.pipeline_mode<synchronous>, transform_indices = @transform_3, window_bounds = array<i64: 8, 1>}, {transform_indices = @transform_4, window_bounds = array<i64: 1, 8, 256>}, {transform_indices = @transform_5, window_bounds = array<i64: 1, 16, 256>}, {transform_indices = @transform_6, window_bounds = array<i64: 1, 8, 256>}]} {
    %c0 = arith.constant 0 : index
    %c0_0 = arith.constant 0 : index
    %0 = vector.load %arg3[%c0, %c0_0] : memref<8x36xf32, #tpu.memory_space<vmem>>, vector<8x36xf32>
    %c0_1 = arith.constant 0 : index
    %c0_2 = arith.constant 0 : index
    %c0_3 = arith.constant 0 : index
    %1 = vector.load %arg2[%c0_1, %c0_2, %c0_3] : memref<1x36x256xf32, #tpu.memory_space<vmem>>, vector<1x36x256xf32>
    %2 = vector.shape_cast %1 : vector<1x36x256xf32> to vector<36x256xf32>
    %cst = arith.constant dense<0.000000e+00> : vector<8x256xf32>
    %3 = tpu.matmul %0, %2, %cst {dimension_numbers = #tpu.dot_dimension_numbers<[1], [0], [0], [1], [0, 0, 1, 1], [], []>} : vector<8x36xf32>, vector<36x256xf32>, vector<8x256xf32> -> vector<8x256xf32>
    %c0_4 = arith.constant 0 : index
    %c0_5 = arith.constant 0 : index
    %4 = vector.load %arg4[%c0_4, %c0_5] : memref<8x1xf32, #tpu.memory_space<vmem>>, vector<8x1xf32>
    %5 = vector.broadcast %4 : vector<8x1xf32> to vector<8x256xf32>
    %6 = arith.addf %3, %5 : vector<8x256xf32>
    %cst_6 = arith.constant dense<0.000000e+00> : vector<8xf32>
    %7 = vector.multi_reduction <add>, %6, %cst_6 [1] : vector<8x256xf32> to vector<8xf32>
    %8 = vector.shape_cast %7 : vector<8xf32> to vector<8x1xf32>
    %cst_7 = arith.constant 2.560000e+02 : f32
    %9 = vector.broadcast %cst_7 : f32 to vector<8x1xf32>
    %10 = arith.divf %8, %9 : vector<8x1xf32>
    %11 = vector.broadcast %10 : vector<8x1xf32> to vector<8x256xf32>
    %12 = arith.subf %6, %11 : vector<8x256xf32>
    %13 = arith.mulf %12, %12 : vector<8x256xf32>
    %cst_8 = arith.constant dense<0.000000e+00> : vector<8xf32>
    %14 = vector.multi_reduction <add>, %13, %cst_8 [1] : vector<8x256xf32> to vector<8xf32>
    %15 = vector.shape_cast %14 : vector<8xf32> to vector<8x1xf32>
    %cst_9 = arith.constant 2.560000e+02 : f32
    %16 = vector.broadcast %cst_9 : f32 to vector<8x1xf32>
    %17 = arith.divf %15, %16 : vector<8x1xf32>
    %cst_10 = arith.constant 9.99999974E-6 : f32
    %18 = vector.broadcast %cst_10 : f32 to vector<8x1xf32>
    %19 = arith.addf %17, %18 : vector<8x1xf32>
    %20 = math.rsqrt %19 : vector<8x1xf32>
    %21 = vector.broadcast %20 : vector<8x1xf32> to vector<8x256xf32>
    %22 = arith.mulf %12, %21 : vector<8x256xf32>
    %c0_11 = arith.constant 0 : index
    %c0_12 = arith.constant 0 : index
    %c0_13 = arith.constant 0 : index
    %23 = vector.load %arg5[%c0_11, %c0_12, %c0_13] : memref<1x8x256xf32, #tpu.memory_space<vmem>>, vector<1x8x256xf32>
    %24 = vector.shape_cast %23 : vector<1x8x256xf32> to vector<8x256xf32>
    %c0_14 = arith.constant 0 : index
    %25 = memref.load %arg1[%c0_14] : memref<1xf32, #tpu.memory_space<smem>>
    %26 = vector.broadcast %25 : f32 to vector<8x256xf32>
    %27 = arith.mulf %24, %26 : vector<8x256xf32>
    %28 = arith.addf %22, %27 : vector<8x256xf32>
    %c0_15 = arith.constant 0 : index
    %c0_16 = arith.constant 0 : index
    %c0_17 = arith.constant 0 : index
    %29 = vector.load %arg6[%c0_15, %c0_16, %c0_17] : memref<1x16x256xf32, #tpu.memory_space<vmem>>, vector<1x8x256xf32>
    %30 = vector.shape_cast %29 : vector<1x8x256xf32> to vector<8x256xf32>
    %c0_18 = arith.constant 0 : index
    %c8 = arith.constant 8 : index
    %c0_19 = arith.constant 0 : index
    %31 = vector.load %arg6[%c0_18, %c8, %c0_19] : memref<1x16x256xf32, #tpu.memory_space<vmem>>, vector<1x8x256xf32>
    %32 = vector.shape_cast %31 : vector<1x8x256xf32> to vector<8x256xf32>
    %33 = arith.mulf %28, %30 : vector<8x256xf32>
    %34 = arith.addf %33, %32 : vector<8x256xf32>
    %cst_20 = arith.constant 0.000000e+00 : f32
    %35 = vector.broadcast %cst_20 : f32 to vector<8x256xf32>
    %36 = arith.cmpf oge, %34, %35 : vector<8x256xf32>
    %cst_21 = arith.constant 2.000000e-01 : f32
    %37 = vector.broadcast %cst_21 : f32 to vector<8x256xf32>
    %38 = arith.mulf %37, %34 : vector<8x256xf32>
    %39 = arith.select %36, %34, %38 : vector<8x256xi1>, vector<8x256xf32>
    %c0_22 = arith.constant 0 : index
    %c0_23 = arith.constant 0 : index
    %c0_24 = arith.constant 0 : index
    %40 = vector.load %arg7[%c0_22, %c0_23, %c0_24] : memref<1x8x256xf32, #tpu.memory_space<vmem>>, vector<1x8x256xf32>
    %41 = vector.shape_cast %40 : vector<1x8x256xf32> to vector<8x256xf32>
    %42 = vector.shape_cast %39 : vector<8x256xf32> to vector<1x8x256xf32>
    tpu.vector_store %arg7[%c0_22, %c0_23, %c0_24], %42 {strides = array<i32>} : memref<1x8x256xf32, #tpu.memory_space<vmem>>, vector<1x8x256xf32>,
    return
  }
  func.func @transform_0(%arg0: i32) -> i32 {
    %c0_i32 = arith.constant 0 : i32
    %c0_i32_0 = arith.constant 0 : i32
    return %c0_i32 : i32
  }
  func.func @transform_1(%arg0: i32) -> (i32, i32, i32) {
    %c0_i32 = arith.constant 0 : i32
    %c0_i32_0 = arith.constant 0 : i32
    %c0_i32_1 = arith.constant 0 : i32
    return %arg0, %c0_i32, %c0_i32_0 : i32, i32, i32
  }
  func.func @transform_2(%arg0: i32) -> (i32, i32) {
    %c0_i32 = arith.constant 0 : i32
    %c0_i32_0 = arith.constant 0 : i32
    %c0_i32_1 = arith.constant 0 : i32
    return %c0_i32, %c0_i32_0 : i32, i32
  }
  func.func @transform_3(%arg0: i32) -> (i32, i32) {
    %c0_i32 = arith.constant 0 : i32
    %c0_i32_0 = arith.constant 0 : i32
    %c0_i32_1 = arith.constant 0 : i32
    return %c0_i32, %c0_i32_0 : i32, i32
  }
  func.func @transform_4(%arg0: i32) -> (i32, i32, i32) {
    %c0_i32 = arith.constant 0 : i32
    %c0_i32_0 = arith.constant 0 : i32
    %c0_i32_1 = arith.constant 0 : i32
    return %arg0, %c0_i32, %c0_i32_0 : i32, i32, i32
  }
  func.func @transform_5(%arg0: i32) -> (i32, i32, i32) {
    %c0_i32 = arith.constant 0 : i32
    %c0_i32_0 = arith.constant 0 : i32
    %c0_i32_1 = arith.constant 0 : i32
    return %arg0, %c0_i32, %c0_i32_0 : i32, i32, i32
  }
  func.func @transform_6(%arg0: i32) -> (i32, i32, i32) {
    %c0_i32 = arith.constant 0 : i32
    %c0_i32_0 = arith.constant 0 : i32
    %c0_i32_1 = arith.constant 0 : i32
    return %arg0, %c0_i32, %c0_i32_0 : i32, i32, i32
  }
}

</mosaic_0001>

<bundles_post_ra>
// kernel: style_conv_forward.3
= control target key start
LH: loop header
LB: loop body
LE: loop exit
PB: predicated region body
PF: predicated region fallthrough
CT: control target
= control target key end

     0   :  { %s602_s23 = smov 0   ;;  %s636_s0 = inlined_call_operand.<no memory space> [shape: f32[1], index: 0, kind: input, shape index: {}]   ;;  %s637_s1 = inlined_call_operand.vmem [shape: f32[2,36,256], index: 1, kind: input, shape index: {}]   ;;  %s638_s2 = inlined_call_operand.vmem [shape: f32[8,36], index: 2, kind: input, shape index: {}]   ;;  %s639_s3 = inlined_call_operand.vmem [shape: f32[8,1], index: 3, kind: input, shape index: {}]   ;;  %s640_s4 = inlined_call_operand.vmem [shape: f32[2,8,256], index: 4, kind: input, shape index: {}]   ;;  %s641_s5 = inlined_call_operand.vmem [shape: f32[2,16,256], index: 5, kind: input, shape index: {}]   ;;  %s642_s6 = inlined_call_operand.vmem [shape: f32[2,8,256], index: 6, kind: output, shape index: {}]  }
   0x1   :  { %11 = sst [smem:[#allocation2]] %s636_s0 }
   0x2 LB: > { %s512_s24 = sadd.s32 4294967295, %s560_s23   ;;  %p516_p0 = scmp.ge.s32.totalorder %s560_s23, 1  ;;  %s560_s23 = sphi %s602_s23, %s17_s23  }
   0x3   : > { %p233_p1 = scmp.lt.s32.totalorder %s560_s23, 3 }
   0x5   : > { %p234_p2 = pnand %p516_p0, %p233_p1 }
   0x6   : > { %p273_p3 = scmp.lt.s32.totalorder (!%p234_p2), %s512_s24, 1  ;;  %v562_v0 = vmov (!%p234_p2), 0.0   ;;  %v563_v1 = vmov (!%p234_p2), 0   ;;  %v304_v2 = vld [vmem:[%s639_s3] sm:$0xff] (!%p234_p2)  ;;  %vm314_vm0 = vcmask (!%p234_p2), 1043456   ;;  %vm310_vm1 = vcmask (!%p234_p2), 293888  }
   0x7   : > { %237 = sbr.rel (%p234_p2) target bundleno = 567 (0x237), region = 44  ;;  %385 = vmatprep.mubr.f32.mxu0 (!%p234_p2), %v562_v0  ;;  %551 = vset.pattern.permute.xlu0 (!%p234_p2), %v563_v1  ;;  %v293_v17 = vld [vmem:[%s638_s2] sm:$0xff] (!%p234_p2)  ;;  %s411_s8 = sld [smem:[#allocation2]] (!%p234_p2) }
   0x8   : > { %307 = vperm.xlu0 (!%p234_p2), %551, %v304_v2  }
   0xd   : > { %v412_v36 = vstv (!%p234_p2), %s411_s8 }
   0xe   : > { %s644_s24 = smov (!%p273_p3, %s512_s24), 1 }
   0xf   : > { %s540_s26 = smul.u32 80, %s644_s24  ;;  %s529_s9 = sshll.u32 %s644_s24, 4 }
  0x10   : > { %s282_s12 = scalar_lea.vmem %s640_s4, %s529_s9  ;;  %s530_s13 = sshll.u32 %s644_s24, 5 }
  0x11   : > { %s277_s29 = scalar_lea.vmem %s637_s1, %s540_s26  ;;  %v409_v34 = vld [vmem:[%s282_s12] sm:$0xff]  ;;  %v410_v35 = vld [vmem:[%s282_s12 + $0x8] sm:$0xff]  ;;  %s287_s16 = scalar_lea.vmem %s641_s5, %s530_s13 }
  0x12   : > { %v295_v3 = vld [vmem:[%s277_s29 + $0x8] sm:$0xff]  ;;  %v297_v4 = vld [vmem:[%s277_s29 + $0x18] sm:$0xff]  ;;  %v294_v5 = vld [vmem:[%s277_s29] sm:$0xff]  ;;  %v413_v37 = vmul.f32 %v412_v36, %v409_v34  ;;  %v414_v38 = vmul.f32 %v412_v36, %v410_v35  ;;  %s292_s19 = scalar_lea.vmem %s642_s6, %s529_s9 }
  0x13   : > { %v532_v6 = vpack.c.bf16 %v297_v4, %v295_v3  ;;  %v296_v7 = vld [vmem:[%s277_s29 + $0x10] sm:$0xff]  ;;  %v299_v8 = vld [vmem:[%s277_s29 + $0x28] sm:$0xff]  ;;  %v301_v9 = vld [vmem:[%s277_s29 + $0x38] sm:$0xff] }
  0x14   : > { %v534_v10 = vpack.c.bf16 %v296_v7, %v294_v5  ;;  %v536_v11 = vpack.c.bf16 %v301_v9, %v299_v8  ;;  %v298_v12 = vld [vmem:[%s277_s29 + $0x20] sm:$0xff]  ;;  %v300_v13 = vld [vmem:[%s277_s29 + $0x30] sm:$0xff]  ;;  %v303_v15 = vld [vmem:[%s277_s29 + $0x48] sm:$0xf] }
  0x15   : > { %533 = vmatprep.subr.bf16.mxu0 %v532_v6  ;;  %v538_v14 = vpack.c.bf16 %v300_v13, %v298_v12  ;;  %v302_v16 = vld [vmem:[%s277_s29 + $0x40] sm:$0xf]  ;;  %v418_v43 = vld [vmem:[%s287_s16 + $0x8] sm:$0xff]  ;;  %v419_v46 = vld [vmem:[%s287_s16 + $0x10] sm:$0xff] }
  0x16   : > { %535 = vmatpush1.bf16.msra.mxu0 %v534_v10  ;;  %v417_v42 = vld [vmem:[%s287_s16] sm:$0xff]  ;;  %v420_v47 = vld [vmem:[%s287_s16 + $0x18] sm:$0xff] }
  0x17   : > { %537 = vmatprep.subr.bf16.mxu0 %v536_v11 }
  0x1a   : > { %539 = vmatpush1.bf16.msra.mxu0 %v538_v14 }
  0x1b   : > { %524 = vmatprep.subr.msk.mxu0 %vm314_vm0, %v303_v15 }
  0x1e   : > { %525 = vmatpush1.msk.msra.mxu0 %vm314_vm0, %v302_v16 }
  0x1f   : > { %526 = vmatmul.mubr.msk.f32.vlgmr.msra.gmra.mrb[0].mxu0 %vm310_vm1, %v293_v17 }
  0x87   : > { %v308_v18 = vpop.permute.xlu0 %307 }
  0xf2   : > { %v387_v19 = vpop.f32.mrb[0].mxu0 }
  0xf3   : > { %v388_v20 = vadd.f32 %v387_v19, %v308_v18  ;;  %v389_v21 = vpop.f32.mrb[1].mxu0 }
  0xf4   : > { %v390_v22 = vadd.f32 %v389_v21, %v308_v18 }
  0xf6   : > { %v392_v23 = vadd.f32 %v390_v22, %v388_v20 }
  0xf8   : > { %393 = vadd.xlane.f32.xlu0 %v392_v23 }
 0x185   : > { %v394_v24 = vpop.xlane.xlu0 %393 }
 0x186   : > { %v396_v25 = vmul.f32 0.00390625, %v394_v24 }
 0x188   : > { %v397_v26 = vsub.f32 %v388_v20, %v396_v25  ;;  %v398_v27 = vsub.f32 %v390_v22, %v396_v25 }
 0x18a   : > { %v399_v28 = vmul.f32 %v397_v26, %v397_v26  ;;  %v400_v29 = vmul.f32 %v398_v27, %v398_v27 }
 0x18c   : > { %v401_v30 = vadd.f32 %v400_v29, %v399_v28 }
 0x18e   : > { %402 = vadd.xlane.f32.xlu1 %v401_v30 }
 0x21b   : > { %v403_v31 = vpop.xlane.xlu1 %402 }
 0x21c   : > { %v404_v32 = vmul.f32 0.00390625, %v403_v31 }
 0x21e   : > { %v405_v33 = vadd.f32 1e-05, %v404_v32 }
 0x220   : > { %552 = vrsqrt.f32 %v405_v33 }
 0x22a   : > { %v553_v39 = vpop.eup %552 }
 0x22b   : > { %v407_v40 = vmul.f32 %v553_v39, %v397_v26  ;;  %v408_v41 = vmul.f32 %v553_v39, %v398_v27 }
 0x22d   : > { %v415_v44 = vadd.f32 %v413_v37, %v407_v40  ;;  %v416_v45 = vadd.f32 %v414_v38, %v408_v41 }
 0x22f   : > { %v421_v48 = vmul.f32 %v417_v42, %v415_v44  ;;  %v422_v49 = vmul.f32 %v418_v43, %v416_v45 }
 0x231   : > { %v423_v50 = vadd.f32 %v421_v48, %v419_v46  ;;  %v424_v51 = vadd.f32 %v422_v49, %v420_v47 }
 0x233   : > { %vm425_vm2 = vcmp.ge.f32.partialorder %v423_v50, 0.0  ;;  %vm426_vm3 = vcmp.ge.f32.partialorder %v424_v51, 0.0  ;;  %v427_v52 = vmul.f32 0.2, %v423_v50  ;;  %v428_v53 = vmul.f32 0.2, %v424_v51 }
 0x235   : > { %v429_v54 = vsel %vm425_vm2, %v423_v50, %v427_v52  ;;  %v430_v55 = vsel %vm426_vm3, %v424_v51, %v428_v53 }
 0x236   : > { %431 = vst [vmem:[%s292_s19] sm:$0xff] %v429_v54  ;;  %432 = vst [vmem:[%s292_s19 + $0x8] sm:$0xff] %v430_v55 }
 0x237 PF: > { %s17_s23 = sadd.s32 1, %s560_s23  }
 0x238   : > { %p14_p4 = scmp.ge.s32.totalorder %s17_s23, 4  }
 0x23a   :  { %16 = sbr.rel (!%p14_p4) target bundleno = 2 (0x2), region = 80 }

// kernel: style_conv_forward.2
= control target key start
LH: loop header
LB: loop body
LE: loop exit
PB: predicated region body
PF: predicated region fallthrough
CT: control target
= control target key end

     0   :  { %s14153_s15 = smov 0   ;;  %s14155_s16 = smov 0   ;;  %s17623_s0 = inlined_call_operand.vmem [shape: f32[2,1,456,10], index: 0, kind: input, shape index: {}]   ;;  %s17624_s1 = inlined_call_operand.vmem [shape: f32[10,512], index: 1, kind: input, shape index: {}]   ;;  %s17625_s2 = inlined_call_operand.vmem [shape: bf16[9,512,16], index: 2, kind: input, shape index: {}]   ;;  %s17626_s3 = inlined_call_operand.vmem [shape: f32[1,16], index: 3, kind: input, shape index: {}]   ;;  %s17627_s4 = inlined_call_operand.vmem [shape: f32[2,16,384], index: 4, kind: output, shape index: {}]  }
   0x1   :  { %s14157_s17 = smov 0  }
   0x2 LB: > { %s26_s18 = sadd.s32 1, %s14119_s16  ;;  %p11103_p0 = scmp.ge.s32.totalorder %s14123_s17, 1  ;;  %s14123_s17 = sphi %s14157_s17, %s14_s17   ;;  %s14119_s16 = sphi %s14155_s16, %s18722_s16   ;;  %s14115_s15 = sphi %s14153_s15, %s18721_s15  }
   0x3   : > { %p28_p1 = scmp.ge.s32.totalorder %s26_s18, 2  ;;  %p182_p2 = scmp.lt.s32.totalorder %s14123_s17, 3 }
   0x5   : > { %s18724_s18 = smov (%p28_p1, %s26_s18), 0  ;;  %p183_p3 = pnand %p11103_p0, %p182_p2 }
   0x7   : > { %186 = sbr.rel (%p183_p3) target bundleno = 2343 (0x927), region = 36 }
   0xe   : > { %v294_v0 = vld [vmem:[%s17624_s1 + $0x8] sm:$0xff]  ;;  %vm473_vm0 = vcmask 1041408   ;;  %v296_v2 = vld [vmem:[%s17624_s1 + $0x18] sm:$0xff]  ;;  %vm14125_vm1 = vmmov 1   ;;  %v293_v6 = vld [vmem:[%s17624_s1] sm:$0xff]  ;;  %p216_p4 = scmp.lt.s32.totalorder %s14115_s15, 1 }
   0xf   : > { %v298_v1 = vld [vmem:[%s17624_s1 + $0x28] sm:$0x3]  ;;  %vm14182_vm2 = vmpackc.low %vm473_vm0, %vm14125_vm1  ;;  %v300_v5 = vld [vmem:[%s17624_s1 + $0x38] sm:$0x3]  ;;  %v14126_v11 = vmov 0.0   ;;  %vm301_vm3 = vcmask 80896  }
  0x10   : > { %v12771_v3 = vpack.c.bf16 %v298_v1, %v294_v0  ;;  %v12777_v7 = vpack.c.bf16 %v300_v5, %v296_v2  ;;  %v297_v8 = vld [vmem:[%s17624_s1 + $0x20] sm:$0x3]  ;;  %v295_v9 = vld [vmem:[%s17624_s1 + $0x10] sm:$0xff]  ;;  %550 = vmatprep.mubr.f32.mxu0 %v14126_v11  ;;  %957 = vmatprep.mubr.f32.mxu1 %v14126_v11  ;;  %s18726_s15 = smov (!%p216_p4, %s14115_s15), 1  ;;  %v17628_v14 = vmov 0   ;;  %v13814_v19 = vld [vmem:[%s17625_s2 + $0x308] sm:$0xff]  }
  0x11   : > { %v299_v10 = vld [vmem:[%s17624_s1 + $0x30] sm:$0x3]  ;;  %v12774_v12 = vpack.c.bf16 %v297_v8, %v293_v6  ;;  %s13783_s9 = smul.u32 456, %s18726_s15  ;;  %v13812_v15 = vld [vmem:[%s17625_s2 + $0x300] sm:$0xff]   ;;  %v13815_v20 = vld [vmem:[%s17625_s2 + $0x388] sm:$0xff]   ;;  %vm10415_vm4 = vcmask 1046528  }
  0x12   : > { %12773 = vmatprep.subr.msk.bf16.mxu0 %vm14182_vm2, %v12771_v3  ;;  %v12780_v13 = vpack.c.bf16 %v299_v10, %v295_v9  ;;  %12779 = vmatprep.subr.msk.bf16.mxu1 %vm14182_vm2, %v12777_v7  ;;  %v13813_v16 = vld [vmem:[%s17625_s2 + $0x380] sm:$0xff]   ;;  %v13816_v22 = vld [vmem:[%s17625_s2 + $0x310] sm:$0xff]   ;;  %v13818_v25 = vld [vmem:[%s17625_s2 + $0x318] sm:$0xff]   ;;  %vm10658_vm5 = vcmask 1045504   ;;  %s13784_s25 = smul.u32 48, %s18726_s15 }
  0x13   : > { %12776 = vmatpush1.bf16.msk.msra.mxu0 %vm14182_vm2, %v12774_v12  ;;  %s14224_s14 = scalar_lea.vmem %s17623_s0, %s13783_s9  ;;  %v13817_v23 = vld [vmem:[%s17625_s2 + $0x390] sm:$0xff]   ;;  %v13819_v26 = vld [vmem:[%s17625_s2 + $0x398] sm:$0xff]   ;;  %v13820_v28 = vld [vmem:[%s17625_s2 + $0x320] sm:$0xff]  }
  0x14   : > { %12782 = vmatpush1.bf16.msk.msra.mxu1 %vm14182_vm2, %v12780_v13  ;;  %3379 = vmatprep.subr.bf16.mxu0 %v17628_v14  ;;  %v236_v17 = vld [vmem:[%s14224_s14] sm:$0xff]  ;;  %v237_v18 = vld [vmem:[%s14224_s14 + $0x8] sm:$0xff]  ;;  %v238_v21 = vld [vmem:[%s14224_s14 + $0x10] sm:$0xff]  ;;  %s17552_s27 = scalar_lea.vmem %s17627_s4, %s13784_s25 }
  0x15   : > { %3610 = vmatprep.subr.bf16.mxu1 %v17628_v14  ;;  %v239_v24 = vld [vmem:[%s14224_s14 + $0x18] sm:$0xff]  ;;  %v240_v27 = vld [vmem:[%s14224_s14 + $0x20] sm:$0xff]  ;;  %v241_v30 = vld [vmem:[%s14224_s14 + $0x28] sm:$0xff] }
  0x16   : > { %11108 = vmatmul.mubr.msk.f32.vlgmr.msra.gmra.mrb[0].mxu0 %vm301_vm3, %v236_v17  ;;  %v13821_v29 = vld [vmem:[%s17625_s2 + $0x3a0] sm:$0xff]   ;;  %v13822_v31 = vld [vmem:[%s17625_s2 + $0x328] sm:$0xff]   ;;  %v242_v33 = vld [vmem:[%s14224_s14 + $0x30] sm:$0xff] }
  0x17   : > { %11167 = vmatmul.mubr.msk.f32.vlgmr.msra.gmra.mrb[0].mxu1 %vm301_vm3, %v236_v17  ;;  %556 = vmatprep.mubr.f32.mxu0 %v14126_v11  ;;  %v13823_v32 = vld [vmem:[%s17625_s2 + $0x3a8] sm:$0xff]   ;;  %v13824_v34 = vld [vmem:[%s17625_s2 + $0x330] sm:$0xff]   ;;  %v243_v36 = vld [vmem:[%s14224_s14 + $0x38] sm:$0xff] }
  0x18   : > { %963 = vmatprep.mubr.f32.mxu1 %v14126_v11  ;;  %3380 = vmatpush1.bf16.msra.mxu0 %v13812_v15  ;;  %v13825_v35 = vld [vmem:[%s17625_s2 + $0x3b0] sm:$0xff]   ;;  %v13826_v37 = vld [vmem:[%s17625_s2 + $0x338] sm:$0xff]   ;;  %v244_v39 = vld [vmem:[%s14224_s14 + $0x40] sm:$0xff] }
  0x19   : > { %3611 = vmatpush1.bf16.msra.mxu1 %v13813_v16  ;;  %3381 = vmatprep.subr.bf16.mxu0 %v17628_v14  ;;  %v13827_v38 = vld [vmem:[%s17625_s2 + $0x3b8] sm:$0xff]   ;;  %v13828_v40 = vld [vmem:[%s17625_s2 + $0x340] sm:$0xff]   ;;  %v245_v42 = vld [vmem:[%s14224_s14 + $0x48] sm:$0xff] }
  0x1a   : > { %3612 = vmatprep.subr.bf16.mxu1 %v17628_v14  ;;  %11109 = vmatmul.mubr.msk.f32.gmra.mrb[2].mxu0 %vm301_vm3, %v237_v18  ;;  %v13829_v41 = vld [vmem:[%s17625_s2 + $0x3c0] sm:$0xff]   ;;  %v13830_v43 = vld [vmem:[%s17625_s2 + $0x348] sm:$0xff]   ;;  %v246_v45 = vld [vmem:[%s14224_s14 + $0x50] sm:$0xff] }
  0x1b   : > { %11168 = vmatmul.mubr.msk.f32.gmra.mrb[2].mxu1 %vm301_vm3, %v237_v18  ;;  %562 = vmatprep.mubr.f32.mxu0 %v14126_v11  ;;  %v13831_v44 = vld [vmem:[%s17625_s2 + $0x3c8] sm:$0xff]   ;;  %v13832_v46 = vld [vmem:[%s17625_s2 + $0x350] sm:$0xff]   ;;  %v247_v48 = vld [vmem:[%s14224_s14 + $0x58] sm:$0xff] }
  0x1c   : > { %969 = vmatprep.mubr.f32.mxu1 %v14126_v11  ;;  %3382 = vmatpush1.bf16.msra.mxu0 %v13814_v19  ;;  %v13833_v47 = vld [vmem:[%s17625_s2 + $0x3d0] sm:$0xff]   ;;  %v13834_v49 = vld [vmem:[%s17625_s2 + $0x358] sm:$0xff]   ;;  %v248_v51 = vld [vmem:[%s14224_s14 + $0x60] sm:$0xff] }
  0x1d   : > { %3613 = vmatpush1.bf16.msra.mxu1 %v13815_v20  ;;  %3383 = vmatprep.subr.bf16.mxu0 %v17628_v14  ;;  %v13835_v50 = vld [vmem:[%s17625_s2 + $0x3d8] sm:$0xff]   ;;  %v13836_v52 = vld [vmem:[%s17625_s2 + $0x360] sm:$0xff]   ;;  %v249_v53 = vld [vmem:[%s14224_s14 + $0x68] sm:$0xff] }
  0x1e   : > { %3614 = vmatprep.subr.bf16.mxu1 %v17628_v14  ;;  %11110 = vmatmul.mubr.msk.f32.gmra.mrb[4].mxu0 %vm301_vm3, %v238_v21  ;;  %v13837_v54 = vld [vmem:[%s17625_s2 + $0x3e0] sm:$0xff]   ;;  %v250_v55 = vld [vmem:[%s14224_s14 + $0x70] sm:$0xff]  ;;  %v251_v56 = vld [vmem:[%s14224_s14 + $0x78] sm:$0xff] }
  0x1f   : > { %11169 = vmatmul.mubr.msk.f32.gmra.mrb[4].mxu1 %vm301_vm3, %v238_v21  ;;  %568 = vmatprep.mubr.f32.mxu0 %v14126_v11  ;;  %v252_v57 = vld [vmem:[%s14224_s14 + $0x80] sm:$0xff]  ;;  %v13838_v58 = vld [vmem:[%s17625_s2 + $0x368] sm:$0xff]   ;;  %v254_v61 = vld [vmem:[%s14224_s14 + $0x90] sm:$0xff] }
  0x20   : > { %975 = vmatprep.mubr.f32.mxu1 %v14126_v11  ;;  %3384 = vmatpush1.bf16.msra.mxu0 %v13816_v22  ;;  %v13839_v59 = vld [vmem:[%s17625_s2 + $0x3e8] sm:$0xff]   ;;  %v255_v62 = vld [vmem:[%s14224_s14 + $0x98] sm:$0xff]  ;;  %v13840_v63 = vld [vmem:[%s17625_s2 + $0x370] sm:$0xff]  }
  0x21   : > { %3615 = vmatpush1.bf16.msra.mxu1 %v13817_v23  ;;  %3385 = vmatprep.subr.bf16.mxu0 %v17628_v14  ;;  %v253_v60 = vld [vmem:[%s14224_s14 + $0x88] sm:$0xff]  ;;  %v256_v0 = vld [vmem:[%s14224_s14 + $0xa0] sm:$0xff]  ;;  %v13841_v1 = vld [vmem:[%s17625_s2 + $0x3f0] sm:$0xff]  }
  0x22   : > { %3616 = vmatprep.subr.bf16.mxu1 %v17628_v14  ;;  %11111 = vmatmul.mubr.msk.f32.gmra.mrb[6].mxu0 %vm301_vm3, %v239_v24  ;;  %v257_v2 = vld [vmem:[%s14224_s14 + $0xa8] sm:$0xff]  ;;  %v258_v3 = vld [vmem:[%s14224_s14 + $0xb0] sm:$0xff]  ;;  %v259_v4 = vld [vmem:[%s14224_s14 + $0xb8] sm:$0xff] }
  0x23   : > { %11170 = vmatmul.mubr.msk.f32.gmra.mrb[6].mxu1 %vm301_vm3, %v239_v24  ;;  %574 = vmatprep.mubr.f32.mxu0 %v14126_v11  ;;  %v260_v5 = vld [vmem:[%s14224_s14 + $0xc0] sm:$0xff]  ;;  %v13842_v6 = vld [vmem:[%s17625_s2 + $0x378] sm:$0xff]   ;;  %v261_v8 = vld [vmem:[%s14224_s14 + $0xc8] sm:$0xff] }
  0x24   : > { %981 = vmatprep.mubr.f32.mxu1 %v14126_v11  ;;  %3386 = vmatpush1.bf16.msra.mxu0 %v13818_v25  ;;  %v13843_v7 = vld [vmem:[%s17625_s2 + $0x3f8] sm:$0xff]   ;;  %v262_v9 = vld [vmem:[%s14224_s14 + $0xd0] sm:$0xff]  ;;  %v264_v12 = vld [vmem:[%s14224_s14 + $0xe0] sm:$0xff] }
  0x25   : > { %3617 = vmatpush1.bf16.msra.mxu1 %v13819_v26  ;;  %3387 = vmatprep.subr.bf16.mxu0 %v17628_v14  ;;  %v263_v10 = vld [vmem:[%s14224_s14 + $0xd8] sm:$0xff]  ;;  %v265_v13 = vld [vmem:[%s14224_s14 + $0xe8] sm:$0xff]  ;;  %v266_v15 = vld [vmem:[%s14224_s14 + $0xf0] sm:$0xff] }
  0x26   : > { %3618 = vmatprep.subr.bf16.mxu1 %v17628_v14  ;;  %11112 = vmatmul.mubr.msk.f32.gmra.mrb[8].mxu0 %vm301_vm3, %v240_v27  ;;  %v267_v16 = vld [vmem:[%s14224_s14 + $0xf8] sm:$0xff]  ;;  %v268_v17 = vld [vmem:[%s14224_s14 + $0x100] sm:$0xff]  ;;  %v269_v18 = vld [vmem:[%s14224_s14 + $0x108] sm:$0xff] }
  0x27   : > { %11171 = vmatmul.mubr.msk.f32.gmra.mrb[8].mxu1 %vm301_vm3, %v240_v27  ;;  %580 = vmatprep.mubr.f32.mxu0 %v14126_v11  ;;  %v270_v19 = vld [vmem:[%s14224_s14 + $0x110] sm:$0xff]  ;;  %v271_v20 = vld [vmem:[%s14224_s14 + $0x118] sm:$0xff]  ;;  %v272_v21 = vld [vmem:[%s14224_s14 + $0x120] sm:$0xff] }
  0x28   : > { %987 = vmatprep.mubr.f32.mxu1 %v14126_v11  ;;  %3388 = vmatpush1.bf16.msra.mxu0 %v13820_v28  ;;  %v273_v22 = vld [vmem:[%s14224_s14 + $0x128] sm:$0xff]  ;;  %v274_v23 = vld [vmem:[%s14224_s14 + $0x130] sm:$0xff]  ;;  %v275_v24 = vld [vmem:[%s14224_s14 + $0x138] sm:$0xff] }
  0x29   : > { %3619 = vmatpush1.bf16.msra.mxu1 %v13821_v29  ;;  %3389 = vmatprep.subr.bf16.mxu0 %v17628_v14  ;;  %v276_v25 = vld [vmem:[%s14224_s14 + $0x140] sm:$0xff]  ;;  %v277_v26 = vld [vmem:[%s14224_s14 + $0x148] sm:$0xff]  ;;  %v278_v27 = vld [vmem:[%s14224_s14 + $0x150] sm:$0xff] }
  0x2a   : > { %3620 = vmatprep.subr.bf16.mxu1 %v17628_v14  ;;  %11113 = vmatmul.mubr.msk.f32.gmra.mrb[10].mxu0 %vm301_vm3, %v241_v30  ;;  %v279_v28 = vld [vmem:[%s14224_s14 + $0x158] sm:$0xff]  ;;  %v280_v29 = vld [vmem:[%s14224_s14 + $0x160] sm:$0xff] }
  0x2b   : > { %11172 = vmatmul.mubr.msk.f32.gmra.mrb[10].mxu1 %vm301_vm3, %v241_v30  ;;  %586 = vmatprep.mubr.f32.mxu0 %v14126_v11  ;;  %v281_v30 = vld [vmem:[%s14224_s14 + $0x168] sm:$0xff] }
  0x2c   : > { %993 = vmatprep.mubr.f32.mxu1 %v14126_v11  ;;  %3390 = vmatpush1.bf16.msra.mxu0 %v13822_v31  ;;  %v282_v31 = vld [vmem:[%s14224_s14 + $0x170] sm:$0xff] }
  0x2d   : > { %3621 = vmatpush1.bf16.msra.mxu1 %v13823_v32  ;;  %3391 = vmatprep.subr.bf16.mxu0 %v17628_v14  ;;  %v283_v32 = vld [vmem:[%s14224_s14 + $0x178] sm:$0xff] }
  0x2e   : > { %3622 = vmatprep.subr.bf16.mxu1 %v17628_v14  ;;  %11114 = vmatmul.mubr.msk.f32.gmra.mrb[12].mxu0 %vm301_vm3, %v242_v33 }
  0x2f   : > { %11173 = vmatmul.mubr.msk.f32.gmra.mrb[12].mxu1 %vm301_vm3, %v242_v33  ;;  %592 = vmatprep.mubr.f32.mxu0 %v14126_v11  ;;  %v284_v33 = vld [vmem:[%s14224_s14 + $0x180] sm:$0xff] }
  0x30   : > { %999 = vmatprep.mubr.f32.mxu1 %v14126_v11  ;;  %3392 = vmatpush1.bf16.msra.mxu0 %v13824_v34  ;;  %v285_v34 = vld [vmem:[%s14224_s14 + $0x188] sm:$0xff] }
  0x31   : > { %3623 = vmatpush1.bf16.msra.mxu1 %v13825_v35  ;;  %3393 = vmatprep.subr.bf16.mxu0 %v17628_v14  ;;  %v286_v35 = vld [vmem:[%s14224_s14 + $0x190] sm:$0xff] }
  0x32   : > { %3624 = vmatprep.subr.bf16.mxu1 %v17628_v14  ;;  %11115 = vmatmul.mubr.msk.f32.gmra.mrb[14].mxu0 %vm301_vm3, %v243_v36 }
  0x33   : > { %11174 = vmatmul.mubr.msk.f32.gmra.mrb[14].mxu1 %vm301_vm3, %v243_v36  ;;  %598 = vmatprep.mubr.f32.mxu0 %v14126_v11  ;;  %v287_v36 = vld [vmem:[%s14224_s14 + $0x198] sm:$0xff] }
  0x34   : > { %1005 = vmatprep.mubr.f32.mxu1 %v14126_v11  ;;  %3394 = vmatpush1.bf16.msra.mxu0 %v13826_v37  ;;  %v288_v37 = vld [vmem:[%s14224_s14 + $0x1a0] sm:$0xff] }
  0x35   : > { %3625 = vmatpush1.bf16.msra.mxu1 %v13827_v38  ;;  %3395 = vmatprep.subr.bf16.mxu0 %v17628_v14  ;;  %v289_v38 = vld [vmem:[%s14224_s14 + $0x1a8] sm:$0xff] }
  0x36   : > { %3626 = vmatprep.subr.bf16.mxu1 %v17628_v14  ;;  %11116 = vmatmul.mubr.msk.f32.gmra.mrb[16].mxu0 %vm301_vm3, %v244_v39 }
  0x37   : > { %11175 = vmatmul.mubr.msk.f32.gmra.mrb[16].mxu1 %vm301_vm3, %v244_v39  ;;  %604 = vmatprep.mubr.f32.mxu0 %v14126_v11 }
  0x38   : > { %1011 = vmatprep.mubr.f32.mxu1 %v14126_v11  ;;  %3396 = vmatpush1.bf16.msra.mxu0 %v13828_v40 }
  0x39   : > { %3627 = vmatpush1.bf16.msra.mxu1 %v13829_v41  ;;  %3397 = vmatprep.subr.bf16.mxu0 %v17628_v14  ;;  %v290_v41 = vld [vmem:[%s14224_s14 + $0x1b0] sm:$0xff] }
  0x3a   : > { %3628 = vmatprep.subr.bf16.mxu1 %v17628_v14  ;;  %11117 = vmatmul.mubr.msk.f32.gmra.mrb[18].mxu0 %vm301_vm3, %v245_v42 }
  0x3b   : > { %11176 = vmatmul.mubr.msk.f32.gmra.mrb[18].mxu1 %vm301_vm3, %v245_v42  ;;  %610 = vmatprep.mubr.f32.mxu0 %v14126_v11 }
  0x3c   : > { %1017 = vmatprep.mubr.f32.mxu1 %v14126_v11  ;;  %3398 = vmatpush1.bf16.msra.mxu0 %v13830_v43 }
  0x3d   : > { %3629 = vmatpush1.bf16.msra.mxu1 %v13831_v44  ;;  %3399 = vmatprep.subr.bf16.mxu0 %v17628_v14 }
  0x3e   : > { %3630 = vmatprep.subr.bf16.mxu1 %v17628_v14  ;;  %11118 = vmatmul.mubr.msk.f32.gmra.mrb[20].mxu0 %vm301_vm3, %v246_v45 }
  0x3f   : > { %11177 = vmatmul.mubr.msk.f32.gmra.mrb[20].mxu1 %vm301_vm3, %v246_v45  ;;  %616 = vmatprep.mubr.f32.mxu0 %v14126_v11 }
  0x40   : > { %1023 = vmatprep.mubr.f32.mxu1 %v14126_v11  ;;  %3400 = vmatpush1.bf16.msra.mxu0 %v13832_v46 }
  0x41   : > { %3631 = vmatpush1.bf16.msra.mxu1 %v13833_v47  ;;  %3401 = vmatprep.subr.bf16.mxu0 %v17628_v14 }
  0x42   : > { %3632 = vmatprep.subr.bf16.mxu1 %v17628_v14  ;;  %11119 = vmatmul.mubr.msk.f32.gmra.mrb[22].mxu0 %vm301_vm3, %v247_v48 }
  0x43   : > { %11178 = vmatmul.mubr.msk.f32.gmra.mrb[22].mxu1 %vm301_vm3, %v247_v48  ;;  %622 = vmatprep.mubr.f32.mxu0 %v14126_v11 }
  0x44   : > { %1029 = vmatprep.mubr.f32.mxu1 %v14126_v11  ;;  %3402 = vmatpush1.bf16.msra.mxu0 %v13834_v49 }
  0x45   : > { %3633 = vmatpush1.bf16.msra.mxu1 %v13835_v50  ;;  %3403 = vmatprep.subr.bf16.mxu0 %v17628_v14  ;;  %v291_v50 = vld [vmem:[%s14224_s14 + $0x1b8] sm:$0xff] }
  0x46   : > { %3634 = vmatprep.subr.bf16.mxu1 %v17628_v14  ;;  %11120 = vmatmul.mubr.msk.f32.gmra.mrb[24].mxu0 %vm301_vm3, %v248_v51 }
  0x47   : > { %11179 = vmatmul.mubr.msk.f32.gmra.mrb[24].mxu1 %vm301_vm3, %v248_v51  ;;  %628 = vmatprep.mubr.f32.mxu0 %v14126_v11 }
  0x48   : > { %1035 = vmatprep.mubr.f32.mxu1 %v14126_v11  ;;  %3404 = vmatpush1.bf16.msra.mxu0 %v13836_v52 }
  0x49   : > { %3635 = vmatpush1.bf16.msra.mxu1 %v13837_v54  ;;  %3405 = vmatprep.subr.bf16.mxu0 %v17628_v14 }
  0x4a   : > { %11121 = vmatmul.mubr.msk.f32.gmra.mrb[26].mxu0 %vm301_vm3, %v249_v53  ;;  %3636 = vmatprep.subr.bf16.mxu1 %v17628_v14 }
  0x4b   : > { %11180 = vmatmul.mubr.msk.f32.gmra.mrb[26].mxu1 %vm301_vm3, %v249_v53  ;;  %634 = vmatprep.mubr.f32.mxu0 %v14126_v11 }
  0x4c   : > { %1041 = vmatprep.mubr.f32.mxu1 %v14126_v11  ;;  %3406 = vmatpush1.bf16.msra.mxu0 %v13838_v58 }
  0x4d   : > { %3637 = vmatpush1.bf16.msra.mxu1 %v13839_v59  ;;  %3407 = vmatprep.subr.bf16.mxu0 %v17628_v14 }
  0x4e   : > { %11122 = vmatmul.mubr.msk.f32.gmra.mrb[28].mxu0 %vm301_vm3, %v250_v55  ;;  %3638 = vmatprep.subr.bf16.mxu1 %v17628_v14 }
  0x4f   : > { %11181 = vmatmul.mubr.msk.f32.gmra.mrb[28].mxu1 %vm301_vm3, %v250_v55  ;;  %640 = vmatprep.mubr.f32.mxu0 %v14126_v11 }
  0x50   : > { %1047 = vmatprep.mubr.f32.mxu1 %v14126_v11  ;;  %3408 = vmatpush1.bf16.msra.mxu0 %v13840_v63 }
  0x51   : > { %3639 = vmatpush1.bf16.msra.mxu1 %v13841_v1  ;;  %3409 = vmatprep.subr.bf16.mxu0 %v17628_v14 }
  0x52   : > { %11123 = vmatmul.mubr.msk.f32.gmra.mrb[30].mxu0 %vm301_vm3, %v251_v56  ;;  %3640 = vmatprep.subr.bf16.mxu1 %v17628_v14 }
  0x53   : > { %11182 = vmatmul.mubr.msk.f32.gmra.mrb[30].mxu1 %vm301_vm3, %v251_v56  ;;  %646 = vmatprep.mubr.f32.mxu0 %v14126_v11 }
  0x54   : > { %1053 = vmatprep.mubr.f32.mxu1 %v14126_v11  ;;  %3410 = vmatpush1.bf16.msra.mxu0 %v13842_v6 }
  0x55   : > { %3641 = vmatpush1.bf16.msra.mxu1 %v13843_v7  ;;  %4251 = vmatprep.subr.bf16.mxu0 %v17628_v14 }
  0x56   : > { %11124 = vmatmul.mubr.msk.f32.gmra.mrb[32].mxu0 %vm301_vm3, %v252_v57  ;;  %4482 = vmatprep.subr.bf16.mxu1 %v17628_v14 }
  0x57   : > { %11183 = vmatmul.mubr.msk.f32.gmra.mrb[32].mxu1 %vm301_vm3, %v252_v57  ;;  %652 = vmatprep.mubr.f32.mxu0 %v14126_v11 }
  0x58   : > { %1059 = vmatprep.mubr.f32.mxu1 %v14126_v11 }
  0x5a   : > { %11125 = vmatmul.mubr.msk.f32.gmra.mrb[34].mxu0 %vm301_vm3, %v253_v60 }
  0x5b   : > { %11184 = vmatmul.mubr.msk.f32.gmra.mrb[34].mxu1 %vm301_vm3, %v253_v60  ;;  %658 = vmatprep.mubr.f32.mxu0 %v14126_v11 }
  0x5c   : > { %1065 = vmatprep.mubr.f32.mxu1 %v14126_v11 }
  0x5e   : > { %11126 = vmatmul.mubr.msk.f32.gmra.mrb[36].mxu0 %vm301_vm3, %v254_v61 }
  0x5f   : > { %11185 = vmatmul.mubr.msk.f32.gmra.mrb[36].mxu1 %vm301_vm3, %v254_v61  ;;  %664 = vmatprep.mubr.f32.mxu0 %v14126_v11 }
  0x60   : > { %1071 = vmatprep.mubr.f32.mxu1 %v14126_v11 }
  0x62   : > { %11127 = vmatmul.mubr.msk.f32.gmra.mrb[38].mxu0 %vm301_vm3, %v255_v62 }
  0x63   : > { %11186 = vmatmul.mubr.msk.f32.gmra.mrb[38].mxu1 %vm301_vm3, %v255_v62  ;;  %670 = vmatprep.mubr.f32.mxu0 %v14126_v11 }
  0x64   : > { %1077 = vmatprep.mubr.f32.mxu1 %v14126_v11 }
  0x66   : > { %11128 = vmatmul.mubr.msk.f32.gmra.mrb[40].mxu0 %vm301_vm3, %v256_v0 }
  0x67   : > { %11187 = vmatmul.mubr.msk.f32.gmra.mrb[40].mxu1 %vm301_vm3, %v256_v0  ;;  %676 = vmatprep.mubr.f32.mxu0 %v14126_v11 }
  0x68   : > { %1083 = vmatprep.mubr.f32.mxu1 %v14126_v11 }
  0x6a   : > { %11129 = vmatmul.mubr.msk.f32.gmra.mrb[42].mxu0 %vm301_vm3, %v257_v2 }
  0x6b   : > { %11188 = vmatmul.mubr.msk.f32.gmra.mrb[42].mxu1 %vm301_vm3, %v257_v2  ;;  %682 = vmatprep.mubr.f32.mxu0 %v14126_v11 }
  0x6c   : > { %1089 = vmatprep.mubr.f32.mxu1 %v14126_v11 }
  0x6e   : > { %11130 = vmatmul.mubr.msk.f32.gmra.mrb[44].mxu0 %vm301_vm3, %v258_v3 }
  0x6f   : > { %11189 = vmatmul.mubr.msk.f32.gmra.mrb[44].mxu1 %vm301_vm3, %v258_v3  ;;  %688 = vmatprep.mubr.f32.mxu0 %v14126_v11  ;;  %v292_v3 = vld [vmem:[%s14224_s14 + $0x1c0] sm:$0xff] }
  0x70   : > { %1095 = vmatprep.mubr.f32.mxu1 %v14126_v11 }
  0x72   : > { %11131 = vmatmul.mubr.msk.f32.gmra.mrb[46].mxu0 %vm301_vm3, %v259_v4 }
  0x73   : > { %11190 = vmatmul.mubr.msk.f32.gmra.mrb[46].mxu1 %vm301_vm3, %v259_v4  ;;  %694 = vmatprep.mubr.f32.mxu0 %v14126_v11 }
  0x74   : > { %1101 = vmatprep.mubr.f32.mxu1 %v14126_v11 }
  0x76   : > { %11132 = vmatmul.mubr.msk.f32.gmra.mrb[48].mxu0 %vm301_vm3, %v260_v5 }
  0x77   : > { %11191 = vmatmul.mubr.msk.f32.gmra.mrb[48].mxu1 %vm301_vm3, %v260_v5  ;;  %700 = vmatprep.mubr.f32.mxu0 %v14126_v11 }
  0x78   : > { %1107 = vmatprep.mubr.f32.mxu1 %v14126_v11 }
  0x7a   : > { %11133 = vmatmul.mubr.msk.f32.gmra.mrb[50].mxu0 %vm301_vm3, %v261_v8 }
  0x7b   : > { %11192 = vmatmul.mubr.msk.f32.gmra.mrb[50].mxu1 %vm301_vm3, %v261_v8  ;;  %706 = vmatprep.mubr.f32.mxu0 %v14126_v11 }
  0x7c   : > { %1113 = vmatprep.mubr.f32.mxu1 %v14126_v11 }
  0x7e   : > { %11134 = vmatmul.mubr.msk.f32.gmra.mrb[52].mxu0 %vm301_vm3, %v262_v9 }
  0x7f   : > { %11193 = vmatmul.mubr.msk.f32.gmra.mrb[52].mxu1 %vm301_vm3, %v262_v9  ;;  %712 = vmatprep.mubr.f32.mxu0 %v14126_v11 }
  0x80   : > { %1119 = vmatprep.mubr.f32.mxu1 %v14126_v11 }
  0x82   : > { %11135 = vmatmul.mubr.msk.f32.gmra.mrb[54].mxu0 %vm301_vm3, %v263_v10 }
  0x83   : > { %11194 = vmatmul.mubr.msk.f32.gmra.mrb[54].mxu1 %vm301_vm3, %v263_v10  ;;  %718 = vmatprep.mubr.f32.mxu0 %v14126_v11 }
  0x84   : > { %1125 = vmatprep.mubr.f32.mxu1 %v14126_v11 }
  0x86   : > { %11136 = vmatmul.mubr.msk.f32.gmra.mrb[56].mxu0 %vm301_vm3, %v264_v12 }
  0x87   : > { %11195 = vmatmul.mubr.msk.f32.gmra.mrb[56].mxu1 %vm301_vm3, %v264_v12  ;;  %724 = vmatprep.mubr.f32.mxu0 %v14126_v11 }
  0x88   : > { %1131 = vmatprep.mubr.f32.mxu1 %v14126_v11 }
  0x8a   : > { %11137 = vmatmul.mubr.msk.f32.gmra.mrb[58].mxu0 %vm301_vm3, %v265_v13 }
  0x8b   : > { %11196 = vmatmul.mubr.msk.f32.gmra.mrb[58].mxu1 %vm301_vm3, %v265_v13  ;;  %730 = vmatprep.mubr.f32.mxu0 %v14126_v11 }
  0x8c   : > { %1137 = vmatprep.mubr.f32.mxu1 %v14126_v11 }
  0x8e   : > { %11138 = vmatmul.mubr.msk.f32.gmra.mrb[60].mxu0 %vm301_vm3, %v266_v15 }
  0x8f   : > { %11197 = vmatmul.mubr.msk.f32.gmra.mrb[60].mxu1 %vm301_vm3, %v266_v15  ;;  %736 = vmatprep.mubr.f32.mxu0 %v14126_v11 }
  0x90   : > { %1143 = vmatprep.mubr.f32.mxu1 %v14126_v11 }
  0x92   : > { %11139 = vmatmul.mubr.msk.f32.gmra.mrb[62].mxu0 %vm301_vm3, %v267_v16 }
  0x93   : > { %11198 = vmatmul.mubr.msk.f32.gmra.mrb[62].mxu1 %vm301_vm3, %v267_v16  ;;  %742 = vmatprep.mubr.f32.mxu0 %v14126_v11 }
  0x94   : > { %1149 = vmatprep.mubr.f32.mxu1 %v14126_v11 }
  0x96   : > { %11140 = vmatmul.mubr.msk.f32.gmra.mrb[64].mxu0 %vm301_vm3, %v268_v17 }
  0x97   : > { %11199 = vmatmul.mubr.msk.f32.gmra.mrb[64].mxu1 %vm301_vm3, %v268_v17  ;;  %748 = vmatprep.mubr.f32.mxu0 %v14126_v11 }
  0x98   : > { %1155 = vmatprep.mubr.f32.mxu1 %v14126_v11 }
  0x9a   : > { %11141 = vmatmul.mubr.msk.f32.gmra.mrb[66].mxu0 %vm301_vm3, %v269_v18 }
  0x9b   : > { %11200 = vmatmul.mubr.msk.f32.gmra.mrb[66].mxu1 %vm301_vm3, %v269_v18  ;;  %754 = vmatprep.mubr.f32.mxu0 %v14126_v11 }
  0x9c   : > { %1161 = vmatprep.mubr.f32.mxu1 %v14126_v11 }
  0x9e   : > { %11142 = vmatmul.mubr.msk.f32.gmra.mrb[68].mxu0 %vm301_vm3, %v270_v19 }
  0x9f   : > { %11201 = vmatmul.mubr.msk.f32.gmra.mrb[68].mxu1 %vm301_vm3, %v270_v19  ;;  %760 = vmatprep.mubr.f32.mxu0 %v14126_v11 }
  0xa0   : > { %1167 = vmatprep.mubr.f32.mxu1 %v14126_v11 }
  0xa2   : > { %11143 = vmatmul.mubr.msk.f32.gmra.mrb[70].mxu0 %vm301_vm3, %v271_v20 }
  0xa3   : > { %11202 = vmatmul.mubr.msk.f32.gmra.mrb[70].mxu1 %vm301_vm3, %v271_v20  ;;  %766 = vmatprep.mubr.f32.mxu0 %v14126_v11 }
  0xa4   : > { %1173 = vmatprep.mubr.f32.mxu1 %v14126_v11 }
  0xa6   : > { %11144 = vmatmul.mubr.msk.f32.gmra.mrb[72].mxu0 %vm301_vm3, %v272_v21 }
  0xa7   : > { %11203 = vmatmul.mubr.msk.f32.gmra.mrb[72].mxu1 %vm301_vm3, %v272_v21  ;;  %772 = vmatprep.mubr.f32.mxu0 %v14126_v11 }
  0xa8   : > { %1179 = vmatprep.mubr.f32.mxu1 %v14126_v11 }
  0xaa   : > { %11145 = vmatmul.mubr.msk.f32.gmra.mrb[74].mxu0 %vm301_vm3, %v273_v22 }
  0xab   : > { %11204 = vmatmul.mubr.msk.f32.gmra.mrb[74].mxu1 %vm301_vm3, %v273_v22  ;;  %778 = vmatprep.mubr.f32.mxu0 %v14126_v11 }
  0xac   : > { %1185 = vmatprep.mubr.f32.mxu1 %v14126_v11 }
  0xae   : > { %11146 = vmatmul.mubr.msk.f32.gmra.mrb[76].mxu0 %vm301_vm3, %v274_v23 }
  0xaf   : > { %11205 = vmatmul.mubr.msk.f32.gmra.mrb[76].mxu1 %vm301_vm3, %v274_v23  ;;  %784 = vmatprep.mubr.f32.mxu0 %v14126_v11 }
  0xb0   : > { %1191 = vmatprep.mubr.f32.mxu1 %v14126_v11 }
  0xb2   : > { %11147 = vmatmul.mubr.msk.f32.gmra.mrb[78].mxu0 %vm301_vm3, %v275_v24 }
  0xb3   : > { %11206 = vmatmul.mubr.msk.f32.gmra.mrb[78].mxu1 %vm301_vm3, %v275_v24  ;;  %790 = vmatprep.mubr.f32.mxu0 %v14126_v11 }
  0xb4   : > { %1197 = vmatprep.mubr.f32.mxu1 %v14126_v11 }
  0xb6   : > { %11148 = vmatmul.mubr.msk.f32.gmra.mrb[80].mxu0 %vm301_vm3, %v276_v25 }
  0xb7   : > { %11207 = vmatmul.mubr.msk.f32.gmra.mrb[80].mxu1 %vm301_vm3, %v276_v25  ;;  %796 = vmatprep.mubr.f32.mxu0 %v14126_v11 }
  0xb8   : > { %1203 = vmatprep.mubr.f32.mxu1 %v14126_v11 }
  0xba   : > { %11149 = vmatmul.mubr.msk.f32.gmra.mrb[82].mxu0 %vm301_vm3, %v277_v26 }
  0xbb   : > { %11208 = vmatmul.mubr.msk.f32.gmra.mrb[82].mxu1 %vm301_vm3, %v277_v26  ;;  %802 = vmatprep.mubr.f32.mxu0 %v14126_v11 }
  0xbc   : > { %1209 = vmatprep.mubr.f32.mxu1 %v14126_v11 }
  0xbe   : > { %11150 = vmatmul.mubr.msk.f32.gmra.mrb[84].mxu0 %vm301_vm3, %v278_v27 }
  0xbf   : > { %11209 = vmatmul.mubr.msk.f32.gmra.mrb[84].mxu1 %vm301_vm3, %v278_v27  ;;  %808 = vmatprep.mubr.f32.mxu0 %v14126_v11 }
  0xc0   : > { %1215 = vmatprep.mubr.f32.mxu1 %v14126_v11 }
  0xc2   : > { %11151 = vmatmul.mubr.msk.f32.gmra.mrb[86].mxu0 %vm301_vm3, %v279_v28 }
  0xc3   : > { %11210 = vmatmul.mubr.msk.f32.gmra.mrb[86].mxu1 %vm301_vm3, %v279_v28  ;;  %814 = vmatprep.mubr.f32.mxu0 %v14126_v11 }
  0xc4   : > { %1221 = vmatprep.mubr.f32.mxu1 %v14126_v11 }
  0xc6   : > { %11152 = vmatmul.mubr.msk.f32.gmra.mrb[88].mxu0 %vm301_vm3, %v280_v29 }
  0xc7   : > { %11211 = vmatmul.mubr.msk.f32.gmra.mrb[88].mxu1 %vm301_vm3, %v280_v29  ;;  %820 = vmatprep.mubr.f32.mxu0 %v14126_v11 }
  0xc8   : > { %1227 = vmatprep.mubr.f32.mxu1 %v14126_v11 }
  0xca   : > { %11153 = vmatmul.mubr.msk.f32.gmra.mrb[90].mxu0 %vm301_vm3, %v281_v30 }
  0xcb   : > { %11212 = vmatmul.mubr.msk.f32.gmra.mrb[90].mxu1 %vm301_vm3, %v281_v30  ;;  %826 = vmatprep.mubr.f32.mxu0 %v14126_v11 }
  0xcc   : > { %1233 = vmatprep.mubr.f32.mxu1 %v14126_v11 }
  0xce   : > { %11154 = vmatmul.mubr.msk.f32.gmra.mrb[92].mxu0 %vm301_vm3, %v282_v31 }
  0xcf   : > { %11213 = vmatmul.mubr.msk.f32.gmra.mrb[92].mxu1 %vm301_vm3, %v282_v31  ;;  %832 = vmatprep.mubr.f32.mxu0 %v14126_v11 }
  0xd0   : > { %1239 = vmatprep.mubr.f32.mxu1 %v14126_v11 }
  0xd2   : > { %11155 = vmatmul.mubr.msk.f32.gmra.mrb[94].mxu0 %vm301_vm3, %v283_v32 }
  0xd3   : > { %11214 = vmatmul.mubr.msk.f32.gmra.mrb[94].mxu1 %vm301_vm3, %v283_v32  ;;  %838 = vmatprep.mubr.f32.mxu0 %v14126_v11 }
  0xd4   : > { %1245 = vmatprep.mubr.f32.mxu1 %v14126_v11 }
  0xd6   : > { %11156 = vmatmul.mubr.msk.f32.gmra.mrb[96].mxu0 %vm301_vm3, %v284_v33 }
  0xd7   : > { %11215 = vmatmul.mubr.msk.f32.gmra.mrb[96].mxu1 %vm301_vm3, %v284_v33  ;;  %844 = vmatprep.mubr.f32.mxu0 %v14126_v11  ;;  %v13844_v33 = vld [vmem:[%s17625_s2] sm:$0xff]  }
  0xd8   : > { %1251 = vmatprep.mubr.f32.mxu1 %v14126_v11 }
  0xda   : > { %11157 = vmatmul.mubr.msk.f32.gmra.mrb[98].mxu0 %vm301_vm3, %v285_v34 }
  0xdb   : > { %11216 = vmatmul.mubr.msk.f32.gmra.mrb[98].mxu1 %vm301_vm3, %v285_v34  ;;  %850 = vmatprep.mubr.f32.mxu0 %v14126_v11  ;;  %v13845_v34 = vld [vmem:[%s17625_s2 + $0x80] sm:$0xff]  }
  0xdc   : > { %1257 = vmatprep.mubr.f32.mxu1 %v14126_v11 }
  0xde   : > { %11158 = vmatmul.mubr.msk.f32.gmra.mrb[100].mxu0 %vm301_vm3, %v286_v35 }
  0xdf   : > { %11217 = vmatmul.mubr.msk.f32.gmra.mrb[100].mxu1 %vm301_vm3, %v286_v35  ;;  %856 = vmatprep.mubr.f32.mxu0 %v14126_v11 }
  0xe0   : > { %1263 = vmatprep.mubr.f32.mxu1 %v14126_v11 }
  0xe2   : > { %11159 = vmatmul.mubr.msk.f32.gmra.mrb[102].mxu0 %vm301_vm3, %v287_v36 }
  0xe3   : > { %11218 = vmatmul.mubr.msk.f32.gmra.mrb[102].mxu1 %vm301_vm3, %v287_v36  ;;  %862 = vmatprep.mubr.f32.mxu0 %v14126_v11 }
  0xe4   : > { %1269 = vmatprep.mubr.f32.mxu1 %v14126_v11 }
  0xe6   : > { %11160 = vmatmul.mubr.msk.f32.gmra.mrb[104].mxu0 %vm301_vm3, %v288_v37 }
  0xe7   : > { %11219 = vmatmul.mubr.msk.f32.gmra.mrb[104].mxu1 %vm301_vm3, %v288_v37  ;;  %868 = vmatprep.mubr.f32.mxu0 %v14126_v11 }
  0xe8   : > { %1275 = vmatprep.mubr.f32.mxu1 %v14126_v11 }
  0xe9   : > { %v552_v39 = vpop.f32.mrb[0].mxu0 }
  0xea   : > { %v959_v40 = vpop.f32.mrb[0].mxu1  ;;  %v1300_v42 = vmax.f32 %v552_v39, 0.0  ;;  %v554_v43 = vpop.f32.mrb[1].mxu0  ;;  %11161 = vmatmul.mubr.msk.f32.gmra.mrb[106].mxu0 %vm301_vm3, %v289_v38 }
  0xeb   : > { %v1302_v44 = vmax.f32 %v959_v40, 0.0  ;;  %v961_v45 = vpop.f32.mrb[1].mxu1  ;;  %11220 = vmatmul.mubr.msk.f32.gmra.mrb[106].mxu1 %vm301_vm3, %v289_v38  ;;  %v1301_v46 = vmax.f32 %v554_v43, 0.0  ;;  %874 = vmatprep.mubr.f32.mxu0 %v14126_v11 }
  0xec   : > { %v1303_v47 = vmax.f32 %v961_v45, 0.0  ;;  %1281 = vmatprep.mubr.f32.mxu1 %v14126_v11  ;;  %v13846_v45 = vld [vmem:[%s17625_s2 + $0x8] sm:$0xff]  }
  0xed   : > { %v558_v48 = vpop.f32.mrb[2].mxu0 }
  0xee   : > { %v965_v49 = vpop.f32.mrb[2].mxu1  ;;  %v1304_v51 = vmax.f32 %v558_v48, 0.0  ;;  %v560_v53 = vpop.f32.mrb[3].mxu0  ;;  %11162 = vmatmul.mubr.msk.f32.gmra.mrb[108].mxu0 %vm301_vm3, %v290_v41 }
  0xef   : > { %v1306_v52 = vmax.f32 %v965_v49, 0.0  ;;  %v967_v54 = vpop.f32.mrb[3].mxu1  ;;  %11221 = vmatmul.mubr.msk.f32.gmra.mrb[108].mxu1 %vm301_vm3, %v290_v41  ;;  %v1305_v55 = vmax.f32 %v560_v53, 0.0  ;;  %880 = vmatprep.mubr.f32.mxu0 %v14126_v11 }
  0xf0   : > { %v1307_v56 = vmax.f32 %v967_v54, 0.0  ;;  %1287 = vmatprep.mubr.f32.mxu1 %v14126_v11  ;;  %v14627_v57 = vpack.c.bf16 %v1304_v51, %v1300_v42 }
  0xf1   : > { %v14629_v58 = vpack.c.bf16 %v1306_v52, %v1302_v44  ;;  %v564_v59 = vpop.f32.mrb[4].mxu0  ;;  %v14631_v61 = vpack.c.bf16 %v1305_v55, %v1301_v46  ;;  %v13847_v46 = vld [vmem:[%s17625_s2 + $0x88] sm:$0xff]  }
  0xf2   : > { %18046 = vst [vmem:[#allocation3_spill] sm:$0xff] %v14627_v57  ;;  %v971_v60 = vpop.f32.mrb[4].mxu1  ;;  %v14633_v62 = vpack.c.bf16 %v1307_v56, %v1303_v47  ;;  %v1308_v63 = vmax.f32 %v564_v59, 0.0  ;;  %v566_v0 = vpop.f32.mrb[5].mxu0  ;;  %11163 = vmatmul.mubr.msk.f32.gmra.mrb[110].mxu0 %vm301_vm3, %v291_v50 }
  0xf3   : > { %18047 = vst [vmem:[#allocation4_spill] sm:$0xff] %v14629_v58  ;;  %18048 = vst [vmem:[#allocation5_spill] sm:$0xff] %v14631_v61  ;;  %v1310_v1 = vmax.f32 %v971_v60, 0.0  ;;  %v973_v2 = vpop.f32.mrb[5].mxu1  ;;  %11222 = vmatmul.mubr.msk.f32.gmra.mrb[110].mxu1 %vm301_vm3, %v291_v50  ;;  %v1309_v4 = vmax.f32 %v566_v0, 0.0  ;;  %886 = vmatprep.mubr.f32.mxu0 %v14126_v11 }
  0xf4   : > { %18049 = vst [vmem:[#allocation6_spill] sm:$0xff] %v14633_v62  ;;  %v1311_v5 = vmax.f32 %v973_v2, 0.0  ;;  %1293 = vmatprep.mubr.f32.mxu1 %v14126_v11  ;;  %v13849_v2 = vld [vmem:[%s17625_s2 + $0x90] sm:$0xff]  }
  0xf5   : > { %v570_v6 = vpop.f32.mrb[6].mxu0 }
  0xf6   : > { %v977_v7 = vpop.f32.mrb[6].mxu1  ;;  %v1312_v8 = vmax.f32 %v570_v6, 0.0  ;;  %v572_v10 = vpop.f32.mrb[7].mxu0  ;;  %11164 = vmatmul.mubr.msk.f32.gmra.mrb[112].mxu0 %vm301_vm3, %v292_v3 }
  0xf7   : > { %v1314_v9 = vmax.f32 %v977_v7, 0.0  ;;  %v979_v12 = vpop.f32.mrb[7].mxu1  ;;  %11223 = vmatmul.mubr.msk.f32.gmra.mrb[112].mxu1 %vm301_vm3, %v292_v3  ;;  %v1313_v13 = vmax.f32 %v572_v10, 0.0 }
  0xf8   : > { %v1315_v15 = vmax.f32 %v979_v12, 0.0  ;;  %v14642_v16 = vpack.c.bf16 %v1312_v8, %v1308_v63 }
  0xf9   : > { %v14644_v17 = vpack.c.bf16 %v1314_v9, %v1310_v1  ;;  %v576_v18 = vpop.f32.mrb[8].mxu0  ;;  %v14646_v20 = vpack.c.bf16 %v1313_v13, %v1309_v4  ;;  %v13848_v1 = vld [vmem:[%s17625_s2 + $0x10] sm:$0xff]  }
  0xfa   : > { %18050 = vst [vmem:[#allocation7_spill] sm:$0xff] %v14642_v16  ;;  %v983_v19 = vpop.f32.mrb[8].mxu1  ;;  %v14648_v11 = vpack.c.bf16 %v1315_v15, %v1311_v5  ;;  %v1316_v21 = vmax.f32 %v576_v18, 0.0  ;;  %v578_v23 = vpop.f32.mrb[9].mxu0 }
  0xfb   : > { %18051 = vst [vmem:[#allocation8_spill] sm:$0xff] %v14644_v17  ;;  %18052 = vst [vmem:[#allocation9_spill] sm:$0xff] %v14646_v20  ;;  %v1318_v22 = vmax.f32 %v983_v19, 0.0  ;;  %v985_v24 = vpop.f32.mrb[9].mxu1  ;;  %v1317_v25 = vmax.f32 %v578_v23, 0.0  ;;  %v13850_v19 = vld [vmem:[%s17625_s2 + $0x18] sm:$0xff]  }
  0xfc   : > { %18053 = vst [vmem:[#allocation10_spill] sm:$0xff] %v14648_v11  ;;  %v1319_v26 = vmax.f32 %v985_v24, 0.0  ;;  %v14650_v27 = vpack.c.bf16 %v1316_v21, %v1312_v8 }
  0xfd   : > { %v14652_v28 = vpack.c.bf16 %v1318_v22, %v1314_v9  ;;  %v582_v29 = vpop.f32.mrb[10].mxu0  ;;  %v14654_v31 = vpack.c.bf16 %v1317_v25, %v1313_v13 }
  0xfe   : > { %18054 = vst [vmem:[#allocation11_spill] sm:$0xff] %v14650_v27  ;;  %v989_v30 = vpop.f32.mrb[10].mxu1  ;;  %v14656_v32 = vpack.c.bf16 %v1319_v26, %v1315_v15  ;;  %v1320_v35 = vmax.f32 %v582_v29, 0.0  ;;  %v584_v37 = vpop.f32.mrb[11].mxu0 }
  0xff   : > { %18055 = vst [vmem:[#allocation12_spill] sm:$0xff] %v14652_v28  ;;  %18056 = vst [vmem:[#allocation13_spill] sm:$0xff] %v14654_v31  ;;  %v1322_v36 = vmax.f32 %v989_v30, 0.0  ;;  %v991_v38 = vpop.f32.mrb[11].mxu1  ;;  %v1321_v39 = vmax.f32 %v584_v37, 0.0  ;;  %3411 = vmatprep.mubr.bf16.mxu0 %v14654_v31 }
 0x100   : > { %18057 = vst [vmem:[#allocation14_spill] sm:$0xff] %v14656_v32  ;;  %v1323_v40 = vmax.f32 %v991_v38, 0.0  ;;  %3642 = vmatprep.mubr.bf16.mxu1 %v14656_v32  ;;  %3412 = vmatmul.mubr.bf16.vlgmr.msra.gmra.mrb[116].mxu0 %v14650_v27  ;;  %v14668_v41 = vpack.c.bf16 %v1320_v35, %v1316_v21  ;;  %v13851_v21 = vld [vmem:[%s17625_s2 + $0x98] sm:$0xff]   ;;  %v13852_v38 = vld [vmem:[%s17625_s2 + $0x20] sm:$0xff]  }
 0x101   : > { %3643 = vmatmul.mubr.bf16.vlgmr.msra.gmra.mrb[116].mxu1 %v14652_v28  ;;  %v14670_v42 = vpack.c.bf16 %v1322_v36, %v1318_v22  ;;  %4252 = vmatpush1.bf16.msra.mxu0 %v13844_v33  ;;  %v588_v43 = vpop.f32.mrb[12].mxu0  ;;  %v14678_v47 = vpack.c.bf16 %v1321_v39, %v1317_v25 }
 0x102   : > { %18058 = vst [vmem:[#allocation15_spill] sm:$0xff] %v14668_v41  ;;  %v995_v44 = vpop.f32.mrb[12].mxu1  ;;  %4483 = vmatpush1.bf16.msra.mxu1 %v13845_v34  ;;  %v14680_v48 = vpack.c.bf16 %v1323_v40, %v1319_v26  ;;  %v1324_v49 = vmax.f32 %v588_v43, 0.0  ;;  %v590_v51 = vpop.f32.mrb[13].mxu0  ;;  %4253 = vmatprep.subr.bf16.mxu0 %v17628_v14 }
 0x103   : > { %18059 = vst [vmem:[#allocation16_spill] sm:$0xff] %v14670_v42  ;;  %18060 = vst [vmem:[#allocation17_spill] sm:$0xff] %v14678_v47  ;;  %v1326_v50 = vmax.f32 %v995_v44, 0.0  ;;  %v997_v52 = vpop.f32.mrb[13].mxu1  ;;  %4484 = vmatprep.subr.bf16.mxu1 %v17628_v14  ;;  %v1325_v53 = vmax.f32 %v590_v51, 0.0 }
 0x104   : > { %18061 = vst [vmem:[#allocation18_spill] sm:$0xff] %v14680_v48  ;;  %v1327_v54 = vmax.f32 %v997_v52, 0.0  ;;  %v14684_v55 = vpack.c.bf16 %v1324_v49, %v1320_v35 }
 0x105   : > { %v14686_v56 = vpack.c.bf16 %v1326_v50, %v1322_v36  ;;  %v594_v59 = vpop.f32.mrb[14].mxu0  ;;  %v14688_v63 = vpack.c.bf16 %v1325_v53, %v1321_v39  ;;  %4254 = vmatpush1.bf16.msra.mxu0 %v13846_v45  ;;  %v13853_v39 = vld [vmem:[%s17625_s2 + $0xa0] sm:$0xff]  }
 0x106   : > { %18062 = vst [vmem:[#allocation19_spill] sm:$0xff] %v14684_v55  ;;  %v1001_v60 = vpop.f32.mrb[14].mxu1  ;;  %v14690_v0 = vpack.c.bf16 %v1327_v54, %v1323_v40  ;;  %4485 = vmatpush1.bf16.msra.mxu1 %v13847_v46  ;;  %v1328_v3 = vmax.f32 %v594_v59, 0.0  ;;  %v596_v5 = vpop.f32.mrb[15].mxu0  ;;  %4255 = vmatprep.subr.bf16.mxu0 %v17628_v14 }
 0x107   : > { %18063 = vst [vmem:[#allocation20_spill] sm:$0xff] %v14686_v56  ;;  %18064 = vst [vmem:[#allocation21_spill] sm:$0xff] %v14688_v63  ;;  %v1330_v4 = vmax.f32 %v1001_v60, 0.0  ;;  %v1003_v6 = vpop.f32.mrb[15].mxu1  ;;  %4486 = vmatprep.subr.bf16.mxu1 %v17628_v14  ;;  %v1329_v7 = vmax.f32 %v596_v5, 0.0  ;;  %3419 = vmatprep.mubr.bf16.mxu0 %v14688_v63  ;;  %v13854_v60 = vld [vmem:[%s17625_s2 + $0x28] sm:$0xff]  }
 0x108   : > { %18065 = vst [vmem:[#allocation22_spill] sm:$0xff] %v14690_v0  ;;  %v1331_v8 = vmax.f32 %v1003_v6, 0.0  ;;  %3650 = vmatprep.mubr.bf16.mxu1 %v14690_v0  ;;  %v14702_v9 = vpack.c.bf16 %v1328_v3, %v1324_v49  ;;  %3420 = vmatmul.mubr.bf16.gmra.mrb[120].mxu0 %v14684_v55 }
 0x109   : > { %v14704_v10 = vpack.c.bf16 %v1330_v4, %v1326_v50  ;;  %3651 = vmatmul.mubr.bf16.gmra.mrb[120].mxu1 %v14686_v56  ;;  %v14708_v12 = vpack.c.bf16 %v1329_v7, %v1325_v53  ;;  %v600_v15 = vpop.f32.mrb[16].mxu0  ;;  %4256 = vmatpush1.bf16.msra.mxu0 %v13848_v1  ;;  %v13855_v1 = vld [vmem:[%s17625_s2 + $0xa8] sm:$0xff]  }
 0x10a   : > { %18066 = vst [vmem:[#allocation23_spill] sm:$0xff] %v14702_v9  ;;  %v14710_v13 = vpack.c.bf16 %v1331_v8, %v1327_v54  ;;  %v1007_v18 = vpop.f32.mrb[16].mxu1  ;;  %4487 = vmatpush1.bf16.msra.mxu1 %v13849_v2  ;;  %v1332_v22 = vmax.f32 %v600_v15, 0.0  ;;  %v602_v24 = vpop.f32.mrb[17].mxu0  ;;  %4257 = vmatprep.subr.bf16.mxu0 %v17628_v14 }
 0x10b   : > { %18067 = vst [vmem:[#allocation24_spill] sm:$0xff] %v14704_v10  ;;  %18068 = vst [vmem:[#allocation25_spill] sm:$0xff] %v14708_v12  ;;  %v1334_v23 = vmax.f32 %v1007_v18, 0.0  ;;  %v1009_v25 = vpop.f32.mrb[17].mxu1  ;;  %4488 = vmatprep.subr.bf16.mxu1 %v17628_v14  ;;  %v1333_v26 = vmax.f32 %v602_v24, 0.0  ;;  %v13857_v24 = vld [vmem:[%s17625_s2 + $0xb0] sm:$0xff]  }
 0x10c   : > { %18069 = vst [vmem:[#allocation26_spill] sm:$0xff] %v14710_v13  ;;  %v1335_v29 = vmax.f32 %v1009_v25, 0.0  ;;  %v14720_v30 = vpack.c.bf16 %v1332_v22, %v1328_v3 }
 0x10d   : > { %v14722_v33 = vpack.c.bf16 %v1334_v23, %v1330_v4  ;;  %v606_v34 = vpop.f32.mrb[18].mxu0  ;;  %v14724_v36 = vpack.c.bf16 %v1333_v26, %v1329_v7  ;;  %4258 = vmatpush1.bf16.msra.mxu0 %v13850_v19 }
 0x10e   : > { %18070 = vst [vmem:[#allocation27_spill] sm:$0xff] %v14720_v30  ;;  %v1013_v35 = vpop.f32.mrb[18].mxu1  ;;  %v14726_v37 = vpack.c.bf16 %v1335_v29, %v1331_v8  ;;  %4489 = vmatpush1.bf16.msra.mxu1 %v13851_v21  ;;  %v1336_v40 = vmax.f32 %v606_v34, 0.0  ;;  %v608_v44 = vpop.f32.mrb[19].mxu0  ;;  %4259 = vmatprep.subr.bf16.mxu0 %v17628_v14 }
 0x10f   : > { %18071 = vst [vmem:[#allocation28_spill] sm:$0xff] %v14722_v33  ;;  %18072 = vst [vmem:[#allocation29_spill] sm:$0xff] %v14724_v36  ;;  %v1338_v43 = vmax.f32 %v1013_v35, 0.0  ;;  %v1015_v45 = vpop.f32.mrb[19].mxu1  ;;  %4490 = vmatprep.subr.bf16.mxu1 %v17628_v14  ;;  %v1337_v46 = vmax.f32 %v608_v44, 0.0  ;;  %3427 = vmatprep.mubr.bf16.mxu0 %v14724_v36 }
 0x110   : > { %18073 = vst [vmem:[#allocation30_spill] sm:$0xff] %v14726_v37  ;;  %v1339_v49 = vmax.f32 %v1015_v45, 0.0  ;;  %3658 = vmatprep.mubr.bf16.mxu1 %v14726_v37  ;;  %v14738_v50 = vpack.c.bf16 %v1336_v40, %v1332_v22  ;;  %3428 = vmatmul.mubr.bf16.gmra.mrb[124].mxu0 %v14720_v30 }
 0x111   : > { %v14740_v51 = vpack.c.bf16 %v1338_v43, %v1334_v23  ;;  %3659 = vmatmul.mubr.bf16.gmra.mrb[124].mxu1 %v14722_v33  ;;  %v14744_v52 = vpack.c.bf16 %v1337_v46, %v1333_v26  ;;  %v612_v54 = vpop.f32.mrb[20].mxu0  ;;  %4260 = vmatpush1.bf16.msra.mxu0 %v13852_v38  ;;  %v13856_v23 = vld [vmem:[%s17625_s2 + $0x30] sm:$0xff]  }
 0x112   : > { %18074 = vst [vmem:[#allocation31_spill] sm:$0xff] %v14738_v50  ;;  %v14746_v53 = vpack.c.bf16 %v1339_v49, %v1335_v29  ;;  %v1019_v59 = vpop.f32.mrb[20].mxu1  ;;  %4491 = vmatpush1.bf16.msra.mxu1 %v13853_v39  ;;  %v1340_v2 = vmax.f32 %v612_v54, 0.0  ;;  %v614_v4 = vpop.f32.mrb[21].mxu0  ;;  %4261 = vmatprep.subr.bf16.mxu0 %v17628_v14  ;;  %v13859_v54 = vld [vmem:[%s17625_s2 + $0xb8] sm:$0xff]  }
 0x113   : > { %18075 = vst [vmem:[#allocation32_spill] sm:$0xff] %v14740_v51  ;;  %18076 = vst [vmem:[#allocation33_spill] sm:$0xff] %v14744_v52  ;;  %v1342_v3 = vmax.f32 %v1019_v59, 0.0  ;;  %v1021_v5 = vpop.f32.mrb[21].mxu1  ;;  %4492 = vmatprep.subr.bf16.mxu1 %v17628_v14  ;;  %v1341_v6 = vmax.f32 %v614_v4, 0.0 }
 0x114   : > { %18077 = vst [vmem:[#allocation34_spill] sm:$0xff] %v14746_v53  ;;  %v1343_v7 = vmax.f32 %v1021_v5, 0.0  ;;  %v14756_v8 = vpack.c.bf16 %v1340_v2, %v1336_v40 }
 0x115   : > { %v14758_v15 = vpack.c.bf16 %v1342_v3, %v1338_v43  ;;  %v618_v18 = vpop.f32.mrb[22].mxu0  ;;  %v14760_v21 = vpack.c.bf16 %v1341_v6, %v1337_v46  ;;  %4262 = vmatpush1.bf16.msra.mxu0 %v13854_v60 }
 0x116   : > { %18078 = vst [vmem:[#allocation35_spill] sm:$0xff] %v14756_v8  ;;  %v1025_v19 = vpop.f32.mrb[22].mxu1  ;;  %v14762_v22 = vpack.c.bf16 %v1343_v7, %v1339_v49  ;;  %4493 = vmatpush1.bf16.msra.mxu1 %v13855_v1  ;;  %v1344_v25 = vmax.f32 %v618_v18, 0.0  ;;  %v620_v29 = vpop.f32.mrb[23].mxu0  ;;  %4263 = vmatprep.subr.bf16.mxu0 %v17628_v14  ;;  %v13858_v49 = vld [vmem:[%s17625_s2 + $0x38] sm:$0xff]  }
 0x117   : > { %18079 = vst [vmem:[#allocation36_spill] sm:$0xff] %v14758_v15  ;;  %18080 = vst [vmem:[#allocation37_spill] sm:$0xff] %v14760_v21  ;;  %v1346_v26 = vmax.f32 %v1025_v19, 0.0  ;;  %v1027_v34 = vpop.f32.mrb[23].mxu1  ;;  %4494 = vmatprep.subr.bf16.mxu1 %v17628_v14  ;;  %v1345_v35 = vmax.f32 %v620_v29, 0.0  ;;  %3435 = vmatprep.mubr.bf16.mxu0 %v14760_v21  ;;  %v13861_v29 = vld [vmem:[%s17625_s2 + $0xc0] sm:$0xff]  }
 0x118   : > { %18081 = vst [vmem:[#allocation38_spill] sm:$0xff] %v14762_v22  ;;  %v1347_v38 = vmax.f32 %v1027_v34, 0.0  ;;  %3666 = vmatprep.mubr.bf16.mxu1 %v14762_v22  ;;  %v14774_v39 = vpack.c.bf16 %v1344_v25, %v1340_v2  ;;  %3436 = vmatmul.mubr.bf16.gmra.mrb[128].mxu0 %v14756_v8 }
 0x119   : > { %v14776_v40 = vpack.c.bf16 %v1346_v26, %v1342_v3  ;;  %3667 = vmatmul.mubr.bf16.gmra.mrb[128].mxu1 %v14758_v15  ;;  %v14780_v43 = vpack.c.bf16 %v1345_v35, %v1341_v6  ;;  %v624_v45 = vpop.f32.mrb[24].mxu0  ;;  %4264 = vmatpush1.bf16.msra.mxu0 %v13856_v23 }
 0x11a   : > { %18082 = vst [vmem:[#allocation39_spill] sm:$0xff] %v14774_v39  ;;  %v14782_v44 = vpack.c.bf16 %v1347_v38, %v1343_v7  ;;  %v1031_v46 = vpop.f32.mrb[24].mxu1  ;;  %4495 = vmatpush1.bf16.msra.mxu1 %v13857_v24  ;;  %v1348_v59 = vmax.f32 %v624_v45, 0.0  ;;  %v626_v1 = vpop.f32.mrb[25].mxu0  ;;  %4265 = vmatprep.subr.bf16.mxu0 %v17628_v14  ;;  %v13860_v24 = vld [vmem:[%s17625_s2 + $0x40] sm:$0xff]  }
 0x11b   : > { %18083 = vst [vmem:[#allocation40_spill] sm:$0xff] %v14776_v40  ;;  %18084 = vst [vmem:[#allocation41_spill] sm:$0xff] %v14780_v43  ;;  %v1350_v60 = vmax.f32 %v1031_v46, 0.0  ;;  %v1033_v2 = vpop.f32.mrb[25].mxu1  ;;  %4496 = vmatprep.subr.bf16.mxu1 %v17628_v14  ;;  %v1349_v3 = vmax.f32 %v626_v1, 0.0 }
 0x11c   : > { %18085 = vst [vmem:[#allocation42_spill] sm:$0xff] %v14782_v44  ;;  %v1351_v4 = vmax.f32 %v1033_v2, 0.0  ;;  %v14792_v5 = vpack.c.bf16 %v1348_v59, %v1344_v25 }
 0x11d   : > { %v14794_v6 = vpack.c.bf16 %v1350_v60, %v1346_v26  ;;  %v630_v7 = vpop.f32.mrb[26].mxu0  ;;  %v14796_v19 = vpack.c.bf16 %v1349_v3, %v1345_v35  ;;  %4266 = vmatpush1.bf16.msra.mxu0 %v13858_v49 }
 0x11e   : > { %18086 = vst [vmem:[#allocation43_spill] sm:$0xff] %v14792_v5  ;;  %v1037_v18 = vpop.f32.mrb[26].mxu1  ;;  %v14798_v23 = vpack.c.bf16 %v1351_v4, %v1347_v38  ;;  %4497 = vmatpush1.bf16.msra.mxu1 %v13859_v54  ;;  %v1352_v25 = vmax.f32 %v630_v7, 0.0  ;;  %v632_v26 = vpop.f32.mrb[27].mxu0  ;;  %4267 = vmatprep.subr.bf16.mxu0 %v17628_v14 }
 0x11f   : > { %18087 = vst [vmem:[#allocation44_spill] sm:$0xff] %v14794_v6  ;;  %18088 = vst [vmem:[#allocation45_spill] sm:$0xff] %v14796_v19  ;;  %v1354_v34 = vmax.f32 %v1037_v18, 0.0  ;;  %v1039_v45 = vpop.f32.mrb[27].mxu1  ;;  %4498 = vmatprep.subr.bf16.mxu1 %v17628_v14  ;;  %v1353_v35 = vmax.f32 %v632_v26, 0.0  ;;  %3443 = vmatprep.mubr.bf16.mxu0 %v14796_v19  ;;  %v13862_v18 = vld [vmem:[%s17625_s2 + $0x48] sm:$0xff]  }
 0x120   : > { %18089 = vst [vmem:[#allocation46_spill] sm:$0xff] %v14798_v23  ;;  %v1355_v38 = vmax.f32 %v1039_v45, 0.0  ;;  %3674 = vmatprep.mubr.bf16.mxu1 %v14798_v23  ;;  %v14810_v46 = vpack.c.bf16 %v1352_v25, %v1348_v59  ;;  %3444 = vmatmul.mubr.bf16.gmra.mrb[132].mxu0 %v14792_v5  ;;  %v13863_v59 = vld [vmem:[%s17625_s2 + $0xc8] sm:$0xff]  }
 0x121   : > { %v14812_v49 = vpack.c.bf16 %v1354_v34, %v1350_v60  ;;  %3675 = vmatmul.mubr.bf16.gmra.mrb[132].mxu1 %v14794_v6  ;;  %v14816_v54 = vpack.c.bf16 %v1353_v35, %v1349_v3  ;;  %v636_v2 = vpop.f32.mrb[28].mxu0  ;;  %4268 = vmatpush1.bf16.msra.mxu0 %v13860_v24  ;;  %v18094_v3 = vmov 0  }
 0x122   : > { %18090 = vst [vmem:[#allocation47_spill] sm:$0xff] %v14810_v46  ;;  %v14818_v1 = vpack.c.bf16 %v1355_v38, %v1351_v4  ;;  %v1043_v7 = vpop.f32.mrb[28].mxu1  ;;  %4499 = vmatpush1.bf16.msra.mxu1 %v13861_v29  ;;  %v1356_v60 = vmax.f32 %v636_v2, 0.0  ;;  %v638_v45 = vpop.f32.mrb[29].mxu0  ;;  %4269 = vmatprep.subr.bf16.mxu0 %v18094_v3  ;;  %v13864_v2 = vld [vmem:[%s17625_s2 + $0x50] sm:$0xff]  }
 0x123   : > { %18091 = vst [vmem:[#allocation48_spill] sm:$0xff] %v14812_v49  ;;  %18092 = vst [vmem:[#allocation49_spill] sm:$0xff] %v14816_v54  ;;  %v1358_v26 = vmax.f32 %v1043_v7, 0.0  ;;  %v1045_v14 = vpop.f32.mrb[29].mxu1  ;;  %4500 = vmatprep.subr.bf16.mxu1 %v18094_v3  ;;  %v1357_v4 = vmax.f32 %v638_v45, 0.0 }
 0x124   : > { %18093 = vst [vmem:[#allocation50_spill] sm:$0xff] %v14818_v1  ;;  %v1359_v6 = vmax.f32 %v1045_v14, 0.0  ;;  %v14828_v24 = vpack.c.bf16 %v1356_v60, %v1352_v25  ;;  %v13865_v14 = vld [vmem:[%s17625_s2 + $0xd0] sm:$0xff]  }
 0x125   : > { %v14830_v29 = vpack.c.bf16 %v1358_v26, %v1354_v34  ;;  %v642_v23 = vpop.f32.mrb[30].mxu0  ;;  %v14832_v22 = vpack.c.bf16 %v1357_v4, %v1353_v35  ;;  %4270 = vmatpush1.bf16.msra.mxu0 %v13862_v18 }
 0x126   : > { %18095 = vst [vmem:[#allocation51_spill] sm:$0xff] %v14828_v24  ;;  %v1049_v15 = vpop.f32.mrb[30].mxu1  ;;  %v14834_v33 = vpack.c.bf16 %v1359_v6, %v1355_v38  ;;  %4501 = vmatpush1.bf16.msra.mxu1 %v13863_v59  ;;  %v1360_v25 = vmax.f32 %v642_v23, 0.0  ;;  %v644_v34 = vpop.f32.mrb[31].mxu0  ;;  %4271 = vmatprep.subr.bf16.mxu0 %v18094_v3 }
 0x127   : > { %18096 = vst [vmem:[#allocation52_spill] sm:$0xff] %v14830_v29  ;;  %18097 = vst [vmem:[#allocation53_spill] sm:$0xff] %v14832_v22  ;;  %v1362_v7 = vmax.f32 %v1049_v15, 0.0  ;;  %v1051_v45 = vpop.f32.mrb[31].mxu1  ;;  %4502 = vmatprep.subr.bf16.mxu1 %v18094_v3  ;;  %v1361_v35 = vmax.f32 %v644_v34, 0.0  ;;  %3451 = vmatprep.mubr.bf16.mxu0 %v14832_v22  ;;  %v13866_v34 = vld [vmem:[%s17625_s2 + $0x58] sm:$0xff]  }
 0x128   : > { %18098 = vst [vmem:[#allocation54_spill] sm:$0xff] %v14834_v33  ;;  %v1363_v38 = vmax.f32 %v1051_v45, 0.0  ;;  %3682 = vmatprep.mubr.bf16.mxu1 %v14834_v33  ;;  %v14846_v18 = vpack.c.bf16 %v1360_v25, %v1356_v60  ;;  %3452 = vmatmul.mubr.bf16.gmra.mrb[136].mxu0 %v14828_v24  ;;  %v13867_v60 = vld [vmem:[%s17625_s2 + $0xd8] sm:$0xff]  }
 0x129   : > { %v14848_v59 = vpack.c.bf16 %v1362_v7, %v1358_v26  ;;  %3683 = vmatmul.mubr.bf16.gmra.mrb[136].mxu1 %v14830_v29  ;;  %v14852_v15 = vpack.c.bf16 %v1361_v35, %v1357_v4  ;;  %v648_v37 = vpop.f32.mrb[32].mxu0  ;;  %4272 = vmatpush1.bf16.msra.mxu0 %v13864_v2 }
 0x12a   : > { %18099 = vst [vmem:[#allocation55_spill] sm:$0xff] %v14846_v18  ;;  %v14854_v23 = vpack.c.bf16 %v1363_v38, %v1359_v6  ;;  %v1055_v56 = vpop.f32.mrb[32].mxu1  ;;  %4503 = vmatpush1.bf16.msra.mxu1 %v13865_v14  ;;  %v1364_v26 = vmax.f32 %v648_v37, 0.0  ;;  %v650_v33 = vpop.f32.mrb[33].mxu0  ;;  %4273 = vmatprep.subr.bf16.mxu0 %v18094_v3 }
 0x12b   : > { %18100 = vst [vmem:[#allocation56_spill] sm:$0xff] %v14848_v59  ;;  %18101 = vst [vmem:[#allocation57_spill] sm:$0xff] %v14852_v15  ;;  %v1366_v45 = vmax.f32 %v1055_v56, 0.0  ;;  %v1057_v29 = vpop.f32.mrb[33].mxu1  ;;  %4504 = vmatprep.subr.bf16.mxu1 %v18094_v3  ;;  %v1365_v6 = vmax.f32 %v650_v33, 0.0  ;;  %v13868_v56 = vld [vmem:[%s17625_s2 + $0x60] sm:$0xff]  }
 0x12c   : > { %18102 = vst [vmem:[#allocation58_spill] sm:$0xff] %v14854_v23  ;;  %v1367_v4 = vmax.f32 %v1057_v29, 0.0  ;;  %v14864_v2 = vpack.c.bf16 %v1364_v26, %v1360_v25  ;;  %v13869_v33 = vld [vmem:[%s17625_s2 + $0xe0] sm:$0xff]  }
 0x12d   : > { %v14866_v14 = vpack.c.bf16 %v1366_v45, %v1362_v7  ;;  %v654_v0 = vpop.f32.mrb[34].mxu0  ;;  %v14868_v32 = vpack.c.bf16 %v1365_v6, %v1361_v35  ;;  %4274 = vmatpush1.bf16.msra.mxu0 %v13866_v34 }
 0x12e   : > { %18103 = vst [vmem:[#allocation59_spill] sm:$0xff] %v14864_v2  ;;  %v1061_v28 = vpop.f32.mrb[34].mxu1  ;;  %v14870_v24 = vpack.c.bf16 %v1367_v4, %v1363_v38  ;;  %4505 = vmatpush1.bf16.msra.mxu1 %v13867_v60  ;;  %v1368_v37 = vmax.f32 %v654_v0, 0.0  ;;  %v656_v25 = vpop.f32.mrb[35].mxu0  ;;  %4275 = vmatprep.subr.bf16.mxu0 %v18094_v3 }
 0x12f   : > { %18104 = vst [vmem:[#allocation60_spill] sm:$0xff] %v14866_v14  ;;  %18105 = vst [vmem:[#allocation61_spill] sm:$0xff] %v14868_v32  ;;  %v1370_v29 = vmax.f32 %v1061_v28, 0.0  ;;  %v1063_v7 = vpop.f32.mrb[35].mxu1  ;;  %4506 = vmatprep.subr.bf16.mxu1 %v18094_v3  ;;  %v1369_v35 = vmax.f32 %v656_v25, 0.0  ;;  %3459 = vmatprep.mubr.bf16.mxu0 %v14868_v32  ;;  %v13870_v25 = vld [vmem:[%s17625_s2 + $0x68] sm:$0xff]  }
 0x130   : > { %18106 = vst [vmem:[#allocation62_spill] sm:$0xff] %v14870_v24  ;;  %v1371_v38 = vmax.f32 %v1063_v7, 0.0  ;;  %3690 = vmatprep.mubr.bf16.mxu1 %v14870_v24  ;;  %v14882_v34 = vpack.c.bf16 %v1368_v37, %v1364_v26  ;;  %3460 = vmatmul.mubr.bf16.gmra.mrb[140].mxu0 %v14864_v2  ;;  %v13871_v26 = vld [vmem:[%s17625_s2 + $0xe8] sm:$0xff]  }
 0x131   : > { %v14884_v60 = vpack.c.bf16 %v1370_v29, %v1366_v45  ;;  %3691 = vmatmul.mubr.bf16.gmra.mrb[140].mxu1 %v14866_v14  ;;  %v14888_v28 = vpack.c.bf16 %v1369_v35, %v1365_v6  ;;  %v660_v22 = vpop.f32.mrb[36].mxu0  ;;  %4276 = vmatpush1.bf16.msra.mxu0 %v13868_v56 }
 0x132   : > { %18107 = vst [vmem:[#allocation63_spill] sm:$0xff] %v14882_v34  ;;  %v14890_v0 = vpack.c.bf16 %v1371_v38, %v1367_v4  ;;  %v1067_v5 = vpop.f32.mrb[36].mxu1  ;;  %4507 = vmatpush1.bf16.msra.mxu1 %v13869_v33  ;;  %v1372_v45 = vmax.f32 %v660_v22, 0.0  ;;  %v662_v24 = vpop.f32.mrb[37].mxu0  ;;  %4277 = vmatprep.subr.bf16.mxu0 %v18094_v3  ;;  %v13872_v22 = vld [vmem:[%s17625_s2 + $0x70] sm:$0xff]  }
 0x133   : > { %18108 = vst [vmem:[#allocation64_spill] sm:$0xff] %v14884_v60  ;;  %18109 = vst [vmem:[#allocation65_spill] sm:$0xff] %v14888_v28  ;;  %v1374_v7 = vmax.f32 %v1067_v5, 0.0  ;;  %v1069_v14 = vpop.f32.mrb[37].mxu1  ;;  %4508 = vmatprep.subr.bf16.mxu1 %v18094_v3  ;;  %v1373_v6 = vmax.f32 %v662_v24, 0.0  ;;  %v13873_v5 = vld [vmem:[%s17625_s2 + $0xf0] sm:$0xff]  }
 0x134   : > { %18110 = vst [vmem:[#allocation66_spill] sm:$0xff] %v14890_v0  ;;  %v1375_v4 = vmax.f32 %v1069_v14, 0.0  ;;  %v14900_v56 = vpack.c.bf16 %v1372_v45, %v1368_v37 }
 0x135   : > { %v14902_v33 = vpack.c.bf16 %v1374_v7, %v1370_v29  ;;  %v666_v2 = vpop.f32.mrb[38].mxu0  ;;  %v14904_v19 = vpack.c.bf16 %v1373_v6, %v1369_v35  ;;  %4278 = vmatpush1.bf16.msra.mxu0 %v13870_v25 }
 0x136   : > { %18111 = vst [vmem:[#allocation67_spill] sm:$0xff] %v14900_v56  ;;  %v1073_v32 = vpop.f32.mrb[38].mxu1  ;;  %v14906_v8 = vpack.c.bf16 %v1375_v4, %v1371_v38  ;;  %4509 = vmatpush1.bf16.msra.mxu1 %v13871_v26  ;;  %v1376_v24 = vmax.f32 %v666_v2, 0.0  ;;  %v668_v37 = vpop.f32.mrb[39].mxu0  ;;  %4279 = vmatprep.subr.bf16.mxu0 %v18094_v3 }
 0x137   : > { %18112 = vst [vmem:[#allocation68_spill] sm:$0xff] %v14902_v33  ;;  %18113 = vst [vmem:[#allocation69_spill] sm:$0xff] %v14904_v19  ;;  %v1378_v14 = vmax.f32 %v1073_v32, 0.0  ;;  %v1075_v29 = vpop.f32.mrb[39].mxu1  ;;  %4510 = vmatprep.subr.bf16.mxu1 %v18094_v3  ;;  %v1377_v35 = vmax.f32 %v668_v37, 0.0  ;;  %3467 = vmatprep.mubr.bf16.mxu0 %v14904_v19 }
 0x138   : > { %18114 = vst [vmem:[#allocation70_spill] sm:$0xff] %v14906_v8  ;;  %v1379_v38 = vmax.f32 %v1075_v29, 0.0  ;;  %3698 = vmatprep.mubr.bf16.mxu1 %v14906_v8  ;;  %v14918_v25 = vpack.c.bf16 %v1376_v24, %v1372_v45  ;;  %3468 = vmatmul.mubr.bf16.gmra.mrb[144].mxu0 %v14900_v56  ;;  %v13874_v45 = vld [vmem:[%s17625_s2 + $0x78] sm:$0xff]  }
 0x139   : > { %v14920_v26 = vpack.c.bf16 %v1378_v14, %v1374_v7  ;;  %3699 = vmatmul.mubr.bf16.gmra.mrb[144].mxu1 %v14902_v33  ;;  %v14924_v32 = vpack.c.bf16 %v1377_v35, %v1373_v6  ;;  %v672_v21 = vpop.f32.mrb[40].mxu0  ;;  %4280 = vmatpush1.bf16.msra.mxu0 %v13872_v22 }
 0x13a   : > { %18115 = vst [vmem:[#allocation71_spill] sm:$0xff] %v14918_v25  ;;  %v14926_v2 = vpack.c.bf16 %v1379_v38, %v1375_v4  ;;  %v1079_v30 = vpop.f32.mrb[40].mxu1  ;;  %4511 = vmatpush1.bf16.msra.mxu1 %v13873_v5  ;;  %v1380_v37 = vmax.f32 %v672_v21, 0.0  ;;  %v674_v19 = vpop.f32.mrb[41].mxu0  ;;  %4281 = vmatprep.subr.bf16.mxu0 %v18094_v3 }
 0x13b   : > { %18116 = vst [vmem:[#allocation72_spill] sm:$0xff] %v14920_v26  ;;  %18117 = vst [vmem:[#allocation73_spill] sm:$0xff] %v14924_v32  ;;  %v1382_v29 = vmax.f32 %v1079_v30, 0.0  ;;  %v1081_v8 = vpop.f32.mrb[41].mxu1  ;;  %4512 = vmatprep.subr.bf16.mxu1 %v18094_v3  ;;  %v1381_v7 = vmax.f32 %v674_v19, 0.0 }
 0x13c   : > { %18118 = vst [vmem:[#allocation74_spill] sm:$0xff] %v14926_v2  ;;  %v1383_v6 = vmax.f32 %v1081_v8, 0.0  ;;  %v14933_v4 = vpack.c.bf16 %v1380_v37, %v1376_v24 }
 0x13d   : > { %v14935_v33 = vpack.c.bf16 %v1382_v29, %v1378_v14  ;;  %v678_v22 = vpop.f32.mrb[42].mxu0  ;;  %v14937_v21 = vpack.c.bf16 %v1381_v7, %v1377_v35  ;;  %4282 = vmatpush1.bf16.msra.mxu0 %v13874_v45  ;;  %v13875_v14 = vld [vmem:[%s17625_s2 + $0xf8] sm:$0xff]  }
 0x13e   : > { %18119 = vst [vmem:[#allocation75_spill] sm:$0xff] %v14933_v4  ;;  %v1085_v5 = vpop.f32.mrb[42].mxu1  ;;  %v14939_v30 = vpack.c.bf16 %v1383_v6, %v1379_v38  ;;  %v1384_v56 = vmax.f32 %v678_v22, 0.0  ;;  %v680_v55 = vpop.f32.mrb[43].mxu0  ;;  %4970 = vmatprep.subr.bf16.mxu0 %v18094_v3  ;;  %4513 = vmatpush1.bf16.msra.mxu1 %v13875_v14 }
 0x13f   : > { %18120 = vst [vmem:[#allocation76_spill] sm:$0xff] %v14935_v33  ;;  %18121 = vst [vmem:[#allocation77_spill] sm:$0xff] %v14937_v21  ;;  %v1386_v36 = vmax.f32 %v1085_v5, 0.0  ;;  %v1087_v63 = vpop.f32.mrb[43].mxu1  ;;  %v1385_v27 = vmax.f32 %v680_v55, 0.0  ;;  %3475 = vmatprep.mubr.bf16.mxu0 %v14937_v21  ;;  %6347 = vmatprep.subr.bf16.mxu1 %v18094_v3 }
 0x140   : > { %18122 = vst [vmem:[#allocation78_spill] sm:$0xff] %v14939_v30  ;;  %v1387_v19 = vmax.f32 %v1087_v63, 0.0  ;;  %3706 = vmatprep.mubr.bf16.mxu1 %v14939_v30  ;;  %v14944_v8 = vpack.c.bf16 %v1384_v56, %v1380_v37  ;;  %3476 = vmatmul.mubr.bf16.gmra.mrb[148].mxu0 %v14933_v4 }
 0x141   : > { %v14946_v24 = vpack.c.bf16 %v1386_v36, %v1382_v29  ;;  %3707 = vmatmul.mubr.bf16.gmra.mrb[148].mxu1 %v14935_v33  ;;  %v14953_v35 = vpack.c.bf16 %v1385_v27, %v1381_v7  ;;  %v684_v63 = vpop.f32.mrb[44].mxu0 }
 0x142   : > { %18123 = vst [vmem:[#allocation79_spill] sm:$0xff] %v14944_v8  ;;  %v14955_v55 = vpack.c.bf16 %v1387_v19, %v1383_v6  ;;  %v1091_v38 = vpop.f32.mrb[44].mxu1  ;;  %v1388_v45 = vmax.f32 %v684_v63, 0.0  ;;  %v686_v37 = vpop.f32.mrb[45].mxu0 }
 0x143   : > { %18124 = vst [vmem:[#allocation80_spill] sm:$0xff] %v14946_v24  ;;  %18125 = vst [vmem:[#allocation81_spill] sm:$0xff] %v14953_v35  ;;  %v1390_v22 = vmax.f32 %v1091_v38, 0.0  ;;  %v1093_v5 = vpop.f32.mrb[45].mxu1  ;;  %v1389_v29 = vmax.f32 %v686_v37, 0.0 }
 0x144   : > { %18126 = vst [vmem:[#allocation82_spill] sm:$0xff] %v14955_v55  ;;  %v1391_v30 = vmax.f32 %v1093_v5, 0.0  ;;  %v14958_v33 = vpack.c.bf16 %v1388_v45, %v1384_v56 }
 0x145   : > { %v14960_v4 = vpack.c.bf16 %v1390_v22, %v1386_v36  ;;  %v690_v21 = vpop.f32.mrb[46].mxu0  ;;  %v14962_v31 = vpack.c.bf16 %v1389_v29, %v1385_v27 }
 0x146   : > { %18127 = vst [vmem:[#allocation83_spill] sm:$0xff] %v14958_v33  ;;  %v1097_v7 = vpop.f32.mrb[46].mxu1  ;;  %v14964_v6 = vpack.c.bf16 %v1391_v30, %v1387_v19  ;;  %v1392_v24 = vmax.f32 %v690_v21, 0.0  ;;  %v692_v38 = vpop.f32.mrb[47].mxu0 }
 0x147   : > { %18128 = vst [vmem:[#allocation84_spill] sm:$0xff] %v14960_v4  ;;  %18129 = vst [vmem:[#allocation85_spill] sm:$0xff] %v14962_v31  ;;  %v1394_v63 = vmax.f32 %v1097_v7, 0.0  ;;  %v1099_v8 = vpop.f32.mrb[47].mxu1  ;;  %v1393_v55 = vmax.f32 %v692_v38, 0.0  ;;  %3483 = vmatprep.mubr.bf16.mxu0 %v14962_v31 }
 0x148   : > { %18130 = vst [vmem:[#allocation86_spill] sm:$0xff] %v14964_v6  ;;  %v1395_v14 = vmax.f32 %v1099_v8, 0.0  ;;  %3714 = vmatprep.mubr.bf16.mxu1 %v14964_v6  ;;  %v14968_v56 = vpack.c.bf16 %v1392_v24, %v1388_v45  ;;  %3484 = vmatmul.mubr.bf16.gmra.mrb[152].mxu0 %v14958_v33 }
 0x149   : > { %v14970_v36 = vpack.c.bf16 %v1394_v63, %v1390_v22  ;;  %3715 = vmatmul.mubr.bf16.gmra.mrb[152].mxu1 %v14960_v4  ;;  %v14974_v27 = vpack.c.bf16 %v1393_v55, %v1389_v29  ;;  %v696_v19 = vpop.f32.mrb[48].mxu0 }
 0x14a   : > { %18131 = vst [vmem:[#allocation87_spill] sm:$0xff] %v14968_v56  ;;  %v14976_v21 = vpack.c.bf16 %v1395_v14, %v1391_v30  ;;  %v1103_v37 = vpop.f32.mrb[48].mxu1  ;;  %v1396_v5 = vmax.f32 %v696_v19, 0.0  ;;  %v698_v7 = vpop.f32.mrb[49].mxu0 }
 0x14b   : > { %18132 = vst [vmem:[#allocation88_spill] sm:$0xff] %v14970_v36  ;;  %18133 = vst [vmem:[#allocation89_spill] sm:$0xff] %v14974_v27  ;;  %v1398_v8 = vmax.f32 %v1103_v37, 0.0  ;;  %v1105_v38 = vpop.f32.mrb[49].mxu1  ;;  %v1397_v31 = vmax.f32 %v698_v7, 0.0 }
 0x14c   : > { %18134 = vst [vmem:[#allocation90_spill] sm:$0xff] %v14976_v21  ;;  %v1399_v6 = vmax.f32 %v1105_v38, 0.0  ;;  %v14978_v45 = vpack.c.bf16 %v1396_v5, %v1392_v24 }
 0x14d   : > { %v14980_v22 = vpack.c.bf16 %v1398_v8, %v1394_v63  ;;  %v702_v36 = vpop.f32.mrb[50].mxu0  ;;  %v14982_v56 = vpack.c.bf16 %v1397_v31, %v1393_v55 }
 0x14e   : > { %18135 = vst [vmem:[#allocation91_spill] sm:$0xff] %v14978_v45  ;;  %v1109_v33 = vpop.f32.mrb[50].mxu1  ;;  %v14984_v29 = vpack.c.bf16 %v1399_v6, %v1395_v14  ;;  %v1400_v30 = vmax.f32 %v702_v36, 0.0  ;;  %v704_v21 = vpop.f32.mrb[51].mxu0 }
 0x14f   : > { %18136 = vst [vmem:[#allocation92_spill] sm:$0xff] %v14980_v22  ;;  %18137 = vst [vmem:[#allocation93_spill] sm:$0xff] %v14982_v56  ;;  %v1402_v4 = vmax.f32 %v1109_v33, 0.0  ;;  %v1111_v27 = vpop.f32.mrb[51].mxu1  ;;  %v1401_v19 = vmax.f32 %v704_v21, 0.0  ;;  %3491 = vmatprep.mubr.bf16.mxu0 %v14982_v56 }
 0x150   : > { %18138 = vst [vmem:[#allocation94_spill] sm:$0xff] %v14984_v29  ;;  %v1403_v37 = vmax.f32 %v1111_v27, 0.0  ;;  %3722 = vmatprep.mubr.bf16.mxu1 %v14984_v29  ;;  %v14988_v24 = vpack.c.bf16 %v1400_v30, %v1396_v5  ;;  %3492 = vmatmul.mubr.bf16.gmra.mrb[156].mxu0 %v14978_v45 }
 0x151   : > { %v14990_v63 = vpack.c.bf16 %v1402_v4, %v1398_v8  ;;  %3723 = vmatmul.mubr.bf16.gmra.mrb[156].mxu1 %v14980_v22  ;;  %v14994_v55 = vpack.c.bf16 %v1401_v19, %v1397_v31  ;;  %v708_v33 = vpop.f32.mrb[52].mxu0 }
 0x152   : > { %18139 = vst [vmem:[#allocation95_spill] sm:$0xff] %v14988_v24  ;;  %v14996_v14 = vpack.c.bf16 %v1403_v37, %v1399_v6  ;;  %v1115_v36 = vpop.f32.mrb[52].mxu1  ;;  %v1404_v21 = vmax.f32 %v708_v33, 0.0  ;;  %v710_v7 = vpop.f32.mrb[53].mxu0 }
 0x153   : > { %18140 = vst [vmem:[#allocation96_spill] sm:$0xff] %v14990_v63  ;;  %18141 = vst [vmem:[#allocation97_spill] sm:$0xff] %v14994_v55  ;;  %v1406_v27 = vmax.f32 %v1115_v36, 0.0  ;;  %v1117_v38 = vpop.f32.mrb[53].mxu1  ;;  %v1405_v56 = vmax.f32 %v710_v7, 0.0 }
 0x154   : > { %18142 = vst [vmem:[#allocation98_spill] sm:$0xff] %v14996_v14  ;;  %v1407_v29 = vmax.f32 %v1117_v38, 0.0  ;;  %v14998_v5 = vpack.c.bf16 %v1404_v21, %v1400_v30 }
 0x155   : > { %v15000_v8 = vpack.c.bf16 %v1406_v27, %v1402_v4  ;;  %v714_v63 = vpop.f32.mrb[54].mxu0  ;;  %v15002_v24 = vpack.c.bf16 %v1405_v56, %v1401_v19 }
 0x156   : > { %18143 = vst [vmem:[#allocation99_spill] sm:$0xff] %v14998_v5  ;;  %v1121_v45 = vpop.f32.mrb[54].mxu1  ;;  %v15004_v31 = vpack.c.bf16 %v1407_v29, %v1403_v37  ;;  %v1408_v6 = vmax.f32 %v714_v63, 0.0  ;;  %v716_v14 = vpop.f32.mrb[55].mxu0 }
 0x157   : > { %18144 = vst [vmem:[#allocation100_spill] sm:$0xff] %v15000_v8  ;;  %18145 = vst [vmem:[#allocation101_spill] sm:$0xff] %v15002_v24  ;;  %v1410_v22 = vmax.f32 %v1121_v45, 0.0  ;;  %v1123_v55 = vpop.f32.mrb[55].mxu1  ;;  %v1409_v33 = vmax.f32 %v716_v14, 0.0  ;;  %3499 = vmatprep.mubr.bf16.mxu0 %v15002_v24 }
 0x158   : > { %18146 = vst [vmem:[#allocation102_spill] sm:$0xff] %v15004_v31  ;;  %v1411_v36 = vmax.f32 %v1123_v55, 0.0  ;;  %3730 = vmatprep.mubr.bf16.mxu1 %v15004_v31  ;;  %v15008_v30 = vpack.c.bf16 %v1408_v6, %v1404_v21  ;;  %3500 = vmatmul.mubr.bf16.gmra.mrb[160].mxu0 %v14998_v5 }
 0x159   : > { %v15010_v4 = vpack.c.bf16 %v1410_v22, %v1406_v27  ;;  %3731 = vmatmul.mubr.bf16.gmra.mrb[160].mxu1 %v15000_v8  ;;  %v15014_v19 = vpack.c.bf16 %v1409_v33, %v1405_v56  ;;  %v720_v45 = vpop.f32.mrb[56].mxu0 }
 0x15a   : > { %18147 = vst [vmem:[#allocation103_spill] sm:$0xff] %v15008_v30  ;;  %v15016_v37 = vpack.c.bf16 %v1411_v36, %v1407_v29  ;;  %v1127_v63 = vpop.f32.mrb[56].mxu1  ;;  %v1412_v14 = vmax.f32 %v720_v45, 0.0  ;;  %v722_v7 = vpop.f32.mrb[57].mxu0 }
 0x15b   : > { %18148 = vst [vmem:[#allocation104_spill] sm:$0xff] %v15010_v4  ;;  %18149 = vst [vmem:[#allocation105_spill] sm:$0xff] %v15014_v19  ;;  %v1414_v55 = vmax.f32 %v1127_v63, 0.0  ;;  %v1129_v38 = vpop.f32.mrb[57].mxu1  ;;  %v1413_v24 = vmax.f32 %v722_v7, 0.0 }
 0x15c   : > { %18150 = vst [vmem:[#allocation106_spill] sm:$0xff] %v15016_v37  ;;  %v1415_v31 = vmax.f32 %v1129_v38, 0.0  ;;  %v15018_v21 = vpack.c.bf16 %v1412_v14, %v1408_v6 }
 0x15d   : > { %v15020_v27 = vpack.c.bf16 %v1414_v55, %v1410_v22  ;;  %v726_v4 = vpop.f32.mrb[58].mxu0  ;;  %v15022_v30 = vpack.c.bf16 %v1413_v24, %v1409_v33 }
 0x15e   : > { %18151 = vst [vmem:[#allocation107_spill] sm:$0xff] %v15018_v21  ;;  %v1133_v5 = vpop.f32.mrb[58].mxu1  ;;  %v15024_v56 = vpack.c.bf16 %v1415_v31, %v1411_v36  ;;  %v1416_v29 = vmax.f32 %v726_v4, 0.0  ;;  %v728_v37 = vpop.f32.mrb[59].mxu0 }
 0x15f   : > { %18152 = vst [vmem:[#allocation108_spill] sm:$0xff] %v15020_v27  ;;  %18153 = vst [vmem:[#allocation109_spill] sm:$0xff] %v15022_v30  ;;  %v1418_v8 = vmax.f32 %v1133_v5, 0.0  ;;  %v1135_v19 = vpop.f32.mrb[59].mxu1  ;;  %v1417_v45 = vmax.f32 %v728_v37, 0.0  ;;  %3507 = vmatprep.mubr.bf16.mxu0 %v15022_v30 }
 0x160   : > { %18154 = vst [vmem:[#allocation110_spill] sm:$0xff] %v15024_v56  ;;  %v1419_v63 = vmax.f32 %v1135_v19, 0.0  ;;  %3738 = vmatprep.mubr.bf16.mxu1 %v15024_v56  ;;  %v15028_v6 = vpack.c.bf16 %v1416_v29, %v1412_v14  ;;  %3508 = vmatmul.mubr.bf16.gmra.mrb[164].mxu0 %v15018_v21 }
 0x161   : > { %v15030_v22 = vpack.c.bf16 %v1418_v8, %v1414_v55  ;;  %3739 = vmatmul.mubr.bf16.gmra.mrb[164].mxu1 %v15020_v27  ;;  %v15034_v33 = vpack.c.bf16 %v1417_v45, %v1413_v24  ;;  %v732_v5 = vpop.f32.mrb[60].mxu0 }
 0x162   : > { %18155 = vst [vmem:[#allocation111_spill] sm:$0xff] %v15028_v6  ;;  %v15036_v36 = vpack.c.bf16 %v1419_v63, %v1415_v31  ;;  %v1139_v4 = vpop.f32.mrb[60].mxu1  ;;  %v734_v37 = vpop.f32.mrb[61].mxu0  ;;  %v1420_v7 = vmax.f32 %v732_v5, 0.0 }
 0x163   : > { %18156 = vst [vmem:[#allocation112_spill] sm:$0xff] %v15030_v22  ;;  %18157 = vst [vmem:[#allocation113_spill] sm:$0xff] %v15034_v33  ;;  %v1141_v19 = vpop.f32.mrb[61].mxu1  ;;  %v1422_v38 = vmax.f32 %v1139_v4, 0.0  ;;  %v1421_v30 = vmax.f32 %v734_v37, 0.0 }
 0x164   : > { %18158 = vst [vmem:[#allocation114_spill] sm:$0xff] %v15036_v36  ;;  %v1423_v56 = vmax.f32 %v1141_v19, 0.0  ;;  %v15038_v14 = vpack.c.bf16 %v1420_v7, %v1416_v29 }
 0x165   : > { %v15040_v55 = vpack.c.bf16 %v1422_v38, %v1418_v8  ;;  %v738_v22 = vpop.f32.mrb[62].mxu0  ;;  %v15042_v6 = vpack.c.bf16 %v1421_v30, %v1417_v45 }
 0x166   : > { %18159 = vst [vmem:[#allocation115_spill] sm:$0xff] %v15038_v14  ;;  %v1145_v21 = vpop.f32.mrb[62].mxu1  ;;  %v15044_v24 = vpack.c.bf16 %v1423_v56, %v1419_v63  ;;  %v740_v31 = vpop.f32.mrb[63].mxu0  ;;  %v1424_v36 = vmax.f32 %v738_v22, 0.0 }
 0x167   : > { %18160 = vst [vmem:[#allocation116_spill] sm:$0xff] %v15040_v55  ;;  %18161 = vst [vmem:[#allocation117_spill] sm:$0xff] %v15042_v6  ;;  %v1147_v27 = vpop.f32.mrb[63].mxu1  ;;  %v1426_v33 = vmax.f32 %v1145_v21, 0.0  ;;  %3515 = vmatprep.mubr.bf16.mxu0 %v15042_v6  ;;  %v1425_v5 = vmax.f32 %v740_v31, 0.0 }
 0x168   : > { %18162 = vst [vmem:[#allocation118_spill] sm:$0xff] %v15044_v24  ;;  %3746 = vmatprep.mubr.bf16.mxu1 %v15044_v24  ;;  %v1427_v4 = vmax.f32 %v1147_v27, 0.0  ;;  %3516 = vmatmul.mubr.bf16.gmra.mrb[168].mxu0 %v15038_v14  ;;  %v15050_v8 = vpack.c.bf16 %v1424_v36, %v1420_v7 }
 0x169   : > { %3747 = vmatmul.mubr.bf16.gmra.mrb[168].mxu1 %v15040_v55  ;;  %v15052_v29 = vpack.c.bf16 %v1426_v33, %v1422_v38  ;;  %v744_v45 = vpop.f32.mrb[64].mxu0  ;;  %v15054_v37 = vpack.c.bf16 %v1425_v5, %v1421_v30 }
 0x16a   : > { %18163 = vst [vmem:[#allocation119_spill] sm:$0xff] %v15050_v8  ;;  %v1151_v63 = vpop.f32.mrb[64].mxu1  ;;  %v15056_v22 = vpack.c.bf16 %v1427_v4, %v1423_v56  ;;  %v746_v21 = vpop.f32.mrb[65].mxu0  ;;  %v1428_v6 = vmax.f32 %v744_v45, 0.0 }
 0x16b   : > { %18164 = vst [vmem:[#allocation120_spill] sm:$0xff] %v15052_v29  ;;  %18165 = vst [vmem:[#allocation121_spill] sm:$0xff] %v15054_v37  ;;  %v1153_v19 = vpop.f32.mrb[65].mxu1  ;;  %v1430_v24 = vmax.f32 %v1151_v63, 0.0  ;;  %v1429_v31 = vmax.f32 %v746_v21, 0.0 }
 0x16c   : > { %18166 = vst [vmem:[#allocation122_spill] sm:$0xff] %v15056_v22  ;;  %v1431_v27 = vmax.f32 %v1153_v19, 0.0  ;;  %v15058_v35 = vpack.c.bf16 %v1428_v6, %v1424_v36 }
 0x16d   : > { %v15060_v14 = vpack.c.bf16 %v1430_v24, %v1426_v33  ;;  %v750_v7 = vpop.f32.mrb[66].mxu0  ;;  %v15062_v38 = vpack.c.bf16 %v1429_v31, %v1425_v5 }
 0x16e   : > { %18167 = vst [vmem:[#allocation123_spill] sm:$0xff] %v15058_v35  ;;  %v1157_v55 = vpop.f32.mrb[66].mxu1  ;;  %v15064_v29 = vpack.c.bf16 %v1431_v27, %v1427_v4  ;;  %v752_v30 = vpop.f32.mrb[67].mxu0  ;;  %v1432_v56 = vmax.f32 %v750_v7, 0.0 }
 0x16f   : > { %18168 = vst [vmem:[#allocation124_spill] sm:$0xff] %v15060_v14  ;;  %18169 = vst [vmem:[#allocation125_spill] sm:$0xff] %v15062_v38  ;;  %v1159_v8 = vpop.f32.mrb[67].mxu1  ;;  %v1434_v22 = vmax.f32 %v1157_v55, 0.0  ;;  %3523 = vmatprep.mubr.bf16.mxu0 %v15062_v38  ;;  %v1433_v45 = vmax.f32 %v752_v30, 0.0 }
 0x170   : > { %18170 = vst [vmem:[#allocation126_spill] sm:$0xff] %v15064_v29  ;;  %3754 = vmatprep.mubr.bf16.mxu1 %v15064_v29  ;;  %v1435_v63 = vmax.f32 %v1159_v8, 0.0  ;;  %3524 = vmatmul.mubr.bf16.gmra.mrb[172].mxu0 %v15058_v35  ;;  %v15070_v33 = vpack.c.bf16 %v1432_v56, %v1428_v6 }
 0x171   : > { %3755 = vmatmul.mubr.bf16.gmra.mrb[172].mxu1 %v15060_v14  ;;  %v15072_v36 = vpack.c.bf16 %v1434_v22, %v1430_v24  ;;  %v756_v5 = vpop.f32.mrb[68].mxu0  ;;  %v15074_v21 = vpack.c.bf16 %v1433_v45, %v1429_v31 }
 0x172   : > { %18171 = vst [vmem:[#allocation127_spill] sm:$0xff] %v15070_v33  ;;  %v1163_v4 = vpop.f32.mrb[68].mxu1  ;;  %v15076_v19 = vpack.c.bf16 %v1435_v63, %v1431_v27  ;;  %v758_v55 = vpop.f32.mrb[69].mxu0  ;;  %v1436_v38 = vmax.f32 %v756_v5, 0.0 }
 0x173   : > { %18172 = vst [vmem:[#allocation128_spill] sm:$0xff] %v15072_v36  ;;  %18173 = vst [vmem:[#allocation129_spill] sm:$0xff] %v15074_v21  ;;  %v1165_v7 = vpop.f32.mrb[69].mxu1  ;;  %v1438_v29 = vmax.f32 %v1163_v4, 0.0  ;;  %v1437_v30 = vmax.f32 %v758_v55, 0.0 }
 0x174   : > { %18174 = vst [vmem:[#allocation130_spill] sm:$0xff] %v15076_v19  ;;  %v1439_v8 = vmax.f32 %v1165_v7, 0.0  ;;  %v15078_v37 = vpack.c.bf16 %v1436_v38, %v1432_v56 }
 0x175   : > { %v15080_v35 = vpack.c.bf16 %v1438_v29, %v1434_v22  ;;  %v762_v6 = vpop.f32.mrb[70].mxu0  ;;  %v15082_v24 = vpack.c.bf16 %v1437_v30, %v1433_v45 }
 0x176   : > { %18175 = vst [vmem:[#allocation131_spill] sm:$0xff] %v15078_v37  ;;  %v1169_v14 = vpop.f32.mrb[70].mxu1  ;;  %v15084_v36 = vpack.c.bf16 %v1439_v8, %v1435_v63  ;;  %v764_v31 = vpop.f32.mrb[71].mxu0  ;;  %v1440_v27 = vmax.f32 %v762_v6, 0.0 }
 0x177   : > { %18176 = vst [vmem:[#allocation132_spill] sm:$0xff] %v15080_v35  ;;  %18177 = vst [vmem:[#allocation133_spill] sm:$0xff] %v15082_v24  ;;  %v1171_v33 = vpop.f32.mrb[71].mxu1  ;;  %v1442_v19 = vmax.f32 %v1169_v14, 0.0  ;;  %3531 = vmatprep.mubr.bf16.mxu0 %v15082_v24  ;;  %v1441_v5 = vmax.f32 %v764_v31, 0.0 }
 0x178   : > { %18178 = vst [vmem:[#allocation134_spill] sm:$0xff] %v15084_v36  ;;  %3762 = vmatprep.mubr.bf16.mxu1 %v15084_v36  ;;  %v1443_v4 = vmax.f32 %v1171_v33, 0.0  ;;  %3532 = vmatmul.mubr.bf16.gmra.mrb[176].mxu0 %v15078_v37  ;;  %v15090_v22 = vpack.c.bf16 %v1440_v27, %v1436_v38 }
 0x179   : > { %3763 = vmatmul.mubr.bf16.gmra.mrb[176].mxu1 %v15080_v35  ;;  %v15092_v56 = vpack.c.bf16 %v1442_v19, %v1438_v29  ;;  %v768_v45 = vpop.f32.mrb[72].mxu0  ;;  %v15094_v55 = vpack.c.bf16 %v1441_v5, %v1437_v30 }
 0x17a   : > { %18179 = vst [vmem:[#allocation135_spill] sm:$0xff] %v15090_v22  ;;  %v1175_v63 = vpop.f32.mrb[72].mxu1  ;;  %v15096_v7 = vpack.c.bf16 %v1443_v4, %v1439_v8  ;;  %v770_v14 = vpop.f32.mrb[73].mxu0  ;;  %v1444_v24 = vmax.f32 %v768_v45, 0.0 }
 0x17b   : > { %18180 = vst [vmem:[#allocation136_spill] sm:$0xff] %v15092_v56  ;;  %18181 = vst [vmem:[#allocation137_spill] sm:$0xff] %v15094_v55  ;;  %v1177_v6 = vpop.f32.mrb[73].mxu1  ;;  %v1446_v36 = vmax.f32 %v1175_v63, 0.0  ;;  %v1445_v31 = vmax.f32 %v770_v14, 0.0 }
 0x17c   : > { %18182 = vst [vmem:[#allocation138_spill] sm:$0xff] %v15096_v7  ;;  %v1447_v33 = vmax.f32 %v1177_v6, 0.0  ;;  %v15098_v21 = vpack.c.bf16 %v1444_v24, %v1440_v27 }
 0x17d   : > { %v15100_v37 = vpack.c.bf16 %v1446_v36, %v1442_v19  ;;  %v774_v38 = vpop.f32.mrb[74].mxu0  ;;  %v15102_v29 = vpack.c.bf16 %v1445_v31, %v1441_v5 }
 0x17e   : > { %18183 = vst [vmem:[#allocation139_spill] sm:$0xff] %v15098_v21  ;;  %v1181_v35 = vpop.f32.mrb[74].mxu1  ;;  %v15104_v56 = vpack.c.bf16 %v1447_v33, %v1443_v4  ;;  %v776_v30 = vpop.f32.mrb[75].mxu0  ;;  %v1448_v8 = vmax.f32 %v774_v38, 0.0 }
 0x17f   : > { %18184 = vst [vmem:[#allocation140_spill] sm:$0xff] %v15100_v37  ;;  %18185 = vst [vmem:[#allocation141_spill] sm:$0xff] %v15102_v29  ;;  %v1183_v22 = vpop.f32.mrb[75].mxu1  ;;  %v1450_v7 = vmax.f32 %v1181_v35, 0.0  ;;  %3539 = vmatprep.mubr.bf16.mxu0 %v15102_v29  ;;  %v1449_v45 = vmax.f32 %v776_v30, 0.0 }
 0x180   : > { %18186 = vst [vmem:[#allocation142_spill] sm:$0xff] %v15104_v56  ;;  %3770 = vmatprep.mubr.bf16.mxu1 %v15104_v56  ;;  %v1451_v63 = vmax.f32 %v1183_v22, 0.0  ;;  %3540 = vmatmul.mubr.bf16.gmra.mrb[180].mxu0 %v15098_v21  ;;  %v15110_v19 = vpack.c.bf16 %v1448_v8, %v1444_v24 }
 0x181   : > { %3771 = vmatmul.mubr.bf16.gmra.mrb[180].mxu1 %v15100_v37  ;;  %v15112_v27 = vpack.c.bf16 %v1450_v7, %v1446_v36  ;;  %v780_v5 = vpop.f32.mrb[76].mxu0  ;;  %v15114_v14 = vpack.c.bf16 %v1449_v45, %v1445_v31 }
 0x182   : > { %18187 = vst [vmem:[#allocation143_spill] sm:$0xff] %v15110_v19  ;;  %v1187_v4 = vpop.f32.mrb[76].mxu1  ;;  %v15116_v6 = vpack.c.bf16 %v1451_v63, %v1447_v33  ;;  %v782_v35 = vpop.f32.mrb[77].mxu0  ;;  %v1452_v29 = vmax.f32 %v780_v5, 0.0 }
 0x183   : > { %18188 = vst [vmem:[#allocation144_spill] sm:$0xff] %v15112_v27  ;;  %18189 = vst [vmem:[#allocation145_spill] sm:$0xff] %v15114_v14  ;;  %v1189_v38 = vpop.f32.mrb[77].mxu1  ;;  %v1454_v56 = vmax.f32 %v1187_v4, 0.0  ;;  %v1453_v30 = vmax.f32 %v782_v35, 0.0 }
 0x184   : > { %18190 = vst [vmem:[#allocation146_spill] sm:$0xff] %v15116_v6  ;;  %v1455_v22 = vmax.f32 %v1189_v38, 0.0  ;;  %v15118_v55 = vpack.c.bf16 %v1452_v29, %v1448_v8 }
 0x185   : > { %v15120_v21 = vpack.c.bf16 %v1454_v56, %v1450_v7  ;;  %v786_v24 = vpop.f32.mrb[78].mxu0  ;;  %v15122_v36 = vpack.c.bf16 %v1453_v30, %v1449_v45 }
 0x186   : > { %18191 = vst [vmem:[#allocation147_spill] sm:$0xff] %v15118_v55  ;;  %v1193_v37 = vpop.f32.mrb[78].mxu1  ;;  %v15124_v27 = vpack.c.bf16 %v1455_v22, %v1451_v63  ;;  %v788_v31 = vpop.f32.mrb[79].mxu0  ;;  %v1456_v33 = vmax.f32 %v786_v24, 0.0 }
 0x187   : > { %18192 = vst [vmem:[#allocation148_spill] sm:$0xff] %v15120_v21  ;;  %18193 = vst [vmem:[#allocation149_spill] sm:$0xff] %v15122_v36  ;;  %v1195_v19 = vpop.f32.mrb[79].mxu1  ;;  %v1458_v6 = vmax.f32 %v1193_v37, 0.0  ;;  %3547 = vmatprep.mubr.bf16.mxu0 %v15122_v36  ;;  %v1457_v5 = vmax.f32 %v788_v31, 0.0 }
 0x188   : > { %18194 = vst [vmem:[#allocation150_spill] sm:$0xff] %v15124_v27  ;;  %3778 = vmatprep.mubr.bf16.mxu1 %v15124_v27  ;;  %v1459_v4 = vmax.f32 %v1195_v19, 0.0  ;;  %3548 = vmatmul.mubr.bf16.gmra.mrb[184].mxu0 %v15118_v55  ;;  %v15130_v7 = vpack.c.bf16 %v1456_v33, %v1452_v29 }
 0x189   : > { %3779 = vmatmul.mubr.bf16.gmra.mrb[184].mxu1 %v15120_v21  ;;  %v15132_v8 = vpack.c.bf16 %v1458_v6, %v1454_v56  ;;  %v792_v45 = vpop.f32.mrb[80].mxu0  ;;  %v15134_v35 = vpack.c.bf16 %v1457_v5, %v1453_v30 }
 0x18a   : > { %18195 = vst [vmem:[#allocation151_spill] sm:$0xff] %v15130_v7  ;;  %v1199_v63 = vpop.f32.mrb[80].mxu1  ;;  %v15136_v38 = vpack.c.bf16 %v1459_v4, %v1455_v22  ;;  %v794_v37 = vpop.f32.mrb[81].mxu0  ;;  %v1460_v36 = vmax.f32 %v792_v45, 0.0 }
 0x18b   : > { %18196 = vst [vmem:[#allocation152_spill] sm:$0xff] %v15132_v8  ;;  %18197 = vst [vmem:[#allocation153_spill] sm:$0xff] %v15134_v35  ;;  %v1201_v24 = vpop.f32.mrb[81].mxu1  ;;  %v1462_v27 = vmax.f32 %v1199_v63, 0.0  ;;  %v1461_v31 = vmax.f32 %v794_v37, 0.0 }
 0x18c   : > { %18198 = vst [vmem:[#allocation154_spill] sm:$0xff] %v15136_v38  ;;  %v1463_v19 = vmax.f32 %v1201_v24, 0.0  ;;  %v15138_v14 = vpack.c.bf16 %v1460_v36, %v1456_v33 }
 0x18d   : > { %v15140_v55 = vpack.c.bf16 %v1462_v27, %v1458_v6  ;;  %v798_v29 = vpop.f32.mrb[82].mxu0  ;;  %v15142_v56 = vpack.c.bf16 %v1461_v31, %v1457_v5 }
 0x18e   : > { %18199 = vst [vmem:[#allocation155_spill] sm:$0xff] %v15138_v14  ;;  %v1205_v21 = vpop.f32.mrb[82].mxu1  ;;  %v15144_v8 = vpack.c.bf16 %v1463_v19, %v1459_v4  ;;  %v800_v30 = vpop.f32.mrb[83].mxu0  ;;  %v1464_v22 = vmax.f32 %v798_v29, 0.0 }
 0x18f   : > { %18200 = vst [vmem:[#allocation156_spill] sm:$0xff] %v15140_v55  ;;  %18201 = vst [vmem:[#allocation157_spill] sm:$0xff] %v15142_v56  ;;  %v1207_v7 = vpop.f32.mrb[83].mxu1  ;;  %v1466_v38 = vmax.f32 %v1205_v21, 0.0  ;;  %3555 = vmatprep.mubr.bf16.mxu0 %v15142_v56  ;;  %v1465_v45 = vmax.f32 %v800_v30, 0.0 }
 0x190   : > { %18202 = vst [vmem:[#allocation158_spill] sm:$0xff] %v15144_v8  ;;  %3786 = vmatprep.mubr.bf16.mxu1 %v15144_v8  ;;  %v1467_v63 = vmax.f32 %v1207_v7, 0.0  ;;  %3556 = vmatmul.mubr.bf16.gmra.mrb[188].mxu0 %v15138_v14  ;;  %v15150_v6 = vpack.c.bf16 %v1464_v22, %v1460_v36 }
 0x191   : > { %3787 = vmatmul.mubr.bf16.gmra.mrb[188].mxu1 %v15140_v55  ;;  %v15152_v33 = vpack.c.bf16 %v1466_v38, %v1462_v27  ;;  %v804_v5 = vpop.f32.mrb[84].mxu0  ;;  %v15154_v37 = vpack.c.bf16 %v1465_v45, %v1461_v31 }
 0x192   : > { %18203 = vst [vmem:[#allocation159_spill] sm:$0xff] %v15150_v6  ;;  %v1211_v4 = vpop.f32.mrb[84].mxu1  ;;  %v15156_v24 = vpack.c.bf16 %v1467_v63, %v1463_v19  ;;  %v806_v21 = vpop.f32.mrb[85].mxu0  ;;  %v1468_v56 = vmax.f32 %v804_v5, 0.0 }
 0x193   : > { %18204 = vst [vmem:[#allocation160_spill] sm:$0xff] %v15152_v33  ;;  %18205 = vst [vmem:[#allocation161_spill] sm:$0xff] %v15154_v37  ;;  %v1213_v29 = vpop.f32.mrb[85].mxu1  ;;  %v1470_v8 = vmax.f32 %v1211_v4, 0.0  ;;  %v1469_v30 = vmax.f32 %v806_v21, 0.0 }
 0x194   : > { %18206 = vst [vmem:[#allocation162_spill] sm:$0xff] %v15156_v24  ;;  %v1471_v7 = vmax.f32 %v1213_v29, 0.0  ;;  %v15158_v35 = vpack.c.bf16 %v1468_v56, %v1464_v22 }
 0x195   : > { %v15160_v14 = vpack.c.bf16 %v1470_v8, %v1466_v38  ;;  %v810_v36 = vpop.f32.mrb[86].mxu0  ;;  %v15162_v27 = vpack.c.bf16 %v1469_v30, %v1465_v45 }
 0x196   : > { %18207 = vst [vmem:[#allocation163_spill] sm:$0xff] %v15158_v35  ;;  %v1217_v55 = vpop.f32.mrb[86].mxu1  ;;  %v15164_v33 = vpack.c.bf16 %v1471_v7, %v1467_v63  ;;  %v812_v31 = vpop.f32.mrb[87].mxu0  ;;  %v1472_v19 = vmax.f32 %v810_v36, 0.0 }
 0x197   : > { %18208 = vst [vmem:[#allocation164_spill] sm:$0xff] %v15160_v14  ;;  %18209 = vst [vmem:[#allocation165_spill] sm:$0xff] %v15162_v27  ;;  %v1219_v6 = vpop.f32.mrb[87].mxu1  ;;  %v1474_v24 = vmax.f32 %v1217_v55, 0.0  ;;  %3563 = vmatprep.mubr.bf16.mxu0 %v15162_v27  ;;  %v1473_v5 = vmax.f32 %v812_v31, 0.0 }
 0x198   : > { %18210 = vst [vmem:[#allocation166_spill] sm:$0xff] %v15164_v33  ;;  %3794 = vmatprep.mubr.bf16.mxu1 %v15164_v33  ;;  %v1475_v4 = vmax.f32 %v1219_v6, 0.0  ;;  %3564 = vmatmul.mubr.bf16.gmra.mrb[192].mxu0 %v15158_v35  ;;  %v15170_v38 = vpack.c.bf16 %v1472_v19, %v1468_v56 }
 0x199   : > { %3795 = vmatmul.mubr.bf16.gmra.mrb[192].mxu1 %v15160_v14  ;;  %v15172_v22 = vpack.c.bf16 %v1474_v24, %v1470_v8  ;;  %v816_v45 = vpop.f32.mrb[88].mxu0  ;;  %v15174_v21 = vpack.c.bf16 %v1473_v5, %v1469_v30 }
 0x19a   : > { %18211 = vst [vmem:[#allocation167_spill] sm:$0xff] %v15170_v38  ;;  %v1223_v63 = vpop.f32.mrb[88].mxu1  ;;  %v15176_v29 = vpack.c.bf16 %v1475_v4, %v1471_v7  ;;  %v818_v55 = vpop.f32.mrb[89].mxu0  ;;  %v1476_v27 = vmax.f32 %v816_v45, 0.0 }
 0x19b   : > { %18212 = vst [vmem:[#allocation168_spill] sm:$0xff] %v15172_v22  ;;  %18213 = vst [vmem:[#allocation169_spill] sm:$0xff] %v15174_v21  ;;  %v1225_v36 = vpop.f32.mrb[89].mxu1  ;;  %v1478_v33 = vmax.f32 %v1223_v63, 0.0  ;;  %v1477_v31 = vmax.f32 %v818_v55, 0.0 }
 0x19c   : > { %18214 = vst [vmem:[#allocation170_spill] sm:$0xff] %v15176_v29  ;;  %v1479_v6 = vmax.f32 %v1225_v36, 0.0  ;;  %v15178_v37 = vpack.c.bf16 %v1476_v27, %v1472_v19 }
 0x19d   : > { %v15180_v35 = vpack.c.bf16 %v1478_v33, %v1474_v24  ;;  %v822_v56 = vpop.f32.mrb[90].mxu0  ;;  %v15182_v8 = vpack.c.bf16 %v1477_v31, %v1473_v5 }
 0x19e   : > { %18215 = vst [vmem:[#allocation171_spill] sm:$0xff] %v15178_v37  ;;  %v1229_v14 = vpop.f32.mrb[90].mxu1  ;;  %v15184_v22 = vpack.c.bf16 %v1479_v6, %v1475_v4  ;;  %v824_v30 = vpop.f32.mrb[91].mxu0  ;;  %v1480_v7 = vmax.f32 %v822_v56, 0.0 }
 0x19f   : > { %18216 = vst [vmem:[#allocation172_spill] sm:$0xff] %v15180_v35  ;;  %18217 = vst [vmem:[#allocation173_spill] sm:$0xff] %v15182_v8  ;;  %v1231_v38 = vpop.f32.mrb[91].mxu1  ;;  %v1482_v29 = vmax.f32 %v1229_v14, 0.0  ;;  %3571 = vmatprep.mubr.bf16.mxu0 %v15182_v8  ;;  %v1481_v45 = vmax.f32 %v824_v30, 0.0 }
 0x1a0   : > { %18218 = vst [vmem:[#allocation174_spill] sm:$0xff] %v15184_v22  ;;  %3802 = vmatprep.mubr.bf16.mxu1 %v15184_v22  ;;  %v1483_v63 = vmax.f32 %v1231_v38, 0.0  ;;  %3572 = vmatmul.mubr.bf16.gmra.mrb[196].mxu0 %v15178_v37  ;;  %v15190_v24 = vpack.c.bf16 %v1480_v7, %v1476_v27 }
 0x1a1   : > { %3803 = vmatmul.mubr.bf16.gmra.mrb[196].mxu1 %v15180_v35  ;;  %v15192_v19 = vpack.c.bf16 %v1482_v29, %v1478_v33  ;;  %v828_v5 = vpop.f32.mrb[92].mxu0  ;;  %v15194_v55 = vpack.c.bf16 %v1481_v45, %v1477_v31 }
 0x1a2   : > { %18219 = vst [vmem:[#allocation175_spill] sm:$0xff] %v15190_v24  ;;  %v1235_v4 = vpop.f32.mrb[92].mxu1  ;;  %v15196_v36 = vpack.c.bf16 %v1483_v63, %v1479_v6  ;;  %v830_v14 = vpop.f32.mrb[93].mxu0  ;;  %v1484_v8 = vmax.f32 %v828_v5, 0.0 }
 0x1a3   : > { %18220 = vst [vmem:[#allocation176_spill] sm:$0xff] %v15192_v19  ;;  %18221 = vst [vmem:[#allocation177_spill] sm:$0xff] %v15194_v55  ;;  %v1237_v56 = vpop.f32.mrb[93].mxu1  ;;  %v1486_v22 = vmax.f32 %v1235_v4, 0.0  ;;  %v1485_v30 = vmax.f32 %v830_v14, 0.0 }
 0x1a4   : > { %18222 = vst [vmem:[#allocation178_spill] sm:$0xff] %v15196_v36  ;;  %v1487_v38 = vmax.f32 %v1237_v56, 0.0  ;;  %v15198_v21 = vpack.c.bf16 %v1484_v8, %v1480_v7 }
 0x1a5   : > { %v15200_v37 = vpack.c.bf16 %v1486_v22, %v1482_v29  ;;  %v834_v27 = vpop.f32.mrb[94].mxu0  ;;  %v15202_v33 = vpack.c.bf16 %v1485_v30, %v1481_v45 }
 0x1a6   : > { %18223 = vst [vmem:[#allocation179_spill] sm:$0xff] %v15198_v21  ;;  %v1241_v35 = vpop.f32.mrb[94].mxu1  ;;  %v15204_v19 = vpack.c.bf16 %v1487_v38, %v1483_v63  ;;  %v836_v31 = vpop.f32.mrb[95].mxu0  ;;  %v1488_v6 = vmax.f32 %v834_v27, 0.0 }
 0x1a7   : > { %18224 = vst [vmem:[#allocation180_spill] sm:$0xff] %v15200_v37  ;;  %18225 = vst [vmem:[#allocation181_spill] sm:$0xff] %v15202_v33  ;;  %v1243_v24 = vpop.f32.mrb[95].mxu1  ;;  %v1490_v36 = vmax.f32 %v1241_v35, 0.0  ;;  %3579 = vmatprep.mubr.bf16.mxu0 %v15202_v33  ;;  %v1489_v5 = vmax.f32 %v836_v31, 0.0 }
 0x1a8   : > { %18226 = vst [vmem:[#allocation182_spill] sm:$0xff] %v15204_v19  ;;  %3810 = vmatprep.mubr.bf16.mxu1 %v15204_v19  ;;  %v1491_v4 = vmax.f32 %v1243_v24, 0.0  ;;  %3580 = vmatmul.mubr.bf16.gmra.mrb[200].mxu0 %v15198_v21  ;;  %v15210_v29 = vpack.c.bf16 %v1488_v6, %v1484_v8 }
 0x1a9   : > { %3811 = vmatmul.mubr.bf16.gmra.mrb[200].mxu1 %v15200_v37  ;;  %v15212_v7 = vpack.c.bf16 %v1490_v36, %v1486_v22  ;;  %v840_v45 = vpop.f32.mrb[96].mxu0  ;;  %v15214_v14 = vpack.c.bf16 %v1489_v5, %v1485_v30 }
 0x1aa   : > { %18227 = vst [vmem:[#allocation183_spill] sm:$0xff] %v15210_v29  ;;  %v1247_v63 = vpop.f32.mrb[96].mxu1  ;;  %v15216_v56 = vpack.c.bf16 %v1491_v4, %v1487_v38  ;;  %v842_v35 = vpop.f32.mrb[97].mxu0  ;;  %v15218_v33 = vmax.f32 %v840_v45, 0.0 }
 0x1ab   : > { %18228 = vst [vmem:[#allocation184_spill] sm:$0xff] %v15212_v7  ;;  %18229 = vst [vmem:[#allocation185_spill] sm:$0xff] %v15214_v14  ;;  %v1249_v27 = vpop.f32.mrb[97].mxu1  ;;  %v15220_v31 = vmax.f32 %v1247_v63, 0.0  ;;  %v15222_v24 = vmax.f32 %v842_v35, 0.0 }
 0x1ac   : > { %18230 = vst [vmem:[#allocation186_spill] sm:$0xff] %v15216_v56  ;;  %18231 = vst [vmem:[#allocation187_spill] sm:$0xff] %v15218_v33  ;;  %v15224_v19 = vmax.f32 %v1249_v27, 0.0  ;;  %v15227_v8 = vpack.c.bf16 %v15218_v33, %v1488_v6 }
 0x1ad   : > { %18232 = vst [vmem:[#allocation188_spill] sm:$0xff] %v15220_v31  ;;  %18233 = vst [vmem:[#allocation189_spill] sm:$0xff] %v15222_v24  ;;  %v15230_v22 = vpack.c.bf16 %v15220_v31, %v1490_v36  ;;  %v846_v30 = vpop.f32.mrb[98].mxu0  ;;  %v15233_v38 = vpack.c.bf16 %v15222_v24, %v1489_v5 }
 0x1ae   : > { %18234 = vst [vmem:[#allocation190_spill] sm:$0xff] %v15224_v19  ;;  %18235 = vst [vmem:[#allocation191_spill] sm:$0xff] %v15227_v8  ;;  %v1253_v37 = vpop.f32.mrb[98].mxu1  ;;  %v15236_v45 = vpack.c.bf16 %v15224_v19, %v1491_v4  ;;  %v848_v63 = vpop.f32.mrb[99].mxu0  ;;  %v1496_v35 = vmax.f32 %v846_v30, 0.0 }
 0x1af   : > { %18236 = vst [vmem:[#allocation192_spill] sm:$0xff] %v15230_v22  ;;  %18237 = vst [vmem:[#allocation193_spill] sm:$0xff] %v15233_v38  ;;  %v1255_v21 = vpop.f32.mrb[99].mxu1  ;;  %v1498_v7 = vmax.f32 %v1253_v37, 0.0  ;;  %3587 = vmatprep.mubr.bf16.mxu0 %v15233_v38  ;;  %v1497_v6 = vmax.f32 %v848_v63, 0.0 }
 0x1b0   : > { %18238 = vst [vmem:[#allocation194_spill] sm:$0xff] %v15236_v45  ;;  %3818 = vmatprep.mubr.bf16.mxu1 %v15236_v45  ;;  %v1499_v27 = vmax.f32 %v1255_v21, 0.0  ;;  %3588 = vmatmul.mubr.bf16.gmra.mrb[204].mxu0 %v15227_v8  ;;  %v15243_v36 = vpack.c.bf16 %v1496_v35, %v15218_v33 }
 0x1b1   : > { %3819 = vmatmul.mubr.bf16.gmra.mrb[204].mxu1 %v15230_v22  ;;  %v15246_v5 = vpack.c.bf16 %v1498_v7, %v15220_v31  ;;  %v852_v4 = vpop.f32.mrb[100].mxu0  ;;  %v15249_v37 = vpack.c.bf16 %v1497_v6, %v15222_v24 }
 0x1b2   : > { %18239 = vst [vmem:[#allocation195_spill] sm:$0xff] %v15243_v36  ;;  %v1259_v29 = vpop.f32.mrb[100].mxu1  ;;  %v15252_v30 = vpack.c.bf16 %v1499_v27, %v15224_v19  ;;  %v854_v63 = vpop.f32.mrb[101].mxu0  ;;  %v1500_v45 = vmax.f32 %v852_v4, 0.0 }
 0x1b3   : > { %18240 = vst [vmem:[#allocation196_spill] sm:$0xff] %v15246_v5  ;;  %18241 = vst [vmem:[#allocation197_spill] sm:$0xff] %v15249_v37  ;;  %v1261_v21 = vpop.f32.mrb[101].mxu1  ;;  %v1502_v8 = vmax.f32 %v1259_v29, 0.0  ;;  %v1501_v38 = vmax.f32 %v854_v63, 0.0 }
 0x1b4   : > { %18242 = vst [vmem:[#allocation198_spill] sm:$0xff] %v15252_v30  ;;  %v1503_v22 = vmax.f32 %v1261_v21, 0.0  ;;  %v15254_v56 = vpack.c.bf16 %v1500_v45, %v1496_v35 }
 0x1b5   : > { %v15256_v36 = vpack.c.bf16 %v1502_v8, %v1498_v7  ;;  %v858_v31 = vpop.f32.mrb[102].mxu0  ;;  %v15258_v33 = vpack.c.bf16 %v1501_v38, %v1497_v6 }
 0x1b6   : > { %18243 = vst [vmem:[#allocation199_spill] sm:$0xff] %v15254_v56  ;;  %v1265_v5 = vpop.f32.mrb[102].mxu1  ;;  %v15260_v14 = vpack.c.bf16 %v1503_v22, %v1499_v27  ;;  %v860_v37 = vpop.f32.mrb[103].mxu0  ;;  %v1504_v19 = vmax.f32 %v858_v31, 0.0 }
 0x1b7   : > { %18244 = vst [vmem:[#allocation200_spill] sm:$0xff] %v15256_v36  ;;  %18245 = vst [vmem:[#allocation201_spill] sm:$0xff] %v15258_v33  ;;  %v1267_v24 = vpop.f32.mrb[103].mxu1  ;;  %v1506_v30 = vmax.f32 %v1265_v5, 0.0  ;;  %3595 = vmatprep.mubr.bf16.mxu0 %v15258_v33  ;;  %v1505_v29 = vmax.f32 %v860_v37, 0.0 }
 0x1b8   : > { %18246 = vst [vmem:[#allocation202_spill] sm:$0xff] %v15260_v14  ;;  %3826 = vmatprep.mubr.bf16.mxu1 %v15260_v14  ;;  %v1507_v4 = vmax.f32 %v1267_v24, 0.0  ;;  %3596 = vmatmul.mubr.bf16.gmra.mrb[208].mxu0 %v15254_v56  ;;  %v15266_v7 = vpack.c.bf16 %v1504_v19, %v1500_v45 }
 0x1b9   : > { %3827 = vmatmul.mubr.bf16.gmra.mrb[208].mxu1 %v15256_v36  ;;  %v864_v35 = vpop.f32.mrb[104].mxu0  ;;  %v15268_v27 = vpack.c.bf16 %v1505_v29, %v1505_v29  ;;  %v15272_v31 = vpack.c.bf16 %v1506_v30, %v1502_v8  ;;  %v15274_v5 = vpack.c.bf16 %v1505_v29, %v1501_v38  ;;  %v15282_v29 = vpack.c.bf16 %v1504_v19, %v1504_v19 }
 0x1ba   : > { %18247 = vst [vmem:[#allocation203_spill] sm:$0xff] %v15266_v7  ;;  %v1271_v6 = vpop.f32.mrb[104].mxu1  ;;  %v15270_v63 = vpack.c.bf16 %v1507_v4, %v1507_v4  ;;  %v866_v21 = vpop.f32.mrb[105].mxu0  ;;  %v15276_v37 = vpack.c.bf16 %v1507_v4, %v1503_v22  ;;  %v1508_v24 = vmax.f32 %v864_v35, 0.0  ;;  %v15280_v7 = vpack.c.bf16 %v1506_v30, %v1506_v30 }
 0x1bb   : > { %18248 = vst [vmem:[#allocation204_spill] sm:$0xff] %v15268_v27  ;;  %18250 = vst [vmem:[#allocation206_spill] sm:$0xff] %v15272_v31  ;;  %v1273_v14 = vpop.f32.mrb[105].mxu1  ;;  %3603 = vmatprep.mubr.bf16.mxu0 %v15268_v27  ;;  %v1510_v45 = vmax.f32 %v1271_v6, 0.0  ;;  %v1509_v33 = vmax.f32 %v866_v21, 0.0  ;;  %v13876_v6 = vld [vmem:[%s17625_s2 + $0x400] sm:$0xff]  }
 0x1bc   : > { %18249 = vst [vmem:[#allocation205_spill] sm:$0xff] %v15270_v63  ;;  %18251 = vst [vmem:[#allocation207_spill] sm:$0xff] %v15274_v5  ;;  %3834 = vmatprep.mubr.bf16.mxu1 %v15270_v63  ;;  %v1511_v55 = vmax.f32 %v1273_v14, 0.0  ;;  %v13877_v21 = vld [vmem:[%s17625_s2 + $0x500] sm:$0xff]  }
 0x1bd   : > { %18252 = vst [vmem:[#allocation208_spill] sm:$0xff] %v15276_v37  ;;  %18253 = vst [vmem:[#allocation209_spill] sm:$0xff] %v15280_v7  ;;  %v870_v36 = vpop.f32.mrb[106].mxu0  ;;  %v13916_v63 = vld [vmem:[%s17625_s2 + $0x4a0] sm:$0xff]  }
 0x1be   : > { %v1277_v56 = vpop.f32.mrb[106].mxu1  ;;  %v1512_v8 = vmax.f32 %v870_v36, 0.0  ;;  %v872_v31 = vpop.f32.mrb[107].mxu0 }
 0x1bf   : > { %v1514_v38 = vmax.f32 %v1277_v56, 0.0  ;;  %v1279_v5 = vpop.f32.mrb[107].mxu1  ;;  %v1513_v22 = vmax.f32 %v872_v31, 0.0 }
 0x1c0   : > { %v1515_v4 = vmax.f32 %v1279_v5, 0.0  ;;  %v15284_v37 = vpack.c.bf16 %v1512_v8, %v1508_v24  ;;  %3604 = vmatmul.mubr.bf16.gmra.mrb[212].mxu0 %v15282_v29  ;;  %v13878_v8 = vld [vmem:[%s17625_s2 + $0x408] sm:$0xff]  }
 0x1c1   : > { %v15286_v27 = vpack.c.bf16 %v1514_v38, %v1510_v45  ;;  %3835 = vmatmul.mubr.bf16.gmra.mrb[212].mxu1 %v15280_v7  ;;  %4283 = vmatprep.mubr.bf16.mxu0 %v14631_v61  ;;  %v15292_v14 = vpop.f32.mrb[108].mxu0  ;;  %v15296_v19 = vpack.c.bf16 %v1513_v22, %v1509_v33 }
 0x1c2   : > { %18254 = vst [vmem:[#allocation210_spill] sm:$0xff] %v15284_v37  ;;  %4514 = vmatprep.mubr.bf16.mxu1 %v14633_v62  ;;  %18256 = vst [vmem:[#allocation212_spill] sm:$0xff] %v15292_v14  ;;  %v15294_v56 = vpop.f32.mrb[108].mxu1  ;;  %v15298_v36 = vpack.c.bf16 %v1515_v4, %v1511_v55  ;;  %v15300_v30 = vpop.f32.mrb[109].mxu0  ;;  %v13879_v4 = vld [vmem:[%s17625_s2 + $0x508] sm:$0xff]   ;;  %v18275_v62 = vld [vmem:[#allocation106_spill] sm:$0xff] }
 0x1c3   : > { %18255 = vst [vmem:[#allocation211_spill] sm:$0xff] %v15286_v27  ;;  %18257 = vst [vmem:[#allocation213_spill] sm:$0xff] %v15294_v56  ;;  %v15302_v35 = vpop.f32.mrb[109].mxu1  ;;  %v13885_v56 = vld [vmem:[%s17625_s2 + $0x520] sm:$0xff]   ;;  %v13889_v27 = vld [vmem:[%s17625_s2 + $0x530] sm:$0xff]  }
 0x1c4   : > { %18258 = vst [vmem:[#allocation214_spill] sm:$0xff] %v15296_v19  ;;  %18259 = vst [vmem:[#allocation215_spill] sm:$0xff] %v15298_v36  ;;  %v13897_v36 = vld [vmem:[%s17625_s2 + $0x550] sm:$0xff]  }
 0x1c5   : > { %18260 = vst [vmem:[#allocation216_spill] sm:$0xff] %v15300_v30  ;;  %18261 = vst [vmem:[#allocation217_spill] sm:$0xff] %v15302_v35  ;;  %v882_v31 = vpop.f32.mrb[110].mxu0  ;;  %v13893_v35 = vld [vmem:[%s17625_s2 + $0x540] sm:$0xff]  }
 0x1c6   : > { %v1289_v5 = vpop.f32.mrb[110].mxu1  ;;  %v884_v24 = vpop.f32.mrb[111].mxu0  ;;  %v13881_v31 = vld [vmem:[%s17625_s2 + $0x510] sm:$0xff]  }
 0x1c7   : > { %v1291_v45 = vpop.f32.mrb[111].mxu1  ;;  %v13882_v5 = vld [vmem:[%s17625_s2 + $0x418] sm:$0xff]  }
 0x1c8   : > { %4284 = vmatmul.mubr.bf16.vlgmr.msra.gmra.mrb[216].mxu0 %v14627_v57 }
 0x1c9   : > { %4515 = vmatmul.mubr.bf16.vlgmr.msra.gmra.mrb[216].mxu1 %v14629_v58  ;;  %4971 = vmatpush1.bf16.msra.mxu0 %v13876_v6  ;;  %v888_v55 = vpop.f32.mrb[112].mxu0  ;;  %v13880_v6 = vld [vmem:[%s17625_s2 + $0x410] sm:$0xff]   ;;  %v18273_v58 = vld [vmem:[#allocation96_spill] sm:$0xff] }
 0x1ca   : > { %4291 = vmatprep.mubr.bf16.mxu0 %v14646_v20  ;;  %v1295_v33 = vpop.f32.mrb[112].mxu1  ;;  %4522 = vmatprep.mubr.bf16.mxu1 %v14648_v11  ;;  %v890_v38 = vpop.f32.mrb[113].mxu0  ;;  %v18324_v20 = vld [vmem:[#allocation188_spill] sm:$0xff] }
 0x1cb   : > { %6348 = vmatpush1.bf16.msra.mxu1 %v13877_v21  ;;  %v1297_v22 = vpop.f32.mrb[113].mxu1  ;;  %4972 = vmatprep.subr.bf16.mxu0 %v18094_v3  ;;  %v13883_v21 = vld [vmem:[%s17625_s2 + $0x518] sm:$0xff]  }
 0x1cc   : > { %6349 = vmatprep.subr.bf16.mxu1 %v18094_v3 }
 0x1cd   : > { %4973 = vmatpush1.bf16.msra.mxu0 %v13878_v8 }
 0x1ce   : > { %4974 = vmatprep.subr.bf16.mxu0 %v18094_v3 }
 0x1cf   : > { %6350 = vmatpush1.bf16.msra.mxu1 %v13879_v4 }
 0x1d0   : > { %6351 = vmatprep.subr.bf16.mxu1 %v18094_v3  ;;  %4292 = vmatmul.mubr.bf16.gmra.mrb[220].mxu0 %v14642_v16 }
 0x1d1   : > { %4523 = vmatmul.mubr.bf16.gmra.mrb[220].mxu1 %v14644_v17  ;;  %4299 = vmatprep.mubr.bf16.mxu0 %v14678_v47 }
 0x1d2   : > { %4530 = vmatprep.mubr.bf16.mxu1 %v14680_v48  ;;  %4975 = vmatpush1.bf16.msra.mxu0 %v13880_v6  ;;  %v18271_v48 = vld [vmem:[#allocation98_spill] sm:$0xff] }
 0x1d3   : > { %6352 = vmatpush1.bf16.msra.mxu1 %v13881_v31  ;;  %v3413_v24 = vpop.f32.mrb[116].mxu0  ;;  %4976 = vmatprep.subr.bf16.mxu0 %v18094_v3  ;;  %v13884_v31 = vld [vmem:[%s17625_s2 + $0x420] sm:$0xff]  }
 0x1d4   : > { %v3644_v45 = vpop.f32.mrb[116].mxu1  ;;  %6353 = vmatprep.subr.bf16.mxu1 %v18094_v3  ;;  %v3415_v55 = vpop.f32.mrb[117].mxu0 }
 0x1d5   : > { %v3646_v33 = vpop.f32.mrb[117].mxu1  ;;  %v15342_v8 = vadd.f32 %v3644_v45, %v3413_v24  ;;  %v3416_v38 = vpop.f32.mrb[118].mxu0 }
 0x1d6   : > { %v3647_v22 = vpop.f32.mrb[118].mxu1  ;;  %v3418_v4 = vpop.f32.mrb[119].mxu0  ;;  %4977 = vmatpush1.bf16.msra.mxu0 %v13882_v5  ;;  %v13886_v5 = vld [vmem:[%s17625_s2 + $0x428] sm:$0xff]  }
 0x1d7   : > { %v3649_v6 = vpop.f32.mrb[119].mxu1  ;;  %6354 = vmatpush1.bf16.msra.mxu1 %v13883_v21  ;;  %v15350_v14 = vadd.f32 %v3647_v22, %v3416_v38  ;;  %4978 = vmatprep.subr.bf16.mxu0 %v18094_v3  ;;  %v13887_v21 = vld [vmem:[%s17625_s2 + $0x528] sm:$0xff]  }
 0x1d8   : > { %6355 = vmatprep.subr.bf16.mxu1 %v18094_v3  ;;  %4300 = vmatmul.mubr.bf16.gmra.mrb[224].mxu0 %v14668_v41 }
 0x1d9   : > { %4531 = vmatmul.mubr.bf16.gmra.mrb[224].mxu1 %v14670_v42  ;;  %4307 = vmatprep.mubr.bf16.mxu0 %v14708_v12  ;;  %v18269_v42 = vld [vmem:[#allocation88_spill] sm:$0xff] }
 0x1da   : > { %4538 = vmatprep.mubr.bf16.mxu1 %v14710_v13  ;;  %4979 = vmatpush1.bf16.msra.mxu0 %v13884_v31  ;;  %v13888_v31 = vld [vmem:[%s17625_s2 + $0x430] sm:$0xff]  }
 0x1db   : > { %6356 = vmatpush1.bf16.msra.mxu1 %v13885_v56  ;;  %v3421_v24 = vpop.f32.mrb[120].mxu0  ;;  %4980 = vmatprep.subr.bf16.mxu0 %v18094_v3 }
 0x1dc   : > { %v3652_v45 = vpop.f32.mrb[120].mxu1  ;;  %6357 = vmatprep.subr.bf16.mxu1 %v18094_v3  ;;  %v3423_v55 = vpop.f32.mrb[121].mxu0 }
 0x1dd   : > { %v3654_v33 = vpop.f32.mrb[121].mxu1  ;;  %v15366_v38 = vadd.f32 %v3652_v45, %v3421_v24  ;;  %v3424_v22 = vpop.f32.mrb[122].mxu0 }
 0x1de   : > { %v3655_v56 = vpop.f32.mrb[122].mxu1  ;;  %v3426_v4 = vpop.f32.mrb[123].mxu0  ;;  %4981 = vmatpush1.bf16.msra.mxu0 %v13886_v5  ;;  %v13890_v5 = vld [vmem:[%s17625_s2 + $0x438] sm:$0xff]  }
 0x1df   : > { %v3657_v6 = vpop.f32.mrb[123].mxu1  ;;  %6358 = vmatpush1.bf16.msra.mxu1 %v13887_v21  ;;  %v15374_v37 = vadd.f32 %v3655_v56, %v3424_v22  ;;  %4982 = vmatprep.subr.bf16.mxu0 %v18094_v3  ;;  %v13891_v21 = vld [vmem:[%s17625_s2 + $0x538] sm:$0xff]  }
 0x1e0   : > { %6359 = vmatprep.subr.bf16.mxu1 %v18094_v3  ;;  %4308 = vmatmul.mubr.bf16.gmra.mrb[228].mxu0 %v14702_v9 }
 0x1e1   : > { %4539 = vmatmul.mubr.bf16.gmra.mrb[228].mxu1 %v14704_v10  ;;  %4315 = vmatprep.mubr.bf16.mxu0 %v14744_v52 }
 0x1e2   : > { %4546 = vmatprep.mubr.bf16.mxu1 %v14746_v53  ;;  %4983 = vmatpush1.bf16.msra.mxu0 %v13888_v31  ;;  %v13892_v31 = vld [vmem:[%s17625_s2 + $0x440] sm:$0xff]   ;;  %v18267_v53 = vld [vmem:[#allocation90_spill] sm:$0xff] }
 0x1e3   : > { %6360 = vmatpush1.bf16.msra.mxu1 %v13889_v27  ;;  %v3429_v24 = vpop.f32.mrb[124].mxu0  ;;  %4984 = vmatprep.subr.bf16.mxu0 %v18094_v3 }
 0x1e4   : > { %v3660_v45 = vpop.f32.mrb[124].mxu1  ;;  %6361 = vmatprep.subr.bf16.mxu1 %v18094_v3  ;;  %v3431_v55 = vpop.f32.mrb[125].mxu0 }
 0x1e5   : > { %v3662_v33 = vpop.f32.mrb[125].mxu1  ;;  %v15390_v22 = vadd.f32 %v3660_v45, %v3429_v24  ;;  %v3432_v56 = vpop.f32.mrb[126].mxu0 }
 0x1e6   : > { %v3663_v27 = vpop.f32.mrb[126].mxu1  ;;  %v3434_v4 = vpop.f32.mrb[127].mxu0  ;;  %4985 = vmatpush1.bf16.msra.mxu0 %v13890_v5  ;;  %v13894_v5 = vld [vmem:[%s17625_s2 + $0x448] sm:$0xff]  }
 0x1e7   : > { %v3665_v6 = vpop.f32.mrb[127].mxu1  ;;  %6362 = vmatpush1.bf16.msra.mxu1 %v13891_v21  ;;  %v15398_v30 = vadd.f32 %v3663_v27, %v3432_v56  ;;  %4986 = vmatprep.subr.bf16.mxu0 %v18094_v3  ;;  %v13895_v21 = vld [vmem:[%s17625_s2 + $0x548] sm:$0xff]  }
 0x1e8   : > { %6363 = vmatprep.subr.bf16.mxu1 %v18094_v3  ;;  %4316 = vmatmul.mubr.bf16.gmra.mrb[232].mxu0 %v14738_v50 }
 0x1e9   : > { %4547 = vmatmul.mubr.bf16.gmra.mrb[232].mxu1 %v14740_v51  ;;  %4323 = vmatprep.mubr.bf16.mxu0 %v14780_v43  ;;  %v18265_v51 = vld [vmem:[#allocation80_spill] sm:$0xff] }
 0x1ea   : > { %4554 = vmatprep.mubr.bf16.mxu1 %v14782_v44  ;;  %4987 = vmatpush1.bf16.msra.mxu0 %v13892_v31  ;;  %v13896_v31 = vld [vmem:[%s17625_s2 + $0x450] sm:$0xff]  }
 0x1eb   : > { %6364 = vmatpush1.bf16.msra.mxu1 %v13893_v35  ;;  %v3437_v24 = vpop.f32.mrb[128].mxu0  ;;  %4988 = vmatprep.subr.bf16.mxu0 %v18094_v3 }
 0x1ec   : > { %v3668_v45 = vpop.f32.mrb[128].mxu1  ;;  %6365 = vmatprep.subr.bf16.mxu1 %v18094_v3  ;;  %v3439_v55 = vpop.f32.mrb[129].mxu0 }
 0x1ed   : > { %v3670_v33 = vpop.f32.mrb[129].mxu1  ;;  %v15414_v56 = vadd.f32 %v3668_v45, %v3437_v24  ;;  %v3440_v27 = vpop.f32.mrb[130].mxu0 }
 0x1ee   : > { %v3671_v35 = vpop.f32.mrb[130].mxu1  ;;  %v3442_v4 = vpop.f32.mrb[131].mxu0  ;;  %4989 = vmatpush1.bf16.msra.mxu0 %v13894_v5  ;;  %v13898_v5 = vld [vmem:[%s17625_s2 + $0x458] sm:$0xff]  }
 0x1ef   : > { %v3673_v6 = vpop.f32.mrb[131].mxu1  ;;  %6366 = vmatpush1.bf16.msra.mxu1 %v13895_v21  ;;  %v15422_v19 = vadd.f32 %v3671_v35, %v3440_v27  ;;  %4990 = vmatprep.subr.bf16.mxu0 %v18094_v3  ;;  %v13899_v21 = vld [vmem:[%s17625_s2 + $0x558] sm:$0xff]  }
 0x1f0   : > { %6367 = vmatprep.subr.bf16.mxu1 %v18094_v3  ;;  %4324 = vmatmul.mubr.bf16.gmra.mrb[236].mxu0 %v14774_v39 }
 0x1f1   : > { %4555 = vmatmul.mubr.bf16.gmra.mrb[236].mxu1 %v14776_v40  ;;  %4331 = vmatprep.mubr.bf16.mxu0 %v14816_v54 }
 0x1f2   : > { %4562 = vmatprep.mubr.bf16.mxu1 %v14818_v1  ;;  %4991 = vmatpush1.bf16.msra.mxu0 %v13896_v31  ;;  %v13900_v31 = vld [vmem:[%s17625_s2 + $0x460] sm:$0xff]  }
 0x1f3   : > { %6368 = vmatpush1.bf16.msra.mxu1 %v13897_v36  ;;  %v3445_v24 = vpop.f32.mrb[132].mxu0  ;;  %4992 = vmatprep.subr.bf16.mxu0 %v18094_v3  ;;  %v13901_v1 = vld [vmem:[%s17625_s2 + $0x560] sm:$0xff]  }
 0x1f4   : > { %v3676_v45 = vpop.f32.mrb[132].mxu1  ;;  %6369 = vmatprep.subr.bf16.mxu1 %v18094_v3  ;;  %v3447_v55 = vpop.f32.mrb[133].mxu0 }
 0x1f5   : > { %v3678_v33 = vpop.f32.mrb[133].mxu1  ;;  %v15438_v27 = vadd.f32 %v3676_v45, %v3445_v24  ;;  %v3448_v35 = vpop.f32.mrb[134].mxu0 }
 0x1f6   : > { %v3679_v36 = vpop.f32.mrb[134].mxu1  ;;  %v3450_v4 = vpop.f32.mrb[135].mxu0  ;;  %4993 = vmatpush1.bf16.msra.mxu0 %v13898_v5  ;;  %v13902_v5 = vld [vmem:[%s17625_s2 + $0x468] sm:$0xff]  }
 0x1f7   : > { %v3681_v6 = vpop.f32.mrb[135].mxu1  ;;  %6370 = vmatpush1.bf16.msra.mxu1 %v13899_v21  ;;  %v15446_v40 = vadd.f32 %v3679_v36, %v3448_v35  ;;  %4994 = vmatprep.subr.bf16.mxu0 %v18094_v3  ;;  %v13903_v21 = vld [vmem:[%s17625_s2 + $0x568] sm:$0xff]  }
 0x1f8   : > { %6371 = vmatprep.subr.bf16.mxu1 %v18094_v3  ;;  %4332 = vmatmul.mubr.bf16.gmra.mrb[240].mxu0 %v14810_v46 }
 0x1f9   : > { %4563 = vmatmul.mubr.bf16.gmra.mrb[240].mxu1 %v14812_v49  ;;  %4339 = vmatprep.mubr.bf16.mxu0 %v14852_v15 }
 0x1fa   : > { %4570 = vmatprep.mubr.bf16.mxu1 %v14854_v23  ;;  %4995 = vmatpush1.bf16.msra.mxu0 %v13900_v31  ;;  %v13904_v31 = vld [vmem:[%s17625_s2 + $0x470] sm:$0xff]  }
 0x1fb   : > { %6372 = vmatpush1.bf16.msra.mxu1 %v13901_v1  ;;  %v3453_v24 = vpop.f32.mrb[136].mxu0  ;;  %4996 = vmatprep.subr.bf16.mxu0 %v18094_v3  ;;  %v13905_v23 = vld [vmem:[%s17625_s2 + $0x570] sm:$0xff]  }
 0x1fc   : > { %v3684_v45 = vpop.f32.mrb[136].mxu1  ;;  %6373 = vmatprep.subr.bf16.mxu1 %v18094_v3  ;;  %v3455_v55 = vpop.f32.mrb[137].mxu0 }
 0x1fd   : > { %v3686_v33 = vpop.f32.mrb[137].mxu1  ;;  %v15462_v35 = vadd.f32 %v3684_v45, %v3453_v24  ;;  %v3456_v36 = vpop.f32.mrb[138].mxu0  ;;  %v13906_v55 = vld [vmem:[%s17625_s2 + $0x478] sm:$0xff]  }
 0x1fe   : > { %v3687_v1 = vpop.f32.mrb[138].mxu1  ;;  %v3458_v4 = vpop.f32.mrb[139].mxu0  ;;  %4997 = vmatpush1.bf16.msra.mxu0 %v13902_v5 }
 0x1ff   : > { %v3689_v6 = vpop.f32.mrb[139].mxu1  ;;  %6374 = vmatpush1.bf16.msra.mxu1 %v13903_v21  ;;  %v15470_v49 = vadd.f32 %v3687_v1, %v3456_v36  ;;  %4998 = vmatprep.subr.bf16.mxu0 %v18094_v3 }
 0x200   : > { %6375 = vmatprep.subr.bf16.mxu1 %v18094_v3  ;;  %4340 = vmatmul.mubr.bf16.gmra.mrb[244].mxu0 %v14846_v18 }
 0x201   : > { %4571 = vmatmul.mubr.bf16.gmra.mrb[244].mxu1 %v14848_v59  ;;  %4347 = vmatprep.mubr.bf16.mxu0 %v14888_v28 }
 0x202   : > { %4578 = vmatprep.mubr.bf16.mxu1 %v14890_v0  ;;  %4999 = vmatpush1.bf16.msra.mxu0 %v13904_v31 }
 0x203   : > { %6376 = vmatpush1.bf16.msra.mxu1 %v13905_v23  ;;  %v3461_v5 = vpop.f32.mrb[140].mxu0  ;;  %5000 = vmatprep.subr.bf16.mxu0 %v18094_v3  ;;  %v13907_v23 = vld [vmem:[%s17625_s2 + $0x578] sm:$0xff]  }
 0x204   : > { %v3692_v21 = vpop.f32.mrb[140].mxu1  ;;  %6377 = vmatprep.subr.bf16.mxu1 %v18094_v3  ;;  %v3463_v24 = vpop.f32.mrb[141].mxu0 }
 0x205   : > { %v3694_v45 = vpop.f32.mrb[141].mxu1  ;;  %v15483_v33 = vadd.f32 %v3692_v21, %v3461_v5  ;;  %v3464_v36 = vpop.f32.mrb[142].mxu0 }
 0x206   : > { %v3695_v1 = vpop.f32.mrb[142].mxu1  ;;  %v3466_v4 = vpop.f32.mrb[143].mxu0  ;;  %5001 = vmatpush1.bf16.msra.mxu0 %v13906_v55 }
 0x207   : > { %v3697_v6 = vpop.f32.mrb[143].mxu1  ;;  %v15488_v31 = vadd.f32 %v3695_v1, %v3464_v36  ;;  %5202 = vmatprep.subr.bf16.mxu0 %v18094_v3  ;;  %6378 = vmatpush1.bf16.msra.mxu1 %v13907_v23  ;;  %v18263_v23 = vld [vmem:[#allocation82_spill] sm:$0xff] }
 0x208   : > { %4348 = vmatmul.mubr.bf16.gmra.mrb[248].mxu0 %v14882_v34  ;;  %6579 = vmatprep.subr.bf16.mxu1 %v18094_v3 }
 0x209   : > { %4579 = vmatmul.mubr.bf16.gmra.mrb[248].mxu1 %v14884_v60  ;;  %4355 = vmatprep.mubr.bf16.mxu0 %v14924_v32 }
 0x20a   : > { %4586 = vmatprep.mubr.bf16.mxu1 %v14926_v2  ;;  %v18262_v2 = vld [vmem:[#allocation81_spill] sm:$0xff] }
 0x20b   : > { %v3469_v5 = vpop.f32.mrb[144].mxu0 }
 0x20c   : > { %v3700_v21 = vpop.f32.mrb[144].mxu1  ;;  %v3471_v24 = vpop.f32.mrb[145].mxu0 }
 0x20d   : > { %v3702_v45 = vpop.f32.mrb[145].mxu1  ;;  %v15496_v55 = vadd.f32 %v3700_v21, %v3469_v5  ;;  %v3472_v36 = vpop.f32.mrb[146].mxu0 }
 0x20e   : > { %v3703_v1 = vpop.f32.mrb[146].mxu1  ;;  %v3474_v4 = vpop.f32.mrb[147].mxu0 }
 0x20f   : > { %v3705_v6 = vpop.f32.mrb[147].mxu1  ;;  %v15498_v0 = vadd.f32 %v3703_v1, %v3472_v36  ;;  %v18264_v1 = vld [vmem:[#allocation79_spill] sm:$0xff] }
 0x210   : > { %4356 = vmatmul.mubr.bf16.gmra.mrb[252].mxu0 %v14918_v25 }
 0x211   : > { %4587 = vmatmul.mubr.bf16.gmra.mrb[252].mxu1 %v14920_v26  ;;  %4363 = vmatprep.mubr.bf16.mxu0 %v18262_v2  ;;  %v18266_v26 = vld [vmem:[#allocation89_spill] sm:$0xff] }
 0x212   : > { %4594 = vmatprep.mubr.bf16.mxu1 %v18263_v23 }
 0x213   : > { %v3477_v60 = vpop.f32.mrb[148].mxu0 }
 0x214   : > { %v3708_v59 = vpop.f32.mrb[148].mxu1  ;;  %v3479_v24 = vpop.f32.mrb[149].mxu0 }
 0x215   : > { %v3710_v45 = vpop.f32.mrb[149].mxu1  ;;  %v15504_v5 = vadd.f32 %v3708_v59, %v3477_v60  ;;  %v3480_v21 = vpop.f32.mrb[150].mxu0 }
 0x216   : > { %v3711_v44 = vpop.f32.mrb[150].mxu1  ;;  %v3482_v4 = vpop.f32.mrb[151].mxu0 }
 0x217   : > { %v3713_v6 = vpop.f32.mrb[151].mxu1  ;;  %v15506_v36 = vadd.f32 %v3711_v44, %v3480_v21  ;;  %v18268_v21 = vld [vmem:[#allocation87_spill] sm:$0xff] }
 0x218   : > { %4364 = vmatmul.mubr.bf16.gmra.mrb[0].mxu0 %v18264_v1 }
 0x219   : > { %4595 = vmatmul.mubr.bf16.gmra.mrb[0].mxu1 %v18265_v51  ;;  %4371 = vmatprep.mubr.bf16.mxu0 %v18266_v26  ;;  %v18270_v51 = vld [vmem:[#allocation97_spill] sm:$0xff] }
 0x21a   : > { %4602 = vmatprep.mubr.bf16.mxu1 %v18267_v53 }
 0x21b   : > { %v3485_v23 = vpop.f32.mrb[152].mxu0 }
 0x21c   : > { %v3716_v10 = vpop.f32.mrb[152].mxu1  ;;  %v3487_v24 = vpop.f32.mrb[153].mxu0 }
 0x21d   : > { %v3718_v45 = vpop.f32.mrb[153].mxu1  ;;  %v15512_v59 = vadd.f32 %v3716_v10, %v3485_v23  ;;  %v3488_v60 = vpop.f32.mrb[154].mxu0 }
 0x21e   : > { %v3719_v13 = vpop.f32.mrb[154].mxu1  ;;  %v3490_v4 = vpop.f32.mrb[155].mxu0 }
 0x21f   : > { %v3721_v6 = vpop.f32.mrb[155].mxu1  ;;  %v15514_v44 = vadd.f32 %v3719_v13, %v3488_v60  ;;  %v18272_v60 = vld [vmem:[#allocation95_spill] sm:$0xff] }
 0x220   : > { %4372 = vmatmul.mubr.bf16.gmra.mrb[4].mxu0 %v18268_v21 }
 0x221   : > { %4603 = vmatmul.mubr.bf16.gmra.mrb[4].mxu1 %v18269_v42  ;;  %4379 = vmatprep.mubr.bf16.mxu0 %v18270_v51  ;;  %v18274_v42 = vld [vmem:[#allocation105_spill] sm:$0xff] }
 0x222   : > { %4610 = vmatprep.mubr.bf16.mxu1 %v18271_v48 }
 0x223   : > { %v3493_v53 = vpop.f32.mrb[156].mxu0 }
 0x224   : > { %v3724_v17 = vpop.f32.mrb[156].mxu1  ;;  %v3495_v24 = vpop.f32.mrb[157].mxu0 }
 0x225   : > { %v3726_v45 = vpop.f32.mrb[157].mxu1  ;;  %v15520_v10 = vadd.f32 %v3724_v17, %v3493_v53  ;;  %v3496_v23 = vpop.f32.mrb[158].mxu0 }
 0x226   : > { %v3727_v11 = vpop.f32.mrb[158].mxu1  ;;  %v3498_v4 = vpop.f32.mrb[159].mxu0 }
 0x227   : > { %v3729_v6 = vpop.f32.mrb[159].mxu1  ;;  %v15522_v13 = vadd.f32 %v3727_v11, %v3496_v23  ;;  %v18276_v23 = vld [vmem:[#allocation103_spill] sm:$0xff] }
 0x228   : > { %4380 = vmatmul.mubr.bf16.gmra.mrb[8].mxu0 %v18272_v60  ;;  %v18277_v60 = vld [vmem:[#allocation104_spill] sm:$0xff] }
 0x229   : > { %4611 = vmatmul.mubr.bf16.gmra.mrb[8].mxu1 %v18273_v58  ;;  %4387 = vmatprep.mubr.bf16.mxu0 %v18274_v42  ;;  %v18278_v58 = vld [vmem:[#allocation113_spill] sm:$0xff]  ;;  %v18279_v42 = vld [vmem:[#allocation114_spill] sm:$0xff] }
 0x22a   : > { %4618 = vmatprep.mubr.bf16.mxu1 %v18275_v62 }
 0x22b   : > { %v3501_v48 = vpop.f32.mrb[160].mxu0 }
 0x22c   : > { %v3732_v51 = vpop.f32.mrb[160].mxu1  ;;  %v3503_v24 = vpop.f32.mrb[161].mxu0 }
 0x22d   : > { %v3734_v45 = vpop.f32.mrb[161].mxu1  ;;  %v15528_v17 = vadd.f32 %v3732_v51, %v3501_v48  ;;  %v3504_v53 = vpop.f32.mrb[162].mxu0 }
 0x22e   : > { %v3735_v21 = vpop.f32.mrb[162].mxu1  ;;  %v3506_v4 = vpop.f32.mrb[163].mxu0 }
 0x22f   : > { %v3737_v6 = vpop.f32.mrb[163].mxu1  ;;  %v15530_v11 = vadd.f32 %v3735_v21, %v3504_v53  ;;  %v18280_v53 = vld [vmem:[#allocation111_spill] sm:$0xff] }
 0x230   : > { %4388 = vmatmul.mubr.bf16.gmra.mrb[12].mxu0 %v18276_v23  ;;  %v18281_v23 = vld [vmem:[#allocation112_spill] sm:$0xff] }
 0x231   : > { %4619 = vmatmul.mubr.bf16.gmra.mrb[12].mxu1 %v18277_v60  ;;  %4395 = vmatprep.mubr.bf16.mxu0 %v18278_v58  ;;  %v18282_v60 = vld [vmem:[#allocation121_spill] sm:$0xff]  ;;  %v18283_v58 = vld [vmem:[#allocation122_spill] sm:$0xff] }
 0x232   : > { %4626 = vmatprep.mubr.bf16.mxu1 %v18279_v42 }
 0x233   : > { %v3509_v62 = vpop.f32.mrb[164].mxu0 }
 0x234   : > { %v3740_v26 = vpop.f32.mrb[164].mxu1  ;;  %v3511_v24 = vpop.f32.mrb[165].mxu0 }
 0x235   : > { %v3742_v45 = vpop.f32.mrb[165].mxu1  ;;  %v15536_v48 = vadd.f32 %v3740_v26, %v3509_v62  ;;  %v3512_v51 = vpop.f32.mrb[166].mxu0 }
 0x236   : > { %v3743_v1 = vpop.f32.mrb[166].mxu1  ;;  %v3514_v4 = vpop.f32.mrb[167].mxu0 }
 0x237   : > { %v3745_v6 = vpop.f32.mrb[167].mxu1  ;;  %v15538_v21 = vadd.f32 %v3743_v1, %v3512_v51  ;;  %v18284_v51 = vld [vmem:[#allocation119_spill] sm:$0xff] }
 0x238   : > { %4396 = vmatmul.mubr.bf16.gmra.mrb[16].mxu0 %v18280_v53  ;;  %v18285_v53 = vld [vmem:[#allocation120_spill] sm:$0xff] }
 0x239   : > { %4627 = vmatmul.mubr.bf16.gmra.mrb[16].mxu1 %v18281_v23  ;;  %4403 = vmatprep.mubr.bf16.mxu0 %v18282_v60  ;;  %v18286_v23 = vld [vmem:[#allocation129_spill] sm:$0xff]  ;;  %v18287_v60 = vld [vmem:[#allocation130_spill] sm:$0xff] }
 0x23a   : > { %4634 = vmatprep.mubr.bf16.mxu1 %v18283_v58 }
 0x23b   : > { %v3517_v42 = vpop.f32.mrb[168].mxu0 }
 0x23c   : > { %v3748_v2 = vpop.f32.mrb[168].mxu1  ;;  %v3519_v24 = vpop.f32.mrb[169].mxu0 }
 0x23d   : > { %v3750_v45 = vpop.f32.mrb[169].mxu1  ;;  %v15544_v62 = vadd.f32 %v3748_v2, %v3517_v42  ;;  %v3520_v26 = vpop.f32.mrb[170].mxu0 }
 0x23e   : > { %v3751_v25 = vpop.f32.mrb[170].mxu1  ;;  %v3522_v4 = vpop.f32.mrb[171].mxu0 }
 0x23f   : > { %v3753_v6 = vpop.f32.mrb[171].mxu1  ;;  %v15546_v1 = vadd.f32 %v3751_v25, %v3520_v26  ;;  %v18288_v26 = vld [vmem:[#allocation127_spill] sm:$0xff] }
 0x240   : > { %4404 = vmatmul.mubr.bf16.gmra.mrb[20].mxu0 %v18284_v51  ;;  %v18289_v51 = vld [vmem:[#allocation128_spill] sm:$0xff] }
 0x241   : > { %4635 = vmatmul.mubr.bf16.gmra.mrb[20].mxu1 %v18285_v53  ;;  %4411 = vmatprep.mubr.bf16.mxu0 %v18286_v23  ;;  %v18290_v53 = vld [vmem:[#allocation137_spill] sm:$0xff]  ;;  %v18291_v23 = vld [vmem:[#allocation138_spill] sm:$0xff] }
 0x242   : > { %4642 = vmatprep.mubr.bf16.mxu1 %v18287_v60 }
 0x243   : > { %v3525_v58 = vpop.f32.mrb[172].mxu0 }
 0x244   : > { %v3756_v32 = vpop.f32.mrb[172].mxu1  ;;  %v3527_v24 = vpop.f32.mrb[173].mxu0 }
 0x245   : > { %v3758_v45 = vpop.f32.mrb[173].mxu1  ;;  %v15552_v42 = vadd.f32 %v3756_v32, %v3525_v58  ;;  %v3528_v2 = vpop.f32.mrb[174].mxu0 }
 0x246   : > { %v3759_v34 = vpop.f32.mrb[174].mxu1  ;;  %v3530_v4 = vpop.f32.mrb[175].mxu0 }
 0x247   : > { %v3761_v6 = vpop.f32.mrb[175].mxu1  ;;  %v15554_v25 = vadd.f32 %v3759_v34, %v3528_v2  ;;  %v18292_v2 = vld [vmem:[#allocation135_spill] sm:$0xff] }
 0x248   : > { %4412 = vmatmul.mubr.bf16.gmra.mrb[24].mxu0 %v18288_v26  ;;  %v18293_v26 = vld [vmem:[#allocation136_spill] sm:$0xff] }
 0x249   : > { %4643 = vmatmul.mubr.bf16.gmra.mrb[24].mxu1 %v18289_v51  ;;  %4419 = vmatprep.mubr.bf16.mxu0 %v18290_v53  ;;  %v18294_v51 = vld [vmem:[#allocation145_spill] sm:$0xff]  ;;  %v18295_v53 = vld [vmem:[#allocation146_spill] sm:$0xff] }
 0x24a   : > { %4650 = vmatprep.mubr.bf16.mxu1 %v18291_v23 }
 0x24b   : > { %v3533_v60 = vpop.f32.mrb[176].mxu0 }
 0x24c   : > { %v3764_v28 = vpop.f32.mrb[176].mxu1  ;;  %v3535_v24 = vpop.f32.mrb[177].mxu0 }
 0x24d   : > { %v3766_v45 = vpop.f32.mrb[177].mxu1  ;;  %v15560_v58 = vadd.f32 %v3764_v28, %v3533_v60  ;;  %v3536_v32 = vpop.f32.mrb[178].mxu0 }
 0x24e   : > { %v3767_v18 = vpop.f32.mrb[178].mxu1  ;;  %v3538_v4 = vpop.f32.mrb[179].mxu0 }
 0x24f   : > { %v3769_v6 = vpop.f32.mrb[179].mxu1  ;;  %v15562_v34 = vadd.f32 %v3767_v18, %v3536_v32  ;;  %v18296_v32 = vld [vmem:[#allocation143_spill] sm:$0xff] }
 0x250   : > { %4420 = vmatmul.mubr.bf16.gmra.mrb[28].mxu0 %v18292_v2  ;;  %v18297_v2 = vld [vmem:[#allocation144_spill] sm:$0xff] }
 0x251   : > { %4651 = vmatmul.mubr.bf16.gmra.mrb[28].mxu1 %v18293_v26  ;;  %4427 = vmatprep.mubr.bf16.mxu0 %v18294_v51  ;;  %v18298_v26 = vld [vmem:[#allocation153_spill] sm:$0xff]  ;;  %v18299_v51 = vld [vmem:[#allocation154_spill] sm:$0xff] }
 0x252   : > { %4658 = vmatprep.mubr.bf16.mxu1 %v18295_v53 }
 0x253   : > { %v3541_v23 = vpop.f32.mrb[180].mxu0 }
 0x254   : > { %v3772_v15 = vpop.f32.mrb[180].mxu1  ;;  %v3543_v24 = vpop.f32.mrb[181].mxu0 }
 0x255   : > { %v3774_v45 = vpop.f32.mrb[181].mxu1  ;;  %v15568_v28 = vadd.f32 %v3772_v15, %v3541_v23  ;;  %v3544_v60 = vpop.f32.mrb[182].mxu0 }
 0x256   : > { %v3775_v46 = vpop.f32.mrb[182].mxu1  ;;  %v3546_v4 = vpop.f32.mrb[183].mxu0 }
 0x257   : > { %v3777_v6 = vpop.f32.mrb[183].mxu1  ;;  %v15570_v18 = vadd.f32 %v3775_v46, %v3544_v60  ;;  %v18300_v60 = vld [vmem:[#allocation151_spill] sm:$0xff] }
 0x258   : > { %4428 = vmatmul.mubr.bf16.gmra.mrb[32].mxu0 %v18296_v32  ;;  %v18301_v32 = vld [vmem:[#allocation152_spill] sm:$0xff] }
 0x259   : > { %4659 = vmatmul.mubr.bf16.gmra.mrb[32].mxu1 %v18297_v2  ;;  %4435 = vmatprep.mubr.bf16.mxu0 %v18298_v26  ;;  %v18302_v2 = vld [vmem:[#allocation161_spill] sm:$0xff]  ;;  %v18303_v26 = vld [vmem:[#allocation162_spill] sm:$0xff] }
 0x25a   : > { %4666 = vmatprep.mubr.bf16.mxu1 %v18299_v51 }
 0x25b   : > { %v3549_v53 = vpop.f32.mrb[184].mxu0 }
 0x25c   : > { %v3780_v54 = vpop.f32.mrb[184].mxu1  ;;  %v3551_v24 = vpop.f32.mrb[185].mxu0 }
 0x25d   : > { %v3782_v45 = vpop.f32.mrb[185].mxu1  ;;  %v15576_v15 = vadd.f32 %v3780_v54, %v3549_v53  ;;  %v3552_v23 = vpop.f32.mrb[186].mxu0 }
 0x25e   : > { %v3783_v39 = vpop.f32.mrb[186].mxu1  ;;  %v3554_v4 = vpop.f32.mrb[187].mxu0 }
 0x25f   : > { %v3785_v6 = vpop.f32.mrb[187].mxu1  ;;  %v15578_v46 = vadd.f32 %v3783_v39, %v3552_v23  ;;  %v18304_v23 = vld [vmem:[#allocation159_spill] sm:$0xff] }
 0x260   : > { %4436 = vmatmul.mubr.bf16.gmra.mrb[36].mxu0 %v18300_v60  ;;  %v18305_v60 = vld [vmem:[#allocation160_spill] sm:$0xff] }
 0x261   : > { %4667 = vmatmul.mubr.bf16.gmra.mrb[36].mxu1 %v18301_v32  ;;  %4443 = vmatprep.mubr.bf16.mxu0 %v18302_v2  ;;  %v18306_v32 = vld [vmem:[#allocation169_spill] sm:$0xff]  ;;  %v18307_v2 = vld [vmem:[#allocation170_spill] sm:$0xff] }
 0x262   : > { %4674 = vmatprep.mubr.bf16.mxu1 %v18303_v26 }
 0x263   : > { %v3557_v51 = vpop.f32.mrb[188].mxu0 }
 0x264   : > { %v3788_v43 = vpop.f32.mrb[188].mxu1  ;;  %v3559_v24 = vpop.f32.mrb[189].mxu0 }
 0x265   : > { %v3790_v45 = vpop.f32.mrb[189].mxu1  ;;  %v15584_v54 = vadd.f32 %v3788_v43, %v3557_v51  ;;  %v3560_v53 = vpop.f32.mrb[190].mxu0 }
 0x266   : > { %v3791_v50 = vpop.f32.mrb[190].mxu1  ;;  %v3562_v4 = vpop.f32.mrb[191].mxu0 }
 0x267   : > { %v3793_v6 = vpop.f32.mrb[191].mxu1  ;;  %v15586_v39 = vadd.f32 %v3791_v50, %v3560_v53  ;;  %v18308_v53 = vld [vmem:[#allocation167_spill] sm:$0xff] }
 0x268   : > { %4444 = vmatmul.mubr.bf16.gmra.mrb[40].mxu0 %v18304_v23  ;;  %v18309_v23 = vld [vmem:[#allocation168_spill] sm:$0xff] }
 0x269   : > { %4675 = vmatmul.mubr.bf16.gmra.mrb[40].mxu1 %v18305_v60  ;;  %4451 = vmatprep.mubr.bf16.mxu0 %v18306_v32  ;;  %v18310_v60 = vld [vmem:[#allocation177_spill] sm:$0xff]  ;;  %v18311_v32 = vld [vmem:[#allocation178_spill] sm:$0xff] }
 0x26a   : > { %4682 = vmatprep.mubr.bf16.mxu1 %v18307_v2 }
 0x26b   : > { %v3565_v26 = vpop.f32.mrb[192].mxu0 }
 0x26c   : > { %v3796_v52 = vpop.f32.mrb[192].mxu1  ;;  %v3567_v24 = vpop.f32.mrb[193].mxu0 }
 0x26d   : > { %v3798_v45 = vpop.f32.mrb[193].mxu1  ;;  %v15592_v43 = vadd.f32 %v3796_v52, %v3565_v26  ;;  %v3568_v51 = vpop.f32.mrb[194].mxu0 }
 0x26e   : > { %v3799_v9 = vpop.f32.mrb[194].mxu1  ;;  %v3570_v4 = vpop.f32.mrb[195].mxu0 }
 0x26f   : > { %v3801_v6 = vpop.f32.mrb[195].mxu1  ;;  %v15594_v50 = vadd.f32 %v3799_v9, %v3568_v51  ;;  %v18312_v51 = vld [vmem:[#allocation175_spill] sm:$0xff] }
 0x270   : > { %4452 = vmatmul.mubr.bf16.gmra.mrb[44].mxu0 %v18308_v53  ;;  %v18313_v53 = vld [vmem:[#allocation176_spill] sm:$0xff] }
 0x271   : > { %4683 = vmatmul.mubr.bf16.gmra.mrb[44].mxu1 %v18309_v23  ;;  %4459 = vmatprep.mubr.bf16.mxu0 %v18310_v60  ;;  %v18314_v23 = vld [vmem:[#allocation185_spill] sm:$0xff]  ;;  %v18315_v60 = vld [vmem:[#allocation186_spill] sm:$0xff] }
 0x272   : > { %4690 = vmatprep.mubr.bf16.mxu1 %v18311_v32 }
 0x273   : > { %v3573_v2 = vpop.f32.mrb[196].mxu0 }
 0x274   : > { %v3804_v12 = vpop.f32.mrb[196].mxu1  ;;  %v3575_v24 = vpop.f32.mrb[197].mxu0 }
 0x275   : > { %v3806_v45 = vpop.f32.mrb[197].mxu1  ;;  %v15600_v52 = vadd.f32 %v3804_v12, %v3573_v2  ;;  %v3576_v26 = vpop.f32.mrb[198].mxu0 }
 0x276   : > { %v3807_v41 = vpop.f32.mrb[198].mxu1  ;;  %v3578_v4 = vpop.f32.mrb[199].mxu0 }
 0x277   : > { %v3809_v6 = vpop.f32.mrb[199].mxu1  ;;  %v15602_v9 = vadd.f32 %v3807_v41, %v3576_v26  ;;  %v18316_v26 = vld [vmem:[#allocation189_spill] sm:$0xff] }
 0x278   : > { %4460 = vmatmul.mubr.bf16.gmra.mrb[48].mxu0 %v18312_v51  ;;  %v15614_v51 = vpack.c.bf16 %v18316_v26, %v18316_v26  ;;  %v18322_v26 = vld [vmem:[#allocation187_spill] sm:$0xff] }
 0x279   : > { %4691 = vmatmul.mubr.bf16.gmra.mrb[48].mxu1 %v18313_v53  ;;  %4467 = vmatprep.mubr.bf16.mxu0 %v18314_v23  ;;  %v18318_v53 = vld [vmem:[#allocation190_spill] sm:$0xff] }
 0x27a   : > { %4698 = vmatprep.mubr.bf16.mxu1 %v18315_v60  ;;  %18317 = vst [vmem:[#allocation189_spill] sm:$0xff] %v15614_v51  ;;  %v15618_v23 = vpack.c.bf16 %v18318_v53, %v18318_v53  ;;  %v18320_v60 = vld [vmem:[#allocation183_spill] sm:$0xff]  ;;  %v15628_v53 = vpack.c.bf16 %v18322_v26, %v18322_v26 }
 0x27b   : > { %v3581_v32 = vpop.f32.mrb[200].mxu0 }
 0x27c   : > { %v3812_v47 = vpop.f32.mrb[200].mxu1  ;;  %v3583_v24 = vpop.f32.mrb[201].mxu0  ;;  %18319 = vst [vmem:[#allocation190_spill] sm:$0xff] %v15618_v23  ;;  %18323 = vst [vmem:[#allocation187_spill] sm:$0xff] %v15628_v53 }
 0x27d   : > { %v3814_v45 = vpop.f32.mrb[201].mxu1  ;;  %v15608_v12 = vadd.f32 %v3812_v47, %v3581_v32  ;;  %v3584_v2 = vpop.f32.mrb[202].mxu0  ;;  %v18321_v24 = vld [vmem:[#allocation184_spill] sm:$0xff] }
 0x27e   : > { %v3815_v16 = vpop.f32.mrb[202].mxu1  ;;  %v3586_v4 = vpop.f32.mrb[203].mxu0 }
 0x27f   : > { %v3817_v6 = vpop.f32.mrb[203].mxu1  ;;  %v15610_v41 = vadd.f32 %v3815_v16, %v3584_v2 }
 0x280   : > { %4468 = vmatmul.mubr.bf16.gmra.mrb[52].mxu0 %v18320_v60  ;;  %v15632_v60 = vpack.c.bf16 %v18324_v20, %v18324_v20 }
 0x281   : > { %4699 = vmatmul.mubr.bf16.gmra.mrb[52].mxu1 %v18321_v24  ;;  %4475 = vmatprep.mubr.bf16.mxu0 %v15614_v51 }
 0x282   : > { %4706 = vmatprep.mubr.bf16.mxu1 %v15618_v23  ;;  %18325 = vst [vmem:[#allocation188_spill] sm:$0xff] %v15632_v60 }
 0x283   : > { %v3589_v47 = vpop.f32.mrb[204].mxu0 }
 0x284   : > { %v3820_v32 = vpop.f32.mrb[204].mxu1  ;;  %v3591_v16 = vpop.f32.mrb[205].mxu0 }
 0x285   : > { %v3822_v45 = vpop.f32.mrb[205].mxu1  ;;  %v15624_v2 = vadd.f32 %v3820_v32, %v3589_v47  ;;  %v3592_v4 = vpop.f32.mrb[206].mxu0  ;;  %v18326_v47 = vld [vmem:[#allocation13_spill] sm:$0xff] }
 0x286   : > { %v3823_v6 = vpop.f32.mrb[206].mxu1  ;;  %v3594_v24 = vpop.f32.mrb[207].mxu0 }
 0x287   : > { %v3825_v51 = vpop.f32.mrb[207].mxu1  ;;  %v15634_v57 = vadd.f32 %v3823_v6, %v3592_v4  ;;  %v13909_v6 = vld [vmem:[%s17625_s2 + $0x580] sm:$0xff]  }
 0x288   : > { %4476 = vmatmul.mubr.bf16.gmra.mrb[56].mxu0 %v15628_v53  ;;  %v13908_v51 = vld [vmem:[%s17625_s2 + $0x480] sm:$0xff]  }
 0x289   : > { %4707 = vmatmul.mubr.bf16.gmra.mrb[56].mxu1 %v15632_v60  ;;  %5002 = vmatprep.mubr.bf16.mxu0 %v18326_v47 }
 0x28a   : > { %6379 = vmatprep.mubr.bf16.mxu1 %v18326_v47  ;;  %v18327_v47 = vld [vmem:[#allocation11_spill] sm:$0xff] }
 0x28b   : > { %v3597_v32 = vpop.f32.mrb[208].mxu0 }
 0x28c   : > { %v3828_v16 = vpop.f32.mrb[208].mxu1  ;;  %v3599_v45 = vpop.f32.mrb[209].mxu0 }
 0x28d   : > { %v3830_v26 = vpop.f32.mrb[209].mxu1  ;;  %v15640_v23 = vadd.f32 %v3828_v16, %v3597_v32  ;;  %v3600_v20 = vpop.f32.mrb[210].mxu0  ;;  %v18328_v32 = vld [vmem:[#allocation21_spill] sm:$0xff]  ;;  %v13910_v16 = vld [vmem:[%s17625_s2 + $0x488] sm:$0xff]  }
 0x28e   : > { %v3831_v61 = vpop.f32.mrb[210].mxu1  ;;  %v3602_v24 = vpop.f32.mrb[211].mxu0  ;;  %v13911_v45 = vld [vmem:[%s17625_s2 + $0x588] sm:$0xff]  }
 0x28f   : > { %v3833_v4 = vpop.f32.mrb[211].mxu1  ;;  %v15648_v60 = vadd.f32 %v3831_v61, %v3600_v20 }
 0x290   : > { %5003 = vmatmul.mubr.bf16.vlgmr.msra.gmra.mrb[60].mxu0 %v18327_v47 }
 0x291   : > { %6380 = vmatmul.mubr.bf16.vlgmr.msra.gmra.mrb[60].mxu1 %v18327_v47  ;;  %5203 = vmatpush1.bf16.msra.mxu0 %v13908_v51 }
 0x292   : > { %5010 = vmatprep.mubr.bf16.mxu0 %v18328_v32  ;;  %6387 = vmatprep.mubr.bf16.mxu1 %v18328_v32  ;;  %v13913_v32 = vld [vmem:[%s17625_s2 + $0x590] sm:$0xff]  }
 0x293   : > { %6580 = vmatpush1.bf16.msra.mxu1 %v13909_v6  ;;  %v3605_v61 = vpop.f32.mrb[212].mxu0  ;;  %5204 = vmatprep.subr.bf16.mxu0 %v18094_v3  ;;  %v13912_v6 = vld [vmem:[%s17625_s2 + $0x490] sm:$0xff]  }
 0x294   : > { %v3836_v26 = vpop.f32.mrb[212].mxu1  ;;  %6581 = vmatprep.subr.bf16.mxu1 %v18094_v3  ;;  %v3606_v20 = vpop.f32.mrb[213].mxu0  ;;  %v18329_v61 = vld [vmem:[#allocation19_spill] sm:$0xff] }
 0x295   : > { %v3837_v51 = vpop.f32.mrb[213].mxu1  ;;  %v3607_v24 = vpop.f32.mrb[214].mxu0  ;;  %5205 = vmatpush1.bf16.msra.mxu0 %v13910_v16  ;;  %v18330_v16 = vld [vmem:[#allocation29_spill] sm:$0xff] }
 0x296   : > { %v3838_v4 = vpop.f32.mrb[214].mxu1  ;;  %v3608_v47 = vpop.f32.mrb[215].mxu0  ;;  %5206 = vmatprep.subr.bf16.mxu0 %v18094_v3 }
 0x297   : > { %v3839_v53 = vpop.f32.mrb[215].mxu1  ;;  %6582 = vmatpush1.bf16.msra.mxu1 %v13911_v45  ;;  %v13915_v45 = vld [vmem:[%s17625_s2 + $0x598] sm:$0xff]  }
 0x298   : > { %6583 = vmatprep.subr.bf16.mxu1 %v18094_v3  ;;  %5011 = vmatmul.mubr.bf16.gmra.mrb[64].mxu0 %v18329_v61  ;;  %v13914_v53 = vld [vmem:[%s17625_s2 + $0x498] sm:$0xff]  }
 0x299   : > { %6388 = vmatmul.mubr.bf16.gmra.mrb[64].mxu1 %v18329_v61  ;;  %5018 = vmatprep.mubr.bf16.mxu0 %v18330_v16 }
 0x29a   : > { %6395 = vmatprep.mubr.bf16.mxu1 %v18330_v16  ;;  %5207 = vmatpush1.bf16.msra.mxu0 %v13912_v6 }
 0x29b   : > { %6584 = vmatpush1.bf16.msra.mxu1 %v13913_v32  ;;  %v4285_v26 = vpop.f32.mrb[216].mxu0  ;;  %5208 = vmatprep.subr.bf16.mxu0 %v18094_v3 }
 0x29c   : > { %v4516_v20 = vpop.f32.mrb[216].mxu1  ;;  %6585 = vmatprep.subr.bf16.mxu1 %v18094_v3  ;;  %v4286_v51 = vadd.f32 %v4285_v26, %v15342_v8  ;;  %v4287_v24 = vpop.f32.mrb[217].mxu0  ;;  %v13917_v8 = vld [vmem:[%s17625_s2 + $0x5a0] sm:$0xff]  }
 0x29d   : > { %v4518_v4 = vpop.f32.mrb[217].mxu1  ;;  %v4288_v47 = vpop.f32.mrb[218].mxu0 }
 0x29e   : > { %v4519_v6 = vpop.f32.mrb[218].mxu1  ;;  %v15683_v32 = vadd.f32 %v4516_v20, %v4286_v51  ;;  %v4289_v61 = vadd.f32 %v4288_v47, %v15350_v14  ;;  %v4290_v16 = vpop.f32.mrb[219].mxu0  ;;  %5209 = vmatpush1.bf16.msra.mxu0 %v13914_v53  ;;  %v18333_v20 = vld [vmem:[#allocation27_spill] sm:$0xff]  ;;  %v13918_v14 = vld [vmem:[%s17625_s2 + $0x4a8] sm:$0xff]  }
 0x29f   : > { %v4521_v7 = vpop.f32.mrb[219].mxu1  ;;  %6586 = vmatpush1.bf16.msra.mxu1 %v13915_v45  ;;  %5210 = vmatprep.subr.bf16.mxu0 %v18094_v3  ;;  %v13919_v53 = vld [vmem:[%s17625_s2 + $0x5a8] sm:$0xff]  }
 0x2a0   : > { %18331 = vst [vmem:[#allocation13_spill] sm:$0xff] %v15683_v32  ;;  %6587 = vmatprep.subr.bf16.mxu1 %v18094_v3  ;;  %v15694_v26 = vadd.f32 %v4519_v6, %v4289_v61  ;;  %5019 = vmatmul.mubr.bf16.gmra.mrb[68].mxu0 %v18333_v20  ;;  %v18334_v7 = vld [vmem:[#allocation37_spill] sm:$0xff]  ;;  %v18549_v32 = vld [vmem:[#allocation106_spill] sm:$0xff] }
 0x2a1   : > { %6396 = vmatmul.mubr.bf16.gmra.mrb[68].mxu1 %v18333_v20  ;;  %5026 = vmatprep.mubr.bf16.mxu0 %v18334_v7 }
 0x2a2   : > { %18332 = vst [vmem:[#allocation11_spill] sm:$0xff] %v15694_v26  ;;  %6403 = vmatprep.mubr.bf16.mxu1 %v18334_v7  ;;  %5211 = vmatpush1.bf16.msra.mxu0 %v13916_v63  ;;  %v13920_v7 = vld [vmem:[%s17625_s2 + $0x4b0] sm:$0xff]   ;;  %v18548_v26 = vld [vmem:[#allocation96_spill] sm:$0xff] }
 0x2a3   : > { %6588 = vmatpush1.bf16.msra.mxu1 %v13917_v8  ;;  %v4293_v45 = vpop.f32.mrb[220].mxu0  ;;  %5212 = vmatprep.subr.bf16.mxu0 %v18094_v3 }
 0x2a4   : > { %v4524_v51 = vpop.f32.mrb[220].mxu1  ;;  %6589 = vmatprep.subr.bf16.mxu1 %v18094_v3  ;;  %v4294_v24 = vadd.f32 %v4293_v45, %v15366_v38  ;;  %v4295_v4 = vpop.f32.mrb[221].mxu0  ;;  %v13921_v38 = vld [vmem:[%s17625_s2 + $0x5b0] sm:$0xff]  }
 0x2a5   : > { %v4526_v47 = vpop.f32.mrb[221].mxu1  ;;  %v4296_v63 = vpop.f32.mrb[222].mxu0 }
 0x2a6   : > { %v4527_v6 = vpop.f32.mrb[222].mxu1  ;;  %v15709_v61 = vadd.f32 %v4524_v51, %v4294_v24  ;;  %v4297_v16 = vadd.f32 %v4296_v63, %v15374_v37  ;;  %v4298_v8 = vpop.f32.mrb[223].mxu0  ;;  %5213 = vmatpush1.bf16.msra.mxu0 %v13918_v14  ;;  %v18337_v51 = vld [vmem:[#allocation35_spill] sm:$0xff]  ;;  %v18338_v37 = vld [vmem:[#allocation45_spill] sm:$0xff]  ;;  %v13922_v14 = vld [vmem:[%s17625_s2 + $0x4b8] sm:$0xff]  }
 0x2a7   : > { %v4529_v20 = vpop.f32.mrb[223].mxu1  ;;  %6590 = vmatpush1.bf16.msra.mxu1 %v13919_v53  ;;  %5214 = vmatprep.subr.bf16.mxu0 %v18094_v3  ;;  %v13923_v53 = vld [vmem:[%s17625_s2 + $0x5b8] sm:$0xff]  }
 0x2a8   : > { %18335 = vst [vmem:[#allocation21_spill] sm:$0xff] %v15709_v61  ;;  %6591 = vmatprep.subr.bf16.mxu1 %v18094_v3  ;;  %v15720_v45 = vadd.f32 %v4527_v6, %v4297_v16  ;;  %5027 = vmatmul.mubr.bf16.gmra.mrb[72].mxu0 %v18337_v51  ;;  %v18547_v61 = vld [vmem:[#allocation98_spill] sm:$0xff] }
 0x2a9   : > { %6404 = vmatmul.mubr.bf16.gmra.mrb[72].mxu1 %v18337_v51  ;;  %5034 = vmatprep.mubr.bf16.mxu0 %v18338_v37 }
 0x2aa   : > { %18336 = vst [vmem:[#allocation19_spill] sm:$0xff] %v15720_v45  ;;  %6411 = vmatprep.mubr.bf16.mxu1 %v18338_v37  ;;  %5215 = vmatpush1.bf16.msra.mxu0 %v13920_v7  ;;  %v13924_v37 = vld [vmem:[%s17625_s2 + $0x4c0] sm:$0xff]   ;;  %v18546_v45 = vld [vmem:[#allocation88_spill] sm:$0xff] }
 0x2ab   : > { %6592 = vmatpush1.bf16.msra.mxu1 %v13921_v38  ;;  %v4301_v24 = vpop.f32.mrb[224].mxu0  ;;  %5216 = vmatprep.subr.bf16.mxu0 %v18094_v3 }
 0x2ac   : > { %v4532_v4 = vpop.f32.mrb[224].mxu1  ;;  %6593 = vmatprep.subr.bf16.mxu1 %v18094_v3  ;;  %v4302_v47 = vadd.f32 %v4301_v24, %v15390_v22  ;;  %v4303_v63 = vpop.f32.mrb[225].mxu0  ;;  %v13925_v22 = vld [vmem:[%s17625_s2 + $0x5c0] sm:$0xff]  }
 0x2ad   : > { %v4534_v6 = vpop.f32.mrb[225].mxu1  ;;  %v4304_v16 = vpop.f32.mrb[226].mxu0 }
 0x2ae   : > { %v4535_v8 = vpop.f32.mrb[226].mxu1  ;;  %v15735_v20 = vadd.f32 %v4532_v4, %v4302_v47  ;;  %v4305_v7 = vadd.f32 %v4304_v16, %v15398_v30  ;;  %v4306_v38 = vpop.f32.mrb[227].mxu0  ;;  %5217 = vmatpush1.bf16.msra.mxu0 %v13922_v14  ;;  %v18341_v4 = vld [vmem:[#allocation43_spill] sm:$0xff]  ;;  %v18342_v30 = vld [vmem:[#allocation53_spill] sm:$0xff]  ;;  %v13926_v14 = vld [vmem:[%s17625_s2 + $0x4c8] sm:$0xff]  }
 0x2af   : > { %v4537_v51 = vpop.f32.mrb[227].mxu1  ;;  %6594 = vmatpush1.bf16.msra.mxu1 %v13923_v53  ;;  %5218 = vmatprep.subr.bf16.mxu0 %v18094_v3  ;;  %v13927_v53 = vld [vmem:[%s17625_s2 + $0x5c8] sm:$0xff]  }
 0x2b0   : > { %18339 = vst [vmem:[#allocation29_spill] sm:$0xff] %v15735_v20  ;;  %6595 = vmatprep.subr.bf16.mxu1 %v18094_v3  ;;  %v15746_v24 = vadd.f32 %v4535_v8, %v4305_v7  ;;  %5035 = vmatmul.mubr.bf16.gmra.mrb[76].mxu0 %v18341_v4  ;;  %v18543_v20 = vld [vmem:[#allocation82_spill] sm:$0xff] }
 0x2b1   : > { %6412 = vmatmul.mubr.bf16.gmra.mrb[76].mxu1 %v18341_v4  ;;  %5042 = vmatprep.mubr.bf16.mxu0 %v18342_v30 }
 0x2b2   : > { %18340 = vst [vmem:[#allocation27_spill] sm:$0xff] %v15746_v24  ;;  %6419 = vmatprep.mubr.bf16.mxu1 %v18342_v30  ;;  %5219 = vmatpush1.bf16.msra.mxu0 %v13924_v37  ;;  %v13928_v30 = vld [vmem:[%s17625_s2 + $0x4d0] sm:$0xff]   ;;  %v18542_v24 = vld [vmem:[#allocation72_spill] sm:$0xff] }
 0x2b3   : > { %6596 = vmatpush1.bf16.msra.mxu1 %v13925_v22  ;;  %v4309_v47 = vpop.f32.mrb[228].mxu0  ;;  %5220 = vmatprep.subr.bf16.mxu0 %v18094_v3 }
 0x2b4   : > { %v4540_v63 = vpop.f32.mrb[228].mxu1  ;;  %6597 = vmatprep.subr.bf16.mxu1 %v18094_v3  ;;  %v4310_v6 = vadd.f32 %v4309_v47, %v15414_v56  ;;  %v4311_v16 = vpop.f32.mrb[229].mxu0  ;;  %v13929_v56 = vld [vmem:[%s17625_s2 + $0x5d0] sm:$0xff]  }
 0x2b5   : > { %v4542_v8 = vpop.f32.mrb[229].mxu1  ;;  %v4312_v7 = vpop.f32.mrb[230].mxu0 }
 0x2b6   : > { %v4543_v38 = vpop.f32.mrb[230].mxu1  ;;  %v15761_v51 = vadd.f32 %v4540_v63, %v4310_v6  ;;  %v4313_v37 = vadd.f32 %v4312_v7, %v15422_v19  ;;  %v4314_v22 = vpop.f32.mrb[231].mxu0  ;;  %5221 = vmatpush1.bf16.msra.mxu0 %v13926_v14  ;;  %v18345_v63 = vld [vmem:[#allocation51_spill] sm:$0xff]  ;;  %v18346_v19 = vld [vmem:[#allocation61_spill] sm:$0xff]  ;;  %v13930_v14 = vld [vmem:[%s17625_s2 + $0x4d8] sm:$0xff]  }
 0x2b7   : > { %v4545_v4 = vpop.f32.mrb[231].mxu1  ;;  %6598 = vmatpush1.bf16.msra.mxu1 %v13927_v53  ;;  %5222 = vmatprep.subr.bf16.mxu0 %v18094_v3  ;;  %v13931_v53 = vld [vmem:[%s17625_s2 + $0x5d8] sm:$0xff]  }
 0x2b8   : > { %18343 = vst [vmem:[#allocation37_spill] sm:$0xff] %v15761_v51  ;;  %6599 = vmatprep.subr.bf16.mxu1 %v18094_v3  ;;  %v15772_v47 = vadd.f32 %v4543_v38, %v4313_v37  ;;  %5043 = vmatmul.mubr.bf16.gmra.mrb[80].mxu0 %v18345_v63  ;;  %v18539_v51 = vld [vmem:[#allocation66_spill] sm:$0xff] }
 0x2b9   : > { %6420 = vmatmul.mubr.bf16.gmra.mrb[80].mxu1 %v18345_v63  ;;  %5050 = vmatprep.mubr.bf16.mxu0 %v18346_v19 }
 0x2ba   : > { %18344 = vst [vmem:[#allocation35_spill] sm:$0xff] %v15772_v47  ;;  %6427 = vmatprep.mubr.bf16.mxu1 %v18346_v19  ;;  %5223 = vmatpush1.bf16.msra.mxu0 %v13928_v30  ;;  %v13932_v19 = vld [vmem:[%s17625_s2 + $0x4e0] sm:$0xff]   ;;  %v14032_v47 = vld [vmem:[%s17625_s2 + $0x670] sm:$0xff]  }
 0x2bb   : > { %6600 = vmatpush1.bf16.msra.mxu1 %v13929_v56  ;;  %v4317_v6 = vpop.f32.mrb[232].mxu0  ;;  %5224 = vmatprep.subr.bf16.mxu0 %v18094_v3 }
 0x2bc   : > { %v4548_v16 = vpop.f32.mrb[232].mxu1  ;;  %6601 = vmatprep.subr.bf16.mxu1 %v18094_v3  ;;  %v4318_v8 = vadd.f32 %v4317_v6, %v15438_v27  ;;  %v4319_v7 = vpop.f32.mrb[233].mxu0  ;;  %v13933_v27 = vld [vmem:[%s17625_s2 + $0x5e0] sm:$0xff]  }
 0x2bd   : > { %v4550_v38 = vpop.f32.mrb[233].mxu1  ;;  %v4320_v37 = vpop.f32.mrb[234].mxu0 }
 0x2be   : > { %v4551_v22 = vpop.f32.mrb[234].mxu1  ;;  %v15787_v4 = vadd.f32 %v4548_v16, %v4318_v8  ;;  %v4321_v30 = vadd.f32 %v4320_v37, %v15446_v40  ;;  %v4322_v56 = vpop.f32.mrb[235].mxu0  ;;  %5225 = vmatpush1.bf16.msra.mxu0 %v13930_v14  ;;  %v18349_v16 = vld [vmem:[#allocation59_spill] sm:$0xff]  ;;  %v18350_v40 = vld [vmem:[#allocation69_spill] sm:$0xff]  ;;  %v13934_v14 = vld [vmem:[%s17625_s2 + $0x4e8] sm:$0xff]  }
 0x2bf   : > { %v4553_v63 = vpop.f32.mrb[235].mxu1  ;;  %6602 = vmatpush1.bf16.msra.mxu1 %v13931_v53  ;;  %5226 = vmatprep.subr.bf16.mxu0 %v18094_v3  ;;  %v13935_v53 = vld [vmem:[%s17625_s2 + $0x5e8] sm:$0xff]  }
 0x2c0   : > { %18347 = vst [vmem:[#allocation45_spill] sm:$0xff] %v15787_v4  ;;  %6603 = vmatprep.subr.bf16.mxu1 %v18094_v3  ;;  %v15798_v6 = vadd.f32 %v4551_v22, %v4321_v30  ;;  %5051 = vmatmul.mubr.bf16.gmra.mrb[84].mxu0 %v18349_v16  ;;  %v18537_v4 = vld [vmem:[#allocation58_spill] sm:$0xff] }
 0x2c1   : > { %6428 = vmatmul.mubr.bf16.gmra.mrb[84].mxu1 %v18349_v16  ;;  %5058 = vmatprep.mubr.bf16.mxu0 %v18350_v40 }
 0x2c2   : > { %18348 = vst [vmem:[#allocation43_spill] sm:$0xff] %v15798_v6  ;;  %6435 = vmatprep.mubr.bf16.mxu1 %v18350_v40  ;;  %5227 = vmatpush1.bf16.msra.mxu0 %v13932_v19  ;;  %v13936_v40 = vld [vmem:[%s17625_s2 + $0x4f0] sm:$0xff]   ;;  %v14028_v6 = vld [vmem:[%s17625_s2 + $0x660] sm:$0xff]  }
 0x2c3   : > { %6604 = vmatpush1.bf16.msra.mxu1 %v13933_v27  ;;  %v4325_v8 = vpop.f32.mrb[236].mxu0  ;;  %5228 = vmatprep.subr.bf16.mxu0 %v18094_v3 }
 0x2c4   : > { %v4556_v7 = vpop.f32.mrb[236].mxu1  ;;  %6605 = vmatprep.subr.bf16.mxu1 %v18094_v3  ;;  %v4326_v38 = vadd.f32 %v4325_v8, %v15462_v35  ;;  %v4327_v37 = vpop.f32.mrb[237].mxu0  ;;  %v13937_v35 = vld [vmem:[%s17625_s2 + $0x5f0] sm:$0xff]  }
 0x2c5   : > { %v4558_v22 = vpop.f32.mrb[237].mxu1  ;;  %v4328_v30 = vpop.f32.mrb[238].mxu0 }
 0x2c6   : > { %v4559_v56 = vpop.f32.mrb[238].mxu1  ;;  %v15813_v63 = vadd.f32 %v4556_v7, %v4326_v38  ;;  %v4329_v19 = vadd.f32 %v4328_v30, %v15470_v49  ;;  %v4330_v27 = vpop.f32.mrb[239].mxu0  ;;  %5229 = vmatpush1.bf16.msra.mxu0 %v13934_v14  ;;  %v18353_v7 = vld [vmem:[#allocation67_spill] sm:$0xff]  ;;  %v18354_v49 = vld [vmem:[#allocation77_spill] sm:$0xff] }
 0x2c7   : > { %v4561_v16 = vpop.f32.mrb[239].mxu1  ;;  %6606 = vmatpush1.bf16.msra.mxu1 %v13935_v53  ;;  %5230 = vmatprep.subr.bf16.mxu0 %v18094_v3 }
 0x2c8   : > { %18351 = vst [vmem:[#allocation53_spill] sm:$0xff] %v15813_v63  ;;  %6607 = vmatprep.subr.bf16.mxu1 %v18094_v3  ;;  %v15824_v8 = vadd.f32 %v4559_v56, %v4329_v19  ;;  %5059 = vmatmul.mubr.bf16.gmra.mrb[88].mxu0 %v18353_v7  ;;  %v18535_v63 = vld [vmem:[#allocation50_spill] sm:$0xff] }
 0x2c9   : > { %6436 = vmatmul.mubr.bf16.gmra.mrb[88].mxu1 %v18353_v7  ;;  %5066 = vmatprep.mubr.bf16.mxu0 %v18354_v49 }
 0x2ca   : > { %18352 = vst [vmem:[#allocation51_spill] sm:$0xff] %v15824_v8  ;;  %6443 = vmatprep.mubr.bf16.mxu1 %v18354_v49  ;;  %5231 = vmatpush1.bf16.msra.mxu0 %v13936_v40  ;;  %v13938_v40 = vld [vmem:[%s17625_s2 + $0x4f8] sm:$0xff]   ;;  %v18357_v49 = vld [vmem:[#allocation75_spill] sm:$0xff]  ;;  %v14024_v8 = vld [vmem:[%s17625_s2 + $0x650] sm:$0xff]  }
 0x2cb   : > { %6608 = vmatpush1.bf16.msra.mxu1 %v13937_v35  ;;  %v4333_v14 = vpop.f32.mrb[240].mxu0  ;;  %5232 = vmatprep.subr.bf16.mxu0 %v18094_v3 }
 0x2cc   : > { %v4564_v53 = vpop.f32.mrb[240].mxu1  ;;  %6609 = vmatprep.subr.bf16.mxu1 %v18094_v3  ;;  %v4334_v38 = vadd.f32 %v4333_v14, %v15483_v33  ;;  %v4335_v37 = vpop.f32.mrb[241].mxu0  ;;  %v13939_v33 = vld [vmem:[%s17625_s2 + $0x5f8] sm:$0xff]   ;;  %v18358_v14 = vld [vmem:[#allocation85_spill] sm:$0xff] }
 0x2cd   : > { %v4566_v22 = vpop.f32.mrb[241].mxu1  ;;  %v4336_v30 = vpop.f32.mrb[242].mxu0 }
 0x2ce   : > { %v4567_v56 = vpop.f32.mrb[242].mxu1  ;;  %v15833_v19 = vadd.f32 %v4564_v53, %v4334_v38  ;;  %v4337_v27 = vadd.f32 %v4336_v30, %v15488_v31  ;;  %v4338_v16 = vpop.f32.mrb[243].mxu0  ;;  %5233 = vmatpush1.bf16.msra.mxu0 %v13938_v40 }
 0x2cf   : > { %v4569_v7 = vpop.f32.mrb[243].mxu1  ;;  %6610 = vmatpush1.bf16.msra.mxu1 %v13939_v33  ;;  %5626 = vmatprep.subr.bf16.mxu0 %v18094_v3  ;;  %v18361_v33 = vld [vmem:[#allocation83_spill] sm:$0xff] }
 0x2d0   : > { %18355 = vst [vmem:[#allocation61_spill] sm:$0xff] %v15833_v19  ;;  %v15839_v35 = vadd.f32 %v4567_v56, %v4337_v27  ;;  %5067 = vmatmul.mubr.bf16.gmra.mrb[92].mxu0 %v18357_v49  ;;  %7003 = vmatprep.subr.bf16.mxu1 %v18094_v3  ;;  %v18533_v19 = vld [vmem:[#allocation42_spill] sm:$0xff] }
 0x2d1   : > { %6444 = vmatmul.mubr.bf16.gmra.mrb[92].mxu1 %v18357_v49  ;;  %5074 = vmatprep.mubr.bf16.mxu0 %v18358_v14 }
 0x2d2   : > { %18356 = vst [vmem:[#allocation59_spill] sm:$0xff] %v15839_v35  ;;  %6451 = vmatprep.mubr.bf16.mxu1 %v18358_v14  ;;  %v18362_v14 = vld [vmem:[#allocation93_spill] sm:$0xff]  ;;  %v14020_v35 = vld [vmem:[%s17625_s2 + $0x640] sm:$0xff]  }
 0x2d3   : > { %v4341_v31 = vpop.f32.mrb[244].mxu0 }
 0x2d4   : > { %v4572_v53 = vpop.f32.mrb[244].mxu1  ;;  %v4342_v38 = vadd.f32 %v4341_v31, %v15496_v55  ;;  %v4343_v37 = vpop.f32.mrb[245].mxu0 }
 0x2d5   : > { %v4574_v22 = vpop.f32.mrb[245].mxu1  ;;  %v4344_v30 = vpop.f32.mrb[246].mxu0 }
 0x2d6   : > { %v4575_v56 = vpop.f32.mrb[246].mxu1  ;;  %v15851_v27 = vadd.f32 %v4572_v53, %v4342_v38  ;;  %v4345_v16 = vadd.f32 %v4344_v30, %v15498_v0  ;;  %v4346_v7 = vpop.f32.mrb[247].mxu0 }
 0x2d7   : > { %v4577_v49 = vpop.f32.mrb[247].mxu1 }
 0x2d8   : > { %18359 = vst [vmem:[#allocation69_spill] sm:$0xff] %v15851_v27  ;;  %v15854_v40 = vadd.f32 %v4575_v56, %v4345_v16  ;;  %5075 = vmatmul.mubr.bf16.gmra.mrb[96].mxu0 %v18361_v33  ;;  %v18531_v27 = vld [vmem:[#allocation34_spill] sm:$0xff] }
 0x2d9   : > { %6452 = vmatmul.mubr.bf16.gmra.mrb[96].mxu1 %v18361_v33  ;;  %5082 = vmatprep.mubr.bf16.mxu0 %v18362_v14  ;;  %v18365_v33 = vld [vmem:[#allocation91_spill] sm:$0xff] }
 0x2da   : > { %18360 = vst [vmem:[#allocation67_spill] sm:$0xff] %v15854_v40  ;;  %6459 = vmatprep.mubr.bf16.mxu1 %v18362_v14  ;;  %v18366_v14 = vld [vmem:[#allocation101_spill] sm:$0xff]  ;;  %v18524_v40 = vld [vmem:[#allocation4_spill] sm:$0xff] }
 0x2db   : > { %v4349_v55 = vpop.f32.mrb[248].mxu0 }
 0x2dc   : > { %v4580_v31 = vpop.f32.mrb[248].mxu1  ;;  %v4350_v37 = vadd.f32 %v4349_v55, %v15504_v5  ;;  %v4351_v53 = vpop.f32.mrb[249].mxu0 }
 0x2dd   : > { %v4582_v38 = vpop.f32.mrb[249].mxu1  ;;  %v4352_v22 = vpop.f32.mrb[250].mxu0 }
 0x2de   : > { %v4583_v0 = vpop.f32.mrb[250].mxu1  ;;  %v15861_v30 = vadd.f32 %v4580_v31, %v4350_v37  ;;  %v4353_v56 = vadd.f32 %v4352_v22, %v15506_v36  ;;  %v4354_v16 = vpop.f32.mrb[251].mxu0 }
 0x2df   : > { %v4585_v7 = vpop.f32.mrb[251].mxu1 }
 0x2e0   : > { %18363 = vst [vmem:[#allocation77_spill] sm:$0xff] %v15861_v30  ;;  %v15864_v49 = vadd.f32 %v4583_v0, %v4353_v56  ;;  %5083 = vmatmul.mubr.bf16.gmra.mrb[100].mxu0 %v18365_v33  ;;  %v14005_v30 = vld [vmem:[%s17625_s2 + $0x680] sm:$0xff]  }
 0x2e1   : > { %6460 = vmatmul.mubr.bf16.gmra.mrb[100].mxu1 %v18365_v33  ;;  %5090 = vmatprep.mubr.bf16.mxu0 %v18366_v14  ;;  %v18369_v33 = vld [vmem:[#allocation99_spill] sm:$0xff] }
 0x2e2   : > { %18364 = vst [vmem:[#allocation75_spill] sm:$0xff] %v15864_v49  ;;  %6467 = vmatprep.mubr.bf16.mxu1 %v18366_v14  ;;  %v18370_v14 = vld [vmem:[#allocation109_spill] sm:$0xff]  ;;  %v14004_v49 = vld [vmem:[%s17625_s2 + $0x600] sm:$0xff]  }
 0x2e3   : > { %v4357_v5 = vpop.f32.mrb[252].mxu0 }
 0x2e4   : > { %v4588_v55 = vpop.f32.mrb[252].mxu1  ;;  %v4358_v53 = vadd.f32 %v4357_v5, %v15512_v59  ;;  %v4359_v31 = vpop.f32.mrb[253].mxu0 }
 0x2e5   : > { %v4590_v37 = vpop.f32.mrb[253].mxu1  ;;  %v4360_v38 = vpop.f32.mrb[254].mxu0 }
 0x2e6   : > { %v4591_v36 = vpop.f32.mrb[254].mxu1  ;;  %v15871_v22 = vadd.f32 %v4588_v55, %v4358_v53  ;;  %v4361_v0 = vadd.f32 %v4360_v38, %v15514_v44  ;;  %v4362_v56 = vpop.f32.mrb[255].mxu0 }
 0x2e7   : > { %v4593_v16 = vpop.f32.mrb[255].mxu1 }
 0x2e8   : > { %18367 = vst [vmem:[#allocation85_spill] sm:$0xff] %v15871_v22  ;;  %v15874_v7 = vadd.f32 %v4591_v36, %v4361_v0  ;;  %5091 = vmatmul.mubr.bf16.gmra.mrb[104].mxu0 %v18369_v33  ;;  %v18523_v22 = vld [vmem:[#allocation6_spill] sm:$0xff] }
 0x2e9   : > { %6468 = vmatmul.mubr.bf16.gmra.mrb[104].mxu1 %v18369_v33  ;;  %5098 = vmatprep.mubr.bf16.mxu0 %v18370_v14  ;;  %v18373_v33 = vld [vmem:[#allocation107_spill] sm:$0xff] }
 0x2ea   : > { %18368 = vst [vmem:[#allocation83_spill] sm:$0xff] %v15874_v7  ;;  %6475 = vmatprep.mubr.bf16.mxu1 %v18370_v14  ;;  %v18374_v14 = vld [vmem:[#allocation117_spill] sm:$0xff]  ;;  %v18522_v7 = vld [vmem:[#allocation187_spill] sm:$0xff] }
 0x2eb   : > { %v4365_v59 = vpop.f32.mrb[0].mxu0 }
 0x2ec   : > { %v4596_v5 = vpop.f32.mrb[0].mxu1  ;;  %v4366_v31 = vadd.f32 %v4365_v59, %v15520_v10  ;;  %v4367_v55 = vpop.f32.mrb[1].mxu0 }
 0x2ed   : > { %v4598_v53 = vpop.f32.mrb[1].mxu1  ;;  %v4368_v37 = vpop.f32.mrb[2].mxu0 }
 0x2ee   : > { %v4599_v44 = vpop.f32.mrb[2].mxu1  ;;  %v15881_v38 = vadd.f32 %v4596_v5, %v4366_v31  ;;  %v4369_v36 = vadd.f32 %v4368_v37, %v15522_v13  ;;  %v4370_v0 = vpop.f32.mrb[3].mxu0 }
 0x2ef   : > { %v4601_v56 = vpop.f32.mrb[3].mxu1 }
 0x2f0   : > { %18371 = vst [vmem:[#allocation93_spill] sm:$0xff] %v15881_v38  ;;  %v15884_v16 = vadd.f32 %v4599_v44, %v4369_v36  ;;  %5099 = vmatmul.mubr.bf16.gmra.mrb[108].mxu0 %v18373_v33  ;;  %v18521_v38 = vld [vmem:[#allocation189_spill] sm:$0xff] }
 0x2f1   : > { %6476 = vmatmul.mubr.bf16.gmra.mrb[108].mxu1 %v18373_v33  ;;  %5106 = vmatprep.mubr.bf16.mxu0 %v18374_v14  ;;  %v18377_v33 = vld [vmem:[#allocation115_spill] sm:$0xff] }
 0x2f2   : > { %18372 = vst [vmem:[#allocation91_spill] sm:$0xff] %v15884_v16  ;;  %6483 = vmatprep.mubr.bf16.mxu1 %v18374_v14  ;;  %v18378_v14 = vld [vmem:[#allocation125_spill] sm:$0xff]  ;;  %v18520_v16 = vld [vmem:[#allocation183_spill] sm:$0xff] }
 0x2f3   : > { %v4373_v10 = vpop.f32.mrb[4].mxu0 }
 0x2f4   : > { %v4604_v59 = vpop.f32.mrb[4].mxu1  ;;  %v4374_v55 = vadd.f32 %v4373_v10, %v15528_v17  ;;  %v4375_v5 = vpop.f32.mrb[5].mxu0 }
 0x2f5   : > { %v4606_v31 = vpop.f32.mrb[5].mxu1  ;;  %v4376_v53 = vpop.f32.mrb[6].mxu0 }
 0x2f6   : > { %v4607_v13 = vpop.f32.mrb[6].mxu1  ;;  %v15891_v37 = vadd.f32 %v4604_v59, %v4374_v55  ;;  %v4377_v44 = vadd.f32 %v4376_v53, %v15530_v11  ;;  %v4378_v36 = vpop.f32.mrb[7].mxu0 }
 0x2f7   : > { %v4609_v0 = vpop.f32.mrb[7].mxu1 }
 0x2f8   : > { %18375 = vst [vmem:[#allocation101_spill] sm:$0xff] %v15891_v37  ;;  %v15894_v56 = vadd.f32 %v4607_v13, %v4377_v44  ;;  %5107 = vmatmul.mubr.bf16.gmra.mrb[112].mxu0 %v18377_v33  ;;  %v18519_v37 = vld [vmem:[#allocation185_spill] sm:$0xff] }
 0x2f9   : > { %6484 = vmatmul.mubr.bf16.gmra.mrb[112].mxu1 %v18377_v33  ;;  %5114 = vmatprep.mubr.bf16.mxu0 %v18378_v14  ;;  %v18381_v33 = vld [vmem:[#allocation123_spill] sm:$0xff] }
 0x2fa   : > { %18376 = vst [vmem:[#allocation99_spill] sm:$0xff] %v15894_v56  ;;  %6491 = vmatprep.mubr.bf16.mxu1 %v18378_v14  ;;  %v18382_v14 = vld [vmem:[#allocation133_spill] sm:$0xff]  ;;  %v18518_v56 = vld [vmem:[#allocation175_spill] sm:$0xff] }
 0x2fb   : > { %v4381_v17 = vpop.f32.mrb[8].mxu0 }
 0x2fc   : > { %v4612_v10 = vpop.f32.mrb[8].mxu1  ;;  %v4382_v5 = vadd.f32 %v4381_v17, %v15536_v48  ;;  %v4383_v59 = vpop.f32.mrb[9].mxu0 }
 0x2fd   : > { %v4614_v55 = vpop.f32.mrb[9].mxu1  ;;  %v4384_v31 = vpop.f32.mrb[10].mxu0 }
 0x2fe   : > { %v4615_v11 = vpop.f32.mrb[10].mxu1  ;;  %v15901_v53 = vadd.f32 %v4612_v10, %v4382_v5  ;;  %v4385_v13 = vadd.f32 %v4384_v31, %v15538_v21  ;;  %v4386_v44 = vpop.f32.mrb[11].mxu0 }
 0x2ff   : > { %v4617_v36 = vpop.f32.mrb[11].mxu1 }
 0x300   : > { %18379 = vst [vmem:[#allocation109_spill] sm:$0xff] %v15901_v53  ;;  %v15904_v0 = vadd.f32 %v4615_v11, %v4385_v13  ;;  %5115 = vmatmul.mubr.bf16.gmra.mrb[116].mxu0 %v18381_v33  ;;  %v18517_v53 = vld [vmem:[#allocation177_spill] sm:$0xff] }
 0x301   : > { %6492 = vmatmul.mubr.bf16.gmra.mrb[116].mxu1 %v18381_v33  ;;  %5122 = vmatprep.mubr.bf16.mxu0 %v18382_v14  ;;  %v18385_v33 = vld [vmem:[#allocation131_spill] sm:$0xff] }
 0x302   : > { %18380 = vst [vmem:[#allocation107_spill] sm:$0xff] %v15904_v0  ;;  %6499 = vmatprep.mubr.bf16.mxu1 %v18382_v14  ;;  %v18386_v14 = vld [vmem:[#allocation141_spill] sm:$0xff]  ;;  %v18516_v0 = vld [vmem:[#allocation167_spill] sm:$0xff] }
 0x303   : > { %v4389_v48 = vpop.f32.mrb[12].mxu0 }
 0x304   : > { %v4620_v17 = vpop.f32.mrb[12].mxu1  ;;  %v4390_v59 = vadd.f32 %v4389_v48, %v15544_v62  ;;  %v4391_v10 = vpop.f32.mrb[13].mxu0 }
 0x305   : > { %v4622_v5 = vpop.f32.mrb[13].mxu1  ;;  %v4392_v55 = vpop.f32.mrb[14].mxu0 }
 0x306   : > { %v4623_v21 = vpop.f32.mrb[14].mxu1  ;;  %v15911_v31 = vadd.f32 %v4620_v17, %v4390_v59  ;;  %v4393_v11 = vadd.f32 %v4392_v55, %v15546_v1  ;;  %v4394_v13 = vpop.f32.mrb[15].mxu0 }
 0x307   : > { %v4625_v44 = vpop.f32.mrb[15].mxu1 }
 0x308   : > { %18383 = vst [vmem:[#allocation117_spill] sm:$0xff] %v15911_v31  ;;  %v15914_v36 = vadd.f32 %v4623_v21, %v4393_v11  ;;  %5123 = vmatmul.mubr.bf16.gmra.mrb[120].mxu0 %v18385_v33  ;;  %v18515_v31 = vld [vmem:[#allocation169_spill] sm:$0xff] }
 0x309   : > { %6500 = vmatmul.mubr.bf16.gmra.mrb[120].mxu1 %v18385_v33  ;;  %5130 = vmatprep.mubr.bf16.mxu0 %v18386_v14  ;;  %v18389_v33 = vld [vmem:[#allocation139_spill] sm:$0xff] }
 0x30a   : > { %18384 = vst [vmem:[#allocation115_spill] sm:$0xff] %v15914_v36  ;;  %6507 = vmatprep.mubr.bf16.mxu1 %v18386_v14  ;;  %v18390_v14 = vld [vmem:[#allocation149_spill] sm:$0xff]  ;;  %v18514_v36 = vld [vmem:[#allocation159_spill] sm:$0xff] }
 0x30b   : > { %v4397_v62 = vpop.f32.mrb[16].mxu0 }
 0x30c   : > { %v4628_v48 = vpop.f32.mrb[16].mxu1  ;;  %v4398_v10 = vadd.f32 %v4397_v62, %v15552_v42  ;;  %v4399_v17 = vpop.f32.mrb[17].mxu0 }
 0x30d   : > { %v4630_v59 = vpop.f32.mrb[17].mxu1  ;;  %v4400_v5 = vpop.f32.mrb[18].mxu0 }
 0x30e   : > { %v4631_v1 = vpop.f32.mrb[18].mxu1  ;;  %v15921_v55 = vadd.f32 %v4628_v48, %v4398_v10  ;;  %v4401_v21 = vadd.f32 %v4400_v5, %v15554_v25  ;;  %v4402_v11 = vpop.f32.mrb[19].mxu0 }
 0x30f   : > { %v4633_v13 = vpop.f32.mrb[19].mxu1 }
 0x310   : > { %18387 = vst [vmem:[#allocation125_spill] sm:$0xff] %v15921_v55  ;;  %v15924_v44 = vadd.f32 %v4631_v1, %v4401_v21  ;;  %5131 = vmatmul.mubr.bf16.gmra.mrb[124].mxu0 %v18389_v33  ;;  %v18513_v55 = vld [vmem:[#allocation161_spill] sm:$0xff] }
 0x311   : > { %6508 = vmatmul.mubr.bf16.gmra.mrb[124].mxu1 %v18389_v33  ;;  %5138 = vmatprep.mubr.bf16.mxu0 %v18390_v14  ;;  %v18393_v33 = vld [vmem:[#allocation147_spill] sm:$0xff] }
 0x312   : > { %18388 = vst [vmem:[#allocation123_spill] sm:$0xff] %v15924_v44  ;;  %6515 = vmatprep.mubr.bf16.mxu1 %v18390_v14  ;;  %v18394_v14 = vld [vmem:[#allocation157_spill] sm:$0xff]  ;;  %v18512_v44 = vld [vmem:[#allocation151_spill] sm:$0xff] }
 0x313   : > { %v4405_v42 = vpop.f32.mrb[20].mxu0 }
 0x314   : > { %v4636_v62 = vpop.f32.mrb[20].mxu1  ;;  %v4406_v17 = vadd.f32 %v4405_v42, %v15560_v58  ;;  %v4407_v48 = vpop.f32.mrb[21].mxu0 }
 0x315   : > { %v4638_v10 = vpop.f32.mrb[21].mxu1  ;;  %v4408_v59 = vpop.f32.mrb[22].mxu0 }
 0x316   : > { %v4639_v25 = vpop.f32.mrb[22].mxu1  ;;  %v15931_v5 = vadd.f32 %v4636_v62, %v4406_v17  ;;  %v4409_v1 = vadd.f32 %v4408_v59, %v15562_v34  ;;  %v4410_v21 = vpop.f32.mrb[23].mxu0 }
 0x317   : > { %v4641_v11 = vpop.f32.mrb[23].mxu1 }
 0x318   : > { %18391 = vst [vmem:[#allocation133_spill] sm:$0xff] %v15931_v5  ;;  %v15934_v13 = vadd.f32 %v4639_v25, %v4409_v1  ;;  %5139 = vmatmul.mubr.bf16.gmra.mrb[128].mxu0 %v18393_v33  ;;  %v18511_v5 = vld [vmem:[#allocation153_spill] sm:$0xff] }
 0x319   : > { %6516 = vmatmul.mubr.bf16.gmra.mrb[128].mxu1 %v18393_v33  ;;  %5146 = vmatprep.mubr.bf16.mxu0 %v18394_v14  ;;  %v18397_v33 = vld [vmem:[#allocation155_spill] sm:$0xff] }
 0x31a   : > { %18392 = vst [vmem:[#allocation131_spill] sm:$0xff] %v15934_v13  ;;  %6523 = vmatprep.mubr.bf16.mxu1 %v18394_v14  ;;  %v18398_v14 = vld [vmem:[#allocation165_spill] sm:$0xff]  ;;  %v18510_v13 = vld [vmem:[#allocation143_spill] sm:$0xff] }
 0x31b   : > { %v4413_v58 = vpop.f32.mrb[24].mxu0 }
 0x31c   : > { %v4644_v42 = vpop.f32.mrb[24].mxu1  ;;  %v4414_v48 = vadd.f32 %v4413_v58, %v15568_v28  ;;  %v4415_v62 = vpop.f32.mrb[25].mxu0 }
 0x31d   : > { %v4646_v17 = vpop.f32.mrb[25].mxu1  ;;  %v4416_v10 = vpop.f32.mrb[26].mxu0 }
 0x31e   : > { %v4647_v34 = vpop.f32.mrb[26].mxu1  ;;  %v15941_v59 = vadd.f32 %v4644_v42, %v4414_v48  ;;  %v4417_v25 = vadd.f32 %v4416_v10, %v15570_v18  ;;  %v4418_v1 = vpop.f32.mrb[27].mxu0 }
 0x31f   : > { %v4649_v21 = vpop.f32.mrb[27].mxu1 }
 0x320   : > { %18395 = vst [vmem:[#allocation141_spill] sm:$0xff] %v15941_v59  ;;  %v15944_v11 = vadd.f32 %v4647_v34, %v4417_v25  ;;  %5147 = vmatmul.mubr.bf16.gmra.mrb[132].mxu0 %v18397_v33  ;;  %v18509_v59 = vld [vmem:[#allocation145_spill] sm:$0xff] }
 0x321   : > { %6524 = vmatmul.mubr.bf16.gmra.mrb[132].mxu1 %v18397_v33  ;;  %5154 = vmatprep.mubr.bf16.mxu0 %v18398_v14  ;;  %v18401_v33 = vld [vmem:[#allocation163_spill] sm:$0xff] }
 0x322   : > { %18396 = vst [vmem:[#allocation139_spill] sm:$0xff] %v15944_v11  ;;  %6531 = vmatprep.mubr.bf16.mxu1 %v18398_v14  ;;  %v18402_v14 = vld [vmem:[#allocation173_spill] sm:$0xff]  ;;  %v18508_v11 = vld [vmem:[#allocation135_spill] sm:$0xff] }
 0x323   : > { %v4421_v28 = vpop.f32.mrb[28].mxu0 }
 0x324   : > { %v4652_v58 = vpop.f32.mrb[28].mxu1  ;;  %v4422_v62 = vadd.f32 %v4421_v28, %v15576_v15  ;;  %v4423_v42 = vpop.f32.mrb[29].mxu0 }
 0x325   : > { %v4654_v48 = vpop.f32.mrb[29].mxu1  ;;  %v4424_v17 = vpop.f32.mrb[30].mxu0 }
 0x326   : > { %v4655_v18 = vpop.f32.mrb[30].mxu1  ;;  %v15951_v10 = vadd.f32 %v4652_v58, %v4422_v62  ;;  %v4425_v34 = vadd.f32 %v4424_v17, %v15578_v46  ;;  %v4426_v25 = vpop.f32.mrb[31].mxu0 }
 0x327   : > { %v4657_v1 = vpop.f32.mrb[31].mxu1 }
 0x328   : > { %18399 = vst [vmem:[#allocation149_spill] sm:$0xff] %v15951_v10  ;;  %v15954_v21 = vadd.f32 %v4655_v18, %v4425_v34  ;;  %5155 = vmatmul.mubr.bf16.gmra.mrb[136].mxu0 %v18401_v33  ;;  %v18507_v10 = vld [vmem:[#allocation137_spill] sm:$0xff] }
 0x329   : > { %6532 = vmatmul.mubr.bf16.gmra.mrb[136].mxu1 %v18401_v33  ;;  %5162 = vmatprep.mubr.bf16.mxu0 %v18402_v14  ;;  %v18405_v33 = vld [vmem:[#allocation171_spill] sm:$0xff] }
 0x32a   : > { %18400 = vst [vmem:[#allocation147_spill] sm:$0xff] %v15954_v21  ;;  %6539 = vmatprep.mubr.bf16.mxu1 %v18402_v14  ;;  %v18406_v14 = vld [vmem:[#allocation181_spill] sm:$0xff]  ;;  %v18506_v21 = vld [vmem:[#allocation127_spill] sm:$0xff] }
 0x32b   : > { %v4429_v15 = vpop.f32.mrb[32].mxu0 }
 0x32c   : > { %v4660_v28 = vpop.f32.mrb[32].mxu1  ;;  %v4430_v42 = vadd.f32 %v4429_v15, %v15584_v54  ;;  %v4431_v58 = vpop.f32.mrb[33].mxu0 }
 0x32d   : > { %v4662_v62 = vpop.f32.mrb[33].mxu1  ;;  %v4432_v48 = vpop.f32.mrb[34].mxu0 }
 0x32e   : > { %v4663_v46 = vpop.f32.mrb[34].mxu1  ;;  %v15961_v17 = vadd.f32 %v4660_v28, %v4430_v42  ;;  %v4433_v18 = vadd.f32 %v4432_v48, %v15586_v39  ;;  %v4434_v34 = vpop.f32.mrb[35].mxu0 }
 0x32f   : > { %v4665_v25 = vpop.f32.mrb[35].mxu1 }
 0x330   : > { %18403 = vst [vmem:[#allocation157_spill] sm:$0xff] %v15961_v17  ;;  %v15964_v1 = vadd.f32 %v4663_v46, %v4433_v18  ;;  %5163 = vmatmul.mubr.bf16.gmra.mrb[140].mxu0 %v18405_v33  ;;  %v18505_v17 = vld [vmem:[#allocation129_spill] sm:$0xff] }
 0x331   : > { %6540 = vmatmul.mubr.bf16.gmra.mrb[140].mxu1 %v18405_v33  ;;  %5170 = vmatprep.mubr.bf16.mxu0 %v18406_v14  ;;  %v18409_v33 = vld [vmem:[#allocation179_spill] sm:$0xff] }
 0x332   : > { %18404 = vst [vmem:[#allocation155_spill] sm:$0xff] %v15964_v1  ;;  %6547 = vmatprep.mubr.bf16.mxu1 %v18406_v14  ;;  %v18410_v14 = vld [vmem:[#allocation193_spill] sm:$0xff]  ;;  %v18504_v1 = vld [vmem:[#allocation119_spill] sm:$0xff] }
 0x333   : > { %v4437_v54 = vpop.f32.mrb[36].mxu0 }
 0x334   : > { %v4668_v15 = vpop.f32.mrb[36].mxu1  ;;  %v4438_v58 = vadd.f32 %v4437_v54, %v15592_v43  ;;  %v4439_v28 = vpop.f32.mrb[37].mxu0 }
 0x335   : > { %v4670_v42 = vpop.f32.mrb[37].mxu1  ;;  %v4440_v62 = vpop.f32.mrb[38].mxu0 }
 0x336   : > { %v4671_v39 = vpop.f32.mrb[38].mxu1  ;;  %v15971_v48 = vadd.f32 %v4668_v15, %v4438_v58  ;;  %v4441_v46 = vadd.f32 %v4440_v62, %v15594_v50  ;;  %v4442_v18 = vpop.f32.mrb[39].mxu0 }
 0x337   : > { %v4673_v34 = vpop.f32.mrb[39].mxu1 }
 0x338   : > { %18407 = vst [vmem:[#allocation165_spill] sm:$0xff] %v15971_v48  ;;  %v15974_v25 = vadd.f32 %v4671_v39, %v4441_v46  ;;  %5171 = vmatmul.mubr.bf16.gmra.mrb[144].mxu0 %v18409_v33  ;;  %v18503_v48 = vld [vmem:[#allocation121_spill] sm:$0xff] }
 0x339   : > { %6548 = vmatmul.mubr.bf16.gmra.mrb[144].mxu1 %v18409_v33  ;;  %5178 = vmatprep.mubr.bf16.mxu0 %v18410_v14  ;;  %v18413_v33 = vld [vmem:[#allocation191_spill] sm:$0xff] }
 0x33a   : > { %18408 = vst [vmem:[#allocation163_spill] sm:$0xff] %v15974_v25  ;;  %6555 = vmatprep.mubr.bf16.mxu1 %v18410_v14  ;;  %v18414_v14 = vld [vmem:[#allocation201_spill] sm:$0xff]  ;;  %v18502_v25 = vld [vmem:[#allocation111_spill] sm:$0xff] }
 0x33b   : > { %v4445_v43 = vpop.f32.mrb[40].mxu0 }
 0x33c   : > { %v4676_v54 = vpop.f32.mrb[40].mxu1  ;;  %v4446_v28 = vadd.f32 %v4445_v43, %v15600_v52  ;;  %v4447_v15 = vpop.f32.mrb[41].mxu0 }
 0x33d   : > { %v4678_v58 = vpop.f32.mrb[41].mxu1  ;;  %v4448_v42 = vpop.f32.mrb[42].mxu0 }
 0x33e   : > { %v4679_v50 = vpop.f32.mrb[42].mxu1  ;;  %v15981_v62 = vadd.f32 %v4676_v54, %v4446_v28  ;;  %v4449_v39 = vadd.f32 %v4448_v42, %v15602_v9  ;;  %v4450_v46 = vpop.f32.mrb[43].mxu0 }
 0x33f   : > { %v4681_v18 = vpop.f32.mrb[43].mxu1 }
 0x340   : > { %18411 = vst [vmem:[#allocation173_spill] sm:$0xff] %v15981_v62  ;;  %v15984_v34 = vadd.f32 %v4679_v50, %v4449_v39  ;;  %5179 = vmatmul.mubr.bf16.gmra.mrb[148].mxu0 %v18413_v33  ;;  %v18501_v62 = vld [vmem:[#allocation113_spill] sm:$0xff] }
 0x341   : > { %6556 = vmatmul.mubr.bf16.gmra.mrb[148].mxu1 %v18413_v33  ;;  %5186 = vmatprep.mubr.bf16.mxu0 %v18414_v14  ;;  %v18417_v33 = vld [vmem:[#allocation199_spill] sm:$0xff] }
 0x342   : > { %18412 = vst [vmem:[#allocation171_spill] sm:$0xff] %v15984_v34  ;;  %6563 = vmatprep.mubr.bf16.mxu1 %v18414_v14  ;;  %v18418_v14 = vld [vmem:[#allocation204_spill] sm:$0xff]  ;;  %v18500_v34 = vld [vmem:[#allocation103_spill] sm:$0xff] }
 0x343   : > { %v4453_v52 = vpop.f32.mrb[44].mxu0 }
 0x344   : > { %v4684_v43 = vpop.f32.mrb[44].mxu1  ;;  %v4454_v15 = vadd.f32 %v4453_v52, %v15608_v12  ;;  %v4455_v54 = vpop.f32.mrb[45].mxu0 }
 0x345   : > { %v4686_v28 = vpop.f32.mrb[45].mxu1  ;;  %v4456_v58 = vpop.f32.mrb[46].mxu0 }
 0x346   : > { %v4687_v9 = vpop.f32.mrb[46].mxu1  ;;  %v15991_v42 = vadd.f32 %v4684_v43, %v4454_v15  ;;  %v4457_v50 = vadd.f32 %v4456_v58, %v15610_v41  ;;  %v4458_v39 = vpop.f32.mrb[47].mxu0 }
 0x347   : > { %v4689_v46 = vpop.f32.mrb[47].mxu1 }
 0x348   : > { %18415 = vst [vmem:[#allocation181_spill] sm:$0xff] %v15991_v42  ;;  %v15994_v18 = vadd.f32 %v4687_v9, %v4457_v50  ;;  %5187 = vmatmul.mubr.bf16.gmra.mrb[152].mxu0 %v18417_v33  ;;  %v18499_v42 = vld [vmem:[#allocation105_spill] sm:$0xff] }
 0x349   : > { %6564 = vmatmul.mubr.bf16.gmra.mrb[152].mxu1 %v18417_v33  ;;  %5194 = vmatprep.mubr.bf16.mxu0 %v18418_v14  ;;  %v18421_v33 = vld [vmem:[#allocation14_spill] sm:$0xff] }
 0x34a   : > { %18416 = vst [vmem:[#allocation179_spill] sm:$0xff] %v15994_v18  ;;  %6571 = vmatprep.mubr.bf16.mxu1 %v18418_v14  ;;  %v18498_v18 = vld [vmem:[#allocation95_spill] sm:$0xff] }
 0x34b   : > { %v4461_v12 = vpop.f32.mrb[48].mxu0 }
 0x34c   : > { %v4692_v52 = vpop.f32.mrb[48].mxu1  ;;  %v4462_v54 = vadd.f32 %v4461_v12, %v15624_v2  ;;  %v4463_v43 = vpop.f32.mrb[49].mxu0 }
 0x34d   : > { %v4694_v15 = vpop.f32.mrb[49].mxu1  ;;  %v4464_v28 = vpop.f32.mrb[50].mxu0 }
 0x34e   : > { %v4695_v41 = vpop.f32.mrb[50].mxu1  ;;  %v16001_v58 = vadd.f32 %v4692_v52, %v4462_v54  ;;  %v4465_v9 = vadd.f32 %v4464_v28, %v15634_v57  ;;  %v4466_v50 = vpop.f32.mrb[51].mxu0  ;;  %v13940_v15 = vld [vmem:[%s17625_s2 + $0x100] sm:$0xff]  }
 0x34f   : > { %v4697_v39 = vpop.f32.mrb[51].mxu1  ;;  %v13941_v50 = vld [vmem:[%s17625_s2 + $0x200] sm:$0xff]  }
 0x350   : > { %18419 = vst [vmem:[#allocation193_spill] sm:$0xff] %v16001_v58  ;;  %v16004_v46 = vadd.f32 %v4695_v41, %v4465_v9  ;;  %5195 = vmatmul.mubr.bf16.gmra.mrb[156].mxu0 %v15282_v29  ;;  %v18497_v58 = vld [vmem:[#allocation97_spill] sm:$0xff] }
 0x351   : > { %6572 = vmatmul.mubr.bf16.gmra.mrb[156].mxu1 %v15282_v29  ;;  %5234 = vmatprep.mubr.bf16.mxu0 %v18421_v33 }
 0x352   : > { %18420 = vst [vmem:[#allocation191_spill] sm:$0xff] %v16004_v46  ;;  %6611 = vmatprep.mubr.bf16.mxu1 %v18421_v33  ;;  %v18425_v33 = vld [vmem:[#allocation22_spill] sm:$0xff]  ;;  %v18496_v46 = vld [vmem:[#allocation87_spill] sm:$0xff] }
 0x353   : > { %v4469_v2 = vpop.f32.mrb[52].mxu0 }
 0x354   : > { %v4700_v14 = vpop.f32.mrb[52].mxu1  ;;  %v4470_v12 = vadd.f32 %v4469_v2, %v15640_v23  ;;  %v4471_v52 = vpop.f32.mrb[53].mxu0  ;;  %v18424_v23 = vld [vmem:[#allocation12_spill] sm:$0xff] }
 0x355   : > { %v4702_v54 = vpop.f32.mrb[53].mxu1  ;;  %v4472_v43 = vpop.f32.mrb[54].mxu0  ;;  %v13942_v2 = vld [vmem:[%s17625_s2 + $0x108] sm:$0xff]  }
 0x356   : > { %v4703_v57 = vpop.f32.mrb[54].mxu1  ;;  %v16014_v28 = vadd.f32 %v4700_v14, %v4470_v12  ;;  %v4473_v29 = vadd.f32 %v4472_v43, %v15648_v60  ;;  %v4474_v41 = vpop.f32.mrb[55].mxu0  ;;  %v13943_v60 = vld [vmem:[%s17625_s2 + $0x208] sm:$0xff]  }
 0x357   : > { %v4705_v9 = vpop.f32.mrb[55].mxu1  ;;  %v13944_v41 = vld [vmem:[%s17625_s2 + $0x110] sm:$0xff]  }
 0x358   : > { %18422 = vst [vmem:[#allocation201_spill] sm:$0xff] %v16014_v28  ;;  %v16020_v39 = vadd.f32 %v4703_v57, %v4473_v29  ;;  %5235 = vmatmul.mubr.bf16.vlgmr.msra.gmra.mrb[60].mxu0 %v18424_v23  ;;  %v13945_v9 = vld [vmem:[%s17625_s2 + $0x210] sm:$0xff]  }
 0x359   : > { %6612 = vmatmul.mubr.bf16.vlgmr.msra.gmra.mrb[60].mxu1 %v18424_v23  ;;  %5627 = vmatpush1.bf16.msra.mxu0 %v13940_v15  ;;  %v18427_v23 = vld [vmem:[#allocation30_spill] sm:$0xff]  ;;  %v18493_v28 = vld [vmem:[#allocation81_spill] sm:$0xff] }
 0x35a   : > { %18423 = vst [vmem:[#allocation199_spill] sm:$0xff] %v16020_v39  ;;  %5242 = vmatprep.mubr.bf16.mxu0 %v18425_v33  ;;  %6619 = vmatprep.mubr.bf16.mxu1 %v18425_v33  ;;  %v13946_v33 = vld [vmem:[%s17625_s2 + $0x118] sm:$0xff]   ;;  %v18492_v39 = vld [vmem:[#allocation71_spill] sm:$0xff] }
 0x35b   : > { %7004 = vmatpush1.bf16.msra.mxu1 %v13941_v50  ;;  %v4477_v14 = vpop.f32.mrb[56].mxu0  ;;  %5628 = vmatprep.subr.bf16.mxu0 %v18094_v3  ;;  %v18426_v50 = vld [vmem:[#allocation20_spill] sm:$0xff] }
 0x35c   : > { %v4708_v12 = vpop.f32.mrb[56].mxu1  ;;  %7005 = vmatprep.subr.bf16.mxu1 %v18094_v3  ;;  %v4478_v52 = vpop.f32.mrb[57].mxu0  ;;  %v13949_v14 = vld [vmem:[%s17625_s2 + $0x220] sm:$0xff]  }
 0x35d   : > { %v4709_v54 = vpop.f32.mrb[57].mxu1  ;;  %v4479_v43 = vpop.f32.mrb[58].mxu0  ;;  %5629 = vmatpush1.bf16.msra.mxu0 %v13942_v2  ;;  %v13947_v2 = vld [vmem:[%s17625_s2 + $0x218] sm:$0xff]   ;;  %v18428_v12 = vld [vmem:[#allocation28_spill] sm:$0xff] }
 0x35e   : > { %v4710_v57 = vpop.f32.mrb[58].mxu1  ;;  %v4480_v15 = vpop.f32.mrb[59].mxu0  ;;  %5630 = vmatprep.subr.bf16.mxu0 %v18094_v3  ;;  %v18429_v52 = vld [vmem:[#allocation38_spill] sm:$0xff]  ;;  %v13950_v54 = vld [vmem:[%s17625_s2 + $0x128] sm:$0xff]  }
 0x35f   : > { %v4711_v29 = vpop.f32.mrb[59].mxu1  ;;  %7006 = vmatpush1.bf16.msra.mxu1 %v13943_v60  ;;  %v13948_v60 = vld [vmem:[%s17625_s2 + $0x120] sm:$0xff]   ;;  %v13951_v43 = vld [vmem:[%s17625_s2 + $0x228] sm:$0xff]   ;;  %v13952_v57 = vld [vmem:[%s17625_s2 + $0x130] sm:$0xff]  }
 0x360   : > { %7007 = vmatprep.subr.bf16.mxu1 %v18094_v3  ;;  %5243 = vmatmul.mubr.bf16.gmra.mrb[64].mxu0 %v18426_v50  ;;  %v13953_v15 = vld [vmem:[%s17625_s2 + $0x230] sm:$0xff]   ;;  %v18430_v29 = vld [vmem:[#allocation36_spill] sm:$0xff] }
 0x361   : > { %6620 = vmatmul.mubr.bf16.gmra.mrb[64].mxu1 %v18426_v50  ;;  %5250 = vmatprep.mubr.bf16.mxu0 %v18427_v23  ;;  %v13955_v50 = vld [vmem:[%s17625_s2 + $0x238] sm:$0xff]  }
 0x362   : > { %6627 = vmatprep.mubr.bf16.mxu1 %v18427_v23  ;;  %5631 = vmatpush1.bf16.msra.mxu0 %v13944_v41  ;;  %v18431_v41 = vld [vmem:[#allocation46_spill] sm:$0xff]  ;;  %v13956_v23 = vld [vmem:[%s17625_s2 + $0x140] sm:$0xff]  }
 0x363   : > { %7008 = vmatpush1.bf16.msra.mxu1 %v13945_v9  ;;  %5632 = vmatprep.subr.bf16.mxu0 %v18094_v3  ;;  %v13954_v9 = vld [vmem:[%s17625_s2 + $0x138] sm:$0xff]  }
 0x364   : > { %7009 = vmatprep.subr.bf16.mxu1 %v18094_v3 }
 0x366   : > { %5633 = vmatpush1.bf16.msra.mxu0 %v13946_v33  ;;  %v13957_v33 = vld [vmem:[%s17625_s2 + $0x240] sm:$0xff]  }
 0x367   : > { %7010 = vmatpush1.bf16.msra.mxu1 %v13947_v2  ;;  %5634 = vmatprep.subr.bf16.mxu0 %v18094_v3  ;;  %v18432_v2 = vld [vmem:[#allocation44_spill] sm:$0xff] }
 0x368   : > { %7011 = vmatprep.subr.bf16.mxu1 %v18094_v3  ;;  %5251 = vmatmul.mubr.bf16.gmra.mrb[68].mxu0 %v18428_v12 }
 0x369   : > { %6628 = vmatmul.mubr.bf16.gmra.mrb[68].mxu1 %v18428_v12  ;;  %5258 = vmatprep.mubr.bf16.mxu0 %v18429_v52  ;;  %v13959_v12 = vld [vmem:[%s17625_s2 + $0x248] sm:$0xff]  }
 0x36a   : > { %6635 = vmatprep.mubr.bf16.mxu1 %v18429_v52  ;;  %5635 = vmatpush1.bf16.msra.mxu0 %v13948_v60  ;;  %v18433_v60 = vld [vmem:[#allocation54_spill] sm:$0xff]  ;;  %v13960_v52 = vld [vmem:[%s17625_s2 + $0x150] sm:$0xff]  }
 0x36b   : > { %7012 = vmatpush1.bf16.msra.mxu1 %v13949_v14  ;;  %5636 = vmatprep.subr.bf16.mxu0 %v18094_v3  ;;  %v13958_v14 = vld [vmem:[%s17625_s2 + $0x148] sm:$0xff]  }
 0x36c   : > { %7013 = vmatprep.subr.bf16.mxu1 %v18094_v3 }
 0x36e   : > { %5637 = vmatpush1.bf16.msra.mxu0 %v13950_v54  ;;  %v13961_v54 = vld [vmem:[%s17625_s2 + $0x250] sm:$0xff]  }
 0x36f   : > { %7014 = vmatpush1.bf16.msra.mxu1 %v13951_v43  ;;  %5638 = vmatprep.subr.bf16.mxu0 %v18094_v3  ;;  %v18434_v43 = vld [vmem:[#allocation52_spill] sm:$0xff] }
 0x370   : > { %7015 = vmatprep.subr.bf16.mxu1 %v18094_v3  ;;  %5259 = vmatmul.mubr.bf16.gmra.mrb[72].mxu0 %v18430_v29 }
 0x371   : > { %6636 = vmatmul.mubr.bf16.gmra.mrb[72].mxu1 %v18430_v29  ;;  %5266 = vmatprep.mubr.bf16.mxu0 %v18431_v41  ;;  %v13963_v29 = vld [vmem:[%s17625_s2 + $0x258] sm:$0xff]  }
 0x372   : > { %6643 = vmatprep.mubr.bf16.mxu1 %v18431_v41  ;;  %5639 = vmatpush1.bf16.msra.mxu0 %v13952_v57  ;;  %v18435_v57 = vld [vmem:[#allocation62_spill] sm:$0xff]  ;;  %v13964_v41 = vld [vmem:[%s17625_s2 + $0x160] sm:$0xff]  }
 0x373   : > { %7016 = vmatpush1.bf16.msra.mxu1 %v13953_v15  ;;  %5640 = vmatprep.subr.bf16.mxu0 %v18094_v3  ;;  %v13962_v15 = vld [vmem:[%s17625_s2 + $0x158] sm:$0xff]  }
 0x374   : > { %7017 = vmatprep.subr.bf16.mxu1 %v18094_v3 }
 0x376   : > { %5641 = vmatpush1.bf16.msra.mxu0 %v13954_v9  ;;  %v13965_v9 = vld [vmem:[%s17625_s2 + $0x260] sm:$0xff]  }
 0x377   : > { %7018 = vmatpush1.bf16.msra.mxu1 %v13955_v50  ;;  %5642 = vmatprep.subr.bf16.mxu0 %v18094_v3  ;;  %v18436_v50 = vld [vmem:[#allocation60_spill] sm:$0xff] }
 0x378   : > { %7019 = vmatprep.subr.bf16.mxu1 %v18094_v3  ;;  %5267 = vmatmul.mubr.bf16.gmra.mrb[76].mxu0 %v18432_v2 }
 0x379   : > { %6644 = vmatmul.mubr.bf16.gmra.mrb[76].mxu1 %v18432_v2  ;;  %5274 = vmatprep.mubr.bf16.mxu0 %v18433_v60  ;;  %v13967_v2 = vld [vmem:[%s17625_s2 + $0x268] sm:$0xff]  }
 0x37a   : > { %6651 = vmatprep.mubr.bf16.mxu1 %v18433_v60  ;;  %5643 = vmatpush1.bf16.msra.mxu0 %v13956_v23  ;;  %v18437_v23 = vld [vmem:[#allocation70_spill] sm:$0xff]  ;;  %v13968_v60 = vld [vmem:[%s17625_s2 + $0x170] sm:$0xff]  }
 0x37b   : > { %7020 = vmatpush1.bf16.msra.mxu1 %v13957_v33  ;;  %5644 = vmatprep.subr.bf16.mxu0 %v18094_v3  ;;  %v13966_v33 = vld [vmem:[%s17625_s2 + $0x168] sm:$0xff]  }
 0x37c   : > { %7021 = vmatprep.subr.bf16.mxu1 %v18094_v3 }
 0x37e   : > { %5645 = vmatpush1.bf16.msra.mxu0 %v13958_v14  ;;  %v13969_v14 = vld [vmem:[%s17625_s2 + $0x270] sm:$0xff]  }
 0x37f   : > { %7022 = vmatpush1.bf16.msra.mxu1 %v13959_v12  ;;  %5646 = vmatprep.subr.bf16.mxu0 %v18094_v3  ;;  %v18438_v12 = vld [vmem:[#allocation68_spill] sm:$0xff] }
 0x380   : > { %7023 = vmatprep.subr.bf16.mxu1 %v18094_v3  ;;  %5275 = vmatmul.mubr.bf16.gmra.mrb[80].mxu0 %v18434_v43 }
 0x381   : > { %6652 = vmatmul.mubr.bf16.gmra.mrb[80].mxu1 %v18434_v43  ;;  %5282 = vmatprep.mubr.bf16.mxu0 %v18435_v57  ;;  %v13971_v43 = vld [vmem:[%s17625_s2 + $0x278] sm:$0xff]  }
 0x382   : > { %6659 = vmatprep.mubr.bf16.mxu1 %v18435_v57  ;;  %5647 = vmatpush1.bf16.msra.mxu0 %v13960_v52  ;;  %v18439_v52 = vld [vmem:[#allocation78_spill] sm:$0xff]  ;;  %v18440_v57 = vld [vmem:[#allocation76_spill] sm:$0xff] }
 0x383   : > { %7024 = vmatpush1.bf16.msra.mxu1 %v13961_v54  ;;  %5648 = vmatprep.subr.bf16.mxu0 %v18094_v3  ;;  %v13970_v54 = vld [vmem:[%s17625_s2 + $0x178] sm:$0xff]  }
 0x384   : > { %7025 = vmatprep.subr.bf16.mxu1 %v18094_v3 }
 0x386   : > { %5649 = vmatpush1.bf16.msra.mxu0 %v13962_v15  ;;  %v18441_v15 = vld [vmem:[#allocation86_spill] sm:$0xff] }
 0x387   : > { %7026 = vmatpush1.bf16.msra.mxu1 %v13963_v29  ;;  %5650 = vmatprep.subr.bf16.mxu0 %v18094_v3  ;;  %v18442_v29 = vld [vmem:[#allocation84_spill] sm:$0xff] }
 0x388   : > { %7027 = vmatprep.subr.bf16.mxu1 %v18094_v3  ;;  %5283 = vmatmul.mubr.bf16.gmra.mrb[84].mxu0 %v18436_v50 }
 0x389   : > { %6660 = vmatmul.mubr.bf16.gmra.mrb[84].mxu1 %v18436_v50  ;;  %5290 = vmatprep.mubr.bf16.mxu0 %v18437_v23  ;;  %v18445_v50 = vld [vmem:[#allocation102_spill] sm:$0xff] }
 0x38a   : > { %6667 = vmatprep.mubr.bf16.mxu1 %v18437_v23  ;;  %5651 = vmatpush1.bf16.msra.mxu0 %v13964_v41  ;;  %v18443_v41 = vld [vmem:[#allocation94_spill] sm:$0xff]  ;;  %v18446_v23 = vld [vmem:[#allocation100_spill] sm:$0xff] }
 0x38b   : > { %7028 = vmatpush1.bf16.msra.mxu1 %v13965_v9  ;;  %5652 = vmatprep.subr.bf16.mxu0 %v18094_v3  ;;  %v18444_v9 = vld [vmem:[#allocation92_spill] sm:$0xff] }
 0x38c   : > { %7029 = vmatprep.subr.bf16.mxu1 %v18094_v3 }
 0x38e   : > { %5653 = vmatpush1.bf16.msra.mxu0 %v13966_v33  ;;  %v18447_v33 = vld [vmem:[#allocation110_spill] sm:$0xff] }
 0x38f   : > { %7030 = vmatpush1.bf16.msra.mxu1 %v13967_v2  ;;  %5654 = vmatprep.subr.bf16.mxu0 %v18094_v3  ;;  %v18448_v2 = vld [vmem:[#allocation108_spill] sm:$0xff] }
 0x390   : > { %7031 = vmatprep.subr.bf16.mxu1 %v18094_v3  ;;  %5291 = vmatmul.mubr.bf16.gmra.mrb[88].mxu0 %v18438_v12 }
 0x391   : > { %6668 = vmatmul.mubr.bf16.gmra.mrb[88].mxu1 %v18438_v12  ;;  %5298 = vmatprep.mubr.bf16.mxu0 %v18439_v52  ;;  %v18451_v12 = vld [vmem:[#allocation126_spill] sm:$0xff] }
 0x392   : > { %6675 = vmatprep.mubr.bf16.mxu1 %v18439_v52  ;;  %5655 = vmatpush1.bf16.msra.mxu0 %v13968_v60  ;;  %v18449_v60 = vld [vmem:[#allocation118_spill] sm:$0xff]  ;;  %v18452_v52 = vld [vmem:[#allocation124_spill] sm:$0xff] }
 0x393   : > { %7032 = vmatpush1.bf16.msra.mxu1 %v13969_v14  ;;  %5656 = vmatprep.subr.bf16.mxu0 %v18094_v3  ;;  %v18450_v14 = vld [vmem:[#allocation116_spill] sm:$0xff] }
 0x394   : > { %7033 = vmatprep.subr.bf16.mxu1 %v18094_v3 }
 0x396   : > { %5657 = vmatpush1.bf16.msra.mxu0 %v13970_v54  ;;  %v18453_v54 = vld [vmem:[#allocation134_spill] sm:$0xff] }
 0x397   : > { %7034 = vmatpush1.bf16.msra.mxu1 %v13971_v43  ;;  %5858 = vmatprep.subr.bf16.mxu0 %v18094_v3  ;;  %v18454_v43 = vld [vmem:[#allocation132_spill] sm:$0xff] }
 0x398   : > { %7235 = vmatprep.subr.bf16.mxu1 %v18094_v3  ;;  %5299 = vmatmul.mubr.bf16.gmra.mrb[92].mxu0 %v18440_v57 }
 0x399   : > { %6676 = vmatmul.mubr.bf16.gmra.mrb[92].mxu1 %v18440_v57  ;;  %5306 = vmatprep.mubr.bf16.mxu0 %v18441_v15  ;;  %v18455_v57 = vld [vmem:[#allocation142_spill] sm:$0xff] }
 0x39a   : > { %6683 = vmatprep.mubr.bf16.mxu1 %v18441_v15  ;;  %v18456_v15 = vld [vmem:[#allocation140_spill] sm:$0xff] }
 0x3a0   : > { %5307 = vmatmul.mubr.bf16.gmra.mrb[96].mxu0 %v18442_v29 }
 0x3a1   : > { %6684 = vmatmul.mubr.bf16.gmra.mrb[96].mxu1 %v18442_v29  ;;  %5314 = vmatprep.mubr.bf16.mxu0 %v18443_v41  ;;  %v18457_v29 = vld [vmem:[#allocation150_spill] sm:$0xff] }
 0x3a2   : > { %6691 = vmatprep.mubr.bf16.mxu1 %v18443_v41  ;;  %v18458_v41 = vld [vmem:[#allocation148_spill] sm:$0xff] }
 0x3a8   : > { %5315 = vmatmul.mubr.bf16.gmra.mrb[100].mxu0 %v18444_v9 }
 0x3a9   : > { %6692 = vmatmul.mubr.bf16.gmra.mrb[100].mxu1 %v18444_v9  ;;  %5322 = vmatprep.mubr.bf16.mxu0 %v18445_v50  ;;  %v18459_v9 = vld [vmem:[#allocation158_spill] sm:$0xff] }
 0x3aa   : > { %6699 = vmatprep.mubr.bf16.mxu1 %v18445_v50  ;;  %v18460_v50 = vld [vmem:[#allocation156_spill] sm:$0xff] }
 0x3b0   : > { %5323 = vmatmul.mubr.bf16.gmra.mrb[104].mxu0 %v18446_v23 }
 0x3b1   : > { %6700 = vmatmul.mubr.bf16.gmra.mrb[104].mxu1 %v18446_v23  ;;  %5330 = vmatprep.mubr.bf16.mxu0 %v18447_v33  ;;  %v18461_v23 = vld [vmem:[#allocation166_spill] sm:$0xff] }
 0x3b2   : > { %6707 = vmatprep.mubr.bf16.mxu1 %v18447_v33  ;;  %v18462_v33 = vld [vmem:[#allocation164_spill] sm:$0xff] }
 0x3b8   : > { %5331 = vmatmul.mubr.bf16.gmra.mrb[108].mxu0 %v18448_v2 }
 0x3b9   : > { %6708 = vmatmul.mubr.bf16.gmra.mrb[108].mxu1 %v18448_v2  ;;  %5338 = vmatprep.mubr.bf16.mxu0 %v18449_v60  ;;  %v18463_v2 = vld [vmem:[#allocation174_spill] sm:$0xff] }
 0x3ba   : > { %6715 = vmatprep.mubr.bf16.mxu1 %v18449_v60  ;;  %v18464_v60 = vld [vmem:[#allocation172_spill] sm:$0xff] }
 0x3c0   : > { %5339 = vmatmul.mubr.bf16.gmra.mrb[112].mxu0 %v18450_v14 }
 0x3c1   : > { %6716 = vmatmul.mubr.bf16.gmra.mrb[112].mxu1 %v18450_v14  ;;  %5346 = vmatprep.mubr.bf16.mxu0 %v18451_v12  ;;  %v18465_v14 = vld [vmem:[#allocation182_spill] sm:$0xff] }
 0x3c2   : > { %6723 = vmatprep.mubr.bf16.mxu1 %v18451_v12  ;;  %v18466_v12 = vld [vmem:[#allocation180_spill] sm:$0xff] }
 0x3c8   : > { %5347 = vmatmul.mubr.bf16.gmra.mrb[116].mxu0 %v18452_v52 }
 0x3c9   : > { %6724 = vmatmul.mubr.bf16.gmra.mrb[116].mxu1 %v18452_v52  ;;  %5354 = vmatprep.mubr.bf16.mxu0 %v18453_v54  ;;  %v18467_v52 = vld [vmem:[#allocation194_spill] sm:$0xff] }
 0x3ca   : > { %6731 = vmatprep.mubr.bf16.mxu1 %v18453_v54  ;;  %v18468_v54 = vld [vmem:[#allocation192_spill] sm:$0xff] }
 0x3d0   : > { %5355 = vmatmul.mubr.bf16.gmra.mrb[120].mxu0 %v18454_v43 }
 0x3d1   : > { %6732 = vmatmul.mubr.bf16.gmra.mrb[120].mxu1 %v18454_v43  ;;  %5362 = vmatprep.mubr.bf16.mxu0 %v18455_v57  ;;  %v18469_v43 = vld [vmem:[#allocation202_spill] sm:$0xff] }
 0x3d2   : > { %6739 = vmatprep.mubr.bf16.mxu1 %v18455_v57  ;;  %v18470_v57 = vld [vmem:[#allocation200_spill] sm:$0xff] }
 0x3d8   : > { %5363 = vmatmul.mubr.bf16.gmra.mrb[124].mxu0 %v18456_v15 }
 0x3d9   : > { %6740 = vmatmul.mubr.bf16.gmra.mrb[124].mxu1 %v18456_v15  ;;  %5370 = vmatprep.mubr.bf16.mxu0 %v18457_v29  ;;  %v18471_v15 = vld [vmem:[#allocation205_spill] sm:$0xff] }
 0x3da   : > { %6747 = vmatprep.mubr.bf16.mxu1 %v18457_v29  ;;  %v18472_v29 = vld [vmem:[#allocation209_spill] sm:$0xff] }
 0x3e0   : > { %5371 = vmatmul.mubr.bf16.gmra.mrb[128].mxu0 %v18458_v41 }
 0x3e1   : > { %6748 = vmatmul.mubr.bf16.gmra.mrb[128].mxu1 %v18458_v41  ;;  %5378 = vmatprep.mubr.bf16.mxu0 %v18459_v9  ;;  %v18473_v41 = vld [vmem:[#allocation5_spill] sm:$0xff] }
 0x3e2   : > { %6755 = vmatprep.mubr.bf16.mxu1 %v18459_v9  ;;  %v13972_v9 = vld [vmem:[%s17625_s2 + $0x180] sm:$0xff]  }
 0x3e8   : > { %5379 = vmatmul.mubr.bf16.gmra.mrb[132].mxu0 %v18460_v50 }
 0x3e9   : > { %6756 = vmatmul.mubr.bf16.gmra.mrb[132].mxu1 %v18460_v50  ;;  %5386 = vmatprep.mubr.bf16.mxu0 %v18461_v23  ;;  %v13973_v50 = vld [vmem:[%s17625_s2 + $0x280] sm:$0xff]  }
 0x3ea   : > { %6763 = vmatprep.mubr.bf16.mxu1 %v18461_v23  ;;  %v18474_v23 = vld [vmem:[#allocation3_spill] sm:$0xff] }
 0x3f0   : > { %5387 = vmatmul.mubr.bf16.gmra.mrb[136].mxu0 %v18462_v33 }
 0x3f1   : > { %6764 = vmatmul.mubr.bf16.gmra.mrb[136].mxu1 %v18462_v33  ;;  %5394 = vmatprep.mubr.bf16.mxu0 %v18463_v2  ;;  %v18475_v33 = vld [vmem:[#allocation9_spill] sm:$0xff] }
 0x3f2   : > { %6771 = vmatprep.mubr.bf16.mxu1 %v18463_v2  ;;  %v13974_v2 = vld [vmem:[%s17625_s2 + $0x188] sm:$0xff]  }
 0x3f8   : > { %5395 = vmatmul.mubr.bf16.gmra.mrb[140].mxu0 %v18464_v60 }
 0x3f9   : > { %6772 = vmatmul.mubr.bf16.gmra.mrb[140].mxu1 %v18464_v60  ;;  %5402 = vmatprep.mubr.bf16.mxu0 %v18465_v14  ;;  %v13975_v60 = vld [vmem:[%s17625_s2 + $0x288] sm:$0xff]  }
 0x3fa   : > { %6779 = vmatprep.mubr.bf16.mxu1 %v18465_v14  ;;  %v13976_v14 = vld [vmem:[%s17625_s2 + $0x190] sm:$0xff]  }
 0x400   : > { %5403 = vmatmul.mubr.bf16.gmra.mrb[144].mxu0 %v18466_v12 }
 0x401   : > { %6780 = vmatmul.mubr.bf16.gmra.mrb[144].mxu1 %v18466_v12  ;;  %5410 = vmatprep.mubr.bf16.mxu0 %v18467_v52  ;;  %v13977_v12 = vld [vmem:[%s17625_s2 + $0x290] sm:$0xff]  }
 0x402   : > { %6787 = vmatprep.mubr.bf16.mxu1 %v18467_v52  ;;  %v18476_v52 = vld [vmem:[#allocation7_spill] sm:$0xff] }
 0x408   : > { %5411 = vmatmul.mubr.bf16.gmra.mrb[148].mxu0 %v18468_v54 }
 0x409   : > { %6788 = vmatmul.mubr.bf16.gmra.mrb[148].mxu1 %v18468_v54  ;;  %5418 = vmatprep.mubr.bf16.mxu0 %v18469_v43  ;;  %v18477_v54 = vld [vmem:[#allocation17_spill] sm:$0xff] }
 0x40a   : > { %6795 = vmatprep.mubr.bf16.mxu1 %v18469_v43  ;;  %v13978_v43 = vld [vmem:[%s17625_s2 + $0x198] sm:$0xff]  }
 0x410   : > { %5419 = vmatmul.mubr.bf16.gmra.mrb[152].mxu0 %v18470_v57 }
 0x411   : > { %6796 = vmatmul.mubr.bf16.gmra.mrb[152].mxu1 %v18470_v57  ;;  %5426 = vmatprep.mubr.bf16.mxu0 %v18471_v15  ;;  %v13979_v57 = vld [vmem:[%s17625_s2 + $0x298] sm:$0xff]  }
 0x412   : > { %6803 = vmatprep.mubr.bf16.mxu1 %v18471_v15  ;;  %v13980_v15 = vld [vmem:[%s17625_s2 + $0x1a0] sm:$0xff]  }
 0x418   : > { %5427 = vmatmul.mubr.bf16.gmra.mrb[156].mxu0 %v18472_v29 }
 0x419   : > { %6804 = vmatmul.mubr.bf16.gmra.mrb[156].mxu1 %v18472_v29  ;;  %5658 = vmatprep.mubr.bf16.mxu0 %v18473_v41  ;;  %v13981_v29 = vld [vmem:[%s17625_s2 + $0x2a0] sm:$0xff]  }
 0x41a   : > { %7035 = vmatprep.mubr.bf16.mxu1 %v18473_v41  ;;  %v18478_v41 = vld [vmem:[#allocation15_spill] sm:$0xff] }
 0x420   : > { %5659 = vmatmul.mubr.bf16.vlgmr.msra.gmra.mrb[60].mxu0 %v18474_v23 }
 0x421   : > { %7036 = vmatmul.mubr.bf16.vlgmr.msra.gmra.mrb[60].mxu1 %v18474_v23  ;;  %5859 = vmatpush1.bf16.msra.mxu0 %v13972_v9  ;;  %v18479_v9 = vld [vmem:[#allocation25_spill] sm:$0xff]  ;;  %v13983_v23 = vld [vmem:[%s17625_s2 + $0x2a8] sm:$0xff]  }
 0x422   : > { %5666 = vmatprep.mubr.bf16.mxu0 %v18475_v33  ;;  %7043 = vmatprep.mubr.bf16.mxu1 %v18475_v33  ;;  %v13984_v33 = vld [vmem:[%s17625_s2 + $0x1b0] sm:$0xff]  }
 0x423   : > { %7236 = vmatpush1.bf16.msra.mxu1 %v13973_v50  ;;  %5860 = vmatprep.subr.bf16.mxu0 %v18094_v3  ;;  %v13982_v50 = vld [vmem:[%s17625_s2 + $0x1a8] sm:$0xff]  }
 0x424   : > { %7237 = vmatprep.subr.bf16.mxu1 %v18094_v3 }
 0x425   : > { %5861 = vmatpush1.bf16.msra.mxu0 %v13974_v2  ;;  %v13985_v2 = vld [vmem:[%s17625_s2 + $0x2b0] sm:$0xff]  }
 0x426   : > { %5862 = vmatprep.subr.bf16.mxu0 %v18094_v3 }
 0x427   : > { %7238 = vmatpush1.bf16.msra.mxu1 %v13975_v60  ;;  %v18480_v60 = vld [vmem:[#allocation23_spill] sm:$0xff] }
 0x428   : > { %7239 = vmatprep.subr.bf16.mxu1 %v18094_v3  ;;  %5667 = vmatmul.mubr.bf16.gmra.mrb[64].mxu0 %v18476_v52 }
 0x429   : > { %7044 = vmatmul.mubr.bf16.gmra.mrb[64].mxu1 %v18476_v52  ;;  %5674 = vmatprep.mubr.bf16.mxu0 %v18477_v54  ;;  %v13987_v52 = vld [vmem:[%s17625_s2 + $0x2b8] sm:$0xff]  }
 0x42a   : > { %7051 = vmatprep.mubr.bf16.mxu1 %v18477_v54  ;;  %5863 = vmatpush1.bf16.msra.mxu0 %v13976_v14  ;;  %v18481_v14 = vld [vmem:[#allocation33_spill] sm:$0xff]  ;;  %v13988_v54 = vld [vmem:[%s17625_s2 + $0x1c0] sm:$0xff]  }
 0x42b   : > { %7240 = vmatpush1.bf16.msra.mxu1 %v13977_v12  ;;  %5864 = vmatprep.subr.bf16.mxu0 %v18094_v3  ;;  %v13986_v12 = vld [vmem:[%s17625_s2 + $0x1b8] sm:$0xff]  }
 0x42c   : > { %7241 = vmatprep.subr.bf16.mxu1 %v18094_v3 }
 0x42e   : > { %5865 = vmatpush1.bf16.msra.mxu0 %v13978_v43  ;;  %v13989_v43 = vld [vmem:[%s17625_s2 + $0x2c0] sm:$0xff]  }
 0x42f   : > { %7242 = vmatpush1.bf16.msra.mxu1 %v13979_v57  ;;  %5866 = vmatprep.subr.bf16.mxu0 %v18094_v3  ;;  %v18482_v57 = vld [vmem:[#allocation31_spill] sm:$0xff] }
 0x430   : > { %7243 = vmatprep.subr.bf16.mxu1 %v18094_v3  ;;  %5675 = vmatmul.mubr.bf16.gmra.mrb[68].mxu0 %v18478_v41 }
 0x431   : > { %7052 = vmatmul.mubr.bf16.gmra.mrb[68].mxu1 %v18478_v41  ;;  %5682 = vmatprep.mubr.bf16.mxu0 %v18479_v9  ;;  %v13991_v41 = vld [vmem:[%s17625_s2 + $0x2c8] sm:$0xff]  }
 0x432   : > { %7059 = vmatprep.mubr.bf16.mxu1 %v18479_v9  ;;  %5867 = vmatpush1.bf16.msra.mxu0 %v13980_v15  ;;  %v18483_v15 = vld [vmem:[#allocation41_spill] sm:$0xff] }
 0x433   : > { %7244 = vmatpush1.bf16.msra.mxu1 %v13981_v29  ;;  %5868 = vmatprep.subr.bf16.mxu0 %v18094_v3  ;;  %v13990_v29 = vld [vmem:[%s17625_s2 + $0x1c8] sm:$0xff]  }
 0x434   : > { %7245 = vmatprep.subr.bf16.mxu1 %v18094_v3 }
 0x436   : > { %5869 = vmatpush1.bf16.msra.mxu0 %v13982_v50  ;;  %v13992_v50 = vld [vmem:[%s17625_s2 + $0x1d0] sm:$0xff]  }
 0x437   : > { %7246 = vmatpush1.bf16.msra.mxu1 %v13983_v23  ;;  %5870 = vmatprep.subr.bf16.mxu0 %v18094_v3  ;;  %v13993_v23 = vld [vmem:[%s17625_s2 + $0x2d0] sm:$0xff]  }
 0x438   : > { %7247 = vmatprep.subr.bf16.mxu1 %v18094_v3  ;;  %5683 = vmatmul.mubr.bf16.gmra.mrb[72].mxu0 %v18480_v60 }
 0x439   : > { %7060 = vmatmul.mubr.bf16.gmra.mrb[72].mxu1 %v18480_v60  ;;  %5690 = vmatprep.mubr.bf16.mxu0 %v18481_v14 }
 0x43a   : > { %7067 = vmatprep.mubr.bf16.mxu1 %v18481_v14  ;;  %5871 = vmatpush1.bf16.msra.mxu0 %v13984_v33  ;;  %v18484_v33 = vld [vmem:[#allocation39_spill] sm:$0xff] }
 0x43b   : > { %7248 = vmatpush1.bf16.msra.mxu1 %v13985_v2  ;;  %5872 = vmatprep.subr.bf16.mxu0 %v18094_v3  ;;  %v18485_v2 = vld [vmem:[#allocation49_spill] sm:$0xff] }
 0x43c   : > { %7249 = vmatprep.subr.bf16.mxu1 %v18094_v3 }
 0x43e   : > { %5873 = vmatpush1.bf16.msra.mxu0 %v13986_v12  ;;  %v13994_v12 = vld [vmem:[%s17625_s2 + $0x1d8] sm:$0xff]  }
 0x43f   : > { %7250 = vmatpush1.bf16.msra.mxu1 %v13987_v52  ;;  %5874 = vmatprep.subr.bf16.mxu0 %v18094_v3  ;;  %v13995_v52 = vld [vmem:[%s17625_s2 + $0x2d8] sm:$0xff]  }
 0x440   : > { %7251 = vmatprep.subr.bf16.mxu1 %v18094_v3  ;;  %5691 = vmatmul.mubr.bf16.gmra.mrb[76].mxu0 %v18482_v57 }
 0x441   : > { %7068 = vmatmul.mubr.bf16.gmra.mrb[76].mxu1 %v18482_v57  ;;  %5698 = vmatprep.mubr.bf16.mxu0 %v18483_v15 }
 0x442   : > { %7075 = vmatprep.mubr.bf16.mxu1 %v18483_v15  ;;  %5875 = vmatpush1.bf16.msra.mxu0 %v13988_v54  ;;  %v13996_v54 = vld [vmem:[%s17625_s2 + $0x1e0] sm:$0xff]  }
 0x443   : > { %7252 = vmatpush1.bf16.msra.mxu1 %v13989_v43  ;;  %5876 = vmatprep.subr.bf16.mxu0 %v18094_v3  ;;  %v13997_v43 = vld [vmem:[%s17625_s2 + $0x2e0] sm:$0xff]  }
 0x444   : > { %7253 = vmatprep.subr.bf16.mxu1 %v18094_v3 }
 0x446   : > { %5877 = vmatpush1.bf16.msra.mxu0 %v13990_v29  ;;  %v18486_v29 = vld [vmem:[#allocation47_spill] sm:$0xff] }
 0x447   : > { %7254 = vmatpush1.bf16.msra.mxu1 %v13991_v41  ;;  %5878 = vmatprep.subr.bf16.mxu0 %v18094_v3  ;;  %v18487_v41 = vld [vmem:[#allocation57_spill] sm:$0xff] }
 0x448   : > { %7255 = vmatprep.subr.bf16.mxu1 %v18094_v3  ;;  %5699 = vmatmul.mubr.bf16.gmra.mrb[80].mxu0 %v18484_v33 }
 0x449   : > { %7076 = vmatmul.mubr.bf16.gmra.mrb[80].mxu1 %v18484_v33  ;;  %5706 = vmatprep.mubr.bf16.mxu0 %v18485_v2 }
 0x44a   : > { %7083 = vmatprep.mubr.bf16.mxu1 %v18485_v2  ;;  %5879 = vmatpush1.bf16.msra.mxu0 %v13992_v50  ;;  %v13998_v50 = vld [vmem:[%s17625_s2 + $0x1e8] sm:$0xff]  }
 0x44b   : > { %7256 = vmatpush1.bf16.msra.mxu1 %v13993_v23  ;;  %5880 = vmatprep.subr.bf16.mxu0 %v18094_v3  ;;  %v13999_v23 = vld [vmem:[%s17625_s2 + $0x2e8] sm:$0xff]  }
 0x44c   : > { %7257 = vmatprep.subr.bf16.mxu1 %v18094_v3 }
 0x44e   : > { %5881 = vmatpush1.bf16.msra.mxu0 %v13994_v12  ;;  %v14000_v12 = vld [vmem:[%s17625_s2 + $0x1f0] sm:$0xff]  }
 0x44f   : > { %7258 = vmatpush1.bf16.msra.mxu1 %v13995_v52  ;;  %5882 = vmatprep.subr.bf16.mxu0 %v18094_v3  ;;  %v14001_v52 = vld [vmem:[%s17625_s2 + $0x2f0] sm:$0xff]  }
 0x450   : > { %7259 = vmatprep.subr.bf16.mxu1 %v18094_v3  ;;  %5707 = vmatmul.mubr.bf16.gmra.mrb[84].mxu0 %v18486_v29 }
 0x451   : > { %7084 = vmatmul.mubr.bf16.gmra.mrb[84].mxu1 %v18486_v29  ;;  %5714 = vmatprep.mubr.bf16.mxu0 %v18487_v41 }
 0x452   : > { %7091 = vmatprep.mubr.bf16.mxu1 %v18487_v41  ;;  %5883 = vmatpush1.bf16.msra.mxu0 %v13996_v54  ;;  %v18488_v54 = vld [vmem:[#allocation55_spill] sm:$0xff] }
 0x453   : > { %7260 = vmatpush1.bf16.msra.mxu1 %v13997_v43  ;;  %5884 = vmatprep.subr.bf16.mxu0 %v18094_v3  ;;  %v18489_v43 = vld [vmem:[#allocation65_spill] sm:$0xff] }
 0x454   : > { %7261 = vmatprep.subr.bf16.mxu1 %v18094_v3 }
 0x456   : > { %5885 = vmatpush1.bf16.msra.mxu0 %v13998_v50  ;;  %v14002_v50 = vld [vmem:[%s17625_s2 + $0x1f8] sm:$0xff]  }
 0x457   : > { %7262 = vmatpush1.bf16.msra.mxu1 %v13999_v23  ;;  %5886 = vmatprep.subr.bf16.mxu0 %v18094_v3  ;;  %v14003_v23 = vld [vmem:[%s17625_s2 + $0x2f8] sm:$0xff]  }
 0x458   : > { %7263 = vmatprep.subr.bf16.mxu1 %v18094_v3  ;;  %5715 = vmatmul.mubr.bf16.gmra.mrb[88].mxu0 %v18488_v54 }
 0x459   : > { %7092 = vmatmul.mubr.bf16.gmra.mrb[88].mxu1 %v18488_v54  ;;  %5722 = vmatprep.mubr.bf16.mxu0 %v18489_v43 }
 0x45a   : > { %7099 = vmatprep.mubr.bf16.mxu1 %v18489_v43  ;;  %5887 = vmatpush1.bf16.msra.mxu0 %v14000_v12  ;;  %v18490_v12 = vld [vmem:[#allocation63_spill] sm:$0xff] }
 0x45b   : > { %7264 = vmatpush1.bf16.msra.mxu1 %v14001_v52  ;;  %5888 = vmatprep.subr.bf16.mxu0 %v18094_v3  ;;  %v18491_v52 = vld [vmem:[#allocation73_spill] sm:$0xff] }
 0x45c   : > { %7265 = vmatprep.subr.bf16.mxu1 %v18094_v3 }
 0x45e   : > { %5889 = vmatpush1.bf16.msra.mxu0 %v14002_v50  ;;  %v18494_v50 = vld [vmem:[#allocation79_spill] sm:$0xff] }
 0x45f   : > { %7266 = vmatpush1.bf16.msra.mxu1 %v14003_v23  ;;  %8316 = vmatprep.subr.bf16.mxu0 %v18094_v3  ;;  %v18495_v23 = vld [vmem:[#allocation89_spill] sm:$0xff] }
 0x460   : > { %8547 = vmatprep.subr.bf16.mxu1 %v18094_v3  ;;  %5723 = vmatmul.mubr.bf16.gmra.mrb[92].mxu0 %v18490_v12 }
 0x461   : > { %7100 = vmatmul.mubr.bf16.gmra.mrb[92].mxu1 %v18490_v12  ;;  %5730 = vmatprep.mubr.bf16.mxu0 %v18491_v52 }
 0x462   : > { %7107 = vmatprep.mubr.bf16.mxu1 %v18491_v52 }
 0x468   : > { %5731 = vmatmul.mubr.bf16.gmra.mrb[96].mxu0 %v18492_v39 }
 0x469   : > { %7108 = vmatmul.mubr.bf16.gmra.mrb[96].mxu1 %v18492_v39  ;;  %5738 = vmatprep.mubr.bf16.mxu0 %v18493_v28 }
 0x46a   : > { %7115 = vmatprep.mubr.bf16.mxu1 %v18493_v28 }
 0x470   : > { %5739 = vmatmul.mubr.bf16.gmra.mrb[100].mxu0 %v18494_v50 }
 0x471   : > { %7116 = vmatmul.mubr.bf16.gmra.mrb[100].mxu1 %v18494_v50  ;;  %5746 = vmatprep.mubr.bf16.mxu0 %v18495_v23 }
 0x472   : > { %7123 = vmatprep.mubr.bf16.mxu1 %v18495_v23 }
 0x478   : > { %5747 = vmatmul.mubr.bf16.gmra.mrb[104].mxu0 %v18496_v46 }
 0x479   : > { %7124 = vmatmul.mubr.bf16.gmra.mrb[104].mxu1 %v18496_v46  ;;  %5754 = vmatprep.mubr.bf16.mxu0 %v18497_v58 }
 0x47a   : > { %7131 = vmatprep.mubr.bf16.mxu1 %v18497_v58 }
 0x480   : > { %5755 = vmatmul.mubr.bf16.gmra.mrb[108].mxu0 %v18498_v18 }
 0x481   : > { %7132 = vmatmul.mubr.bf16.gmra.mrb[108].mxu1 %v18498_v18  ;;  %5762 = vmatprep.mubr.bf16.mxu0 %v18499_v42 }
 0x482   : > { %7139 = vmatprep.mubr.bf16.mxu1 %v18499_v42 }
 0x488   : > { %5763 = vmatmul.mubr.bf16.gmra.mrb[112].mxu0 %v18500_v34 }
 0x489   : > { %7140 = vmatmul.mubr.bf16.gmra.mrb[112].mxu1 %v18500_v34  ;;  %5770 = vmatprep.mubr.bf16.mxu0 %v18501_v62 }
 0x48a   : > { %7147 = vmatprep.mubr.bf16.mxu1 %v18501_v62 }
 0x490   : > { %5771 = vmatmul.mubr.bf16.gmra.mrb[116].mxu0 %v18502_v25 }
 0x491   : > { %7148 = vmatmul.mubr.bf16.gmra.mrb[116].mxu1 %v18502_v25  ;;  %5778 = vmatprep.mubr.bf16.mxu0 %v18503_v48 }
 0x492   : > { %7155 = vmatprep.mubr.bf16.mxu1 %v18503_v48 }
 0x498   : > { %5779 = vmatmul.mubr.bf16.gmra.mrb[120].mxu0 %v18504_v1 }
 0x499   : > { %7156 = vmatmul.mubr.bf16.gmra.mrb[120].mxu1 %v18504_v1  ;;  %5786 = vmatprep.mubr.bf16.mxu0 %v18505_v17 }
 0x49a   : > { %7163 = vmatprep.mubr.bf16.mxu1 %v18505_v17 }
 0x4a0   : > { %5787 = vmatmul.mubr.bf16.gmra.mrb[124].mxu0 %v18506_v21 }
 0x4a1   : > { %7164 = vmatmul.mubr.bf16.gmra.mrb[124].mxu1 %v18506_v21  ;;  %5794 = vmatprep.mubr.bf16.mxu0 %v18507_v10 }
 0x4a2   : > { %7171 = vmatprep.mubr.bf16.mxu1 %v18507_v10 }
 0x4a8   : > { %5795 = vmatmul.mubr.bf16.gmra.mrb[128].mxu0 %v18508_v11 }
 0x4a9   : > { %7172 = vmatmul.mubr.bf16.gmra.mrb[128].mxu1 %v18508_v11  ;;  %5802 = vmatprep.mubr.bf16.mxu0 %v18509_v59  ;;  %v18562_v11 = vld [vmem:[#allocation152_spill] sm:$0xff] }
 0x4aa   : > { %7179 = vmatprep.mubr.bf16.mxu1 %v18509_v59  ;;  %v18561_v59 = vld [vmem:[#allocation154_spill] sm:$0xff] }
 0x4b0   : > { %5803 = vmatmul.mubr.bf16.gmra.mrb[132].mxu0 %v18510_v13 }
 0x4b1   : > { %7180 = vmatmul.mubr.bf16.gmra.mrb[132].mxu1 %v18510_v13  ;;  %5810 = vmatprep.mubr.bf16.mxu0 %v18511_v5  ;;  %v18560_v13 = vld [vmem:[#allocation144_spill] sm:$0xff] }
 0x4b2   : > { %7187 = vmatprep.mubr.bf16.mxu1 %v18511_v5  ;;  %v18559_v5 = vld [vmem:[#allocation146_spill] sm:$0xff] }
 0x4b8   : > { %5811 = vmatmul.mubr.bf16.gmra.mrb[136].mxu0 %v18512_v44 }
 0x4b9   : > { %7188 = vmatmul.mubr.bf16.gmra.mrb[136].mxu1 %v18512_v44  ;;  %5818 = vmatprep.mubr.bf16.mxu0 %v18513_v55  ;;  %v18558_v44 = vld [vmem:[#allocation136_spill] sm:$0xff] }
 0x4ba   : > { %7195 = vmatprep.mubr.bf16.mxu1 %v18513_v55  ;;  %v18557_v55 = vld [vmem:[#allocation138_spill] sm:$0xff] }
 0x4c0   : > { %5819 = vmatmul.mubr.bf16.gmra.mrb[140].mxu0 %v18514_v36 }
 0x4c1   : > { %7196 = vmatmul.mubr.bf16.gmra.mrb[140].mxu1 %v18514_v36  ;;  %5826 = vmatprep.mubr.bf16.mxu0 %v18515_v31  ;;  %v18556_v36 = vld [vmem:[#allocation128_spill] sm:$0xff] }
 0x4c2   : > { %7203 = vmatprep.mubr.bf16.mxu1 %v18515_v31  ;;  %v18555_v31 = vld [vmem:[#allocation130_spill] sm:$0xff] }
 0x4c8   : > { %5827 = vmatmul.mubr.bf16.gmra.mrb[144].mxu0 %v18516_v0 }
 0x4c9   : > { %7204 = vmatmul.mubr.bf16.gmra.mrb[144].mxu1 %v18516_v0  ;;  %5834 = vmatprep.mubr.bf16.mxu0 %v18517_v53  ;;  %v18554_v0 = vld [vmem:[#allocation120_spill] sm:$0xff] }
 0x4ca   : > { %7211 = vmatprep.mubr.bf16.mxu1 %v18517_v53  ;;  %v18553_v53 = vld [vmem:[#allocation122_spill] sm:$0xff] }
 0x4d0   : > { %5835 = vmatmul.mubr.bf16.gmra.mrb[148].mxu0 %v18518_v56 }
 0x4d1   : > { %7212 = vmatmul.mubr.bf16.gmra.mrb[148].mxu1 %v18518_v56  ;;  %5842 = vmatprep.mubr.bf16.mxu0 %v18519_v37  ;;  %v18552_v56 = vld [vmem:[#allocation112_spill] sm:$0xff] }
 0x4d2   : > { %7219 = vmatprep.mubr.bf16.mxu1 %v18519_v37  ;;  %v18551_v37 = vld [vmem:[#allocation114_spill] sm:$0xff] }
 0x4d8   : > { %5843 = vmatmul.mubr.bf16.gmra.mrb[152].mxu0 %v18520_v16 }
 0x4d9   : > { %7220 = vmatmul.mubr.bf16.gmra.mrb[152].mxu1 %v18520_v16  ;;  %5850 = vmatprep.mubr.bf16.mxu0 %v18521_v38  ;;  %v18550_v16 = vld [vmem:[#allocation104_spill] sm:$0xff] }
 0x4da   : > { %7227 = vmatprep.mubr.bf16.mxu1 %v18521_v38  ;;  %v18525_v38 = vld [vmem:[#allocation10_spill] sm:$0xff] }
 0x4e0   : > { %5851 = vmatmul.mubr.bf16.gmra.mrb[156].mxu0 %v18522_v7 }
 0x4e1   : > { %7228 = vmatmul.mubr.bf16.gmra.mrb[156].mxu1 %v18522_v7  ;;  %5890 = vmatprep.mubr.bf16.mxu0 %v18523_v22  ;;  %v14006_v7 = vld [vmem:[%s17625_s2 + $0x608] sm:$0xff]  }
 0x4e2   : > { %7267 = vmatprep.mubr.bf16.mxu1 %v18523_v22  ;;  %v14007_v22 = vld [vmem:[%s17625_s2 + $0x688] sm:$0xff]  }
 0x4e8   : > { %5891 = vmatmul.mubr.bf16.vlgmr.msra.gmra.mrb[60].mxu0 %v18524_v40 }
 0x4e9   : > { %7268 = vmatmul.mubr.bf16.vlgmr.msra.gmra.mrb[60].mxu1 %v18524_v40  ;;  %8317 = vmatpush1.bf16.msra.mxu0 %v14004_v49  ;;  %v14008_v40 = vld [vmem:[%s17625_s2 + $0x610] sm:$0xff]   ;;  %v18526_v49 = vld [vmem:[#allocation8_spill] sm:$0xff] }
 0x4ea   : > { %5898 = vmatprep.mubr.bf16.mxu0 %v18525_v38  ;;  %7275 = vmatprep.mubr.bf16.mxu1 %v18525_v38  ;;  %v18527_v38 = vld [vmem:[#allocation18_spill] sm:$0xff] }
 0x4eb   : > { %8548 = vmatpush1.bf16.msra.mxu1 %v14005_v30  ;;  %8318 = vmatprep.subr.bf16.mxu0 %v18094_v3  ;;  %v14009_v30 = vld [vmem:[%s17625_s2 + $0x690] sm:$0xff]  }
 0x4ec   : > { %8549 = vmatprep.subr.bf16.mxu1 %v18094_v3 }
 0x4ed   : > { %8319 = vmatpush1.bf16.msra.mxu0 %v14006_v7  ;;  %v14010_v7 = vld [vmem:[%s17625_s2 + $0x618] sm:$0xff]  }
 0x4ee   : > { %8320 = vmatprep.subr.bf16.mxu0 %v18094_v3 }
 0x4ef   : > { %8550 = vmatpush1.bf16.msra.mxu1 %v14007_v22  ;;  %v14011_v22 = vld [vmem:[%s17625_s2 + $0x698] sm:$0xff]  }
 0x4f0   : > { %8551 = vmatprep.subr.bf16.mxu1 %v18094_v3  ;;  %5899 = vmatmul.mubr.bf16.gmra.mrb[64].mxu0 %v18526_v49 }
 0x4f1   : > { %7276 = vmatmul.mubr.bf16.gmra.mrb[64].mxu1 %v18526_v49  ;;  %5906 = vmatprep.mubr.bf16.mxu0 %v18527_v38  ;;  %v14012_v49 = vld [vmem:[%s17625_s2 + $0x620] sm:$0xff]  }
 0x4f2   : > { %7283 = vmatprep.mubr.bf16.mxu1 %v18527_v38  ;;  %8321 = vmatpush1.bf16.msra.mxu0 %v14008_v40  ;;  %v14013_v40 = vld [vmem:[%s17625_s2 + $0x6a0] sm:$0xff]   ;;  %v18529_v38 = vld [vmem:[#allocation26_spill] sm:$0xff] }
 0x4f3   : > { %8552 = vmatpush1.bf16.msra.mxu1 %v14009_v30  ;;  %8322 = vmatprep.subr.bf16.mxu0 %v18094_v3  ;;  %v18528_v30 = vld [vmem:[#allocation16_spill] sm:$0xff] }
 0x4f4   : > { %8553 = vmatprep.subr.bf16.mxu1 %v18094_v3 }
 0x4f6   : > { %8323 = vmatpush1.bf16.msra.mxu0 %v14010_v7  ;;  %v14014_v7 = vld [vmem:[%s17625_s2 + $0x628] sm:$0xff]  }
 0x4f7   : > { %8554 = vmatpush1.bf16.msra.mxu1 %v14011_v22  ;;  %8324 = vmatprep.subr.bf16.mxu0 %v18094_v3  ;;  %v14015_v22 = vld [vmem:[%s17625_s2 + $0x6a8] sm:$0xff]  }
 0x4f8   : > { %8555 = vmatprep.subr.bf16.mxu1 %v18094_v3  ;;  %5907 = vmatmul.mubr.bf16.gmra.mrb[68].mxu0 %v18528_v30 }
 0x4f9   : > { %7284 = vmatmul.mubr.bf16.gmra.mrb[68].mxu1 %v18528_v30  ;;  %5914 = vmatprep.mubr.bf16.mxu0 %v18529_v38  ;;  %v14016_v30 = vld [vmem:[%s17625_s2 + $0x630] sm:$0xff]  }
 0x4fa   : > { %7291 = vmatprep.mubr.bf16.mxu1 %v18529_v38  ;;  %8325 = vmatpush1.bf16.msra.mxu0 %v14012_v49  ;;  %v14017_v49 = vld [vmem:[%s17625_s2 + $0x6b0] sm:$0xff]  }
 0x4fb   : > { %8556 = vmatpush1.bf16.msra.mxu1 %v14013_v40  ;;  %8326 = vmatprep.subr.bf16.mxu0 %v18094_v3  ;;  %v18530_v40 = vld [vmem:[#allocation24_spill] sm:$0xff] }
 0x4fc   : > { %8557 = vmatprep.subr.bf16.mxu1 %v18094_v3 }
 0x4fe   : > { %8327 = vmatpush1.bf16.msra.mxu0 %v14014_v7  ;;  %v14018_v7 = vld [vmem:[%s17625_s2 + $0x638] sm:$0xff]  }
 0x4ff   : > { %8558 = vmatpush1.bf16.msra.mxu1 %v14015_v22  ;;  %8328 = vmatprep.subr.bf16.mxu0 %v18094_v3  ;;  %v14019_v22 = vld [vmem:[%s17625_s2 + $0x6b8] sm:$0xff]  }
 0x500   : > { %8559 = vmatprep.subr.bf16.mxu1 %v18094_v3  ;;  %5915 = vmatmul.mubr.bf16.gmra.mrb[72].mxu0 %v18530_v40 }
 0x501   : > { %7292 = vmatmul.mubr.bf16.gmra.mrb[72].mxu1 %v18530_v40  ;;  %5922 = vmatprep.mubr.bf16.mxu0 %v18531_v27 }
 0x502   : > { %7299 = vmatprep.mubr.bf16.mxu1 %v18531_v27  ;;  %8329 = vmatpush1.bf16.msra.mxu0 %v14016_v30  ;;  %v14021_v30 = vld [vmem:[%s17625_s2 + $0x6c0] sm:$0xff]  }
 0x503   : > { %8560 = vmatpush1.bf16.msra.mxu1 %v14017_v49  ;;  %8330 = vmatprep.subr.bf16.mxu0 %v18094_v3  ;;  %v18532_v49 = vld [vmem:[#allocation32_spill] sm:$0xff] }
 0x504   : > { %8561 = vmatprep.subr.bf16.mxu1 %v18094_v3 }
 0x506   : > { %8331 = vmatpush1.bf16.msra.mxu0 %v14018_v7  ;;  %v14022_v7 = vld [vmem:[%s17625_s2 + $0x648] sm:$0xff]  }
 0x507   : > { %8562 = vmatpush1.bf16.msra.mxu1 %v14019_v22  ;;  %8332 = vmatprep.subr.bf16.mxu0 %v18094_v3  ;;  %v14023_v22 = vld [vmem:[%s17625_s2 + $0x6c8] sm:$0xff]  }
 0x508   : > { %8563 = vmatprep.subr.bf16.mxu1 %v18094_v3  ;;  %5923 = vmatmul.mubr.bf16.gmra.mrb[76].mxu0 %v18532_v49 }
 0x509   : > { %7300 = vmatmul.mubr.bf16.gmra.mrb[76].mxu1 %v18532_v49  ;;  %5930 = vmatprep.mubr.bf16.mxu0 %v18533_v19 }
 0x50a   : > { %7307 = vmatprep.mubr.bf16.mxu1 %v18533_v19  ;;  %8333 = vmatpush1.bf16.msra.mxu0 %v14020_v35  ;;  %v14025_v35 = vld [vmem:[%s17625_s2 + $0x6d0] sm:$0xff]  }
 0x50b   : > { %8564 = vmatpush1.bf16.msra.mxu1 %v14021_v30  ;;  %8334 = vmatprep.subr.bf16.mxu0 %v18094_v3  ;;  %v18534_v30 = vld [vmem:[#allocation40_spill] sm:$0xff] }
 0x50c   : > { %8565 = vmatprep.subr.bf16.mxu1 %v18094_v3 }
 0x50e   : > { %8335 = vmatpush1.bf16.msra.mxu0 %v14022_v7  ;;  %v14026_v7 = vld [vmem:[%s17625_s2 + $0x658] sm:$0xff]  }
 0x50f   : > { %8566 = vmatpush1.bf16.msra.mxu1 %v14023_v22  ;;  %8336 = vmatprep.subr.bf16.mxu0 %v18094_v3  ;;  %v14027_v22 = vld [vmem:[%s17625_s2 + $0x6d8] sm:$0xff]  }
 0x510   : > { %8567 = vmatprep.subr.bf16.mxu1 %v18094_v3  ;;  %5931 = vmatmul.mubr.bf16.gmra.mrb[80].mxu0 %v18534_v30 }
 0x511   : > { %7308 = vmatmul.mubr.bf16.gmra.mrb[80].mxu1 %v18534_v30  ;;  %5938 = vmatprep.mubr.bf16.mxu0 %v18535_v63 }
 0x512   : > { %7315 = vmatprep.mubr.bf16.mxu1 %v18535_v63  ;;  %8337 = vmatpush1.bf16.msra.mxu0 %v14024_v8  ;;  %v14029_v8 = vld [vmem:[%s17625_s2 + $0x6e0] sm:$0xff]  }
 0x513   : > { %8568 = vmatpush1.bf16.msra.mxu1 %v14025_v35  ;;  %8338 = vmatprep.subr.bf16.mxu0 %v18094_v3  ;;  %v18536_v35 = vld [vmem:[#allocation48_spill] sm:$0xff] }
 0x514   : > { %8569 = vmatprep.subr.bf16.mxu1 %v18094_v3 }
 0x516   : > { %8339 = vmatpush1.bf16.msra.mxu0 %v14026_v7  ;;  %v14030_v7 = vld [vmem:[%s17625_s2 + $0x668] sm:$0xff]  }
 0x517   : > { %8570 = vmatpush1.bf16.msra.mxu1 %v14027_v22  ;;  %8340 = vmatprep.subr.bf16.mxu0 %v18094_v3  ;;  %v14031_v22 = vld [vmem:[%s17625_s2 + $0x6e8] sm:$0xff]  }
 0x518   : > { %8571 = vmatprep.subr.bf16.mxu1 %v18094_v3  ;;  %5939 = vmatmul.mubr.bf16.gmra.mrb[84].mxu0 %v18536_v35 }
 0x519   : > { %7316 = vmatmul.mubr.bf16.gmra.mrb[84].mxu1 %v18536_v35  ;;  %5946 = vmatprep.mubr.bf16.mxu0 %v18537_v4 }
 0x51a   : > { %7323 = vmatprep.mubr.bf16.mxu1 %v18537_v4  ;;  %8341 = vmatpush1.bf16.msra.mxu0 %v14028_v6  ;;  %v14033_v6 = vld [vmem:[%s17625_s2 + $0x6f0] sm:$0xff]  }
 0x51b   : > { %8572 = vmatpush1.bf16.msra.mxu1 %v14029_v8  ;;  %8342 = vmatprep.subr.bf16.mxu0 %v18094_v3  ;;  %v18538_v8 = vld [vmem:[#allocation56_spill] sm:$0xff] }
 0x51c   : > { %8573 = vmatprep.subr.bf16.mxu1 %v18094_v3 }
 0x51e   : > { %8343 = vmatpush1.bf16.msra.mxu0 %v14030_v7  ;;  %v14034_v7 = vld [vmem:[%s17625_s2 + $0x678] sm:$0xff]  }
 0x51f   : > { %8574 = vmatpush1.bf16.msra.mxu1 %v14031_v22  ;;  %8344 = vmatprep.subr.bf16.mxu0 %v18094_v3  ;;  %v14035_v22 = vld [vmem:[%s17625_s2 + $0x6f8] sm:$0xff]  }
 0x520   : > { %8575 = vmatprep.subr.bf16.mxu1 %v18094_v3  ;;  %5947 = vmatmul.mubr.bf16.gmra.mrb[88].mxu0 %v18538_v8 }
 0x521   : > { %7324 = vmatmul.mubr.bf16.gmra.mrb[88].mxu1 %v18538_v8  ;;  %5954 = vmatprep.mubr.bf16.mxu0 %v18539_v51 }
 0x522   : > { %7331 = vmatprep.mubr.bf16.mxu1 %v18539_v51  ;;  %8345 = vmatpush1.bf16.msra.mxu0 %v14032_v47  ;;  %v18540_v47 = vld [vmem:[#allocation64_spill] sm:$0xff] }
 0x523   : > { %8576 = vmatpush1.bf16.msra.mxu1 %v14033_v6  ;;  %8346 = vmatprep.subr.bf16.mxu0 %v18094_v3  ;;  %v18541_v6 = vld [vmem:[#allocation74_spill] sm:$0xff] }
 0x524   : > { %8577 = vmatprep.subr.bf16.mxu1 %v18094_v3 }
 0x526   : > { %8347 = vmatpush1.bf16.msra.mxu0 %v14034_v7  ;;  %v18544_v7 = vld [vmem:[#allocation80_spill] sm:$0xff] }
 0x527   : > { %8578 = vmatpush1.bf16.msra.mxu1 %v14035_v22  ;;  %9083 = vmatprep.subr.bf16.mxu0 %v18094_v3  ;;  %v18545_v22 = vld [vmem:[#allocation90_spill] sm:$0xff] }
 0x528   : > { %9853 = vmatprep.subr.bf16.mxu1 %v18094_v3  ;;  %5955 = vmatmul.mubr.bf16.gmra.mrb[92].mxu0 %v18540_v47 }
 0x529   : > { %7332 = vmatmul.mubr.bf16.gmra.mrb[92].mxu1 %v18540_v47  ;;  %5962 = vmatprep.mubr.bf16.mxu0 %v18541_v6 }
 0x52a   : > { %7339 = vmatprep.mubr.bf16.mxu1 %v18541_v6 }
 0x530   : > { %5963 = vmatmul.mubr.bf16.gmra.mrb[96].mxu0 %v18542_v24 }
 0x531   : > { %7340 = vmatmul.mubr.bf16.gmra.mrb[96].mxu1 %v18542_v24  ;;  %5970 = vmatprep.mubr.bf16.mxu0 %v18543_v20 }
 0x532   : > { %7347 = vmatprep.mubr.bf16.mxu1 %v18543_v20 }
 0x538   : > { %5971 = vmatmul.mubr.bf16.gmra.mrb[100].mxu0 %v18544_v7 }
 0x539   : > { %7348 = vmatmul.mubr.bf16.gmra.mrb[100].mxu1 %v18544_v7  ;;  %5978 = vmatprep.mubr.bf16.mxu0 %v18545_v22 }
 0x53a   : > { %7355 = vmatprep.mubr.bf16.mxu1 %v18545_v22 }
 0x540   : > { %5979 = vmatmul.mubr.bf16.gmra.mrb[104].mxu0 %v18546_v45 }
 0x541   : > { %7356 = vmatmul.mubr.bf16.gmra.mrb[104].mxu1 %v18546_v45  ;;  %5986 = vmatprep.mubr.bf16.mxu0 %v18547_v61 }
 0x542   : > { %7363 = vmatprep.mubr.bf16.mxu1 %v18547_v61 }
 0x548   : > { %5987 = vmatmul.mubr.bf16.gmra.mrb[108].mxu0 %v18548_v26 }
 0x549   : > { %7364 = vmatmul.mubr.bf16.gmra.mrb[108].mxu1 %v18548_v26  ;;  %5994 = vmatprep.mubr.bf16.mxu0 %v18549_v32 }
 0x54a   : > { %7371 = vmatprep.mubr.bf16.mxu1 %v18549_v32 }
 0x550   : > { %5995 = vmatmul.mubr.bf16.gmra.mrb[112].mxu0 %v18550_v16 }
 0x551   : > { %7372 = vmatmul.mubr.bf16.gmra.mrb[112].mxu1 %v18550_v16  ;;  %6002 = vmatprep.mubr.bf16.mxu0 %v18551_v37 }
 0x552   : > { %7379 = vmatprep.mubr.bf16.mxu1 %v18551_v37 }
 0x558   : > { %6003 = vmatmul.mubr.bf16.gmra.mrb[116].mxu0 %v18552_v56 }
 0x559   : > { %7380 = vmatmul.mubr.bf16.gmra.mrb[116].mxu1 %v18552_v56  ;;  %6010 = vmatprep.mubr.bf16.mxu0 %v18553_v53 }
 0x55a   : > { %7387 = vmatprep.mubr.bf16.mxu1 %v18553_v53 }
 0x560   : > { %6011 = vmatmul.mubr.bf16.gmra.mrb[120].mxu0 %v18554_v0 }
 0x561   : > { %7388 = vmatmul.mubr.bf16.gmra.mrb[120].mxu1 %v18554_v0  ;;  %6018 = vmatprep.mubr.bf16.mxu0 %v18555_v31 }
 0x562   : > { %7395 = vmatprep.mubr.bf16.mxu1 %v18555_v31 }
 0x568   : > { %6019 = vmatmul.mubr.bf16.gmra.mrb[124].mxu0 %v18556_v36 }
 0x569   : > { %7396 = vmatmul.mubr.bf16.gmra.mrb[124].mxu1 %v18556_v36  ;;  %6026 = vmatprep.mubr.bf16.mxu0 %v18557_v55 }
 0x56a   : > { %7403 = vmatprep.mubr.bf16.mxu1 %v18557_v55  ;;  %v18563_v55 = vld [vmem:[#allocation162_spill] sm:$0xff] }
 0x570   : > { %6027 = vmatmul.mubr.bf16.gmra.mrb[128].mxu0 %v18558_v44 }
 0x571   : > { %7404 = vmatmul.mubr.bf16.gmra.mrb[128].mxu1 %v18558_v44  ;;  %6034 = vmatprep.mubr.bf16.mxu0 %v18559_v5  ;;  %v18564_v44 = vld [vmem:[#allocation160_spill] sm:$0xff] }
 0x572   : > { %7411 = vmatprep.mubr.bf16.mxu1 %v18559_v5  ;;  %v18565_v5 = vld [vmem:[#allocation170_spill] sm:$0xff] }
 0x578   : > { %6035 = vmatmul.mubr.bf16.gmra.mrb[132].mxu0 %v18560_v13 }
 0x579   : > { %7412 = vmatmul.mubr.bf16.gmra.mrb[132].mxu1 %v18560_v13  ;;  %6042 = vmatprep.mubr.bf16.mxu0 %v18561_v59  ;;  %v18566_v13 = vld [vmem:[#allocation168_spill] sm:$0xff] }
 0x57a   : > { %7419 = vmatprep.mubr.bf16.mxu1 %v18561_v59  ;;  %v18567_v59 = vld [vmem:[#allocation178_spill] sm:$0xff] }
 0x580   : > { %6043 = vmatmul.mubr.bf16.gmra.mrb[136].mxu0 %v18562_v11 }
 0x581   : > { %7420 = vmatmul.mubr.bf16.gmra.mrb[136].mxu1 %v18562_v11  ;;  %6050 = vmatprep.mubr.bf16.mxu0 %v18563_v55  ;;  %v18568_v11 = vld [vmem:[#allocation176_spill] sm:$0xff] }
 0x582   : > { %7427 = vmatprep.mubr.bf16.mxu1 %v18563_v55  ;;  %v18569_v55 = vld [vmem:[#allocation186_spill] sm:$0xff] }
 0x588   : > { %6051 = vmatmul.mubr.bf16.gmra.mrb[140].mxu0 %v18564_v44 }
 0x589   : > { %7428 = vmatmul.mubr.bf16.gmra.mrb[140].mxu1 %v18564_v44  ;;  %6058 = vmatprep.mubr.bf16.mxu0 %v18565_v5  ;;  %v18570_v44 = vld [vmem:[#allocation184_spill] sm:$0xff] }
 0x58a   : > { %7435 = vmatprep.mubr.bf16.mxu1 %v18565_v5  ;;  %v18571_v5 = vld [vmem:[#allocation190_spill] sm:$0xff] }
 0x590   : > { %6059 = vmatmul.mubr.bf16.gmra.mrb[144].mxu0 %v18566_v13 }
 0x591   : > { %7436 = vmatmul.mubr.bf16.gmra.mrb[144].mxu1 %v18566_v13  ;;  %6066 = vmatprep.mubr.bf16.mxu0 %v18567_v59  ;;  %v18572_v13 = vld [vmem:[#allocation188_spill] sm:$0xff] }
 0x592   : > { %7443 = vmatprep.mubr.bf16.mxu1 %v18567_v59 }
 0x598   : > { %6067 = vmatmul.mubr.bf16.gmra.mrb[148].mxu0 %v18568_v11 }
 0x599   : > { %7444 = vmatmul.mubr.bf16.gmra.mrb[148].mxu1 %v18568_v11  ;;  %6074 = vmatprep.mubr.bf16.mxu0 %v18569_v55 }
 0x59a   : > { %7451 = vmatprep.mubr.bf16.mxu1 %v18569_v55  ;;  %v14036_v55 = vld [vmem:[%s17625_s2 + $0x700] sm:$0xff]  }
 0x5a0   : > { %6075 = vmatmul.mubr.bf16.gmra.mrb[152].mxu0 %v18570_v44 }
 0x5a1   : > { %7452 = vmatmul.mubr.bf16.gmra.mrb[152].mxu1 %v18570_v44  ;;  %6082 = vmatprep.mubr.bf16.mxu0 %v18571_v5  ;;  %v14037_v44 = vld [vmem:[%s17625_s2 + $0x800] sm:$0xff]  }
 0x5a2   : > { %7459 = vmatprep.mubr.bf16.mxu1 %v18571_v5  ;;  %v14038_v5 = vld [vmem:[%s17625_s2 + $0x708] sm:$0xff]  }
 0x5a8   : > { %6083 = vmatmul.mubr.bf16.gmra.mrb[156].mxu0 %v18572_v13 }
 0x5a9   : > { %7460 = vmatmul.mubr.bf16.gmra.mrb[156].mxu1 %v18572_v13  ;;  %8348 = vmatprep.mubr.bf16.mxu0 %v18479_v9  ;;  %v14039_v13 = vld [vmem:[%s17625_s2 + $0x808] sm:$0xff]  }
 0x5aa   : > { %8579 = vmatprep.mubr.bf16.mxu1 %v18529_v38 }
 0x5b0   : > { %8349 = vmatmul.mubr.bf16.vlgmr.msra.gmra.mrb[160].mxu0 %v18480_v60 }
 0x5b1   : > { %8580 = vmatmul.mubr.bf16.vlgmr.msra.gmra.mrb[160].mxu1 %v18530_v40  ;;  %9084 = vmatpush1.bf16.msra.mxu0 %v14036_v55  ;;  %v14040_v55 = vld [vmem:[%s17625_s2 + $0x710] sm:$0xff]  }
 0x5b2   : > { %8356 = vmatprep.mubr.bf16.mxu0 %v18481_v14  ;;  %8587 = vmatprep.mubr.bf16.mxu1 %v18531_v27 }
 0x5b3   : > { %9854 = vmatpush1.bf16.msra.mxu1 %v14037_v44  ;;  %9085 = vmatprep.subr.bf16.mxu0 %v18094_v3  ;;  %v14041_v44 = vld [vmem:[%s17625_s2 + $0x810] sm:$0xff]  }
 0x5b4   : > { %9855 = vmatprep.subr.bf16.mxu1 %v18094_v3 }
 0x5b5   : > { %9086 = vmatpush1.bf16.msra.mxu0 %v14038_v5  ;;  %v14042_v5 = vld [vmem:[%s17625_s2 + $0x718] sm:$0xff]  }
 0x5b6   : > { %9087 = vmatprep.subr.bf16.mxu0 %v18094_v3 }
 0x5b7   : > { %9856 = vmatpush1.bf16.msra.mxu1 %v14039_v13  ;;  %v14043_v13 = vld [vmem:[%s17625_s2 + $0x818] sm:$0xff]  }
 0x5b8   : > { %9857 = vmatprep.subr.bf16.mxu1 %v18094_v3  ;;  %8357 = vmatmul.mubr.bf16.gmra.mrb[164].mxu0 %v18482_v57 }
 0x5b9   : > { %8588 = vmatmul.mubr.bf16.gmra.mrb[164].mxu1 %v18532_v49  ;;  %8364 = vmatprep.mubr.bf16.mxu0 %v18483_v15 }
 0x5ba   : > { %8595 = vmatprep.mubr.bf16.mxu1 %v18533_v19  ;;  %9088 = vmatpush1.bf16.msra.mxu0 %v14040_v55  ;;  %v14044_v19 = vld [vmem:[%s17625_s2 + $0x720] sm:$0xff]  }
 0x5bb   : > { %9858 = vmatpush1.bf16.msra.mxu1 %v14041_v44  ;;  %9089 = vmatprep.subr.bf16.mxu0 %v18094_v3  ;;  %v14045_v55 = vld [vmem:[%s17625_s2 + $0x820] sm:$0xff]   ;;  %v14046_v44 = vld [vmem:[%s17625_s2 + $0x728] sm:$0xff]  }
 0x5bc   : > { %9859 = vmatprep.subr.bf16.mxu1 %v18094_v3 }
 0x5be   : > { %9090 = vmatpush1.bf16.msra.mxu0 %v14042_v5  ;;  %v14047_v5 = vld [vmem:[%s17625_s2 + $0x828] sm:$0xff]  }
 0x5bf   : > { %9860 = vmatpush1.bf16.msra.mxu1 %v14043_v13  ;;  %9091 = vmatprep.subr.bf16.mxu0 %v18094_v3  ;;  %v14048_v13 = vld [vmem:[%s17625_s2 + $0x730] sm:$0xff]  }
 0x5c0   : > { %9861 = vmatprep.subr.bf16.mxu1 %v18094_v3  ;;  %8365 = vmatmul.mubr.bf16.gmra.mrb[168].mxu0 %v18484_v33 }
 0x5c1   : > { %8596 = vmatmul.mubr.bf16.gmra.mrb[168].mxu1 %v18534_v30  ;;  %8372 = vmatprep.mubr.bf16.mxu0 %v18485_v2  ;;  %v18614_v30 = vld [vmem:[#allocation213_spill] sm:$0xff] }
 0x5c2   : > { %8603 = vmatprep.mubr.bf16.mxu1 %v18535_v63  ;;  %9092 = vmatpush1.bf16.msra.mxu0 %v14044_v19  ;;  %v14049_v19 = vld [vmem:[%s17625_s2 + $0x830] sm:$0xff]   ;;  %v18612_v63 = vld [vmem:[#allocation211_spill] sm:$0xff] }
 0x5c3   : > { %9862 = vmatpush1.bf16.msra.mxu1 %v14045_v55  ;;  %9093 = vmatprep.subr.bf16.mxu0 %v18094_v3  ;;  %v14050_v55 = vld [vmem:[%s17625_s2 + $0x738] sm:$0xff]  }
 0x5c4   : > { %9863 = vmatprep.subr.bf16.mxu1 %v18094_v3 }
 0x5c6   : > { %9094 = vmatpush1.bf16.msra.mxu0 %v14046_v44  ;;  %v14051_v44 = vld [vmem:[%s17625_s2 + $0x838] sm:$0xff]  }
 0x5c7   : > { %9864 = vmatpush1.bf16.msra.mxu1 %v14047_v5  ;;  %9095 = vmatprep.subr.bf16.mxu0 %v18094_v3  ;;  %v14052_v5 = vld [vmem:[%s17625_s2 + $0x740] sm:$0xff]  }
 0x5c8   : > { %9865 = vmatprep.subr.bf16.mxu1 %v18094_v3  ;;  %8373 = vmatmul.mubr.bf16.gmra.mrb[172].mxu0 %v18486_v29 }
 0x5c9   : > { %8604 = vmatmul.mubr.bf16.gmra.mrb[172].mxu1 %v18536_v35  ;;  %8380 = vmatprep.mubr.bf16.mxu0 %v18487_v41 }
 0x5ca   : > { %8611 = vmatprep.mubr.bf16.mxu1 %v18537_v4  ;;  %9096 = vmatpush1.bf16.msra.mxu0 %v14048_v13  ;;  %v14053_v13 = vld [vmem:[%s17625_s2 + $0x840] sm:$0xff]  }
 0x5cb   : > { %9866 = vmatpush1.bf16.msra.mxu1 %v14049_v19  ;;  %9097 = vmatprep.subr.bf16.mxu0 %v18094_v3  ;;  %v14054_v19 = vld [vmem:[%s17625_s2 + $0x748] sm:$0xff]  }
 0x5cc   : > { %9867 = vmatprep.subr.bf16.mxu1 %v18094_v3 }
 0x5ce   : > { %9098 = vmatpush1.bf16.msra.mxu0 %v14050_v55  ;;  %v14055_v55 = vld [vmem:[%s17625_s2 + $0x848] sm:$0xff]  }
 0x5cf   : > { %9868 = vmatpush1.bf16.msra.mxu1 %v14051_v44  ;;  %9099 = vmatprep.subr.bf16.mxu0 %v18094_v3  ;;  %v14056_v44 = vld [vmem:[%s17625_s2 + $0x750] sm:$0xff]  }
 0x5d0   : > { %9869 = vmatprep.subr.bf16.mxu1 %v18094_v3  ;;  %8381 = vmatmul.mubr.bf16.gmra.mrb[176].mxu0 %v18488_v54 }
 0x5d1   : > { %8612 = vmatmul.mubr.bf16.gmra.mrb[176].mxu1 %v18538_v8  ;;  %8388 = vmatprep.mubr.bf16.mxu0 %v18489_v43  ;;  %v18609_v8 = vld [vmem:[#allocation217_spill] sm:$0xff] }
 0x5d2   : > { %8619 = vmatprep.mubr.bf16.mxu1 %v18539_v51  ;;  %9100 = vmatpush1.bf16.msra.mxu0 %v14052_v5  ;;  %v14057_v5 = vld [vmem:[%s17625_s2 + $0x850] sm:$0xff]  }
 0x5d3   : > { %9870 = vmatpush1.bf16.msra.mxu1 %v14053_v13  ;;  %9101 = vmatprep.subr.bf16.mxu0 %v18094_v3  ;;  %v14058_v13 = vld [vmem:[%s17625_s2 + $0x758] sm:$0xff]  }
 0x5d4   : > { %9871 = vmatprep.subr.bf16.mxu1 %v18094_v3 }
 0x5d6   : > { %9102 = vmatpush1.bf16.msra.mxu0 %v14054_v19  ;;  %v14059_v19 = vld [vmem:[%s17625_s2 + $0x858] sm:$0xff]  }
 0x5d7   : > { %9872 = vmatpush1.bf16.msra.mxu1 %v14055_v55  ;;  %9103 = vmatprep.subr.bf16.mxu0 %v18094_v3  ;;  %v14060_v55 = vld [vmem:[%s17625_s2 + $0x760] sm:$0xff]  }
 0x5d8   : > { %9873 = vmatprep.subr.bf16.mxu1 %v18094_v3  ;;  %8389 = vmatmul.mubr.bf16.gmra.mrb[180].mxu0 %v18490_v12 }
 0x5d9   : > { %8620 = vmatmul.mubr.bf16.gmra.mrb[180].mxu1 %v18540_v47  ;;  %8396 = vmatprep.mubr.bf16.mxu0 %v18491_v52  ;;  %v18607_v47 = vld [vmem:[#allocation215_spill] sm:$0xff] }
 0x5da   : > { %8627 = vmatprep.mubr.bf16.mxu1 %v18541_v6  ;;  %9104 = vmatpush1.bf16.msra.mxu0 %v14056_v44  ;;  %v14061_v44 = vld [vmem:[%s17625_s2 + $0x860] sm:$0xff]   ;;  %v18605_v6 = vld [vmem:[#allocation206_spill] sm:$0xff] }
 0x5db   : > { %9874 = vmatpush1.bf16.msra.mxu1 %v14057_v5  ;;  %9105 = vmatprep.subr.bf16.mxu0 %v18094_v3  ;;  %v14062_v5 = vld [vmem:[%s17625_s2 + $0x768] sm:$0xff]  }
 0x5dc   : > { %9875 = vmatprep.subr.bf16.mxu1 %v18094_v3 }
 0x5de   : > { %9106 = vmatpush1.bf16.msra.mxu0 %v14058_v13  ;;  %v14063_v13 = vld [vmem:[%s17625_s2 + $0x868] sm:$0xff]  }
 0x5df   : > { %9876 = vmatpush1.bf16.msra.mxu1 %v14059_v19  ;;  %9107 = vmatprep.subr.bf16.mxu0 %v18094_v3  ;;  %v14064_v19 = vld [vmem:[%s17625_s2 + $0x770] sm:$0xff]  }
 0x5e0   : > { %9877 = vmatprep.subr.bf16.mxu1 %v18094_v3  ;;  %8397 = vmatmul.mubr.bf16.gmra.mrb[184].mxu0 %v18492_v39 }
 0x5e1   : > { %8628 = vmatmul.mubr.bf16.gmra.mrb[184].mxu1 %v18542_v24  ;;  %8404 = vmatprep.mubr.bf16.mxu0 %v18493_v28  ;;  %v18603_v24 = vld [vmem:[#allocation208_spill] sm:$0xff] }
 0x5e2   : > { %8635 = vmatprep.mubr.bf16.mxu1 %v18543_v20  ;;  %9108 = vmatpush1.bf16.msra.mxu0 %v14060_v55  ;;  %v14065_v55 = vld [vmem:[%s17625_s2 + $0x870] sm:$0xff]   ;;  %v18601_v20 = vld [vmem:[#allocation196_spill] sm:$0xff] }
 0x5e3   : > { %9878 = vmatpush1.bf16.msra.mxu1 %v14061_v44  ;;  %9109 = vmatprep.subr.bf16.mxu0 %v18094_v3  ;;  %v14066_v44 = vld [vmem:[%s17625_s2 + $0x778] sm:$0xff]  }
 0x5e4   : > { %9879 = vmatprep.subr.bf16.mxu1 %v18094_v3 }
 0x5e6   : > { %9110 = vmatpush1.bf16.msra.mxu0 %v14062_v5  ;;  %v14067_v5 = vld [vmem:[%s17625_s2 + $0x878] sm:$0xff]  }
 0x5e7   : > { %9880 = vmatpush1.bf16.msra.mxu1 %v14063_v13  ;;  %9111 = vmatprep.subr.bf16.mxu0 %v18094_v3  ;;  %v18573_v13 = vld [vmem:[#allocation138_spill] sm:$0xff] }
 0x5e8   : > { %9881 = vmatprep.subr.bf16.mxu1 %v18094_v3  ;;  %8405 = vmatmul.mubr.bf16.gmra.mrb[188].mxu0 %v18494_v50 }
 0x5e9   : > { %8636 = vmatmul.mubr.bf16.gmra.mrb[188].mxu1 %v18544_v7  ;;  %8412 = vmatprep.mubr.bf16.mxu0 %v18495_v23  ;;  %v18599_v7 = vld [vmem:[#allocation198_spill] sm:$0xff] }
 0x5ea   : > { %8643 = vmatprep.mubr.bf16.mxu1 %v18545_v22  ;;  %9112 = vmatpush1.bf16.msra.mxu0 %v14064_v19  ;;  %v18574_v19 = vld [vmem:[#allocation135_spill] sm:$0xff]  ;;  %v18597_v22 = vld [vmem:[#allocation184_spill] sm:$0xff] }
 0x5eb   : > { %9882 = vmatpush1.bf16.msra.mxu1 %v14065_v55  ;;  %9113 = vmatprep.subr.bf16.mxu0 %v18094_v3  ;;  %v18575_v55 = vld [vmem:[#allocation136_spill] sm:$0xff] }
 0x5ec   : > { %9883 = vmatprep.subr.bf16.mxu1 %v18094_v3 }
 0x5ee   : > { %9114 = vmatpush1.bf16.msra.mxu0 %v14066_v44  ;;  %v18576_v44 = vld [vmem:[#allocation145_spill] sm:$0xff] }
 0x5ef   : > { %9884 = vmatpush1.bf16.msra.mxu1 %v14067_v5  ;;  %9315 = vmatprep.subr.bf16.mxu0 %v18094_v3  ;;  %v18577_v5 = vld [vmem:[#allocation146_spill] sm:$0xff] }
 0x5f0   : > { %10085 = vmatprep.subr.bf16.mxu1 %v18094_v3  ;;  %8413 = vmatmul.mubr.bf16.gmra.mrb[192].mxu0 %v18496_v46 }
 0x5f1   : > { %8644 = vmatmul.mubr.bf16.gmra.mrb[192].mxu1 %v18546_v45  ;;  %8420 = vmatprep.mubr.bf16.mxu0 %v18497_v58  ;;  %v18595_v45 = vld [vmem:[#allocation186_spill] sm:$0xff] }
 0x5f2   : > { %8651 = vmatprep.mubr.bf16.mxu1 %v18547_v61  ;;  %v18591_v61 = vld [vmem:[#allocation168_spill] sm:$0xff] }
 0x5f8   : > { %8421 = vmatmul.mubr.bf16.gmra.mrb[196].mxu0 %v18498_v18 }
 0x5f9   : > { %8652 = vmatmul.mubr.bf16.gmra.mrb[196].mxu1 %v18548_v26  ;;  %8428 = vmatprep.mubr.bf16.mxu0 %v18499_v42  ;;  %v18589_v26 = vld [vmem:[#allocation170_spill] sm:$0xff] }
 0x5fa   : > { %8659 = vmatprep.mubr.bf16.mxu1 %v18549_v32  ;;  %v18587_v32 = vld [vmem:[#allocation160_spill] sm:$0xff] }
 0x600   : > { %8429 = vmatmul.mubr.bf16.gmra.mrb[200].mxu0 %v18500_v34 }
 0x601   : > { %8660 = vmatmul.mubr.bf16.gmra.mrb[200].mxu1 %v18550_v16  ;;  %8436 = vmatprep.mubr.bf16.mxu0 %v18501_v62  ;;  %v18585_v16 = vld [vmem:[#allocation162_spill] sm:$0xff] }
 0x602   : > { %8667 = vmatprep.mubr.bf16.mxu1 %v18551_v37  ;;  %v18583_v37 = vld [vmem:[#allocation152_spill] sm:$0xff] }
 0x608   : > { %8437 = vmatmul.mubr.bf16.gmra.mrb[204].mxu0 %v18502_v25 }
 0x609   : > { %8668 = vmatmul.mubr.bf16.gmra.mrb[204].mxu1 %v18552_v56  ;;  %8444 = vmatprep.mubr.bf16.mxu0 %v18503_v48  ;;  %v18581_v56 = vld [vmem:[#allocation154_spill] sm:$0xff] }
 0x60a   : > { %8675 = vmatprep.mubr.bf16.mxu1 %v18553_v53  ;;  %v18579_v53 = vld [vmem:[#allocation144_spill] sm:$0xff] }
 0x610   : > { %8445 = vmatmul.mubr.bf16.gmra.mrb[208].mxu0 %v18504_v1 }
 0x611   : > { %8676 = vmatmul.mubr.bf16.gmra.mrb[208].mxu1 %v18554_v0  ;;  %8452 = vmatprep.mubr.bf16.mxu0 %v18505_v17  ;;  %v18578_v0 = vld [vmem:[#allocation143_spill] sm:$0xff] }
 0x612   : > { %8683 = vmatprep.mubr.bf16.mxu1 %v18555_v31  ;;  %v18580_v31 = vld [vmem:[#allocation153_spill] sm:$0xff] }
 0x618   : > { %8453 = vmatmul.mubr.bf16.gmra.mrb[212].mxu0 %v18506_v21 }
 0x619   : > { %8684 = vmatmul.mubr.bf16.gmra.mrb[212].mxu1 %v18556_v36  ;;  %8460 = vmatprep.mubr.bf16.mxu0 %v18507_v10  ;;  %v18582_v36 = vld [vmem:[#allocation151_spill] sm:$0xff] }
 0x61a   : > { %8691 = vmatprep.mubr.bf16.mxu1 %v18573_v13  ;;  %v18584_v13 = vld [vmem:[#allocation161_spill] sm:$0xff] }
 0x620   : > { %8461 = vmatmul.mubr.bf16.gmra.mrb[216].mxu0 %v18574_v19 }
 0x621   : > { %8692 = vmatmul.mubr.bf16.gmra.mrb[216].mxu1 %v18575_v55  ;;  %8468 = vmatprep.mubr.bf16.mxu0 %v18576_v44  ;;  %v18586_v55 = vld [vmem:[#allocation159_spill] sm:$0xff] }
 0x622   : > { %8699 = vmatprep.mubr.bf16.mxu1 %v18577_v5  ;;  %v18588_v5 = vld [vmem:[#allocation169_spill] sm:$0xff] }
 0x628   : > { %8469 = vmatmul.mubr.bf16.gmra.mrb[220].mxu0 %v18578_v0 }
 0x629   : > { %8700 = vmatmul.mubr.bf16.gmra.mrb[220].mxu1 %v18579_v53  ;;  %8476 = vmatprep.mubr.bf16.mxu0 %v18580_v31  ;;  %v18590_v53 = vld [vmem:[#allocation167_spill] sm:$0xff] }
 0x62a   : > { %8707 = vmatprep.mubr.bf16.mxu1 %v18581_v56  ;;  %v18592_v56 = vld [vmem:[#allocation177_spill] sm:$0xff] }
 0x630   : > { %8477 = vmatmul.mubr.bf16.gmra.mrb[224].mxu0 %v18582_v36 }
 0x631   : > { %8708 = vmatmul.mubr.bf16.gmra.mrb[224].mxu1 %v18583_v37  ;;  %8484 = vmatprep.mubr.bf16.mxu0 %v18584_v13  ;;  %v18593_v37 = vld [vmem:[#allocation175_spill] sm:$0xff] }
 0x632   : > { %8715 = vmatprep.mubr.bf16.mxu1 %v18585_v16  ;;  %v18594_v16 = vld [vmem:[#allocation185_spill] sm:$0xff] }
 0x638   : > { %8485 = vmatmul.mubr.bf16.gmra.mrb[228].mxu0 %v18586_v55 }
 0x639   : > { %8716 = vmatmul.mubr.bf16.gmra.mrb[228].mxu1 %v18587_v32  ;;  %8492 = vmatprep.mubr.bf16.mxu0 %v18588_v5  ;;  %v18596_v32 = vld [vmem:[#allocation183_spill] sm:$0xff] }
 0x63a   : > { %8723 = vmatprep.mubr.bf16.mxu1 %v18589_v26  ;;  %v18598_v26 = vld [vmem:[#allocation197_spill] sm:$0xff] }
 0x640   : > { %8493 = vmatmul.mubr.bf16.gmra.mrb[232].mxu0 %v18590_v53 }
 0x641   : > { %8724 = vmatmul.mubr.bf16.gmra.mrb[232].mxu1 %v18591_v61  ;;  %8500 = vmatprep.mubr.bf16.mxu0 %v18592_v56  ;;  %v18600_v61 = vld [vmem:[#allocation195_spill] sm:$0xff] }
 0x642   : > { %8731 = vmatprep.mubr.bf16.mxu1 %v18567_v59  ;;  %v18602_v59 = vld [vmem:[#allocation207_spill] sm:$0xff] }
 0x648   : > { %8501 = vmatmul.mubr.bf16.gmra.mrb[236].mxu0 %v18593_v37 }
 0x649   : > { %8732 = vmatmul.mubr.bf16.gmra.mrb[236].mxu1 %v18568_v11  ;;  %8508 = vmatprep.mubr.bf16.mxu0 %v18594_v16  ;;  %v18604_v11 = vld [vmem:[#allocation203_spill] sm:$0xff] }
 0x64a   : > { %8739 = vmatprep.mubr.bf16.mxu1 %v18595_v45  ;;  %v18606_v45 = vld [vmem:[#allocation214_spill] sm:$0xff] }
 0x650   : > { %8509 = vmatmul.mubr.bf16.gmra.mrb[240].mxu0 %v18596_v32 }
 0x651   : > { %8740 = vmatmul.mubr.bf16.gmra.mrb[240].mxu1 %v18597_v22  ;;  %8516 = vmatprep.mubr.bf16.mxu0 %v18598_v26  ;;  %v18608_v22 = vld [vmem:[#allocation216_spill] sm:$0xff] }
 0x652   : > { %8747 = vmatprep.mubr.bf16.mxu1 %v18599_v7  ;;  %v1517_v51 = vmax.f32 %v18608_v22, 0.0  ;;  %v1519_v7 = vmax.f32 %v18609_v8, 0.0  ;;  %v14074_v8 = vld [vmem:[%s17625_s2 + $0x798] sm:$0xff]  }
 0x654   : > { %v16922_v4 = vpack.c.bf16 %v1517_v51, %v1517_v51  ;;  %v16924_v35 = vpack.c.bf16 %v1519_v7, %v1519_v7  ;;  %v14068_v51 = vld [vmem:[%s17625_s2 + $0x780] sm:$0xff]  }
 0x656   : > { %18610 = vst [vmem:[#allocation204_spill] sm:$0xff] %v16924_v35 }
 0x658   : > { %8517 = vmatmul.mubr.bf16.gmra.mrb[244].mxu0 %v18600_v61 }
 0x659   : > { %8748 = vmatmul.mubr.bf16.gmra.mrb[244].mxu1 %v18601_v20  ;;  %8524 = vmatprep.mubr.bf16.mxu0 %v18602_v59  ;;  %v18611_v20 = vld [vmem:[#allocation210_spill] sm:$0xff] }
 0x65a   : > { %8755 = vmatprep.mubr.bf16.mxu1 %v18603_v24 }
 0x660   : > { %8525 = vmatmul.mubr.bf16.gmra.mrb[248].mxu0 %v18604_v11 }
 0x661   : > { %8756 = vmatmul.mubr.bf16.gmra.mrb[248].mxu1 %v18605_v6  ;;  %8532 = vmatprep.mubr.bf16.mxu0 %v18606_v45  ;;  %v18613_v6 = vld [vmem:[#allocation212_spill] sm:$0xff] }
 0x662   : > { %8763 = vmatprep.mubr.bf16.mxu1 %v18607_v47  ;;  %v1516_v24 = vmax.f32 %v18613_v6, 0.0  ;;  %v1518_v47 = vmax.f32 %v18614_v30, 0.0  ;;  %v14069_v30 = vld [vmem:[%s17625_s2 + $0x880] sm:$0xff]  }
 0x664   : > { %v16932_v49 = vpack.c.bf16 %v1516_v24, %v1516_v24  ;;  %v16934_v22 = vpack.c.bf16 %v1518_v47, %v1518_v47  ;;  %v14070_v24 = vld [vmem:[%s17625_s2 + $0x788] sm:$0xff]   ;;  %v14075_v47 = vld [vmem:[%s17625_s2 + $0x898] sm:$0xff]  }
 0x666   : > { %18615 = vst [vmem:[#allocation14_spill] sm:$0xff] %v16934_v22 }
 0x668   : > { %8533 = vmatmul.mubr.bf16.gmra.mrb[252].mxu0 %v18611_v20 }
 0x669   : > { %8764 = vmatmul.mubr.bf16.gmra.mrb[252].mxu1 %v18612_v63  ;;  %8540 = vmatprep.mubr.bf16.mxu0 %v16922_v4  ;;  %v14076_v63 = vld [vmem:[%s17625_s2 + $0x7a0] sm:$0xff]  }
 0x66a   : > { %8771 = vmatprep.mubr.bf16.mxu1 %v16924_v35 }
 0x670   : > { %8541 = vmatmul.mubr.bf16.gmra.mrb[0].mxu0 %v16932_v49 }
 0x671   : > { %8772 = vmatmul.mubr.bf16.gmra.mrb[0].mxu1 %v16934_v22  ;;  %9115 = vmatprep.mubr.bf16.mxu0 %v18479_v9 }
 0x672   : > { %9885 = vmatprep.mubr.bf16.mxu1 %v18479_v9  ;;  %v14071_v9 = vld [vmem:[%s17625_s2 + $0x888] sm:$0xff]  }
 0x678   : > { %9116 = vmatmul.mubr.bf16.vlgmr.msra.gmra.mrb[60].mxu0 %v18480_v60 }
 0x679   : > { %9886 = vmatmul.mubr.bf16.vlgmr.msra.gmra.mrb[60].mxu1 %v18480_v60  ;;  %9316 = vmatpush1.bf16.msra.mxu0 %v14068_v51  ;;  %v14072_v60 = vld [vmem:[%s17625_s2 + $0x790] sm:$0xff]  }
 0x67a   : > { %9123 = vmatprep.mubr.bf16.mxu0 %v18481_v14  ;;  %9893 = vmatprep.mubr.bf16.mxu1 %v18481_v14  ;;  %v14073_v14 = vld [vmem:[%s17625_s2 + $0x890] sm:$0xff]  }
 0x67b   : > { %10086 = vmatpush1.bf16.msra.mxu1 %v14069_v30  ;;  %9317 = vmatprep.subr.bf16.mxu0 %v18094_v3 }
 0x67c   : > { %10087 = vmatprep.subr.bf16.mxu1 %v18094_v3 }
 0x67d   : > { %9318 = vmatpush1.bf16.msra.mxu0 %v14070_v24 }
 0x67e   : > { %9319 = vmatprep.subr.bf16.mxu0 %v18094_v3 }
 0x67f   : > { %10088 = vmatpush1.bf16.msra.mxu1 %v14071_v9  ;;  %v18616_v9 = vld [vmem:[#allocation13_spill] sm:$0xff] }
 0x680   : > { %10089 = vmatprep.subr.bf16.mxu1 %v18094_v3  ;;  %9124 = vmatmul.mubr.bf16.gmra.mrb[64].mxu0 %v18482_v57 }
 0x681   : > { %9894 = vmatmul.mubr.bf16.gmra.mrb[64].mxu1 %v18482_v57  ;;  %9131 = vmatprep.mubr.bf16.mxu0 %v18483_v15 }
 0x682   : > { %9901 = vmatprep.mubr.bf16.mxu1 %v18483_v15  ;;  %9320 = vmatpush1.bf16.msra.mxu0 %v14072_v60 }
 0x683   : > { %10090 = vmatpush1.bf16.msra.mxu1 %v14073_v14  ;;  %v8350_v6 = vpop.f32.mrb[160].mxu0  ;;  %9321 = vmatprep.subr.bf16.mxu0 %v18094_v3 }
 0x684   : > { %v8581_v7 = vpop.f32.mrb[160].mxu1  ;;  %10091 = vmatprep.subr.bf16.mxu1 %v18094_v3  ;;  %v8352_v51 = vpop.f32.mrb[161].mxu0 }
 0x685   : > { %v8582_v57 = vadd.f32 %v8581_v7, %v8350_v6  ;;  %v8583_v30 = vpop.f32.mrb[161].mxu1  ;;  %v8353_v15 = vpop.f32.mrb[162].mxu0  ;;  %v14077_v6 = vld [vmem:[%s17625_s2 + $0x8a0] sm:$0xff]  }
 0x686   : > { %v8584_v24 = vpop.f32.mrb[162].mxu1  ;;  %v8355_v22 = vpop.f32.mrb[163].mxu0  ;;  %9322 = vmatpush1.bf16.msra.mxu0 %v14074_v8  ;;  %v18617_v7 = vld [vmem:[#allocation11_spill] sm:$0xff] }
 0x687   : > { %v16979_v60 = vadd.f32 %v8582_v57, %v18616_v9  ;;  %v8585_v14 = vadd.f32 %v8584_v24, %v8353_v15  ;;  %v8586_v35 = vpop.f32.mrb[163].mxu1  ;;  %10092 = vmatpush1.bf16.msra.mxu1 %v14075_v47  ;;  %9323 = vmatprep.subr.bf16.mxu0 %v18094_v3  ;;  %v14079_v22 = vld [vmem:[%s17625_s2 + $0x8a8] sm:$0xff]   ;;  %v18618_v15 = vld [vmem:[#allocation21_spill] sm:$0xff] }
 0x688   : > { %10093 = vmatprep.subr.bf16.mxu1 %v18094_v3  ;;  %9132 = vmatmul.mubr.bf16.gmra.mrb[68].mxu0 %v18484_v33  ;;  %v14078_v35 = vld [vmem:[%s17625_s2 + $0x7a8] sm:$0xff]  }
 0x689   : > { %v16990_v57 = vadd.f32 %v8585_v14, %v18617_v7  ;;  %9902 = vmatmul.mubr.bf16.gmra.mrb[68].mxu1 %v18484_v33  ;;  %9139 = vmatprep.mubr.bf16.mxu0 %v18485_v2  ;;  %v14080_v7 = vld [vmem:[%s17625_s2 + $0x7b0] sm:$0xff]  }
 0x68a   : > { %9909 = vmatprep.mubr.bf16.mxu1 %v18485_v2  ;;  %9324 = vmatpush1.bf16.msra.mxu0 %v14076_v63 }
 0x68b   : > { %10094 = vmatpush1.bf16.msra.mxu1 %v14077_v6  ;;  %v8358_v8 = vpop.f32.mrb[164].mxu0  ;;  %9325 = vmatprep.subr.bf16.mxu0 %v18094_v3 }
 0x68c   : > { %v8589_v47 = vpop.f32.mrb[164].mxu1  ;;  %10095 = vmatprep.subr.bf16.mxu1 %v18094_v3  ;;  %v8360_v51 = vpop.f32.mrb[165].mxu0 }
 0x68d   : > { %v8590_v33 = vadd.f32 %v8589_v47, %v8358_v8  ;;  %v8591_v30 = vpop.f32.mrb[165].mxu1  ;;  %v8361_v2 = vpop.f32.mrb[166].mxu0  ;;  %v14081_v8 = vld [vmem:[%s17625_s2 + $0x8b0] sm:$0xff]   ;;  %v18619_v47 = vld [vmem:[#allocation19_spill] sm:$0xff] }
 0x68e   : > { %v8592_v63 = vpop.f32.mrb[166].mxu1  ;;  %v8363_v14 = vpop.f32.mrb[167].mxu0  ;;  %9326 = vmatpush1.bf16.msra.mxu0 %v14078_v35  ;;  %v14082_v35 = vld [vmem:[%s17625_s2 + $0x7b8] sm:$0xff]  }
 0x68f   : > { %v17005_v24 = vadd.f32 %v8590_v33, %v18618_v15  ;;  %v8593_v9 = vadd.f32 %v8592_v63, %v8361_v2  ;;  %v8594_v6 = vpop.f32.mrb[167].mxu1  ;;  %10096 = vmatpush1.bf16.msra.mxu1 %v14079_v22  ;;  %9327 = vmatprep.subr.bf16.mxu0 %v18094_v3  ;;  %v14083_v22 = vld [vmem:[%s17625_s2 + $0x8b8] sm:$0xff]  }
 0x690   : > { %10097 = vmatprep.subr.bf16.mxu1 %v18094_v3  ;;  %9140 = vmatmul.mubr.bf16.gmra.mrb[72].mxu0 %v18486_v29 }
 0x691   : > { %v17016_v33 = vadd.f32 %v8593_v9, %v18619_v47  ;;  %9910 = vmatmul.mubr.bf16.gmra.mrb[72].mxu1 %v18486_v29  ;;  %9147 = vmatprep.mubr.bf16.mxu0 %v18487_v41  ;;  %v18620_v9 = vld [vmem:[#allocation29_spill] sm:$0xff]  ;;  %v14084_v47 = vld [vmem:[%s17625_s2 + $0x7c0] sm:$0xff]  }
 0x692   : > { %9917 = vmatprep.mubr.bf16.mxu1 %v18487_v41  ;;  %9328 = vmatpush1.bf16.msra.mxu0 %v14080_v7 }
 0x693   : > { %10098 = vmatpush1.bf16.msra.mxu1 %v14081_v8  ;;  %v8366_v51 = vpop.f32.mrb[168].mxu0  ;;  %9329 = vmatprep.subr.bf16.mxu0 %v18094_v3 }
 0x694   : > { %v8597_v30 = vpop.f32.mrb[168].mxu1  ;;  %10099 = vmatprep.subr.bf16.mxu1 %v18094_v3  ;;  %v8368_v2 = vpop.f32.mrb[169].mxu0 }
 0x695   : > { %v8598_v29 = vadd.f32 %v8597_v30, %v8366_v51  ;;  %v8599_v63 = vpop.f32.mrb[169].mxu1  ;;  %v8369_v41 = vpop.f32.mrb[170].mxu0  ;;  %v14085_v51 = vld [vmem:[%s17625_s2 + $0x8c0] sm:$0xff]  }
 0x696   : > { %v8600_v15 = vpop.f32.mrb[170].mxu1  ;;  %v8371_v7 = vpop.f32.mrb[171].mxu0  ;;  %9330 = vmatpush1.bf16.msra.mxu0 %v14082_v35  ;;  %v18621_v30 = vld [vmem:[#allocation27_spill] sm:$0xff]  ;;  %v14086_v35 = vld [vmem:[%s17625_s2 + $0x7c8] sm:$0xff]  }
 0x697   : > { %v17031_v14 = vadd.f32 %v8598_v29, %v18620_v9  ;;  %v8601_v6 = vadd.f32 %v8600_v15, %v8369_v41  ;;  %v8602_v8 = vpop.f32.mrb[171].mxu1  ;;  %10100 = vmatpush1.bf16.msra.mxu1 %v14083_v22  ;;  %9331 = vmatprep.subr.bf16.mxu0 %v18094_v3  ;;  %v14087_v22 = vld [vmem:[%s17625_s2 + $0x8c8] sm:$0xff]  }
 0x698   : > { %10101 = vmatprep.subr.bf16.mxu1 %v18094_v3  ;;  %9148 = vmatmul.mubr.bf16.gmra.mrb[76].mxu0 %v18488_v54 }
 0x699   : > { %v17042_v29 = vadd.f32 %v8601_v6, %v18621_v30  ;;  %9918 = vmatmul.mubr.bf16.gmra.mrb[76].mxu1 %v18488_v54  ;;  %9155 = vmatprep.mubr.bf16.mxu0 %v18489_v43  ;;  %v18622_v6 = vld [vmem:[#allocation37_spill] sm:$0xff] }
 0x69a   : > { %9925 = vmatprep.mubr.bf16.mxu1 %v18489_v43  ;;  %9332 = vmatpush1.bf16.msra.mxu0 %v14084_v47  ;;  %v14088_v30 = vld [vmem:[%s17625_s2 + $0x7d0] sm:$0xff]  }
 0x69b   : > { %10102 = vmatpush1.bf16.msra.mxu1 %v14085_v51  ;;  %v8374_v2 = vpop.f32.mrb[172].mxu0  ;;  %9333 = vmatprep.subr.bf16.mxu0 %v18094_v3 }
 0x69c   : > { %v8605_v63 = vpop.f32.mrb[172].mxu1  ;;  %10103 = vmatprep.subr.bf16.mxu1 %v18094_v3  ;;  %v8376_v41 = vpop.f32.mrb[173].mxu0 }
 0x69d   : > { %v8606_v54 = vadd.f32 %v8605_v63, %v8374_v2  ;;  %v8607_v15 = vpop.f32.mrb[173].mxu1  ;;  %v8377_v43 = vpop.f32.mrb[174].mxu0  ;;  %v14089_v2 = vld [vmem:[%s17625_s2 + $0x8d0] sm:$0xff]   ;;  %v18623_v63 = vld [vmem:[#allocation35_spill] sm:$0xff] }
 0x69e   : > { %v8608_v9 = vpop.f32.mrb[174].mxu1  ;;  %v8379_v47 = vpop.f32.mrb[175].mxu0  ;;  %9334 = vmatpush1.bf16.msra.mxu0 %v14086_v35  ;;  %v14090_v35 = vld [vmem:[%s17625_s2 + $0x7d8] sm:$0xff]  }
 0x69f   : > { %v17057_v7 = vadd.f32 %v8606_v54, %v18622_v6  ;;  %v8609_v8 = vadd.f32 %v8608_v9, %v8377_v43  ;;  %v8610_v51 = vpop.f32.mrb[175].mxu1  ;;  %10104 = vmatpush1.bf16.msra.mxu1 %v14087_v22  ;;  %9335 = vmatprep.subr.bf16.mxu0 %v18094_v3  ;;  %v14091_v22 = vld [vmem:[%s17625_s2 + $0x8d8] sm:$0xff]  }
 0x6a0   : > { %10105 = vmatprep.subr.bf16.mxu1 %v18094_v3  ;;  %9156 = vmatmul.mubr.bf16.gmra.mrb[80].mxu0 %v18490_v12 }
 0x6a1   : > { %v17068_v54 = vadd.f32 %v8609_v8, %v18623_v63  ;;  %9926 = vmatmul.mubr.bf16.gmra.mrb[80].mxu1 %v18490_v12  ;;  %9163 = vmatprep.mubr.bf16.mxu0 %v18491_v52  ;;  %v18624_v8 = vld [vmem:[#allocation45_spill] sm:$0xff]  ;;  %v14092_v63 = vld [vmem:[%s17625_s2 + $0x7e0] sm:$0xff]  }
 0x6a2   : > { %9933 = vmatprep.mubr.bf16.mxu1 %v18491_v52  ;;  %9336 = vmatpush1.bf16.msra.mxu0 %v14088_v30 }
 0x6a3   : > { %10106 = vmatpush1.bf16.msra.mxu1 %v14089_v2  ;;  %v8382_v41 = vpop.f32.mrb[176].mxu0  ;;  %9337 = vmatprep.subr.bf16.mxu0 %v18094_v3 }
 0x6a4   : > { %v8613_v15 = vpop.f32.mrb[176].mxu1  ;;  %10107 = vmatprep.subr.bf16.mxu1 %v18094_v3  ;;  %v8384_v43 = vpop.f32.mrb[177].mxu0 }
 0x6a5   : > { %v8614_v12 = vadd.f32 %v8613_v15, %v8382_v41  ;;  %v8615_v9 = vpop.f32.mrb[177].mxu1  ;;  %v8385_v52 = vpop.f32.mrb[178].mxu0  ;;  %v14093_v41 = vld [vmem:[%s17625_s2 + $0x8e0] sm:$0xff]  }
 0x6a6   : > { %v8616_v6 = vpop.f32.mrb[178].mxu1  ;;  %v8387_v30 = vpop.f32.mrb[179].mxu0  ;;  %9338 = vmatpush1.bf16.msra.mxu0 %v14090_v35  ;;  %v18625_v15 = vld [vmem:[#allocation43_spill] sm:$0xff]  ;;  %v14094_v35 = vld [vmem:[%s17625_s2 + $0x7e8] sm:$0xff]  }
 0x6a7   : > { %v17083_v47 = vadd.f32 %v8614_v12, %v18624_v8  ;;  %v8617_v51 = vadd.f32 %v8616_v6, %v8385_v52  ;;  %v8618_v2 = vpop.f32.mrb[179].mxu1  ;;  %10108 = vmatpush1.bf16.msra.mxu1 %v14091_v22  ;;  %9339 = vmatprep.subr.bf16.mxu0 %v18094_v3  ;;  %v14095_v22 = vld [vmem:[%s17625_s2 + $0x8e8] sm:$0xff]  }
 0x6a8   : > { %10109 = vmatprep.subr.bf16.mxu1 %v18094_v3  ;;  %9164 = vmatmul.mubr.bf16.gmra.mrb[84].mxu0 %v18492_v39 }
 0x6a9   : > { %v17094_v12 = vadd.f32 %v8617_v51, %v18625_v15  ;;  %9934 = vmatmul.mubr.bf16.gmra.mrb[84].mxu1 %v18492_v39  ;;  %9171 = vmatprep.mubr.bf16.mxu0 %v18493_v28  ;;  %v18626_v51 = vld [vmem:[#allocation53_spill] sm:$0xff] }
 0x6aa   : > { %9941 = vmatprep.mubr.bf16.mxu1 %v18493_v28  ;;  %9340 = vmatpush1.bf16.msra.mxu0 %v14092_v63  ;;  %v14096_v15 = vld [vmem:[%s17625_s2 + $0x7f0] sm:$0xff]  }
 0x6ab   : > { %10110 = vmatpush1.bf16.msra.mxu1 %v14093_v41  ;;  %v8390_v43 = vpop.f32.mrb[180].mxu0  ;;  %9341 = vmatprep.subr.bf16.mxu0 %v18094_v3 }
 0x6ac   : > { %v8621_v9 = vpop.f32.mrb[180].mxu1  ;;  %10111 = vmatprep.subr.bf16.mxu1 %v18094_v3  ;;  %v8392_v52 = vpop.f32.mrb[181].mxu0 }
 0x6ad   : > { %v8622_v39 = vadd.f32 %v8621_v9, %v8390_v43  ;;  %v8623_v6 = vpop.f32.mrb[181].mxu1  ;;  %v8393_v28 = vpop.f32.mrb[182].mxu0  ;;  %v14097_v43 = vld [vmem:[%s17625_s2 + $0x8f0] sm:$0xff]   ;;  %v18627_v9 = vld [vmem:[#allocation51_spill] sm:$0xff] }
 0x6ae   : > { %v8624_v8 = vpop.f32.mrb[182].mxu1  ;;  %v8395_v63 = vpop.f32.mrb[183].mxu0  ;;  %9342 = vmatpush1.bf16.msra.mxu0 %v14094_v35 }
 0x6af   : > { %v17109_v30 = vadd.f32 %v8622_v39, %v18626_v51  ;;  %v8625_v2 = vadd.f32 %v8624_v8, %v8393_v28  ;;  %v8626_v41 = vpop.f32.mrb[183].mxu1  ;;  %10112 = vmatpush1.bf16.msra.mxu1 %v14095_v22  ;;  %9343 = vmatprep.subr.bf16.mxu0 %v18094_v3 }
 0x6b0   : > { %10113 = vmatprep.subr.bf16.mxu1 %v18094_v3  ;;  %9172 = vmatmul.mubr.bf16.gmra.mrb[88].mxu0 %v18494_v50 }
 0x6b1   : > { %v17120_v39 = vadd.f32 %v8625_v2, %v18627_v9  ;;  %9942 = vmatmul.mubr.bf16.gmra.mrb[88].mxu1 %v18494_v50  ;;  %9179 = vmatprep.mubr.bf16.mxu0 %v18495_v23  ;;  %v18628_v2 = vld [vmem:[#allocation61_spill] sm:$0xff] }
 0x6b2   : > { %9949 = vmatprep.mubr.bf16.mxu1 %v18495_v23  ;;  %9344 = vmatpush1.bf16.msra.mxu0 %v14096_v15  ;;  %v14098_v23 = vld [vmem:[%s17625_s2 + $0x7f8] sm:$0xff]   ;;  %v18629_v15 = vld [vmem:[#allocation59_spill] sm:$0xff] }
 0x6b3   : > { %10114 = vmatpush1.bf16.msra.mxu1 %v14097_v43  ;;  %v8398_v35 = vpop.f32.mrb[184].mxu0  ;;  %9345 = vmatprep.subr.bf16.mxu0 %v18094_v3 }
 0x6b4   : > { %v8629_v22 = vpop.f32.mrb[184].mxu1  ;;  %10115 = vmatprep.subr.bf16.mxu1 %v18094_v3  ;;  %v8400_v6 = vpop.f32.mrb[185].mxu0  ;;  %v14099_v3 = vld [vmem:[%s17625_s2 + $0x8f8] sm:$0xff]  }
 0x6b5   : > { %v8630_v52 = vadd.f32 %v8629_v22, %v8398_v35  ;;  %v8631_v28 = vpop.f32.mrb[185].mxu1  ;;  %v8401_v8 = vpop.f32.mrb[186].mxu0 }
 0x6b6   : > { %v8632_v51 = vpop.f32.mrb[186].mxu1  ;;  %v8403_v41 = vpop.f32.mrb[187].mxu0  ;;  %9346 = vmatpush1.bf16.msra.mxu0 %v14098_v23 }
 0x6b7   : > { %v17129_v63 = vadd.f32 %v8630_v52, %v18628_v2  ;;  %v8633_v50 = vadd.f32 %v8632_v51, %v8401_v8  ;;  %v8634_v9 = vpop.f32.mrb[187].mxu1  ;;  %10116 = vmatpush1.bf16.msra.mxu1 %v14099_v3  ;;  %v18631_v2 = vld [vmem:[#allocation69_spill] sm:$0xff] }
 0x6b8   : > { %9180 = vmatmul.mubr.bf16.gmra.mrb[92].mxu0 %v18496_v46 }
 0x6b9   : > { %v17135_v43 = vadd.f32 %v8633_v50, %v18629_v15  ;;  %9950 = vmatmul.mubr.bf16.gmra.mrb[92].mxu1 %v18496_v46  ;;  %9187 = vmatprep.mubr.bf16.mxu0 %v18497_v58  ;;  %v18632_v15 = vld [vmem:[#allocation67_spill] sm:$0xff] }
 0x6ba   : > { %9957 = vmatprep.mubr.bf16.mxu1 %v18497_v58 }
 0x6bb   : > { %18630 = vst [vmem:[#allocation12_spill] sm:$0xff] %v17135_v43  ;;  %v8406_v35 = vpop.f32.mrb[188].mxu0 }
 0x6bc   : > { %v8637_v22 = vpop.f32.mrb[188].mxu1  ;;  %v8408_v6 = vpop.f32.mrb[189].mxu0 }
 0x6bd   : > { %v8638_v52 = vadd.f32 %v8637_v22, %v8406_v35  ;;  %v8639_v28 = vpop.f32.mrb[189].mxu1  ;;  %v8409_v8 = vpop.f32.mrb[190].mxu0 }
 0x6be   : > { %v8640_v51 = vpop.f32.mrb[190].mxu1  ;;  %v8411_v41 = vpop.f32.mrb[191].mxu0  ;;  %v18633_v28 = vld [vmem:[#allocation77_spill] sm:$0xff] }
 0x6bf   : > { %v17145_v50 = vadd.f32 %v8638_v52, %v18631_v2  ;;  %v8641_v46 = vadd.f32 %v8640_v51, %v8409_v8  ;;  %v8642_v9 = vpop.f32.mrb[191].mxu1  ;;  %v18634_v41 = vld [vmem:[#allocation75_spill] sm:$0xff] }
 0x6c0   : > { %9188 = vmatmul.mubr.bf16.gmra.mrb[96].mxu0 %v18498_v18 }
 0x6c1   : > { %v17148_v43 = vadd.f32 %v8641_v46, %v18632_v15  ;;  %9958 = vmatmul.mubr.bf16.gmra.mrb[96].mxu1 %v18498_v18  ;;  %9195 = vmatprep.mubr.bf16.mxu0 %v18499_v42 }
 0x6c2   : > { %9965 = vmatprep.mubr.bf16.mxu1 %v18499_v42 }
 0x6c3   : > { %v8414_v58 = vpop.f32.mrb[192].mxu0 }
 0x6c4   : > { %v8645_v23 = vpop.f32.mrb[192].mxu1  ;;  %v8416_v35 = vpop.f32.mrb[193].mxu0 }
 0x6c5   : > { %v8646_v3 = vadd.f32 %v8645_v23, %v8414_v58  ;;  %v8647_v22 = vpop.f32.mrb[193].mxu1  ;;  %v8417_v52 = vpop.f32.mrb[194].mxu0 }
 0x6c6   : > { %v8648_v6 = vpop.f32.mrb[194].mxu1  ;;  %v8419_v2 = vpop.f32.mrb[195].mxu0  ;;  %v18635_v22 = vld [vmem:[#allocation85_spill] sm:$0xff] }
 0x6c7   : > { %v17155_v8 = vadd.f32 %v8646_v3, %v18633_v28  ;;  %v8649_v51 = vadd.f32 %v8648_v6, %v8417_v52  ;;  %v8650_v46 = vpop.f32.mrb[195].mxu1  ;;  %v18636_v2 = vld [vmem:[#allocation83_spill] sm:$0xff] }
 0x6c8   : > { %9196 = vmatmul.mubr.bf16.gmra.mrb[100].mxu0 %v18500_v34 }
 0x6c9   : > { %v17158_v9 = vadd.f32 %v8649_v51, %v18634_v41  ;;  %9966 = vmatmul.mubr.bf16.gmra.mrb[100].mxu1 %v18500_v34  ;;  %9203 = vmatprep.mubr.bf16.mxu0 %v18501_v62 }
 0x6ca   : > { %9973 = vmatprep.mubr.bf16.mxu1 %v18501_v62 }
 0x6cb   : > { %v8422_v42 = vpop.f32.mrb[196].mxu0 }
 0x6cc   : > { %v8653_v18 = vpop.f32.mrb[196].mxu1  ;;  %v8424_v58 = vpop.f32.mrb[197].mxu0 }
 0x6cd   : > { %v8654_v15 = vadd.f32 %v8653_v18, %v8422_v42  ;;  %v8655_v23 = vpop.f32.mrb[197].mxu1  ;;  %v8425_v3 = vpop.f32.mrb[198].mxu0 }
 0x6ce   : > { %v8656_v35 = vpop.f32.mrb[198].mxu1  ;;  %v8427_v28 = vpop.f32.mrb[199].mxu0  ;;  %v18637_v23 = vld [vmem:[#allocation93_spill] sm:$0xff] }
 0x6cf   : > { %v17165_v52 = vadd.f32 %v8654_v15, %v18635_v22  ;;  %v8657_v6 = vadd.f32 %v8656_v35, %v8425_v3  ;;  %v8658_v51 = vpop.f32.mrb[199].mxu1  ;;  %v18638_v28 = vld [vmem:[#allocation91_spill] sm:$0xff] }
 0x6d0   : > { %9204 = vmatmul.mubr.bf16.gmra.mrb[104].mxu0 %v18502_v25 }
 0x6d1   : > { %v17168_v46 = vadd.f32 %v8657_v6, %v18636_v2  ;;  %9974 = vmatmul.mubr.bf16.gmra.mrb[104].mxu1 %v18502_v25  ;;  %9211 = vmatprep.mubr.bf16.mxu0 %v18503_v48 }
 0x6d2   : > { %9981 = vmatprep.mubr.bf16.mxu1 %v18503_v48 }
 0x6d3   : > { %v8430_v62 = vpop.f32.mrb[200].mxu0 }
 0x6d4   : > { %v8661_v34 = vpop.f32.mrb[200].mxu1  ;;  %v8432_v42 = vpop.f32.mrb[201].mxu0 }
 0x6d5   : > { %v8662_v41 = vadd.f32 %v8661_v34, %v8430_v62  ;;  %v8663_v18 = vpop.f32.mrb[201].mxu1  ;;  %v8433_v15 = vpop.f32.mrb[202].mxu0 }
 0x6d6   : > { %v8664_v58 = vpop.f32.mrb[202].mxu1  ;;  %v8435_v22 = vpop.f32.mrb[203].mxu0  ;;  %v18639_v18 = vld [vmem:[#allocation101_spill] sm:$0xff] }
 0x6d7   : > { %v17175_v3 = vadd.f32 %v8662_v41, %v18637_v23  ;;  %v8665_v35 = vadd.f32 %v8664_v58, %v8433_v15  ;;  %v8666_v6 = vpop.f32.mrb[203].mxu1  ;;  %v18640_v22 = vld [vmem:[#allocation99_spill] sm:$0xff] }
 0x6d8   : > { %9212 = vmatmul.mubr.bf16.gmra.mrb[108].mxu0 %v18504_v1 }
 0x6d9   : > { %v17178_v51 = vadd.f32 %v8665_v35, %v18638_v28  ;;  %9982 = vmatmul.mubr.bf16.gmra.mrb[108].mxu1 %v18504_v1  ;;  %9219 = vmatprep.mubr.bf16.mxu0 %v18505_v17 }
 0x6da   : > { %9989 = vmatprep.mubr.bf16.mxu1 %v18505_v17 }
 0x6db   : > { %v8438_v48 = vpop.f32.mrb[204].mxu0 }
 0x6dc   : > { %v8669_v25 = vpop.f32.mrb[204].mxu1  ;;  %v8440_v62 = vpop.f32.mrb[205].mxu0 }
 0x6dd   : > { %v8670_v2 = vadd.f32 %v8669_v25, %v8438_v48  ;;  %v8671_v34 = vpop.f32.mrb[205].mxu1  ;;  %v8441_v41 = vpop.f32.mrb[206].mxu0 }
 0x6de   : > { %v8672_v42 = vpop.f32.mrb[206].mxu1  ;;  %v8443_v23 = vpop.f32.mrb[207].mxu0  ;;  %v18641_v34 = vld [vmem:[#allocation109_spill] sm:$0xff] }
 0x6df   : > { %v17185_v15 = vadd.f32 %v8670_v2, %v18639_v18  ;;  %v8673_v58 = vadd.f32 %v8672_v42, %v8441_v41  ;;  %v8674_v35 = vpop.f32.mrb[207].mxu1  ;;  %v18642_v23 = vld [vmem:[#allocation107_spill] sm:$0xff] }
 0x6e0   : > { %9220 = vmatmul.mubr.bf16.gmra.mrb[112].mxu0 %v18506_v21 }
 0x6e1   : > { %v17188_v6 = vadd.f32 %v8673_v58, %v18640_v22  ;;  %9990 = vmatmul.mubr.bf16.gmra.mrb[112].mxu1 %v18506_v21  ;;  %9227 = vmatprep.mubr.bf16.mxu0 %v18507_v10 }
 0x6e2   : > { %9997 = vmatprep.mubr.bf16.mxu1 %v18507_v10 }
 0x6e3   : > { %v8446_v17 = vpop.f32.mrb[208].mxu0 }
 0x6e4   : > { %v8677_v1 = vpop.f32.mrb[208].mxu1  ;;  %v8448_v48 = vpop.f32.mrb[209].mxu0 }
 0x6e5   : > { %v8678_v28 = vadd.f32 %v8677_v1, %v8446_v17  ;;  %v8679_v25 = vpop.f32.mrb[209].mxu1  ;;  %v8449_v2 = vpop.f32.mrb[210].mxu0 }
 0x6e6   : > { %v8680_v62 = vpop.f32.mrb[210].mxu1  ;;  %v8451_v18 = vpop.f32.mrb[211].mxu0  ;;  %v18643_v25 = vld [vmem:[#allocation117_spill] sm:$0xff] }
 0x6e7   : > { %v17195_v41 = vadd.f32 %v8678_v28, %v18641_v34  ;;  %v8681_v42 = vadd.f32 %v8680_v62, %v8449_v2  ;;  %v8682_v58 = vpop.f32.mrb[211].mxu1  ;;  %v18644_v18 = vld [vmem:[#allocation115_spill] sm:$0xff] }
 0x6e8   : > { %9228 = vmatmul.mubr.bf16.gmra.mrb[116].mxu0 %v18574_v19 }
 0x6e9   : > { %v17198_v35 = vadd.f32 %v8681_v42, %v18642_v23  ;;  %9998 = vmatmul.mubr.bf16.gmra.mrb[116].mxu1 %v18574_v19  ;;  %9235 = vmatprep.mubr.bf16.mxu0 %v18576_v44 }
 0x6ea   : > { %10005 = vmatprep.mubr.bf16.mxu1 %v18576_v44 }
 0x6eb   : > { %v8454_v10 = vpop.f32.mrb[212].mxu0 }
 0x6ec   : > { %v8685_v21 = vpop.f32.mrb[212].mxu1  ;;  %v8456_v17 = vpop.f32.mrb[213].mxu0 }
 0x6ed   : > { %v8686_v22 = vadd.f32 %v8685_v21, %v8454_v10  ;;  %v8687_v1 = vpop.f32.mrb[213].mxu1  ;;  %v8457_v28 = vpop.f32.mrb[214].mxu0 }
 0x6ee   : > { %v8688_v48 = vpop.f32.mrb[214].mxu1  ;;  %v8459_v34 = vpop.f32.mrb[215].mxu0  ;;  %v18645_v1 = vld [vmem:[#allocation125_spill] sm:$0xff] }
 0x6ef   : > { %v17205_v2 = vadd.f32 %v8686_v22, %v18643_v25  ;;  %v8689_v62 = vadd.f32 %v8688_v48, %v8457_v28  ;;  %v8690_v42 = vpop.f32.mrb[215].mxu1  ;;  %v18646_v34 = vld [vmem:[#allocation123_spill] sm:$0xff] }
 0x6f0   : > { %9236 = vmatmul.mubr.bf16.gmra.mrb[120].mxu0 %v18578_v0 }
 0x6f1   : > { %v17208_v58 = vadd.f32 %v8689_v62, %v18644_v18  ;;  %10006 = vmatmul.mubr.bf16.gmra.mrb[120].mxu1 %v18578_v0  ;;  %9243 = vmatprep.mubr.bf16.mxu0 %v18580_v31 }
 0x6f2   : > { %10013 = vmatprep.mubr.bf16.mxu1 %v18580_v31 }
 0x6f3   : > { %v8462_v19 = vpop.f32.mrb[216].mxu0 }
 0x6f4   : > { %v8693_v44 = vpop.f32.mrb[216].mxu1  ;;  %v8464_v10 = vpop.f32.mrb[217].mxu0 }
 0x6f5   : > { %v8694_v23 = vadd.f32 %v8693_v44, %v8462_v19  ;;  %v8695_v21 = vpop.f32.mrb[217].mxu1  ;;  %v8465_v22 = vpop.f32.mrb[218].mxu0 }
 0x6f6   : > { %v8696_v17 = vpop.f32.mrb[218].mxu1  ;;  %v8467_v25 = vpop.f32.mrb[219].mxu0  ;;  %v18647_v21 = vld [vmem:[#allocation133_spill] sm:$0xff] }
 0x6f7   : > { %v17215_v28 = vadd.f32 %v8694_v23, %v18645_v1  ;;  %v8697_v48 = vadd.f32 %v8696_v17, %v8465_v22  ;;  %v8698_v62 = vpop.f32.mrb[219].mxu1  ;;  %v18648_v25 = vld [vmem:[#allocation131_spill] sm:$0xff] }
 0x6f8   : > { %9244 = vmatmul.mubr.bf16.gmra.mrb[124].mxu0 %v18582_v36 }
 0x6f9   : > { %v17218_v42 = vadd.f32 %v8697_v48, %v18646_v34  ;;  %10014 = vmatmul.mubr.bf16.gmra.mrb[124].mxu1 %v18582_v36  ;;  %9251 = vmatprep.mubr.bf16.mxu0 %v18584_v13 }
 0x6fa   : > { %10021 = vmatprep.mubr.bf16.mxu1 %v18584_v13 }
 0x6fb   : > { %v8470_v0 = vpop.f32.mrb[220].mxu0 }
 0x6fc   : > { %v8701_v31 = vpop.f32.mrb[220].mxu1  ;;  %v8472_v19 = vpop.f32.mrb[221].mxu0 }
 0x6fd   : > { %v8702_v18 = vadd.f32 %v8701_v31, %v8470_v0  ;;  %v8703_v44 = vpop.f32.mrb[221].mxu1  ;;  %v8473_v23 = vpop.f32.mrb[222].mxu0 }
 0x6fe   : > { %v8704_v10 = vpop.f32.mrb[222].mxu1  ;;  %v8475_v1 = vpop.f32.mrb[223].mxu0  ;;  %v18649_v44 = vld [vmem:[#allocation141_spill] sm:$0xff] }
 0x6ff   : > { %v17225_v22 = vadd.f32 %v8702_v18, %v18647_v21  ;;  %v8705_v17 = vadd.f32 %v8704_v10, %v8473_v23  ;;  %v8706_v48 = vpop.f32.mrb[223].mxu1  ;;  %v18650_v1 = vld [vmem:[#allocation139_spill] sm:$0xff] }
 0x700   : > { %9252 = vmatmul.mubr.bf16.gmra.mrb[128].mxu0 %v18586_v55 }
 0x701   : > { %v17228_v62 = vadd.f32 %v8705_v17, %v18648_v25  ;;  %10022 = vmatmul.mubr.bf16.gmra.mrb[128].mxu1 %v18586_v55  ;;  %9259 = vmatprep.mubr.bf16.mxu0 %v18588_v5 }
 0x702   : > { %10029 = vmatprep.mubr.bf16.mxu1 %v18588_v5 }
 0x703   : > { %v8478_v36 = vpop.f32.mrb[224].mxu0 }
 0x704   : > { %v8709_v13 = vpop.f32.mrb[224].mxu1  ;;  %v8480_v0 = vpop.f32.mrb[225].mxu0 }
 0x705   : > { %v8710_v34 = vadd.f32 %v8709_v13, %v8478_v36  ;;  %v8711_v31 = vpop.f32.mrb[225].mxu1  ;;  %v8481_v18 = vpop.f32.mrb[226].mxu0 }
 0x706   : > { %v8712_v19 = vpop.f32.mrb[226].mxu1  ;;  %v8483_v21 = vpop.f32.mrb[227].mxu0  ;;  %v18651_v31 = vld [vmem:[#allocation149_spill] sm:$0xff] }
 0x707   : > { %v17235_v23 = vadd.f32 %v8710_v34, %v18649_v44  ;;  %v8713_v10 = vadd.f32 %v8712_v19, %v8481_v18  ;;  %v8714_v17 = vpop.f32.mrb[227].mxu1  ;;  %v18652_v21 = vld [vmem:[#allocation147_spill] sm:$0xff] }
 0x708   : > { %9260 = vmatmul.mubr.bf16.gmra.mrb[132].mxu0 %v18590_v53 }
 0x709   : > { %v17238_v48 = vadd.f32 %v8713_v10, %v18650_v1  ;;  %10030 = vmatmul.mubr.bf16.gmra.mrb[132].mxu1 %v18590_v53  ;;  %9267 = vmatprep.mubr.bf16.mxu0 %v18592_v56 }
 0x70a   : > { %10037 = vmatprep.mubr.bf16.mxu1 %v18592_v56 }
 0x70b   : > { %v8486_v55 = vpop.f32.mrb[228].mxu0 }
 0x70c   : > { %v8717_v5 = vpop.f32.mrb[228].mxu1  ;;  %v8488_v36 = vpop.f32.mrb[229].mxu0 }
 0x70d   : > { %v8718_v25 = vadd.f32 %v8717_v5, %v8486_v55  ;;  %v8719_v13 = vpop.f32.mrb[229].mxu1  ;;  %v8489_v34 = vpop.f32.mrb[230].mxu0 }
 0x70e   : > { %v8720_v0 = vpop.f32.mrb[230].mxu1  ;;  %v8491_v44 = vpop.f32.mrb[231].mxu0  ;;  %v18653_v13 = vld [vmem:[#allocation157_spill] sm:$0xff] }
 0x70f   : > { %v17245_v18 = vadd.f32 %v8718_v25, %v18651_v31  ;;  %v8721_v19 = vadd.f32 %v8720_v0, %v8489_v34  ;;  %v8722_v10 = vpop.f32.mrb[231].mxu1  ;;  %v18654_v44 = vld [vmem:[#allocation155_spill] sm:$0xff] }
 0x710   : > { %9268 = vmatmul.mubr.bf16.gmra.mrb[136].mxu0 %v18593_v37 }
 0x711   : > { %v17248_v17 = vadd.f32 %v8721_v19, %v18652_v21  ;;  %10038 = vmatmul.mubr.bf16.gmra.mrb[136].mxu1 %v18593_v37  ;;  %9275 = vmatprep.mubr.bf16.mxu0 %v18594_v16 }
 0x712   : > { %10045 = vmatprep.mubr.bf16.mxu1 %v18594_v16 }
 0x713   : > { %v8494_v56 = vpop.f32.mrb[232].mxu0 }
 0x714   : > { %v8725_v53 = vpop.f32.mrb[232].mxu1  ;;  %v8496_v55 = vpop.f32.mrb[233].mxu0 }
 0x715   : > { %v8726_v1 = vadd.f32 %v8725_v53, %v8494_v56  ;;  %v8727_v5 = vpop.f32.mrb[233].mxu1  ;;  %v8497_v25 = vpop.f32.mrb[234].mxu0 }
 0x716   : > { %v8728_v36 = vpop.f32.mrb[234].mxu1  ;;  %v8499_v31 = vpop.f32.mrb[235].mxu0  ;;  %v18655_v5 = vld [vmem:[#allocation165_spill] sm:$0xff] }
 0x717   : > { %v17255_v34 = vadd.f32 %v8726_v1, %v18653_v13  ;;  %v8729_v0 = vadd.f32 %v8728_v36, %v8497_v25  ;;  %v8730_v19 = vpop.f32.mrb[235].mxu1  ;;  %v18656_v31 = vld [vmem:[#allocation163_spill] sm:$0xff] }
 0x718   : > { %9276 = vmatmul.mubr.bf16.gmra.mrb[140].mxu0 %v18596_v32 }
 0x719   : > { %v17258_v10 = vadd.f32 %v8729_v0, %v18654_v44  ;;  %10046 = vmatmul.mubr.bf16.gmra.mrb[140].mxu1 %v18596_v32  ;;  %9283 = vmatprep.mubr.bf16.mxu0 %v18598_v26 }
 0x71a   : > { %10053 = vmatprep.mubr.bf16.mxu1 %v18598_v26 }
 0x71b   : > { %v8502_v16 = vpop.f32.mrb[236].mxu0 }
 0x71c   : > { %v8733_v37 = vpop.f32.mrb[236].mxu1  ;;  %v8504_v56 = vpop.f32.mrb[237].mxu0 }
 0x71d   : > { %v8734_v21 = vadd.f32 %v8733_v37, %v8502_v16  ;;  %v8735_v53 = vpop.f32.mrb[237].mxu1  ;;  %v8505_v1 = vpop.f32.mrb[238].mxu0 }
 0x71e   : > { %v8736_v55 = vpop.f32.mrb[238].mxu1  ;;  %v8507_v13 = vpop.f32.mrb[239].mxu0  ;;  %v18657_v53 = vld [vmem:[#allocation173_spill] sm:$0xff] }
 0x71f   : > { %v17265_v25 = vadd.f32 %v8734_v21, %v18655_v5  ;;  %v8737_v36 = vadd.f32 %v8736_v55, %v8505_v1  ;;  %v8738_v0 = vpop.f32.mrb[239].mxu1  ;;  %v18658_v13 = vld [vmem:[#allocation171_spill] sm:$0xff] }
 0x720   : > { %9284 = vmatmul.mubr.bf16.gmra.mrb[144].mxu0 %v18600_v61 }
 0x721   : > { %v17268_v19 = vadd.f32 %v8737_v36, %v18656_v31  ;;  %10054 = vmatmul.mubr.bf16.gmra.mrb[144].mxu1 %v18600_v61  ;;  %9291 = vmatprep.mubr.bf16.mxu0 %v18602_v59 }
 0x722   : > { %10061 = vmatprep.mubr.bf16.mxu1 %v18602_v59 }
 0x723   : > { %v8510_v32 = vpop.f32.mrb[240].mxu0 }
 0x724   : > { %v8741_v26 = vpop.f32.mrb[240].mxu1  ;;  %v8512_v16 = vpop.f32.mrb[241].mxu0 }
 0x725   : > { %v8742_v44 = vadd.f32 %v8741_v26, %v8510_v32  ;;  %v8743_v37 = vpop.f32.mrb[241].mxu1  ;;  %v8513_v21 = vpop.f32.mrb[242].mxu0 }
 0x726   : > { %v8744_v56 = vpop.f32.mrb[242].mxu1  ;;  %v8515_v5 = vpop.f32.mrb[243].mxu0  ;;  %v18659_v37 = vld [vmem:[#allocation181_spill] sm:$0xff] }
 0x727   : > { %v17275_v1 = vadd.f32 %v8742_v44, %v18657_v53  ;;  %v8745_v55 = vadd.f32 %v8744_v56, %v8513_v21  ;;  %v8746_v36 = vpop.f32.mrb[243].mxu1  ;;  %v18660_v5 = vld [vmem:[#allocation179_spill] sm:$0xff] }
 0x728   : > { %9292 = vmatmul.mubr.bf16.gmra.mrb[148].mxu0 %v18604_v11 }
 0x729   : > { %v17278_v0 = vadd.f32 %v8745_v55, %v18658_v13  ;;  %10062 = vmatmul.mubr.bf16.gmra.mrb[148].mxu1 %v18604_v11  ;;  %9299 = vmatprep.mubr.bf16.mxu0 %v18606_v45 }
 0x72a   : > { %10069 = vmatprep.mubr.bf16.mxu1 %v18606_v45 }
 0x72b   : > { %v8518_v61 = vpop.f32.mrb[244].mxu0 }
 0x72c   : > { %v8749_v59 = vpop.f32.mrb[244].mxu1  ;;  %v8520_v32 = vpop.f32.mrb[245].mxu0 }
 0x72d   : > { %v8750_v31 = vadd.f32 %v8749_v59, %v8518_v61  ;;  %v8751_v26 = vpop.f32.mrb[245].mxu1  ;;  %v8521_v44 = vpop.f32.mrb[246].mxu0 }
 0x72e   : > { %v8752_v16 = vpop.f32.mrb[246].mxu1  ;;  %v8523_v53 = vpop.f32.mrb[247].mxu0  ;;  %v18661_v26 = vld [vmem:[#allocation193_spill] sm:$0xff] }
 0x72f   : > { %v17285_v21 = vadd.f32 %v8750_v31, %v18659_v37  ;;  %v8753_v56 = vadd.f32 %v8752_v16, %v8521_v44  ;;  %v8754_v55 = vpop.f32.mrb[247].mxu1  ;;  %v18663_v53 = vld [vmem:[#allocation191_spill] sm:$0xff] }
 0x730   : > { %9300 = vmatmul.mubr.bf16.gmra.mrb[152].mxu0 %v18611_v20 }
 0x731   : > { %v17288_v36 = vadd.f32 %v8753_v56, %v18660_v5  ;;  %10070 = vmatmul.mubr.bf16.gmra.mrb[152].mxu1 %v18611_v20  ;;  %9307 = vmatprep.mubr.bf16.mxu0 %v16922_v4 }
 0x732   : > { %10077 = vmatprep.mubr.bf16.mxu1 %v16922_v4 }
 0x733   : > { %v8526_v45 = vpop.f32.mrb[248].mxu0 }
 0x734   : > { %v8757_v11 = vpop.f32.mrb[248].mxu1  ;;  %v8528_v61 = vpop.f32.mrb[249].mxu0 }
 0x735   : > { %v8758_v13 = vadd.f32 %v8757_v11, %v8526_v45  ;;  %v8759_v59 = vpop.f32.mrb[249].mxu1  ;;  %v8529_v31 = vpop.f32.mrb[250].mxu0 }
 0x736   : > { %v8760_v32 = vpop.f32.mrb[250].mxu1  ;;  %v8531_v37 = vpop.f32.mrb[251].mxu0  ;;  %v18665_v59 = vld [vmem:[#allocation201_spill] sm:$0xff] }
 0x737   : > { %v17295_v44 = vadd.f32 %v8758_v13, %v18661_v26  ;;  %v8761_v16 = vadd.f32 %v8760_v32, %v8529_v31  ;;  %v8762_v56 = vpop.f32.mrb[251].mxu1  ;;  %v18667_v37 = vld [vmem:[#allocation199_spill] sm:$0xff] }
 0x738   : > { %9308 = vmatmul.mubr.bf16.gmra.mrb[156].mxu0 %v16932_v49 }
 0x739   : > { %18662 = vst [vmem:[#allocation22_spill] sm:$0xff] %v17295_v44  ;;  %v17298_v55 = vadd.f32 %v8761_v16, %v18663_v53  ;;  %10078 = vmatmul.mubr.bf16.gmra.mrb[156].mxu1 %v16932_v49  ;;  %9347 = vmatprep.mubr.bf16.mxu0 %v18529_v38 }
 0x73a   : > { %10117 = vmatprep.mubr.bf16.mxu1 %v18529_v38 }
 0x73b   : > { %18664 = vst [vmem:[#allocation20_spill] sm:$0xff] %v17298_v55  ;;  %v8534_v20 = vpop.f32.mrb[252].mxu0 }
 0x73c   : > { %v8765_v4 = vpop.f32.mrb[252].mxu1  ;;  %v8536_v45 = vpop.f32.mrb[253].mxu0 }
 0x73d   : > { %v8766_v5 = vadd.f32 %v8765_v4, %v8534_v20  ;;  %v8767_v11 = vpop.f32.mrb[253].mxu1  ;;  %v8537_v13 = vpop.f32.mrb[254].mxu0 }
 0x73e   : > { %v8768_v61 = vpop.f32.mrb[254].mxu1  ;;  %v8539_v26 = vpop.f32.mrb[255].mxu0 }
 0x73f   : > { %v17305_v31 = vadd.f32 %v8766_v5, %v18665_v59  ;;  %v8769_v32 = vadd.f32 %v8768_v61, %v8537_v13  ;;  %v8770_v16 = vpop.f32.mrb[255].mxu1  ;;  %v18669_v13 = vld [vmem:[#allocation32_spill] sm:$0xff]  ;;  %v18670_v61 = vld [vmem:[#allocation42_spill] sm:$0xff] }
 0x740   : > { %9348 = vmatmul.mubr.bf16.vlgmr.msra.gmra.mrb[60].mxu0 %v18530_v40  ;;  %v18673_v59 = vld [vmem:[#allocation48_spill] sm:$0xff]  ;;  %v18676_v16 = vld [vmem:[#allocation66_spill] sm:$0xff] }
 0x741   : > { %18666 = vst [vmem:[#allocation30_spill] sm:$0xff] %v17305_v31  ;;  %v17308_v56 = vadd.f32 %v8769_v32, %v18667_v37  ;;  %10118 = vmatmul.mubr.bf16.vlgmr.msra.gmra.mrb[60].mxu1 %v18530_v40  ;;  %9355 = vmatprep.mubr.bf16.mxu0 %v18531_v27  ;;  %v18671_v40 = vld [vmem:[#allocation40_spill] sm:$0xff]  ;;  %v18674_v32 = vld [vmem:[#allocation58_spill] sm:$0xff] }
 0x742   : > { %10125 = vmatprep.mubr.bf16.mxu1 %v18531_v27  ;;  %v18672_v27 = vld [vmem:[#allocation50_spill] sm:$0xff]  ;;  %v18675_v26 = vld [vmem:[#allocation56_spill] sm:$0xff] }
 0x743   : > { %18668 = vst [vmem:[#allocation28_spill] sm:$0xff] %v17308_v56  ;;  %v8542_v38 = vpop.f32.mrb[0].mxu0  ;;  %v18677_v37 = vld [vmem:[#allocation64_spill] sm:$0xff] }
 0x744   : > { %v8773_v49 = vpop.f32.mrb[0].mxu1  ;;  %v8543_v53 = vpop.f32.mrb[1].mxu0  ;;  %v18678_v38 = vld [vmem:[#allocation74_spill] sm:$0xff] }
 0x745   : > { %v8774_v20 = vpop.f32.mrb[1].mxu1  ;;  %v8544_v4 = vpop.f32.mrb[2].mxu0  ;;  %v18679_v49 = vld [vmem:[#allocation72_spill] sm:$0xff]  ;;  %v18680_v53 = vld [vmem:[#allocation82_spill] sm:$0xff] }
 0x746   : > { %v8775_v5 = vpop.f32.mrb[2].mxu1  ;;  %v8545_v45 = vpop.f32.mrb[3].mxu0  ;;  %v18681_v20 = vld [vmem:[#allocation80_spill] sm:$0xff]  ;;  %v18682_v4 = vld [vmem:[#allocation90_spill] sm:$0xff] }
 0x747   : > { %v8776_v11 = vpop.f32.mrb[3].mxu1  ;;  %v18683_v5 = vld [vmem:[#allocation88_spill] sm:$0xff]  ;;  %v18684_v45 = vld [vmem:[#allocation98_spill] sm:$0xff] }
 0x748   : > { %9356 = vmatmul.mubr.bf16.gmra.mrb[64].mxu0 %v18669_v13  ;;  %v18685_v11 = vld [vmem:[#allocation96_spill] sm:$0xff] }
 0x749   : > { %10126 = vmatmul.mubr.bf16.gmra.mrb[64].mxu1 %v18669_v13  ;;  %9363 = vmatprep.mubr.bf16.mxu0 %v18670_v61  ;;  %v18686_v13 = vld [vmem:[#allocation106_spill] sm:$0xff] }
 0x74a   : > { %10133 = vmatprep.mubr.bf16.mxu1 %v18670_v61  ;;  %v18687_v61 = vld [vmem:[#allocation104_spill] sm:$0xff] }
 0x750   : > { %9364 = vmatmul.mubr.bf16.gmra.mrb[68].mxu0 %v18671_v40 }
 0x751   : > { %10134 = vmatmul.mubr.bf16.gmra.mrb[68].mxu1 %v18671_v40  ;;  %9371 = vmatprep.mubr.bf16.mxu0 %v18672_v27  ;;  %v18688_v40 = vld [vmem:[#allocation114_spill] sm:$0xff] }
 0x752   : > { %10141 = vmatprep.mubr.bf16.mxu1 %v18672_v27  ;;  %v18689_v27 = vld [vmem:[#allocation112_spill] sm:$0xff] }
 0x758   : > { %9372 = vmatmul.mubr.bf16.gmra.mrb[72].mxu0 %v18673_v59 }
 0x759   : > { %10142 = vmatmul.mubr.bf16.gmra.mrb[72].mxu1 %v18673_v59  ;;  %9379 = vmatprep.mubr.bf16.mxu0 %v18674_v32  ;;  %v18690_v59 = vld [vmem:[#allocation122_spill] sm:$0xff] }
 0x75a   : > { %10149 = vmatprep.mubr.bf16.mxu1 %v18674_v32  ;;  %v18691_v32 = vld [vmem:[#allocation120_spill] sm:$0xff] }
 0x760   : > { %9380 = vmatmul.mubr.bf16.gmra.mrb[76].mxu0 %v18675_v26 }
 0x761   : > { %10150 = vmatmul.mubr.bf16.gmra.mrb[76].mxu1 %v18675_v26  ;;  %9387 = vmatprep.mubr.bf16.mxu0 %v18676_v16  ;;  %v18692_v26 = vld [vmem:[#allocation130_spill] sm:$0xff] }
 0x762   : > { %10157 = vmatprep.mubr.bf16.mxu1 %v18676_v16  ;;  %v18693_v16 = vld [vmem:[#allocation128_spill] sm:$0xff] }
 0x768   : > { %9388 = vmatmul.mubr.bf16.gmra.mrb[80].mxu0 %v18677_v37 }
 0x769   : > { %10158 = vmatmul.mubr.bf16.gmra.mrb[80].mxu1 %v18677_v37  ;;  %9395 = vmatprep.mubr.bf16.mxu0 %v18678_v38  ;;  %v18694_v37 = vld [vmem:[#allocation138_spill] sm:$0xff] }
 0x76a   : > { %10165 = vmatprep.mubr.bf16.mxu1 %v18678_v38  ;;  %v18695_v38 = vld [vmem:[#allocation136_spill] sm:$0xff] }
 0x770   : > { %9396 = vmatmul.mubr.bf16.gmra.mrb[84].mxu0 %v18679_v49 }
 0x771   : > { %10166 = vmatmul.mubr.bf16.gmra.mrb[84].mxu1 %v18679_v49  ;;  %9403 = vmatprep.mubr.bf16.mxu0 %v18680_v53  ;;  %v18696_v49 = vld [vmem:[#allocation146_spill] sm:$0xff] }
 0x772   : > { %10173 = vmatprep.mubr.bf16.mxu1 %v18680_v53  ;;  %v18697_v53 = vld [vmem:[#allocation144_spill] sm:$0xff] }
 0x778   : > { %9404 = vmatmul.mubr.bf16.gmra.mrb[88].mxu0 %v18681_v20 }
 0x779   : > { %10174 = vmatmul.mubr.bf16.gmra.mrb[88].mxu1 %v18681_v20  ;;  %9411 = vmatprep.mubr.bf16.mxu0 %v18682_v4  ;;  %v18698_v20 = vld [vmem:[#allocation154_spill] sm:$0xff] }
 0x77a   : > { %10181 = vmatprep.mubr.bf16.mxu1 %v18682_v4  ;;  %v18699_v4 = vld [vmem:[#allocation152_spill] sm:$0xff] }
 0x780   : > { %9412 = vmatmul.mubr.bf16.gmra.mrb[92].mxu0 %v18683_v5 }
 0x781   : > { %10182 = vmatmul.mubr.bf16.gmra.mrb[92].mxu1 %v18683_v5  ;;  %9419 = vmatprep.mubr.bf16.mxu0 %v18684_v45  ;;  %v18700_v5 = vld [vmem:[#allocation162_spill] sm:$0xff] }
 0x782   : > { %10189 = vmatprep.mubr.bf16.mxu1 %v18684_v45  ;;  %v18701_v45 = vld [vmem:[#allocation160_spill] sm:$0xff] }
 0x788   : > { %9420 = vmatmul.mubr.bf16.gmra.mrb[96].mxu0 %v18685_v11 }
 0x789   : > { %10190 = vmatmul.mubr.bf16.gmra.mrb[96].mxu1 %v18685_v11  ;;  %9427 = vmatprep.mubr.bf16.mxu0 %v18686_v13  ;;  %v18702_v11 = vld [vmem:[#allocation170_spill] sm:$0xff] }
 0x78a   : > { %10197 = vmatprep.mubr.bf16.mxu1 %v18686_v13  ;;  %v18703_v13 = vld [vmem:[#allocation168_spill] sm:$0xff] }
 0x790   : > { %9428 = vmatmul.mubr.bf16.gmra.mrb[100].mxu0 %v18687_v61 }
 0x791   : > { %10198 = vmatmul.mubr.bf16.gmra.mrb[100].mxu1 %v18687_v61  ;;  %9435 = vmatprep.mubr.bf16.mxu0 %v18688_v40  ;;  %v18704_v61 = vld [vmem:[#allocation178_spill] sm:$0xff] }
 0x792   : > { %10205 = vmatprep.mubr.bf16.mxu1 %v18688_v40  ;;  %v18705_v40 = vld [vmem:[#allocation176_spill] sm:$0xff] }
 0x798   : > { %9436 = vmatmul.mubr.bf16.gmra.mrb[104].mxu0 %v18689_v27 }
 0x799   : > { %10206 = vmatmul.mubr.bf16.gmra.mrb[104].mxu1 %v18689_v27  ;;  %9443 = vmatprep.mubr.bf16.mxu0 %v18690_v59  ;;  %v18706_v27 = vld [vmem:[#allocation186_spill] sm:$0xff] }
 0x79a   : > { %10213 = vmatprep.mubr.bf16.mxu1 %v18690_v59  ;;  %v18707_v59 = vld [vmem:[#allocation184_spill] sm:$0xff] }
 0x7a0   : > { %9444 = vmatmul.mubr.bf16.gmra.mrb[108].mxu0 %v18691_v32 }
 0x7a1   : > { %10214 = vmatmul.mubr.bf16.gmra.mrb[108].mxu1 %v18691_v32  ;;  %9451 = vmatprep.mubr.bf16.mxu0 %v18692_v26  ;;  %v18708_v32 = vld [vmem:[#allocation198_spill] sm:$0xff] }
 0x7a2   : > { %10221 = vmatprep.mubr.bf16.mxu1 %v18692_v26  ;;  %v18709_v26 = vld [vmem:[#allocation196_spill] sm:$0xff] }
 0x7a8   : > { %9452 = vmatmul.mubr.bf16.gmra.mrb[112].mxu0 %v18693_v16 }
 0x7a9   : > { %10222 = vmatmul.mubr.bf16.gmra.mrb[112].mxu1 %v18693_v16  ;;  %9459 = vmatprep.mubr.bf16.mxu0 %v18694_v37  ;;  %v18710_v16 = vld [vmem:[#allocation208_spill] sm:$0xff] }
 0x7aa   : > { %10229 = vmatprep.mubr.bf16.mxu1 %v18694_v37  ;;  %v18711_v37 = vld [vmem:[#allocation206_spill] sm:$0xff] }
 0x7b0   : > { %9460 = vmatmul.mubr.bf16.gmra.mrb[116].mxu0 %v18695_v38 }
 0x7b1   : > { %10230 = vmatmul.mubr.bf16.gmra.mrb[116].mxu1 %v18695_v38  ;;  %9467 = vmatprep.mubr.bf16.mxu0 %v18696_v49  ;;  %v18712_v38 = vld [vmem:[#allocation215_spill] sm:$0xff] }
 0x7b2   : > { %10237 = vmatprep.mubr.bf16.mxu1 %v18696_v49  ;;  %v18713_v49 = vld [vmem:[#allocation211_spill] sm:$0xff] }
 0x7b8   : > { %9468 = vmatmul.mubr.bf16.gmra.mrb[120].mxu0 %v18697_v53 }
 0x7b9   : > { %10238 = vmatmul.mubr.bf16.gmra.mrb[120].mxu1 %v18697_v53  ;;  %9475 = vmatprep.mubr.bf16.mxu0 %v18698_v20  ;;  %v18714_v53 = vld [vmem:[#allocation204_spill] sm:$0xff] }
 0x7ba   : > { %10245 = vmatprep.mubr.bf16.mxu1 %v18698_v20  ;;  %v18715_v20 = vld [vmem:[#allocation14_spill] sm:$0xff] }
 0x7c0   : > { %9476 = vmatmul.mubr.bf16.gmra.mrb[124].mxu0 %v18699_v4 }
 0x7c1   : > { %10246 = vmatmul.mubr.bf16.gmra.mrb[124].mxu1 %v18699_v4  ;;  %9483 = vmatprep.mubr.bf16.mxu0 %v18700_v5 }
 0x7c2   : > { %10253 = vmatprep.mubr.bf16.mxu1 %v18700_v5 }
 0x7c8   : > { %9484 = vmatmul.mubr.bf16.gmra.mrb[128].mxu0 %v18701_v45 }
 0x7c9   : > { %10254 = vmatmul.mubr.bf16.gmra.mrb[128].mxu1 %v18701_v45  ;;  %9491 = vmatprep.mubr.bf16.mxu0 %v18702_v11 }
 0x7ca   : > { %10261 = vmatprep.mubr.bf16.mxu1 %v18702_v11 }
 0x7d0   : > { %9492 = vmatmul.mubr.bf16.gmra.mrb[132].mxu0 %v18703_v13 }
 0x7d1   : > { %10262 = vmatmul.mubr.bf16.gmra.mrb[132].mxu1 %v18703_v13  ;;  %9499 = vmatprep.mubr.bf16.mxu0 %v18704_v61 }
 0x7d2   : > { %10269 = vmatprep.mubr.bf16.mxu1 %v18704_v61 }
 0x7d8   : > { %9500 = vmatmul.mubr.bf16.gmra.mrb[136].mxu0 %v18705_v40 }
 0x7d9   : > { %10270 = vmatmul.mubr.bf16.gmra.mrb[136].mxu1 %v18705_v40  ;;  %9507 = vmatprep.mubr.bf16.mxu0 %v18706_v27 }
 0x7da   : > { %10277 = vmatprep.mubr.bf16.mxu1 %v18706_v27 }
 0x7e0   : > { %9508 = vmatmul.mubr.bf16.gmra.mrb[140].mxu0 %v18707_v59 }
 0x7e1   : > { %10278 = vmatmul.mubr.bf16.gmra.mrb[140].mxu1 %v18707_v59  ;;  %9515 = vmatprep.mubr.bf16.mxu0 %v18708_v32 }
 0x7e2   : > { %10285 = vmatprep.mubr.bf16.mxu1 %v18708_v32 }
 0x7e8   : > { %9516 = vmatmul.mubr.bf16.gmra.mrb[144].mxu0 %v18709_v26 }
 0x7e9   : > { %10286 = vmatmul.mubr.bf16.gmra.mrb[144].mxu1 %v18709_v26  ;;  %9523 = vmatprep.mubr.bf16.mxu0 %v18710_v16 }
 0x7ea   : > { %10293 = vmatprep.mubr.bf16.mxu1 %v18710_v16 }
 0x7f0   : > { %9524 = vmatmul.mubr.bf16.gmra.mrb[148].mxu0 %v18711_v37 }
 0x7f1   : > { %10294 = vmatmul.mubr.bf16.gmra.mrb[148].mxu1 %v18711_v37  ;;  %9531 = vmatprep.mubr.bf16.mxu0 %v18712_v38 }
 0x7f2   : > { %10301 = vmatprep.mubr.bf16.mxu1 %v18712_v38 }
 0x7f8   : > { %9532 = vmatmul.mubr.bf16.gmra.mrb[152].mxu0 %v18713_v49 }
 0x7f9   : > { %10302 = vmatmul.mubr.bf16.gmra.mrb[152].mxu1 %v18713_v49  ;;  %9539 = vmatprep.mubr.bf16.mxu0 %v18714_v53 }
 0x7fa   : > { %10309 = vmatprep.mubr.bf16.mxu1 %v18714_v53  ;;  %v17414_v53 = vld [vmem:[%s17626_s3] ss:$0 sm:$0xff] }
 0x800   : > { %9540 = vmatmul.mubr.bf16.gmra.mrb[156].mxu0 %v18715_v20 }
 0x801   : > { %10310 = vmatmul.mubr.bf16.gmra.mrb[156].mxu1 %v18715_v20 }
 0x813   : > { %v9349_v4 = vpop.f32.mrb[60].mxu0 }
 0x814   : > { %v10119_v5 = vpop.f32.mrb[60].mxu1  ;;  %v9351_v45 = vpop.f32.mrb[61].mxu0  ;;  %v10416_v40 = vrot.slane %v9349_v4, 1 }
 0x815   : > { %v10121_v11 = vpop.f32.mrb[61].mxu1  ;;  %v9352_v13 = vpop.f32.mrb[62].mxu0  ;;  %v10659_v27 = vrot.slane %v10119_v5, 2 }
 0x816   : > { %v10122_v61 = vpop.f32.mrb[62].mxu1  ;;  %v10417_v59 = vrot.slane %v9352_v13, 1  ;;  %v9354_v26 = vpop.f32.mrb[63].mxu0 }
 0x817   : > { %v10660_v32 = vrot.slane %v10122_v61, 2  ;;  %v10124_v16 = vpop.f32.mrb[63].mxu1 }
 0x818   : > { %v10418_v37 = vsel %vm10415_vm4, %v10416_v40, %v10417_v59 }
 0x819   : > { %v10661_v38 = vsel %vm10658_vm5, %v10659_v27, %v10660_v32  ;;  %v10561_v49 = vadd.f32 %v10418_v37, %v16979_v60 }
 0x81b   : > { %v9357_v20 = vpop.f32.mrb[64].mxu0  ;;  %v10804_v11 = vadd.f32 %v10661_v38, %v10561_v49 }
 0x81c   : > { %v10127_v45 = vpop.f32.mrb[64].mxu1  ;;  %v10419_v4 = vrot.slane %v9357_v20, 1  ;;  %v9359_v13 = vpop.f32.mrb[65].mxu0 }
 0x81d   : > { %v10662_v5 = vrot.slane %v10127_v45, 2  ;;  %v10129_v61 = vpop.f32.mrb[65].mxu1  ;;  %v9360_v26 = vpop.f32.mrb[66].mxu0  ;;  %v10859_v40 = vadd.f32 %v17414_v53, %v10804_v11 }
 0x81e   : > { %v10130_v16 = vpop.f32.mrb[66].mxu1  ;;  %v10420_v27 = vsel %vm10415_vm4, %v10417_v59, %v10419_v4  ;;  %v10421_v56 = vrot.slane %v9360_v26, 1  ;;  %v9362_v37 = vpop.f32.mrb[67].mxu0 }
 0x81f   : > { %v10664_v60 = vrot.slane %v10130_v16, 2  ;;  %v10132_v31 = vpop.f32.mrb[67].mxu1  ;;  %v10663_v55 = vsel %vm10658_vm5, %v10660_v32, %v10662_v5  ;;  %10907 = vxpose.xlu0.b32.start [1/16] (narrow) %v10859_v40, 16  ;;  %v10562_v44 = vadd.f32 %v10420_v27, %v16990_v57 }
 0x820   : > { %v10422_v38 = vsel %vm10415_vm4, %v10419_v4, %v10421_v56 }
 0x821   : > { %v10665_v49 = vsel %vm10658_vm5, %v10662_v5, %v10664_v60  ;;  %v10805_v20 = vadd.f32 %v10663_v55, %v10562_v44  ;;  %v10563_v45 = vadd.f32 %v10422_v38, %v17005_v24 }
 0x823   : > { %v9365_v13 = vpop.f32.mrb[68].mxu0  ;;  %v10860_v59 = vadd.f32 %v17414_v53, %v10805_v20  ;;  %v10806_v61 = vadd.f32 %v10665_v49, %v10563_v45 }
 0x824   : > { %v10135_v11 = vpop.f32.mrb[68].mxu1  ;;  %v10423_v26 = vrot.slane %v9365_v13, 1  ;;  %v9367_v31 = vpop.f32.mrb[69].mxu0 }
 0x825   : > { %v10666_v16 = vrot.slane %v10135_v11, 2  ;;  %v10137_v37 = vpop.f32.mrb[69].mxu1  ;;  %v9368_v32 = vpop.f32.mrb[70].mxu0  ;;  %10908 = vxpose.xlu0.b32.cont [2/16] (narrow) %v10860_v59, 16  ;;  %v10861_v55 = vadd.f32 %v17414_v53, %v10806_v61 }
 0x826   : > { %v10138_v40 = vpop.f32.mrb[70].mxu1  ;;  %v10424_v57 = vsel %vm10415_vm4, %v10421_v56, %v10423_v26  ;;  %v10425_v4 = vrot.slane %v9368_v32, 1  ;;  %v9370_v5 = vpop.f32.mrb[71].mxu0 }
 0x827   : > { %v10668_v27 = vrot.slane %v10138_v40, 2  ;;  %v10140_v44 = vpop.f32.mrb[71].mxu1  ;;  %v10667_v24 = vsel %vm10658_vm5, %v10664_v60, %v10666_v16  ;;  %v10564_v38 = vadd.f32 %v10424_v57, %v17016_v33 }
 0x828   : > { %v10426_v49 = vsel %vm10415_vm4, %v10423_v26, %v10425_v4 }
 0x829   : > { %v10669_v20 = vsel %vm10658_vm5, %v10666_v16, %v10668_v27  ;;  %10909 = vxpose.xlu0.b32.cont [3/16] (narrow) %v10861_v55, 16  ;;  %v10807_v45 = vadd.f32 %v10667_v24, %v10564_v38  ;;  %v10565_v13 = vadd.f32 %v10426_v49, %v17031_v14 }
 0x82b   : > { %v9373_v11 = vpop.f32.mrb[72].mxu0  ;;  %v10862_v59 = vadd.f32 %v17414_v53, %v10807_v45  ;;  %v10808_v31 = vadd.f32 %v10669_v20, %v10565_v13 }
 0x82c   : > { %v10143_v56 = vpop.f32.mrb[72].mxu1  ;;  %v10427_v37 = vrot.slane %v9373_v11, 1  ;;  %v9375_v60 = vpop.f32.mrb[73].mxu0 }
 0x82d   : > { %v10670_v32 = vrot.slane %v10143_v56, 2  ;;  %v10145_v40 = vpop.f32.mrb[73].mxu1  ;;  %v9376_v61 = vpop.f32.mrb[74].mxu0  ;;  %10910 = vxpose.xlu0.b32.cont [4/16] (narrow) %v10862_v59, 16  ;;  %v10863_v24 = vadd.f32 %v17414_v53, %v10808_v31 }
 0x82e   : > { %v10146_v5 = vpop.f32.mrb[74].mxu1  ;;  %v10428_v33 = vsel %vm10415_vm4, %v10425_v4, %v10427_v37  ;;  %v10429_v26 = vrot.slane %v9376_v61, 1  ;;  %v9378_v57 = vpop.f32.mrb[75].mxu0 }
 0x82f   : > { %v10672_v16 = vrot.slane %v10146_v5, 2  ;;  %v10148_v44 = vpop.f32.mrb[75].mxu1  ;;  %v10671_v14 = vsel %vm10658_vm5, %v10668_v27, %v10670_v32  ;;  %v10566_v55 = vadd.f32 %v10428_v33, %v17042_v29 }
 0x830   : > { %v10430_v38 = vsel %vm10415_vm4, %v10427_v37, %v10429_v26 }
 0x831   : > { %v10673_v49 = vsel %vm10658_vm5, %v10670_v32, %v10672_v16  ;;  %10911 = vxpose.xlu0.b32.cont [5/16] (narrow) %v10863_v24, 16  ;;  %v10809_v20 = vadd.f32 %v10671_v14, %v10566_v55  ;;  %v10567_v45 = vadd.f32 %v10430_v38, %v17057_v7 }
 0x833   : > { %v9381_v13 = vpop.f32.mrb[76].mxu0  ;;  %v10864_v11 = vadd.f32 %v17414_v53, %v10809_v20  ;;  %v10810_v56 = vadd.f32 %v10673_v49, %v10567_v45 }
 0x834   : > { %v10151_v4 = vpop.f32.mrb[76].mxu1  ;;  %v10431_v59 = vrot.slane %v9381_v13, 1  ;;  %v9383_v27 = vpop.f32.mrb[77].mxu0 }
 0x835   : > { %v10674_v60 = vrot.slane %v10151_v4, 2  ;;  %v10153_v40 = vpop.f32.mrb[77].mxu1  ;;  %v9384_v31 = vpop.f32.mrb[78].mxu0  ;;  %10912 = vxpose.xlu0.b32.cont [6/16] (narrow) %v10864_v11, 16  ;;  %v10865_v57 = vadd.f32 %v17414_v53, %v10810_v56 }
 0x836   : > { %v10154_v61 = vpop.f32.mrb[78].mxu1  ;;  %v10432_v29 = vsel %vm10415_vm4, %v10429_v26, %v10431_v59  ;;  %v10433_v37 = vrot.slane %v9384_v31, 1  ;;  %v9386_v5 = vpop.f32.mrb[79].mxu0 }
 0x837   : > { %v10676_v32 = vrot.slane %v10154_v61, 2  ;;  %v10156_v33 = vpop.f32.mrb[79].mxu1  ;;  %v10675_v7 = vsel %vm10658_vm5, %v10672_v16, %v10674_v60  ;;  %v10568_v44 = vadd.f32 %v10432_v29, %v17068_v54 }
 0x838   : > { %v10434_v14 = vsel %vm10415_vm4, %v10431_v59, %v10433_v37 }
 0x839   : > { %v10677_v24 = vsel %vm10658_vm5, %v10674_v60, %v10676_v32  ;;  %10913 = vxpose.xlu0.b32.cont [7/16] (narrow) %v10865_v57, 16  ;;  %v10811_v55 = vadd.f32 %v10675_v7, %v10568_v44  ;;  %v10569_v38 = vadd.f32 %v10434_v14, %v17083_v47 }
 0x83b   : > { %v9389_v49 = vpop.f32.mrb[80].mxu0  ;;  %v10866_v20 = vadd.f32 %v17414_v53, %v10811_v55  ;;  %v10812_v45 = vadd.f32 %v10677_v24, %v10569_v38 }
 0x83c   : > { %v10159_v26 = vpop.f32.mrb[80].mxu1  ;;  %v10435_v13 = vrot.slane %v9389_v49, 1  ;;  %v9391_v16 = vpop.f32.mrb[81].mxu0 }
 0x83d   : > { %v10678_v4 = vrot.slane %v10159_v26, 2  ;;  %v10161_v11 = vpop.f32.mrb[81].mxu1  ;;  %v9392_v56 = vpop.f32.mrb[82].mxu0  ;;  %10914 = vxpose.xlu0.b32.cont [8/16] (narrow) %v10866_v20, 16  ;;  %v10867_v61 = vadd.f32 %v17414_v53, %v10812_v45 }
 0x83e   : > { %v10162_v27 = vpop.f32.mrb[82].mxu1  ;;  %v10436_v54 = vsel %vm10415_vm4, %v10433_v37, %v10435_v13  ;;  %v10437_v59 = vrot.slane %v9392_v56, 1  ;;  %v9394_v40 = vpop.f32.mrb[83].mxu0 }
 0x83f   : > { %v10680_v60 = vrot.slane %v10162_v27, 2  ;;  %v10164_v31 = vpop.f32.mrb[83].mxu1  ;;  %v10679_v47 = vsel %vm10658_vm5, %v10676_v32, %v10678_v4  ;;  %v10570_v29 = vadd.f32 %v10436_v54, %v17094_v12 }
 0x840   : > { %v10438_v5 = vsel %vm10415_vm4, %v10435_v13, %v10437_v59 }
 0x841   : > { %v10681_v33 = vsel %vm10658_vm5, %v10678_v4, %v10680_v60  ;;  %10915 = vxpose.xlu0.b32.cont [9/16] (narrow) %v10867_v61, 16  ;;  %v10813_v7 = vadd.f32 %v10679_v47, %v10570_v29  ;;  %v10571_v57 = vadd.f32 %v10438_v5, %v17109_v30 }
 0x843   : > { %v9397_v44 = vpop.f32.mrb[84].mxu0  ;;  %v10868_v14 = vadd.f32 %v17414_v53, %v10813_v7  ;;  %v10814_v24 = vadd.f32 %v10681_v33, %v10571_v57 }
 0x844   : > { %v10167_v37 = vpop.f32.mrb[84].mxu1  ;;  %v10439_v55 = vrot.slane %v9397_v44, 1  ;;  %v9399_v32 = vpop.f32.mrb[85].mxu0 }
 0x845   : > { %v10682_v38 = vrot.slane %v10167_v37, 2  ;;  %v10169_v49 = vpop.f32.mrb[85].mxu1  ;;  %v9400_v26 = vpop.f32.mrb[86].mxu0  ;;  %10916 = vxpose.xlu0.b32.cont [10/16] (narrow) %v10868_v14, 16  ;;  %v10869_v11 = vadd.f32 %v17414_v53, %v10814_v24  ;;  %v18716_v32 = vld [vmem:[#allocation12_spill] sm:$0xff] }
 0x846   : > { %v10170_v20 = vpop.f32.mrb[86].mxu1  ;;  %v10440_v12 = vsel %vm10415_vm4, %v10437_v59, %v10439_v55  ;;  %v10441_v45 = vrot.slane %v9400_v26, 1  ;;  %v9402_v4 = vpop.f32.mrb[87].mxu0 }
 0x847   : > { %v10684_v13 = vrot.slane %v10170_v20, 2  ;;  %v10172_v16 = vpop.f32.mrb[87].mxu1  ;;  %v10683_v30 = vsel %vm10658_vm5, %v10680_v60, %v10682_v38  ;;  %v10572_v56 = vadd.f32 %v10440_v12, %v17120_v39 }
 0x848   : > { %v10442_v27 = vsel %vm10415_vm4, %v10439_v55, %v10441_v45 }
 0x849   : > { %v10685_v54 = vsel %vm10658_vm5, %v10682_v38, %v10684_v13  ;;  %10917 = vxpose.xlu0.b32.cont [11/16] (narrow) %v10869_v11, 16  ;;  %v10815_v40 = vadd.f32 %v10683_v30, %v10572_v56  ;;  %v10573_v31 = vadd.f32 %v10442_v27, %v17129_v63 }
 0x84b   : > { %v9405_v47 = vpop.f32.mrb[88].mxu0  ;;  %v10870_v61 = vadd.f32 %v17414_v53, %v10815_v40  ;;  %v10816_v29 = vadd.f32 %v10685_v54, %v10573_v31 }
 0x84c   : > { %v10175_v59 = vpop.f32.mrb[88].mxu1  ;;  %v10443_v5 = vrot.slane %v9405_v47, 1  ;;  %v9407_v60 = vpop.f32.mrb[89].mxu0 }
 0x84d   : > { %v10686_v33 = vrot.slane %v10175_v59, 2  ;;  %v10177_v7 = vpop.f32.mrb[89].mxu1  ;;  %v9408_v57 = vpop.f32.mrb[90].mxu0  ;;  %10918 = vxpose.xlu0.b32.cont [12/16] (narrow) %v10870_v61, 16  ;;  %v10871_v38 = vadd.f32 %v17414_v53, %v10816_v29 }
 0x84e   : > { %v10178_v44 = vpop.f32.mrb[90].mxu1  ;;  %v10444_v39 = vsel %vm10415_vm4, %v10441_v45, %v10443_v5  ;;  %v10445_v37 = vrot.slane %v9408_v57, 1  ;;  %v9410_v24 = vpop.f32.mrb[91].mxu0 }
 0x84f   : > { %v10688_v14 = vrot.slane %v10178_v44, 2  ;;  %v10180_v55 = vpop.f32.mrb[91].mxu1  ;;  %v10687_v63 = vsel %vm10658_vm5, %v10684_v13, %v10686_v33  ;;  %v10574_v49 = vadd.f32 %v10444_v39, %v18716_v32 }
 0x850   : > { %v10446_v26 = vsel %vm10415_vm4, %v10443_v5, %v10445_v37 }
 0x851   : > { %v10689_v20 = vsel %vm10658_vm5, %v10686_v33, %v10688_v14  ;;  %10919 = vxpose.xlu0.b32.cont [13/16] (narrow) %v10871_v38, 16  ;;  %v10817_v12 = vadd.f32 %v10687_v63, %v10574_v49  ;;  %v10575_v4 = vadd.f32 %v10446_v26, %v17145_v50 }
 0x853   : > { %v9413_v16 = vpop.f32.mrb[92].mxu0  ;;  %v10872_v30 = vadd.f32 %v17414_v53, %v10817_v12  ;;  %v10818_v11 = vadd.f32 %v10689_v20, %v10575_v4 }
 0x854   : > { %v10183_v45 = vpop.f32.mrb[92].mxu1  ;;  %v10447_v56 = vrot.slane %v9413_v16, 1  ;;  %v9415_v13 = vpop.f32.mrb[93].mxu0 }
 0x855   : > { %v10690_v27 = vrot.slane %v10183_v45, 2  ;;  %v10185_v54 = vpop.f32.mrb[93].mxu1  ;;  %v9416_v40 = vpop.f32.mrb[94].mxu0  ;;  %10920 = vxpose.xlu0.b32.cont [14/16] (narrow) %v10872_v30, 16  ;;  %v10873_v33 = vadd.f32 %v17414_v53, %v10818_v11 }
 0x856   : > { %v10186_v31 = vpop.f32.mrb[94].mxu1  ;;  %v10448_v47 = vsel %vm10415_vm4, %v10445_v37, %v10447_v56  ;;  %v10449_v59 = vrot.slane %v9416_v40, 1  ;;  %v9418_v29 = vpop.f32.mrb[95].mxu0 }
 0x857   : > { %v10692_v61 = vrot.slane %v10186_v31, 2  ;;  %v10188_v5 = vpop.f32.mrb[95].mxu1  ;;  %v10691_v50 = vsel %vm10658_vm5, %v10688_v14, %v10690_v27  ;;  %v10576_v60 = vadd.f32 %v10448_v47, %v17148_v43 }
 0x858   : > { %v10450_v7 = vsel %vm10415_vm4, %v10447_v56, %v10449_v59 }
 0x859   : > { %v10693_v57 = vsel %vm10658_vm5, %v10690_v27, %v10692_v61  ;;  %10921 = vxpose.xlu0.b32.cont [15/16] (narrow) %v10873_v33, 16  ;;  %v10819_v44 = vadd.f32 %v10691_v50, %v10576_v60  ;;  %v10577_v39 = vadd.f32 %v10450_v7, %v17155_v8 }
 0x85b   : > { %v9421_v24 = vpop.f32.mrb[96].mxu0  ;;  %v10874_v55 = vadd.f32 %v17414_v53, %v10819_v44  ;;  %v10820_v63 = vadd.f32 %v10693_v57, %v10577_v39 }
 0x85c   : > { %v10191_v37 = vpop.f32.mrb[96].mxu1  ;;  %v10451_v38 = vrot.slane %v9421_v24, 1  ;;  %v9423_v14 = vpop.f32.mrb[97].mxu0 }
 0x85d   : > { %v10694_v32 = vrot.slane %v10191_v37, 2  ;;  %v10193_v49 = vpop.f32.mrb[97].mxu1  ;;  %v9424_v26 = vpop.f32.mrb[98].mxu0  ;;  %10922 = vxpose.xlu0.b32.end [16/16] (narrow) %v10874_v55, 16  ;;  %v10875_v43 = vadd.f32 %v17414_v53, %v10820_v63 }
 0x85e   : > { %v10194_v20 = vpop.f32.mrb[98].mxu1  ;;  %v10452_v12 = vsel %vm10415_vm4, %v10449_v59, %v10451_v38  ;;  %v10453_v4 = vrot.slane %v9424_v26, 1  ;;  %v9426_v45 = vpop.f32.mrb[99].mxu0 }
 0x85f   : > { %v10696_v16 = vrot.slane %v10194_v20, 2  ;;  %v10196_v8 = vpop.f32.mrb[99].mxu1  ;;  %v10695_v30 = vsel %vm10658_vm5, %v10692_v61, %v10694_v32  ;;  %10939 = vxpose.xlu1.b32.start [1/16] (narrow) %v10875_v43, 16  ;;  %v10578_v11 = vadd.f32 %v10452_v12, %v17158_v9 }
 0x860   : > { %v10454_v56 = vsel %vm10415_vm4, %v10451_v38, %v10453_v4 }
 0x861   : > { %v10697_v27 = vsel %vm10658_vm5, %v10694_v32, %v10696_v16  ;;  %v10821_v13 = vadd.f32 %v10695_v30, %v10578_v11  ;;  %v10579_v54 = vadd.f32 %v10454_v56, %v17165_v52 }
 0x863   : > { %v9429_v40 = vpop.f32.mrb[100].mxu0  ;;  %v10876_v47 = vadd.f32 %v17414_v53, %v10821_v13  ;;  %v10822_v59 = vadd.f32 %v10697_v27, %v10579_v54 }
 0x864   : > { %v10199_v31 = vpop.f32.mrb[100].mxu1  ;;  %v10455_v29 = vrot.slane %v9429_v40, 1  ;;  %v9431_v50 = vpop.f32.mrb[101].mxu0 }
 0x865   : > { %v10698_v5 = vrot.slane %v10199_v31, 2  ;;  %v10201_v33 = vpop.f32.mrb[101].mxu1  ;;  %v9432_v61 = vpop.f32.mrb[102].mxu0  ;;  %10940 = vxpose.xlu1.b32.cont [2/16] (narrow) %v10876_v47, 16  ;;  %v10877_v24 = vadd.f32 %v17414_v53, %v10822_v59 }
 0x866   : > { %v10202_v60 = vpop.f32.mrb[102].mxu1  ;;  %v10456_v9 = vsel %vm10415_vm4, %v10453_v4, %v10455_v29  ;;  %v10457_v7 = vrot.slane %v9432_v61, 1  ;;  %v9434_v44 = vpop.f32.mrb[103].mxu0 }
 0x867   : > { %v10700_v57 = vrot.slane %v10202_v60, 2  ;;  %v10204_v39 = vpop.f32.mrb[103].mxu1  ;;  %v10699_v52 = vsel %vm10658_vm5, %v10696_v16, %v10698_v5  ;;  %v10580_v37 = vadd.f32 %v10456_v9, %v17168_v46 }
 0x868   : > { %v10458_v55 = vsel %vm10415_vm4, %v10455_v29, %v10457_v7 }
 0x869   : > { %v10701_v63 = vsel %vm10658_vm5, %v10698_v5, %v10700_v57  ;;  %10941 = vxpose.xlu1.b32.cont [3/16] (narrow) %v10877_v24, 16  ;;  %v10823_v38 = vadd.f32 %v10699_v52, %v10580_v37  ;;  %v10581_v32 = vadd.f32 %v10458_v55, %v17175_v3 }
 0x86b   : > { %v9437_v14 = vpop.f32.mrb[104].mxu0  ;;  %v10878_v26 = vadd.f32 %v17414_v53, %v10823_v38  ;;  %v10824_v20 = vadd.f32 %v10701_v63, %v10581_v32 }
 0x86c   : > { %v10207_v49 = vpop.f32.mrb[104].mxu1  ;;  %v10459_v43 = vrot.slane %v9437_v14, 1  ;;  %v9439_v4 = vpop.f32.mrb[105].mxu0 }
 0x86d   : > { %v10702_v12 = vrot.slane %v10207_v49, 2  ;;  %v10209_v16 = vpop.f32.mrb[105].mxu1  ;;  %v9440_v45 = vpop.f32.mrb[106].mxu0  ;;  %10942 = vxpose.xlu1.b32.cont [4/16] (narrow) %v10878_v26, 16  ;;  %v10879_v13 = vadd.f32 %v17414_v53, %v10824_v20 }
 0x86e   : > { %v10210_v8 = vpop.f32.mrb[106].mxu1  ;;  %v10460_v46 = vsel %vm10415_vm4, %v10457_v7, %v10459_v43  ;;  %v10461_v30 = vrot.slane %v9440_v45, 1  ;;  %v9442_v56 = vpop.f32.mrb[107].mxu0 }
 0x86f   : > { %v10704_v11 = vrot.slane %v10210_v8, 2  ;;  %v10212_v27 = vpop.f32.mrb[107].mxu1  ;;  %v10703_v3 = vsel %vm10658_vm5, %v10700_v57, %v10702_v12  ;;  %v10582_v54 = vadd.f32 %v10460_v46, %v17178_v51 }
 0x870   : > { %v10462_v40 = vsel %vm10415_vm4, %v10459_v43, %v10461_v30 }
 0x871   : > { %v10705_v31 = vsel %vm10658_vm5, %v10702_v12, %v10704_v11  ;;  %10943 = vxpose.xlu1.b32.cont [5/16] (narrow) %v10879_v13, 16  ;;  %v10825_v47 = vadd.f32 %v10703_v3, %v10582_v54  ;;  %v10583_v59 = vadd.f32 %v10462_v40, %v17185_v15 }
 0x873   : > { %v9445_v29 = vpop.f32.mrb[108].mxu0  ;;  %v10880_v50 = vadd.f32 %v17414_v53, %v10825_v47  ;;  %v10826_v33 = vadd.f32 %v10705_v31, %v10583_v59 }
 0x874   : > { %v10215_v5 = vpop.f32.mrb[108].mxu1  ;;  %v10463_v61 = vrot.slane %v9445_v29, 1  ;;  %v9447_v9 = vpop.f32.mrb[109].mxu0 }
 0x875   : > { %v10706_v60 = vrot.slane %v10215_v5, 2  ;;  %v10217_v7 = vpop.f32.mrb[109].mxu1  ;;  %v9448_v57 = vpop.f32.mrb[110].mxu0  ;;  %10944 = vxpose.xlu1.b32.cont [6/16] (narrow) %v10880_v50, 16  ;;  %v10881_v55 = vadd.f32 %v17414_v53, %v10826_v33 }
 0x876   : > { %v10218_v44 = vpop.f32.mrb[110].mxu1  ;;  %v10464_v51 = vsel %vm10415_vm4, %v10461_v30, %v10463_v61  ;;  %v10465_v39 = vrot.slane %v9448_v57, 1  ;;  %v9450_v24 = vpop.f32.mrb[111].mxu0 }
 0x877   : > { %v10708_v52 = vrot.slane %v10218_v44, 2  ;;  %v10220_v37 = vpop.f32.mrb[111].mxu1  ;;  %v10707_v15 = vsel %vm10658_vm5, %v10704_v11, %v10706_v60  ;;  %v10584_v63 = vadd.f32 %v10464_v51, %v17188_v6 }
 0x878   : > { %v10466_v38 = vsel %vm10415_vm4, %v10463_v61, %v10465_v39 }
 0x879   : > { %v10709_v32 = vsel %vm10658_vm5, %v10706_v60, %v10708_v52  ;;  %10945 = vxpose.xlu1.b32.cont [7/16] (narrow) %v10881_v55, 16  ;;  %v10827_v14 = vadd.f32 %v10707_v15, %v10584_v63  ;;  %v10585_v49 = vadd.f32 %v10466_v38, %v17195_v41 }
 0x87b   : > { %v9453_v26 = vpop.f32.mrb[112].mxu0  ;;  %v10882_v43 = vadd.f32 %v17414_v53, %v10827_v14  ;;  %v10828_v12 = vadd.f32 %v10709_v32, %v10585_v49 }
 0x87c   : > { %v10223_v20 = vpop.f32.mrb[112].mxu1  ;;  %v10467_v4 = vrot.slane %v9453_v26, 1  ;;  %v9455_v45 = vpop.f32.mrb[113].mxu0 }
 0x87d   : > { %v10710_v16 = vrot.slane %v10223_v20, 2  ;;  %v10225_v8 = vpop.f32.mrb[113].mxu1  ;;  %v9456_v46 = vpop.f32.mrb[114].mxu0  ;;  %10946 = vxpose.xlu1.b32.cont [8/16] (narrow) %v10882_v43, 16  ;;  %v10883_v13 = vadd.f32 %v17414_v53, %v10828_v12 }
 0x87e   : > { %v10226_v30 = vpop.f32.mrb[114].mxu1  ;;  %v10468_v6 = vsel %vm10415_vm4, %v10465_v39, %v10467_v4  ;;  %v10469_v11 = vrot.slane %v9456_v46, 1  ;;  %v9458_v27 = vpop.f32.mrb[115].mxu0 }
 0x87f   : > { %v10712_v56 = vrot.slane %v10226_v30, 2  ;;  %v10228_v3 = vpop.f32.mrb[115].mxu1  ;;  %v10711_v41 = vsel %vm10658_vm5, %v10708_v52, %v10710_v16  ;;  %v10586_v54 = vadd.f32 %v10468_v6, %v17198_v35 }
 0x880   : > { %v10470_v40 = vsel %vm10415_vm4, %v10467_v4, %v10469_v11 }
 0x881   : > { %v10713_v31 = vsel %vm10658_vm5, %v10710_v16, %v10712_v56  ;;  %10947 = vxpose.xlu1.b32.cont [9/16] (narrow) %v10883_v13, 16  ;;  %v10829_v47 = vadd.f32 %v10711_v41, %v10586_v54  ;;  %v10587_v59 = vadd.f32 %v10470_v40, %v17205_v2 }
 0x883   : > { %v9461_v29 = vpop.f32.mrb[116].mxu0  ;;  %v10884_v50 = vadd.f32 %v17414_v53, %v10829_v47  ;;  %v10830_v33 = vadd.f32 %v10713_v31, %v10587_v59 }
 0x884   : > { %v10231_v5 = vpop.f32.mrb[116].mxu1  ;;  %v10471_v61 = vrot.slane %v9461_v29, 1  ;;  %v9463_v9 = vpop.f32.mrb[117].mxu0 }
 0x885   : > { %v10714_v60 = vrot.slane %v10231_v5, 2  ;;  %v10233_v7 = vpop.f32.mrb[117].mxu1  ;;  %v9464_v57 = vpop.f32.mrb[118].mxu0  ;;  %10948 = vxpose.xlu1.b32.cont [10/16] (narrow) %v10884_v50, 16  ;;  %v10885_v37 = vadd.f32 %v17414_v53, %v10830_v33 }
 0x886   : > { %v10234_v44 = vpop.f32.mrb[118].mxu1  ;;  %v10472_v35 = vsel %vm10415_vm4, %v10469_v11, %v10471_v61  ;;  %v10473_v51 = vrot.slane %v9464_v57, 1  ;;  %v9466_v52 = vpop.f32.mrb[119].mxu0 }
 0x887   : > { %v10716_v39 = vrot.slane %v10234_v44, 2  ;;  %v10236_v24 = vpop.f32.mrb[119].mxu1  ;;  %v10715_v2 = vsel %vm10658_vm5, %v10712_v56, %v10714_v60  ;;  %v10588_v15 = vadd.f32 %v10472_v35, %v17208_v58 }
 0x888   : > { %v10474_v55 = vsel %vm10415_vm4, %v10471_v61, %v10473_v51 }
 0x889   : > { %v10717_v63 = vsel %vm10658_vm5, %v10714_v60, %v10716_v39  ;;  %10949 = vxpose.xlu1.b32.cont [11/16] (narrow) %v10885_v37, 16  ;;  %v10831_v38 = vadd.f32 %v10715_v2, %v10588_v15  ;;  %v10589_v32 = vadd.f32 %v10474_v55, %v17215_v28 }
 0x88b   : > { %v9469_v14 = vpop.f32.mrb[120].mxu0  ;;  %v10886_v26 = vadd.f32 %v17414_v53, %v10831_v38  ;;  %v10832_v20 = vadd.f32 %v10717_v63, %v10589_v32 }
 0x88c   : > { %v10239_v49 = vpop.f32.mrb[120].mxu1  ;;  %v10475_v43 = vrot.slane %v9469_v14, 1  ;;  %v9471_v4 = vpop.f32.mrb[121].mxu0 }
 0x88d   : > { %v10718_v12 = vrot.slane %v10239_v49, 2  ;;  %v10241_v16 = vpop.f32.mrb[121].mxu1  ;;  %v9472_v45 = vpop.f32.mrb[122].mxu0  ;;  %10950 = vxpose.xlu1.b32.cont [12/16] (narrow) %v10886_v26, 16  ;;  %v10887_v56 = vadd.f32 %v17414_v53, %v10832_v20 }
 0x88e   : > { %v10242_v8 = vpop.f32.mrb[122].mxu1  ;;  %v10476_v58 = vsel %vm10415_vm4, %v10473_v51, %v10475_v43  ;;  %v10477_v46 = vrot.slane %v9472_v45, 1  ;;  %v9474_v6 = vpop.f32.mrb[123].mxu0 }
 0x88f   : > { %v10720_v30 = vrot.slane %v10242_v8, 2  ;;  %v10244_v11 = vpop.f32.mrb[123].mxu1  ;;  %v10719_v28 = vsel %vm10658_vm5, %v10716_v39, %v10718_v12  ;;  %v10590_v27 = vadd.f32 %v10476_v58, %v17218_v42 }
 0x890   : > { %v10478_v3 = vsel %vm10415_vm4, %v10475_v43, %v10477_v46 }
 0x891   : > { %v10721_v41 = vsel %vm10658_vm5, %v10718_v12, %v10720_v30  ;;  %10951 = vxpose.xlu1.b32.cont [13/16] (narrow) %v10887_v56, 16  ;;  %v10833_v13 = vadd.f32 %v10719_v28, %v10590_v27  ;;  %v10591_v54 = vadd.f32 %v10478_v3, %v17225_v22 }
 0x893   : > { %v9477_v40 = vpop.f32.mrb[124].mxu0  ;;  %v10888_v47 = vadd.f32 %v17414_v53, %v10833_v13  ;;  %v10834_v59 = vadd.f32 %v10721_v41, %v10591_v54 }
 0x894   : > { %v10247_v31 = vpop.f32.mrb[124].mxu1  ;;  %v10479_v29 = vrot.slane %v9477_v40, 1  ;;  %v9479_v50 = vpop.f32.mrb[125].mxu0 }
 0x895   : > { %v10722_v5 = vrot.slane %v10247_v31, 2  ;;  %v10249_v33 = vpop.f32.mrb[125].mxu1  ;;  %v9480_v61 = vpop.f32.mrb[126].mxu0  ;;  %10952 = vxpose.xlu1.b32.cont [14/16] (narrow) %v10888_v47, 16  ;;  %v10889_v35 = vadd.f32 %v17414_v53, %v10834_v59 }
 0x896   : > { %v10250_v60 = vpop.f32.mrb[126].mxu1  ;;  %v10480_v42 = vsel %vm10415_vm4, %v10477_v46, %v10479_v29  ;;  %v10481_v9 = vrot.slane %v9480_v61, 1  ;;  %v9482_v57 = vpop.f32.mrb[127].mxu0 }
 0x897   : > { %v10724_v7 = vrot.slane %v10250_v60, 2  ;;  %v10252_v44 = vpop.f32.mrb[127].mxu1  ;;  %v10723_v22 = vsel %vm10658_vm5, %v10720_v30, %v10722_v5  ;;  %v10592_v51 = vadd.f32 %v10480_v42, %v17228_v62 }
 0x898   : > { %v10482_v39 = vsel %vm10415_vm4, %v10479_v29, %v10481_v9 }
 0x899   : > { %v10725_v52 = vsel %vm10658_vm5, %v10722_v5, %v10724_v7  ;;  %10953 = vxpose.xlu1.b32.cont [15/16] (narrow) %v10889_v35, 16  ;;  %v10835_v24 = vadd.f32 %v10723_v22, %v10592_v51  ;;  %v10593_v2 = vadd.f32 %v10482_v39, %v17235_v23 }
 0x89b   : > { %v9485_v37 = vpop.f32.mrb[128].mxu0  ;;  %v10890_v55 = vadd.f32 %v17414_v53, %v10835_v24  ;;  %v10836_v63 = vadd.f32 %v10725_v52, %v10593_v2 }
 0x89c   : > { %v10255_v15 = vpop.f32.mrb[128].mxu1  ;;  %v10483_v38 = vrot.slane %v9485_v37, 1  ;;  %v9487_v14 = vpop.f32.mrb[129].mxu0 }
 0x89d   : > { %v10726_v32 = vrot.slane %v10255_v15, 2  ;;  %v10257_v49 = vpop.f32.mrb[129].mxu1  ;;  %v9488_v26 = vpop.f32.mrb[130].mxu0  ;;  %10954 = vxpose.xlu1.b32.end [16/16] (narrow) %v10890_v55, 16  ;;  %v10891_v20 = vadd.f32 %v17414_v53, %v10836_v63 }
 0x89e   : > { %v10258_v62 = vpop.f32.mrb[130].mxu1  ;;  %v10484_v43 = vsel %vm10415_vm4, %v10481_v9, %v10483_v38  ;;  %v10485_v23 = vrot.slane %v9488_v26, 1  ;;  %v9490_v16 = vpop.f32.mrb[131].mxu0 }
 0x89f   : > { %v10727_v12 = vsel %vm10658_vm5, %v10724_v7, %v10726_v32  ;;  %v10728_v4 = vrot.slane %v10258_v62, 2  ;;  %v10260_v45 = vpop.f32.mrb[131].mxu1  ;;  %v10594_v8 = vadd.f32 %v10484_v43, %v17238_v48  ;;  %10971 = vxpose.xlu0.b32.start [1/16] (narrow) %v10891_v20, 16 }
 0x8a0   : > { %v10486_v58 = vsel %vm10415_vm4, %v10483_v38, %v10485_v23 }
 0x8a1   : > { %v10729_v46 = vsel %vm10658_vm5, %v10726_v32, %v10728_v4  ;;  %v10595_v30 = vadd.f32 %v10486_v58, %v17245_v18  ;;  %v10837_v6 = vadd.f32 %v10727_v12, %v10594_v8  ;;  %v10923_v11 = vpop.trf.xlu0 }
 0x8a2   : > { %11003 = vst [vmem:[%s17552_s27] sm:$0xff] %v10923_v11 }
 0x8a3   : > { %v9493_v28 = vpop.f32.mrb[132].mxu0  ;;  %v10892_v48 = vadd.f32 %v17414_v53, %v10837_v6  ;;  %v10838_v27 = vadd.f32 %v10729_v46, %v10595_v30 }
 0x8a4   : > { %v10263_v56 = vpop.f32.mrb[132].mxu1  ;;  %v10487_v3 = vrot.slane %v9493_v28, 1  ;;  %v9495_v13 = vpop.f32.mrb[133].mxu0 }
 0x8a5   : > { %v10730_v41 = vrot.slane %v10263_v56, 2  ;;  %v10265_v54 = vpop.f32.mrb[133].mxu1  ;;  %v9496_v40 = vpop.f32.mrb[134].mxu0  ;;  %10972 = vxpose.xlu0.b32.cont [2/16] (narrow) %v10892_v48, 16  ;;  %v10893_v61 = vadd.f32 %v17414_v53, %v10838_v27 }
 0x8a6   : > { %v10266_v31 = vpop.f32.mrb[134].mxu1  ;;  %v10488_v47 = vsel %vm10415_vm4, %v10485_v23, %v10487_v3  ;;  %v10489_v59 = vrot.slane %v9496_v40, 1  ;;  %v9498_v5 = vpop.f32.mrb[135].mxu0 }
 0x8a7   : > { %v10731_v18 = vsel %vm10658_vm5, %v10728_v4, %v10730_v41  ;;  %v10732_v29 = vrot.slane %v10266_v31, 2  ;;  %v10268_v50 = vpop.f32.mrb[135].mxu1  ;;  %v10596_v33 = vadd.f32 %v10488_v47, %v17248_v17  ;;  %v10924_v60 = vpop.trf.xlu0 }
 0x8a8   : > { %v10490_v42 = vsel %vm10415_vm4, %v10487_v3, %v10489_v59  ;;  %11006 = vst [vmem:[%s17552_s27 + $0x18] sm:$0xff] %v10924_v60 }
 0x8a9   : > { %v10733_v9 = vsel %vm10658_vm5, %v10730_v41, %v10732_v29  ;;  %v10597_v7 = vadd.f32 %v10490_v42, %v17255_v34  ;;  %10973 = vxpose.xlu0.b32.cont [3/16] (narrow) %v10893_v61, 16  ;;  %v10839_v57 = vadd.f32 %v10731_v18, %v10596_v33 }
 0x8ab   : > { %v9501_v44 = vpop.f32.mrb[136].mxu0  ;;  %v10894_v35 = vadd.f32 %v17414_v53, %v10839_v57  ;;  %v10840_v51 = vadd.f32 %v10733_v9, %v10597_v7 }
 0x8ac   : > { %v10271_v22 = vpop.f32.mrb[136].mxu1  ;;  %v10491_v39 = vrot.slane %v9501_v44, 1  ;;  %v9503_v17 = vpop.f32.mrb[137].mxu0 }
 0x8ad   : > { %v10734_v52 = vrot.slane %v10271_v22, 2  ;;  %v10273_v24 = vpop.f32.mrb[137].mxu1  ;;  %v9504_v2 = vpop.f32.mrb[138].mxu0  ;;  %10974 = vxpose.xlu0.b32.cont [4/16] (narrow) %v10894_v35, 16  ;;  %v10895_v49 = vadd.f32 %v17414_v53, %v10840_v51 }
 0x8ae   : > { %v10274_v37 = vpop.f32.mrb[138].mxu1  ;;  %v10492_v15 = vsel %vm10415_vm4, %v10489_v59, %v10491_v39  ;;  %v10493_v63 = vrot.slane %v9504_v2, 1  ;;  %v9506_v38 = vpop.f32.mrb[139].mxu0 }
 0x8af   : > { %v10735_v55 = vsel %vm10658_vm5, %v10732_v29, %v10734_v52  ;;  %v10736_v34 = vrot.slane %v10274_v37, 2  ;;  %v10276_v32 = vpop.f32.mrb[139].mxu1  ;;  %v10598_v14 = vadd.f32 %v10492_v15, %v17258_v10 }
 0x8b0   : > { %v10494_v26 = vsel %vm10415_vm4, %v10491_v39, %v10493_v63 }
 0x8b1   : > { %v10737_v62 = vsel %vm10658_vm5, %v10734_v52, %v10736_v34  ;;  %v10599_v20 = vadd.f32 %v10494_v26, %v17265_v25  ;;  %10975 = vxpose.xlu0.b32.cont [5/16] (narrow) %v10895_v49, 16  ;;  %v10841_v43 = vadd.f32 %v10735_v55, %v10598_v14 }
 0x8b3   : > { %v9509_v12 = vpop.f32.mrb[140].mxu0  ;;  %v10896_v4 = vadd.f32 %v17414_v53, %v10841_v43  ;;  %v10842_v16 = vadd.f32 %v10737_v62, %v10599_v20 }
 0x8b4   : > { %v10279_v23 = vpop.f32.mrb[140].mxu1  ;;  %v10495_v45 = vrot.slane %v9509_v12, 1  ;;  %v9511_v58 = vpop.f32.mrb[141].mxu0 }
 0x8b5   : > { %v10738_v8 = vrot.slane %v10279_v23, 2  ;;  %v10281_v46 = vpop.f32.mrb[141].mxu1  ;;  %v9512_v10 = vpop.f32.mrb[142].mxu0  ;;  %10976 = vxpose.xlu0.b32.cont [6/16] (narrow) %v10896_v4, 16  ;;  %v10897_v3 = vadd.f32 %v17414_v53, %v10842_v16  ;;  %v18717_v4 = vld [vmem:[#allocation22_spill] sm:$0xff] }
 0x8b6   : > { %v10282_v30 = vpop.f32.mrb[142].mxu1  ;;  %v10496_v6 = vsel %vm10415_vm4, %v10493_v63, %v10495_v45  ;;  %v10497_v28 = vrot.slane %v9512_v10, 1  ;;  %v9514_v56 = vpop.f32.mrb[143].mxu0 }
 0x8b7   : > { %v10739_v11 = vsel %vm10658_vm5, %v10736_v34, %v10738_v8  ;;  %v10740_v25 = vrot.slane %v10282_v30, 2  ;;  %v10284_v48 = vpop.f32.mrb[143].mxu1  ;;  %v10600_v27 = vadd.f32 %v10496_v6, %v17268_v19 }
 0x8b8   : > { %v10498_v41 = vsel %vm10415_vm4, %v10495_v45, %v10497_v28 }
 0x8b9   : > { %v10741_v13 = vsel %vm10658_vm5, %v10738_v8, %v10740_v25  ;;  %v10601_v54 = vadd.f32 %v10498_v41, %v17275_v1  ;;  %10977 = vxpose.xlu0.b32.cont [7/16] (narrow) %v10897_v3, 16  ;;  %v10843_v40 = vadd.f32 %v10739_v11, %v10600_v27 }
 0x8bb   : > { %v9517_v31 = vpop.f32.mrb[144].mxu0  ;;  %v10898_v18 = vadd.f32 %v17414_v53, %v10843_v40  ;;  %v10844_v59 = vadd.f32 %v10741_v13, %v10601_v54  ;;  %v18718_v54 = vld [vmem:[#allocation20_spill] sm:$0xff] }
 0x8bc   : > { %v10287_v47 = vpop.f32.mrb[144].mxu1  ;;  %v10499_v29 = vrot.slane %v9517_v31, 1  ;;  %v9519_v50 = vpop.f32.mrb[145].mxu0 }
 0x8bd   : > { %v10742_v5 = vrot.slane %v10287_v47, 2  ;;  %v10289_v33 = vpop.f32.mrb[145].mxu1  ;;  %v9520_v19 = vpop.f32.mrb[146].mxu0  ;;  %10978 = vxpose.xlu0.b32.cont [8/16] (narrow) %v10898_v18, 16  ;;  %v10899_v22 = vadd.f32 %v17414_v53, %v10844_v59  ;;  %v18719_v59 = vld [vmem:[#allocation30_spill] sm:$0xff] }
 0x8be   : > { %v10290_v61 = vpop.f32.mrb[146].mxu1  ;;  %v10500_v60 = vsel %vm10415_vm4, %v10497_v28, %v10499_v29  ;;  %v10501_v9 = vrot.slane %v9520_v19, 1  ;;  %v9522_v7 = vpop.f32.mrb[147].mxu0 }
 0x8bf   : > { %v10743_v42 = vsel %vm10658_vm5, %v10740_v25, %v10742_v5  ;;  %v10744_v1 = vrot.slane %v10290_v61, 2  ;;  %v10292_v57 = vpop.f32.mrb[147].mxu1  ;;  %v10602_v44 = vadd.f32 %v10500_v60, %v17278_v0 }
 0x8c0   : > { %v10502_v35 = vsel %vm10415_vm4, %v10499_v29, %v10501_v9 }
 0x8c1   : > { %v10745_v51 = vsel %vm10658_vm5, %v10742_v5, %v10744_v1  ;;  %v10603_v39 = vadd.f32 %v10502_v35, %v17285_v21  ;;  %10979 = vxpose.xlu0.b32.cont [9/16] (narrow) %v10899_v22, 16  ;;  %v10845_v52 = vadd.f32 %v10743_v42, %v10602_v44 }
 0x8c3   : > { %v9525_v17 = vpop.f32.mrb[148].mxu0  ;;  %v10900_v2 = vadd.f32 %v17414_v53, %v10845_v52  ;;  %v10846_v37 = vadd.f32 %v10745_v51, %v10603_v39  ;;  %v14100_v53 = vld [vmem:[%s17626_s3] ss:$0 sm:$0xff]  ;;  %v18720_v39 = vld [vmem:[#allocation28_spill] sm:$0xff] }
 0x8c4   : > { %v10295_v24 = vpop.f32.mrb[148].mxu1  ;;  %v10503_v15 = vrot.slane %v9525_v17, 1  ;;  %v9527_v63 = vpop.f32.mrb[149].mxu0 }
 0x8c5   : > { %v10746_v55 = vrot.slane %v10295_v24, 2  ;;  %v10297_v34 = vpop.f32.mrb[149].mxu1  ;;  %v9528_v0 = vpop.f32.mrb[150].mxu0  ;;  %10980 = vxpose.xlu0.b32.cont [10/16] (narrow) %v10900_v2, 16  ;;  %v10901_v43 = vadd.f32 %v14100_v53, %v10846_v37 }
 0x8c6   : > { %v10298_v38 = vpop.f32.mrb[150].mxu1  ;;  %v10504_v32 = vsel %vm10415_vm4, %v10501_v9, %v10503_v15  ;;  %v10505_v49 = vrot.slane %v9528_v0, 1  ;;  %v9530_v26 = vpop.f32.mrb[151].mxu0 }
 0x8c7   : > { %v10747_v14 = vsel %vm10658_vm5, %v10744_v1, %v10746_v55  ;;  %v10748_v21 = vrot.slane %v10298_v38, 2  ;;  %v10300_v62 = vpop.f32.mrb[151].mxu1  ;;  %v10604_v20 = vadd.f32 %v10504_v32, %v17288_v36 }
 0x8c8   : > { %v10506_v12 = vsel %vm10415_vm4, %v10503_v15, %v10505_v49 }
 0x8c9   : > { %v10749_v23 = vsel %vm10658_vm5, %v10746_v55, %v10748_v21  ;;  %v10605_v16 = vadd.f32 %v10506_v12, %v18717_v4  ;;  %10981 = vxpose.xlu0.b32.cont [11/16] (narrow) %v10901_v43, 16  ;;  %v10847_v45 = vadd.f32 %v10747_v14, %v10604_v20 }
 0x8cb   : > { %v9533_v8 = vpop.f32.mrb[152].mxu0  ;;  %v10902_v46 = vadd.f32 %v14100_v53, %v10847_v45  ;;  %v10848_v10 = vadd.f32 %v10749_v23, %v10605_v16 }
 0x8cc   : > { %v10303_v58 = vpop.f32.mrb[152].mxu1  ;;  %v10507_v30 = vrot.slane %v9533_v8, 1  ;;  %v9535_v36 = vpop.f32.mrb[153].mxu0 }
 0x8cd   : > { %v10750_v6 = vrot.slane %v10303_v58, 2  ;;  %v10305_v11 = vpop.f32.mrb[153].mxu1  ;;  %v9536_v28 = vpop.f32.mrb[154].mxu0  ;;  %10982 = vxpose.xlu0.b32.cont [12/16] (narrow) %v10902_v46, 16  ;;  %v10903_v31 = vadd.f32 %v14100_v53, %v10848_v10 }
 0x8ce   : > { %v10306_v25 = vpop.f32.mrb[154].mxu1  ;;  %v10508_v56 = vsel %vm10415_vm4, %v10505_v49, %v10507_v30  ;;  %v10509_v27 = vrot.slane %v9536_v28, 1  ;;  %v9538_v41 = vpop.f32.mrb[155].mxu0 }
 0x8cf   : > { %v10751_v48 = vsel %vm10658_vm5, %v10748_v21, %v10750_v6  ;;  %v10752_v3 = vrot.slane %v10306_v25, 2  ;;  %v10308_v13 = vpop.f32.mrb[155].mxu1  ;;  %v10606_v40 = vadd.f32 %v10508_v56, %v18718_v54 }
 0x8d0   : > { %v10510_v47 = vsel %vm10415_vm4, %v10507_v30, %v10509_v27 }
 0x8d1   : > { %v10753_v18 = vsel %vm10658_vm5, %v10750_v6, %v10752_v3  ;;  %v10607_v29 = vadd.f32 %v10510_v47, %v18719_v59  ;;  %10983 = vxpose.xlu0.b32.cont [13/16] (narrow) %v10903_v31, 16  ;;  %v10849_v5 = vadd.f32 %v10751_v48, %v10606_v40 }
 0x8d3   : > { %v9541_v50 = vpop.f32.mrb[156].mxu0  ;;  %v10904_v19 = vadd.f32 %v14100_v53, %v10849_v5  ;;  %v10850_v61 = vadd.f32 %v10753_v18, %v10607_v29 }
 0x8d4   : > { %v10311_v33 = vpop.f32.mrb[156].mxu1  ;;  %v10511_v60 = vrot.slane %v9541_v50, 1  ;;  %v9543_v9 = vpop.f32.mrb[157].mxu0 }
 0x8d5   : > { %v10754_v42 = vrot.slane %v10311_v33, 2  ;;  %v10313_v1 = vpop.f32.mrb[157].mxu1  ;;  %v9544_v7 = vpop.f32.mrb[158].mxu0  ;;  %10984 = vxpose.xlu0.b32.cont [14/16] (narrow) %v10904_v19, 16  ;;  %v10905_v17 = vadd.f32 %v14100_v53, %v10850_v61 }
 0x8d6   : > { %v10314_v57 = vpop.f32.mrb[158].mxu1  ;;  %v10512_v44 = vsel %vm10415_vm4, %v10509_v27, %v10511_v60  ;;  %v9545_v35 = vpop.f32.mrb[159].mxu0 }
 0x8d7   : > { %v10755_v22 = vsel %vm10658_vm5, %v10752_v3, %v10754_v42  ;;  %v10315_v51 = vpop.f32.mrb[159].mxu1  ;;  %v10608_v52 = vadd.f32 %v10512_v44, %v18720_v39 }
 0x8d9   : > { %10985 = vxpose.xlu0.b32.cont [15/16] (narrow) %v10905_v17, 16  ;;  %v10851_v24 = vadd.f32 %v10755_v22, %v10608_v52 }
 0x8db   : > { %v10906_v2 = vadd.f32 %v14100_v53, %v10851_v24 }
 0x8dd   : > { %10986 = vxpose.xlu0.b32.end [16/16] (narrow) %v10906_v2, 16 }
 0x8e1   : > { %v10955_v37 = vpop.trf.xlu1 }
 0x8e2   : > { %11004 = vst [vmem:[%s17552_s27 + $0x8] sm:$0xff] %v10955_v37 }
 0x8e5   : > { %v10956_v15 = vpop.trf.xlu1 }
 0x8e6   : > { %11007 = vst [vmem:[%s17552_s27 + $0x20] sm:$0xff] %v10956_v15 }
 0x921   : > { %v10987_v55 = vpop.trf.xlu0 }
 0x922   : > { %11005 = vst [vmem:[%s17552_s27 + $0x10] sm:$0xff] %v10987_v55 }
 0x925   : > { %v10988_v63 = vpop.trf.xlu0 }
 0x926   : > { %11008 = vst [vmem:[%s17552_s27 + $0x28] sm:$0xff] %v10988_v63 }
 0x927 PF: > { %s14_s17 = sadd.s32 1, %s14123_s17   ;;  %s18721_s15 = smov %s14119_s16 }
 0x928   : > { %p11_p5 = scmp.ge.s32.totalorder %s14_s17, 4   ;;  %s18722_s16 = smov %s18724_s18 }
 0x92a   :  { %13 = sbr.rel (!%p11_p5) target bundleno = 2 (0x2), region = 74 }

</bundles_post_ra>
